<compile_context>
chip_gen: v7x
topology: tpu7x:2x2x1
jax: 0.10.0
libtpu: 0.0.40
codegen_flags: <defaults>
</compile_context>

<pallas_src>
import functools

import jax
import jax.numpy as jnp
import numpy as np
from jax.experimental import pallas as pl
from jax.experimental.pallas import tpu as pltpu

VMEM_LIMIT = 48 * 1024 * 1024


def _round_up(x, m):
    return (x + m - 1) // m * m


# =============================================================================
# Pallas kernel: im2col-free conv (shift-and-matmul over taps, partitions
# folded into K) + optional bias / LeakyReLU + optional fused BN partial stats.
# =============================================================================
def _conv_kernel(*refs, offsets, tm, slope, has_bias, emit_stats, hw_geom):
    it = iter(refs)
    x_ref = next(it)                    # (1, tm + halo_pad, Kp)   bf16
    w_ref = next(it)                    # (n_off, Kp, tcout)       bf16
    b_ref = next(it) if has_bias else None
    y_ref = next(it)                    # (tm, tcout)
    ps_ref = next(it) if emit_stats else None
    pq_ref = next(it) if emit_stats else None

    # Tap reduction with value accumulation: one store per grid step, no
    # per-tap accumulator read-modify-write through VMEM.
    acc = jnp.dot(x_ref[0, pl.ds(offsets[0], tm), :], w_ref[0],
                  preferred_element_type=jnp.float32)
    for t in range(1, len(offsets)):
        acc = acc + jnp.dot(x_ref[0, pl.ds(offsets[t], tm), :], w_ref[t],
                            preferred_element_type=jnp.float32)

    out = acc
    if has_bias:
        out = out + b_ref[...]
    if slope != 1.0:
        out = jnp.where(out >= 0, out, slope * out)
    y_ref[...] = out.astype(y_ref.dtype)

    if emit_stats:
        # Fused BatchNorm partial statistics over the *valid* rows of this
        # tile.  The mask comes from an in-kernel iota; float-only arithmetic
        # (exact for row indices << 2^23), so no integer div/mod is needed.
        Hq, Wq, OH, OW, M_out = hw_geom
        i = pl.program_id(1)
        r = i * tm + jax.lax.broadcasted_iota(jnp.int32, (tm, 1), 0)
        rf = r.astype(jnp.float32)
        hw = float(Hq * Wq)
        n_idx = jnp.floor((rf + 0.5) * (1.0 / hw))
        rem = rf - n_idx * hw
        oh = jnp.floor((rem + 0.5) * (1.0 / float(Wq)))
        ow = rem - oh * float(Wq)
        valid = (rf < float(M_out)) & (oh < float(OH)) & (ow < float(OW))
        mask = valid.astype(jnp.float32)                       # (tm, 1)
        ym = acc * mask
        tc = acc.shape[1]
        ps_ref[...] = jnp.sum(ym, axis=0, keepdims=True).reshape(1, 1, tc)
        pq_ref[...] = jnp.sum(ym * acc, axis=0, keepdims=True).reshape(1, 1, tc)


# =============================================================================
# Host-side prep / glue (fused by XLA between the Pallas conv calls)
# =============================================================================
def prep_conv_input(x_nhwc, stride, pad_hw, tm_hint):
    """Pad -> space-to-batch (partitions folded into channels) -> flatten ->
    M-tile with halo rows.  Returns the tiled activation + static geometry."""
    N, H, W, C = x_nhwc.shape
    s = stride
    ph, pw = pad_hw
    KH = KW = 4
    Hp, Wp = H + 2 * ph, W + 2 * pw
    assert Hp % s == 0 and Wp % s == 0 and KH % s == 0 and KW % s == 0
    Hq, Wq = Hp // s, Wp // s
    nd_h, nd_w = KH // s, KW // s
    OH, OW = Hq - (nd_h - 1), Wq - (nd_w - 1)
    offsets = tuple(di * Wq + dj for di in range(nd_h) for dj in range(nd_w))
    max_off = offsets[-1]

    cin_tot = s * s * C
    cin_tot_p = _round_up(cin_tot, 128 if cin_tot >= 128 else 16)
    M_out = N * Hq * Wq
    halo_pad = _round_up(max_off, 8)
    tm = min(tm_hint, _round_up(M_out, 8))
    tm = max(tm, halo_pad, 8)
    Mt = (M_out + tm - 1) // tm
    M_pad = Mt * tm

    xb = x_nhwc.astype(jnp.bfloat16)
    xb = jnp.pad(xb, ((0, 0), (ph, ph), (pw, pw), (0, 0)))
    xb = xb.reshape(N, Hq, s, Wq, s, C).transpose(0, 1, 3, 2, 4, 5)
    xf = xb.reshape(M_out, cin_tot)
    xf = jnp.pad(xf, ((0, M_pad + tm - M_out), (0, cin_tot_p - cin_tot)))
    main = xf[:M_pad].reshape(Mt, tm, cin_tot_p)
    halo = xf[tm:tm + M_pad].reshape(Mt, tm, cin_tot_p)[:, :halo_pad, :]
    x_tiles = jnp.concatenate([main, halo], axis=1)     # (Mt, tm+halo, Kp)

    geom = dict(N=N, C=C, s=s, Hq=Hq, Wq=Wq, OH=OH, OW=OW,
                nd_h=nd_h, nd_w=nd_w, offsets=offsets, tm=tm, Mt=Mt,
                M_pad=M_pad, M_out=M_out, halo_pad=halo_pad,
                cin_tot=cin_tot, cin_tot_p=cin_tot_p)
    return x_tiles, geom


def prep_weights(w_oihw, geom):
    Cout, Cin, KH, KW = w_oihw.shape
    s, nd_h, nd_w = geom['s'], geom['nd_h'], geom['nd_w']
    assert Cin == geom['C'] and KH == nd_h * s and KW == nd_w * s
    cout_p = _round_up(Cout, 128)
    n_off = nd_h * nd_w
    wt = w_oihw.reshape(Cout, Cin, nd_h, s, nd_w, s)
    wt = jnp.transpose(wt, (2, 4, 3, 5, 1, 0))          # (di,dj,hs,ws,ci,co)
    wt = wt.reshape(n_off, s * s * Cin, Cout)
    wt = jnp.pad(wt, ((0, 0),
                      (0, geom['cin_tot_p'] - geom['cin_tot']),
                      (0, cout_p - Cout))).astype(jnp.bfloat16)
    return wt, cout_p


def conv_layer(x_tiles, geom, w_oihw, bias=None, *, slope=1.0,
               emit_stats=False, out_dtype=jnp.bfloat16):
    assert not (bias is not None and emit_stats)
    wt, cout_p = prep_weights(w_oihw, geom)
    tm, Mt, M_pad = geom['tm'], geom['Mt'], geom['M_pad']
    halo_pad, Kp = geom['halo_pad'], geom['cin_tot_p']
    offsets = geom['offsets']
    n_off = len(offsets)
    tcout = 256 if cout_p % 256 == 0 else 128
    jt = cout_p // tcout
    has_bias = bias is not None

    in_specs = [
        pl.BlockSpec((1, tm + halo_pad, Kp), lambda j, i: (i, 0, 0)),
        # Weight slab stays resident across the (inner) M axis -> fetched jt
        # times total, not once per step.
        pl.BlockSpec((n_off, Kp, tcout), lambda j, i: (0, 0, j)),
    ]
    args = [x_tiles, wt]
    if has_bias:
        bt = jnp.pad(bias.astype(jnp.float32),
                     (0, cout_p - w_oihw.shape[0])).reshape(1, cout_p)
        in_specs.append(pl.BlockSpec((1, tcout), lambda j, i: (0, j)))
        args.append(bt)

    hw_geom = (geom['Hq'], geom['Wq'], geom['OH'], geom['OW'], geom['M_out'])
    kernel = functools.partial(
        _conv_kernel, offsets=offsets, tm=tm, slope=slope,
        has_bias=has_bias, emit_stats=emit_stats, hw_geom=hw_geom)

    if emit_stats:
        out_shape = (jax.ShapeDtypeStruct((M_pad, cout_p), out_dtype),
                     jax.ShapeDtypeStruct((Mt, 1, cout_p), jnp.float32),
                     jax.ShapeDtypeStruct((Mt, 1, cout_p), jnp.float32))
        out_specs = (pl.BlockSpec((tm, tcout), lambda j, i: (i, j)),
                     pl.BlockSpec((1, 1, tcout), lambda j, i: (i, 0, j)),
                     pl.BlockSpec((1, 1, tcout), lambda j, i: (i, 0, j)))
    else:
        out_shape = jax.ShapeDtypeStruct((M_pad, cout_p), out_dtype)
        out_specs = pl.BlockSpec((tm, tcout), lambda j, i: (i, j))

    cost = pl.CostEstimate(
        flops=int(2 * M_pad * n_off * Kp * cout_p),
        transcendentals=0,
        bytes_accessed=int(x_tiles.size * 2 * jt + wt.size * 2
                           + M_pad * cout_p * jnp.dtype(out_dtype).itemsize))

    return pl.pallas_call(
        kernel,
        out_shape=out_shape,
        grid=(jt, Mt),
        in_specs=in_specs,
        out_specs=out_specs,
        compiler_params=pltpu.CompilerParams(
            dimension_semantics=("parallel", "parallel"),
            vmem_limit_bytes=VMEM_LIMIT),
        cost_estimate=cost,
    )(*args)


def finish_layer(y_flat, geom, Cout, stats=None, gamma=None, beta=None,
                 slope=0.2, eps=1e-5):
    """Slice the flat conv output back to NHWC and (optionally) apply
    train-mode BatchNorm (from the fused partial stats) + LeakyReLU.
    Pure elementwise / tiny-reduction XLA glue that fuses with the next
    layer's space-to-batch relayout."""
    N, Hq, Wq = geom['N'], geom['Hq'], geom['Wq']
    OH, OW, M_out = geom['OH'], geom['OW'], geom['M_out']
    cout_p = y_flat.shape[1]
    y = y_flat[:M_out].reshape(N, Hq, Wq, cout_p)[:, :OH, :OW, :Cout]
    if stats is None:
        return y
    psum, psq = stats
    count = float(N * OH * OW)
    s1 = jnp.sum(psum[:, 0, :Cout], axis=0)
    s2 = jnp.sum(psq[:, 0, :Cout], axis=0)
    mean = s1 / count
    # TODO(synk): E[x^2]-E[x]^2 in f32 is cancellation-prone for large means;
    # fine at these scales but a centered formulation would be safer if reused.
    var = jnp.maximum(s2 / count - mean * mean, 0.0)        # biased (train)
    inv = jax.lax.rsqrt(var + eps)
    scale = gamma.astype(jnp.float32) * inv
    shift = beta.astype(jnp.float32) - mean * scale
    yf = y.astype(jnp.float32) * scale + shift
    return jnp.where(yf >= 0, yf, slope * yf)


def conv_block(h, w, bias=None, gamma=None, beta=None, *, stride, pad,
               conv_slope=1.0, out_dtype=jnp.bfloat16):
    Cout = w.shape[0]
    cout_p = _round_up(Cout, 128)
    tm_hint = 256 if cout_p > 128 else 512     # keep the f32 acc tile <=256 KiB
    xt, geom = prep_conv_input(h, stride, pad, tm_hint)
    emit_stats = gamma is not None
    res = conv_layer(xt, geom, w, bias, slope=conv_slope,
                     emit_stats=emit_stats, out_dtype=out_dtype)
    if emit_stats:
        y, ps, pq = res
        return finish_layer(y, geom, Cout, stats=(ps, pq),
                            gamma=gamma, beta=beta, slope=0.2)
    return finish_layer(res, geom, Cout)


# =============================================================================
# Forward pass
# =============================================================================
def discriminator_forward(x_nchw, p):
    x = jnp.transpose(x_nchw, (0, 2, 3, 1))                     # NCHW -> NHWC
    h = conv_block(x, p['w1'], bias=p['b1'], stride=2, pad=(1, 1),
                   conv_slope=0.2)
    h = conv_block(h, p['w2'], gamma=p['g2'], beta=p['be2'],
                   stride=2, pad=(1, 1))
    h = conv_block(h, p['w3'], gamma=p['g3'], beta=p['be3'],
                   stride=2, pad=(1, 1))
    h = conv_block(h, p['w4'], gamma=p['g4'], beta=p['be4'],
                   stride=1, pad=(1, 2))
    out = conv_block(h, p['w5'], bias=p['b5'], stride=1, pad=(2, 1),
                     out_dtype=jnp.float32)
    return jnp.transpose(out, (0, 3, 1, 2)).astype(jnp.float32)  # NHWC -> NCHW


# =============================================================================
# Parameters (deterministic, PyTorch-like shapes)
# =============================================================================
def init_params(key, dim):
    ks = jax.random.split(key, 14)

    def conv_w(k, cout, cin, kh, kw):
        bound = 1.0 / (cin * kh * kw) ** 0.5
        return jax.random.uniform(k, (cout, cin, kh, kw), jnp.float32,
                                  -bound, bound)

    p = {}
    p['w1'] = conv_w(ks[0], dim, 3, 4, 4)
    p['b1'] = jax.random.uniform(ks[1], (dim,), jnp.float32, -0.1, 0.1)
    p['w2'] = conv_w(ks[2], dim * 2, dim, 4, 4)
    p['g2'] = 1.0 + 0.1 * jax.random.normal(ks[3], (dim * 2,), jnp.float32)
    p['be2'] = 0.1 * jax.random.normal(ks[4], (dim * 2,), jnp.float32)
    p['w3'] = conv_w(ks[5], dim * 4, dim * 2, 4, 4)
    p['g3'] = 1.0 + 0.1 * jax.random.normal(ks[6], (dim * 4,), jnp.float32)
    p['be3'] = 0.1 * jax.random.normal(ks[7], (dim * 4,), jnp.float32)
    p['w4'] = conv_w(ks[8], dim * 8, dim * 4, 4, 4)
    p['g4'] = 1.0 + 0.1 * jax.random.normal(ks[9], (dim * 8,), jnp.float32)
    p['be4'] = 0.1 * jax.random.normal(ks[10], (dim * 8,), jnp.float32)
    p['w5'] = conv_w(ks[11], 1, dim * 8, 4, 4)
    p['b5'] = jax.random.uniform(ks[12], (1,), jnp.float32, -0.1, 0.1)
    return p


# =============================================================================
# Pure-JAX reference (mirrors the PyTorch module, training-mode BN)
# =============================================================================
def ref_forward(x, p):
    def conv(x, w, b, stride, pad):
        out = jax.lax.conv_general_dilated(
            x, w, (stride, stride), [(pad[0], pad[0]), (pad[1], pad[1])],
            dimension_numbers=('NCHW', 'OIHW', 'NCHW'))
        if b is not None:
            out = out + b[None, :, None, None]
        return out

    def lrelu(x, s=0.2):
        return jnp.where(x >= 0, x, s * x)

    def bn(x, g, b, eps=1e-5):
        mean = jnp.mean(x, axis=(0, 2, 3), keepdims=True)
        var = jnp.mean((x - mean) ** 2, axis=(0, 2, 3), keepdims=True)
        return ((x - mean) * jax.lax.rsqrt(var + eps)
                * g[None, :, None, None] + b[None, :, None, None])

    h = lrelu(conv(x, p['w1'], p['b1'], 2, (1, 1)))
    h = lrelu(bn(conv(h, p['w2'], None, 2, (1, 1)), p['g2'], p['be2']))
    h = lrelu(bn(conv(h, p['w3'], None, 2, (1, 1)), p['g3'], p['be3']))
    h = lrelu(bn(conv(h, p['w4'], None, 1, (1, 2)), p['g4'], p['be4']))
    return conv(h, p['w5'], p['b5'], 1, (2, 1))


if __name__ == "__main__":
    N, H, W = 2, 32, 32
    dim = 16                                     # small dim for the test
    x = jax.random.normal(jax.random.PRNGKey(0), (N, 3, H, W), jnp.float32)
    params = init_params(jax.random.PRNGKey(1), dim)

    fwd = jax.jit(discriminator_forward)
    out = jax.block_until_ready(fwd(x, params))
    ref = jax.block_until_ready(ref_forward(x, params))

    np.testing.assert_allclose(np.asarray(out), np.asarray(ref),
                               rtol=5e-2, atol=5e-2)
    assert out.shape == (N, 1, H // 8, W // 8), out.shape
    print("KERNEL_OK")
</pallas_src>

<mosaic_0001>
module attributes {stable_mosaic.version = 11 : i64} {
  func.func @_conv_kernel(%arg0: i32, %arg1: i32, %arg2: memref<1x536x16xbf16, #tpu.memory_space<vmem>>, %arg3: memref<4x16x128xbf16, #tpu.memory_space<vmem>>, %arg4: memref<1x128xf32, #tpu.memory_space<vmem>>, %arg5: memref<512x128xbf16, #tpu.memory_space<vmem>>) attributes {dimension_semantics = [#tpu.dimension_semantics<parallel>, #tpu.dimension_semantics<parallel>], iteration_bounds = array<i64: 1, 2>, scalar_prefetch = 0 : i64, scratch_operands = 0 : i64, tpu.core_type = #tpu.core_type<tc>, window_params = [{transform_indices = @transform_0, window_bounds = array<i64: 1, 536, 16>}, {transform_indices = @transform_1, window_bounds = array<i64: 4, 16, 128>}, {transform_indices = @transform_2, window_bounds = array<i64: 1, 128>}, {transform_indices = @transform_3, window_bounds = array<i64: 512, 128>}]} {
    %c0 = arith.constant 0 : index
    %c0_0 = arith.constant 0 : index
    %c0_1 = arith.constant 0 : index
    %0 = vector.load %arg2[%c0, %c0_0, %c0_1] : memref<1x536x16xbf16, #tpu.memory_space<vmem>>, vector<1x512x16xbf16>
    %1 = vector.shape_cast %0 : vector<1x512x16xbf16> to vector<512x16xbf16>
    %c0_2 = arith.constant 0 : index
    %c0_3 = arith.constant 0 : index
    %c0_4 = arith.constant 0 : index
    %2 = vector.load %arg3[%c0_2, %c0_3, %c0_4] : memref<4x16x128xbf16, #tpu.memory_space<vmem>>, vector<1x16x128xbf16>
    %3 = vector.shape_cast %2 : vector<1x16x128xbf16> to vector<16x128xbf16>
    %cst = arith.constant dense<0.000000e+00> : vector<512x128xf32>
    %4 = tpu.matmul %1, %3, %cst {dimension_numbers = #tpu.dot_dimension_numbers<[1], [0], [0], [1], [0, 0, 1, 1], [], []>} : vector<512x16xbf16>, vector<16x128xbf16>, vector<512x128xf32> -> vector<512x128xf32>
    %c0_5 = arith.constant 0 : index
    %c1 = arith.constant 1 : index
    %c0_6 = arith.constant 0 : index
    %5 = vector.load %arg2[%c0_5, %c1, %c0_6] : memref<1x536x16xbf16, #tpu.memory_space<vmem>>, vector<1x512x16xbf16>
    %6 = vector.shape_cast %5 : vector<1x512x16xbf16> to vector<512x16xbf16>
    %c1_7 = arith.constant 1 : index
    %c0_8 = arith.constant 0 : index
    %c0_9 = arith.constant 0 : index
    %7 = vector.load %arg3[%c1_7, %c0_8, %c0_9] : memref<4x16x128xbf16, #tpu.memory_space<vmem>>, vector<1x16x128xbf16>
    %8 = vector.shape_cast %7 : vector<1x16x128xbf16> to vector<16x128xbf16>
    %cst_10 = arith.constant dense<0.000000e+00> : vector<512x128xf32>
    %9 = tpu.matmul %6, %8, %cst_10 {dimension_numbers = #tpu.dot_dimension_numbers<[1], [0], [0], [1], [0, 0, 1, 1], [], []>} : vector<512x16xbf16>, vector<16x128xbf16>, vector<512x128xf32> -> vector<512x128xf32>
    %10 = arith.addf %4, %9 : vector<512x128xf32>
    %c0_11 = arith.constant 0 : index
    %c17 = arith.constant 17 : index
    %c0_12 = arith.constant 0 : index
    %11 = vector.load %arg2[%c0_11, %c17, %c0_12] : memref<1x536x16xbf16, #tpu.memory_space<vmem>>, vector<1x512x16xbf16>
    %12 = vector.shape_cast %11 : vector<1x512x16xbf16> to vector<512x16xbf16>
    %c2 = arith.constant 2 : index
    %c0_13 = arith.constant 0 : index
    %c0_14 = arith.constant 0 : index
    %13 = vector.load %arg3[%c2, %c0_13, %c0_14] : memref<4x16x128xbf16, #tpu.memory_space<vmem>>, vector<1x16x128xbf16>
    %14 = vector.shape_cast %13 : vector<1x16x128xbf16> to vector<16x128xbf16>
    %cst_15 = arith.constant dense<0.000000e+00> : vector<512x128xf32>
    %15 = tpu.matmul %12, %14, %cst_15 {dimension_numbers = #tpu.dot_dimension_numbers<[1], [0], [0], [1], [0, 0, 1, 1], [], []>} : vector<512x16xbf16>, vector<16x128xbf16>, vector<512x128xf32> -> vector<512x128xf32>
    %16 = arith.addf %10, %15 : vector<512x128xf32>
    %c0_16 = arith.constant 0 : index
    %c18 = arith.constant 18 : index
    %c0_17 = arith.constant 0 : index
    %17 = vector.load %arg2[%c0_16, %c18, %c0_17] : memref<1x536x16xbf16, #tpu.memory_space<vmem>>, vector<1x512x16xbf16>
    %18 = vector.shape_cast %17 : vector<1x512x16xbf16> to vector<512x16xbf16>
    %c3 = arith.constant 3 : index
    %c0_18 = arith.constant 0 : index
    %c0_19 = arith.constant 0 : index
    %19 = vector.load %arg3[%c3, %c0_18, %c0_19] : memref<4x16x128xbf16, #tpu.memory_space<vmem>>, vector<1x16x128xbf16>
    %20 = vector.shape_cast %19 : vector<1x16x128xbf16> to vector<16x128xbf16>
    %cst_20 = arith.constant dense<0.000000e+00> : vector<512x128xf32>
    %21 = tpu.matmul %18, %20, %cst_20 {dimension_numbers = #tpu.dot_dimension_numbers<[1], [0], [0], [1], [0, 0, 1, 1], [], []>} : vector<512x16xbf16>, vector<16x128xbf16>, vector<512x128xf32> -> vector<512x128xf32>
    %22 = arith.addf %16, %21 : vector<512x128xf32>
    %c0_21 = arith.constant 0 : index
    %c0_22 = arith.constant 0 : index
    %23 = vector.load %arg4[%c0_21, %c0_22] : memref<1x128xf32, #tpu.memory_space<vmem>>, vector<1x128xf32>
    %24 = vector.broadcast %23 : vector<1x128xf32> to vector<512x128xf32>
    %25 = arith.addf %22, %24 : vector<512x128xf32>
    %cst_23 = arith.constant 0.000000e+00 : f32
    %26 = vector.broadcast %cst_23 : f32 to vector<512x128xf32>
    %27 = arith.cmpf oge, %25, %26 : vector<512x128xf32>
    %cst_24 = arith.constant 2.000000e-01 : f32
    %28 = vector.broadcast %cst_24 : f32 to vector<512x128xf32>
    %29 = arith.mulf %28, %25 : vector<512x128xf32>
    %30 = arith.select %27, %25, %29 : vector<512x128xi1>, vector<512x128xf32>
    %31 = arith.truncf %30 : vector<512x128xf32> to vector<512x128xbf16>
    %c0_25 = arith.constant 0 : index
    %c0_26 = arith.constant 0 : index
    %32 = vector.load %arg5[%c0_25, %c0_26] : memref<512x128xbf16, #tpu.memory_space<vmem>>, vector<512x128xbf16>
    tpu.vector_store %arg5[%c0_25, %c0_26], %31 {strides = array<i32>} : memref<512x128xbf16, #tpu.memory_space<vmem>>, vector<512x128xbf16>,
    return
  }
  func.func @transform_0(%arg0: i32, %arg1: i32) -> (i32, i32, i32) {
    %c0_i32 = arith.constant 0 : i32
    %c0_i32_0 = arith.constant 0 : i32
    %c0_i32_1 = arith.constant 0 : i32
    return %arg1, %c0_i32, %c0_i32_0 : i32, i32, i32
  }
  func.func @transform_1(%arg0: i32, %arg1: i32) -> (i32, i32, i32) {
    %c0_i32 = arith.constant 0 : i32
    %c0_i32_0 = arith.constant 0 : i32
    %c0_i32_1 = arith.constant 0 : i32
    return %c0_i32, %c0_i32_0, %arg0 : i32, i32, i32
  }
  func.func @transform_2(%arg0: i32, %arg1: i32) -> (i32, i32) {
    %c0_i32 = arith.constant 0 : i32
    %c0_i32_0 = arith.constant 0 : i32
    return %c0_i32, %arg0 : i32, i32
  }
  func.func @transform_3(%arg0: i32, %arg1: i32) -> (i32, i32) {
    %c0_i32 = arith.constant 0 : i32
    return %arg1, %arg0 : i32, i32
  }
}

module attributes {stable_mosaic.version = 11 : i64} {
  func.func @_conv_kernel(%arg0: i32, %arg1: i32, %arg2: memref<1x184x64xbf16, #tpu.memory_space<vmem>>, %arg3: memref<4x64x128xbf16, #tpu.memory_space<vmem>>, %arg4: memref<168x128xbf16, #tpu.memory_space<vmem>>, %arg5: memref<1x1x128xf32, #tpu.memory_space<vmem>>, %arg6: memref<1x1x128xf32, #tpu.memory_space<vmem>>) attributes {dimension_semantics = [#tpu.dimension_semantics<parallel>, #tpu.dimension_semantics<parallel>], iteration_bounds = array<i64: 1, 1>, scalar_prefetch = 0 : i64, scratch_operands = 0 : i64, tpu.core_type = #tpu.core_type<tc>, window_params = [{transform_indices = @transform_0, window_bounds = array<i64: 1, 184, 64>}, {transform_indices = @transform_1, window_bounds = array<i64: 4, 64, 128>}, {transform_indices = @transform_2, window_bounds = array<i64: 168, 128>}, {transform_indices = @transform_3, window_bounds = array<i64: 1, 1, 128>}, {transform_indices = @transform_4, window_bounds = array<i64: 1, 1, 128>}]} {
    %c0 = arith.constant 0 : index
    %c0_0 = arith.constant 0 : index
    %c0_1 = arith.constant 0 : index
    %0 = vector.load %arg2[%c0, %c0_0, %c0_1] : memref<1x184x64xbf16, #tpu.memory_space<vmem>>, vector<1x168x64xbf16>
    %1 = vector.shape_cast %0 : vector<1x168x64xbf16> to vector<168x64xbf16>
    %c0_2 = arith.constant 0 : index
    %c0_3 = arith.constant 0 : index
    %c0_4 = arith.constant 0 : index
    %2 = vector.load %arg3[%c0_2, %c0_3, %c0_4] : memref<4x64x128xbf16, #tpu.memory_space<vmem>>, vector<1x64x128xbf16>
    %3 = vector.shape_cast %2 : vector<1x64x128xbf16> to vector<64x128xbf16>
    %cst = arith.constant dense<0.000000e+00> : vector<168x128xf32>
    %4 = tpu.matmul %1, %3, %cst {dimension_numbers = #tpu.dot_dimension_numbers<[1], [0], [0], [1], [0, 0, 1, 1], [], []>} : vector<168x64xbf16>, vector<64x128xbf16>, vector<168x128xf32> -> vector<168x128xf32>
    %c0_5 = arith.constant 0 : index
    %c1 = arith.constant 1 : index
    %c0_6 = arith.constant 0 : index
    %5 = vector.load %arg2[%c0_5, %c1, %c0_6] : memref<1x184x64xbf16, #tpu.memory_space<vmem>>, vector<1x168x64xbf16>
    %6 = vector.shape_cast %5 : vector<1x168x64xbf16> to vector<168x64xbf16>
    %c1_7 = arith.constant 1 : index
    %c0_8 = arith.constant 0 : index
    %c0_9 = arith.constant 0 : index
    %7 = vector.load %arg3[%c1_7, %c0_8, %c0_9] : memref<4x64x128xbf16, #tpu.memory_space<vmem>>, vector<1x64x128xbf16>
    %8 = vector.shape_cast %7 : vector<1x64x128xbf16> to vector<64x128xbf16>
    %cst_10 = arith.constant dense<0.000000e+00> : vector<168x128xf32>
    %9 = tpu.matmul %6, %8, %cst_10 {dimension_numbers = #tpu.dot_dimension_numbers<[1], [0], [0], [1], [0, 0, 1, 1], [], []>} : vector<168x64xbf16>, vector<64x128xbf16>, vector<168x128xf32> -> vector<168x128xf32>
    %10 = arith.addf %4, %9 : vector<168x128xf32>
    %c0_11 = arith.constant 0 : index
    %c9 = arith.constant 9 : index
    %c0_12 = arith.constant 0 : index
    %11 = vector.load %arg2[%c0_11, %c9, %c0_12] : memref<1x184x64xbf16, #tpu.memory_space<vmem>>, vector<1x168x64xbf16>
    %12 = vector.shape_cast %11 : vector<1x168x64xbf16> to vector<168x64xbf16>
    %c2 = arith.constant 2 : index
    %c0_13 = arith.constant 0 : index
    %c0_14 = arith.constant 0 : index
    %13 = vector.load %arg3[%c2, %c0_13, %c0_14] : memref<4x64x128xbf16, #tpu.memory_space<vmem>>, vector<1x64x128xbf16>
    %14 = vector.shape_cast %13 : vector<1x64x128xbf16> to vector<64x128xbf16>
    %cst_15 = arith.constant dense<0.000000e+00> : vector<168x128xf32>
    %15 = tpu.matmul %12, %14, %cst_15 {dimension_numbers = #tpu.dot_dimension_numbers<[1], [0], [0], [1], [0, 0, 1, 1], [], []>} : vector<168x64xbf16>, vector<64x128xbf16>, vector<168x128xf32> -> vector<168x128xf32>
    %16 = arith.addf %10, %15 : vector<168x128xf32>
    %c0_16 = arith.constant 0 : index
    %c10 = arith.constant 10 : index
    %c0_17 = arith.constant 0 : index
    %17 = vector.load %arg2[%c0_16, %c10, %c0_17] : memref<1x184x64xbf16, #tpu.memory_space<vmem>>, vector<1x168x64xbf16>
    %18 = vector.shape_cast %17 : vector<1x168x64xbf16> to vector<168x64xbf16>
    %c3 = arith.constant 3 : index
    %c0_18 = arith.constant 0 : index
    %c0_19 = arith.constant 0 : index
    %19 = vector.load %arg3[%c3, %c0_18, %c0_19] : memref<4x64x128xbf16, #tpu.memory_space<vmem>>, vector<1x64x128xbf16>
    %20 = vector.shape_cast %19 : vector<1x64x128xbf16> to vector<64x128xbf16>
    %cst_20 = arith.constant dense<0.000000e+00> : vector<168x128xf32>
    %21 = tpu.matmul %18, %20, %cst_20 {dimension_numbers = #tpu.dot_dimension_numbers<[1], [0], [0], [1], [0, 0, 1, 1], [], []>} : vector<168x64xbf16>, vector<64x128xbf16>, vector<168x128xf32> -> vector<168x128xf32>
    %22 = arith.addf %16, %21 : vector<168x128xf32>
    %23 = arith.truncf %22 : vector<168x128xf32> to vector<168x128xbf16>
    %c0_21 = arith.constant 0 : index
    %c0_22 = arith.constant 0 : index
    %24 = vector.load %arg4[%c0_21, %c0_22] : memref<168x128xbf16, #tpu.memory_space<vmem>>, vector<168x128xbf16>
    tpu.vector_store %arg4[%c0_21, %c0_22], %23 {strides = array<i32>} : memref<168x128xbf16, #tpu.memory_space<vmem>>, vector<168x128xbf16>,
    %c168_i32 = arith.constant 168 : i32
    %25 = arith.muli %arg1, %c168_i32 : i32
    %26 = tpu.iota {dimensions = array<i32: 0>} : vector<168x1xi32>
    %27 = vector.broadcast %25 : i32 to vector<168x1xi32>
    %28 = arith.addi %27, %26 : vector<168x1xi32>
    %29 = arith.sitofp %28 : vector<168x1xi32> to vector<168x1xf32>
    %cst_23 = arith.constant 5.000000e-01 : f32
    %30 = vector.broadcast %cst_23 : f32 to vector<168x1xf32>
    %31 = arith.addf %29, %30 : vector<168x1xf32>
    %cst_24 = arith.constant 0.0123456791 : f32
    %32 = vector.broadcast %cst_24 : f32 to vector<168x1xf32>
    %33 = arith.mulf %31, %32 : vector<168x1xf32>
    %34 = math.floor %33 : vector<168x1xf32>
    %cst_25 = arith.constant 8.100000e+01 : f32
    %35 = vector.broadcast %cst_25 : f32 to vector<168x1xf32>
    %36 = arith.mulf %34, %35 : vector<168x1xf32>
    %37 = arith.subf %29, %36 : vector<168x1xf32>
    %cst_26 = arith.constant 5.000000e-01 : f32
    %38 = vector.broadcast %cst_26 : f32 to vector<168x1xf32>
    %39 = arith.addf %37, %38 : vector<168x1xf32>
    %cst_27 = arith.constant 0.111111112 : f32
    %40 = vector.broadcast %cst_27 : f32 to vector<168x1xf32>
    %41 = arith.mulf %39, %40 : vector<168x1xf32>
    %42 = math.floor %41 : vector<168x1xf32>
    %cst_28 = arith.constant 9.000000e+00 : f32
    %43 = vector.broadcast %cst_28 : f32 to vector<168x1xf32>
    %44 = arith.mulf %42, %43 : vector<168x1xf32>
    %45 = arith.subf %37, %44 : vector<168x1xf32>
    %cst_29 = arith.constant 1.620000e+02 : f32
    %46 = vector.broadcast %cst_29 : f32 to vector<168x1xf32>
    %47 = arith.cmpf olt, %29, %46 : vector<168x1xf32>
    %cst_30 = arith.constant 8.000000e+00 : f32
    %48 = vector.broadcast %cst_30 : f32 to vector<168x1xf32>
    %49 = arith.cmpf olt, %42, %48 : vector<168x1xf32>
    %50 = arith.andi %47, %49 : vector<168x1xi1>
    %cst_31 = arith.constant 8.000000e+00 : f32
    %51 = vector.broadcast %cst_31 : f32 to vector<168x1xf32>
    %52 = arith.cmpf olt, %45, %51 : vector<168x1xf32>
    %53 = arith.andi %50, %52 : vector<168x1xi1>
    %54 = arith.extui %53 : vector<168x1xi1> to vector<168x1xi32>
    %55 = arith.sitofp %54 : vector<168x1xi32> to vector<168x1xf32>
    %56 = vector.broadcast %55 : vector<168x1xf32> to vector<168x128xf32>
    %57 = arith.mulf %22, %56 : vector<168x128xf32>
    %cst_32 = arith.constant dense<0.000000e+00> : vector<128xf32>
    %58 = vector.multi_reduction <add>, %57, %cst_32 [0] : vector<168x128xf32> to vector<128xf32>
    %59 = vector.shape_cast %58 : vector<128xf32> to vector<1x128xf32>
    %60 = vector.shape_cast %59 : vector<1x128xf32> to vector<1x1x128xf32>
    %c0_33 = arith.constant 0 : index
    %c0_34 = arith.constant 0 : index
    %c0_35 = arith.constant 0 : index
    %61 = vector.load %arg5[%c0_33, %c0_34, %c0_35] : memref<1x1x128xf32, #tpu.memory_space<vmem>>, vector<1x1x128xf32>
    tpu.vector_store %arg5[%c0_33, %c0_34, %c0_35], %60 {strides = array<i32>} : memref<1x1x128xf32, #tpu.memory_space<vmem>>, vector<1x1x128xf32>,
    %62 = arith.mulf %57, %22 : vector<168x128xf32>
    %cst_36 = arith.constant dense<0.000000e+00> : vector<128xf32>
    %63 = vector.multi_reduction <add>, %62, %cst_36 [0] : vector<168x128xf32> to vector<128xf32>
    %64 = vector.shape_cast %63 : vector<128xf32> to vector<1x128xf32>
    %65 = vector.shape_cast %64 : vector<1x128xf32> to vector<1x1x128xf32>
    %c0_37 = arith.constant 0 : index
    %c0_38 = arith.constant 0 : index
    %c0_39 = arith.constant 0 : index
    %66 = vector.load %arg6[%c0_37, %c0_38, %c0_39] : memref<1x1x128xf32, #tpu.memory_space<vmem>>, vector<1x1x128xf32>
    tpu.vector_store %arg6[%c0_37, %c0_38, %c0_39], %65 {strides = array<i32>} : memref<1x1x128xf32, #tpu.memory_space<vmem>>, vector<1x1x128xf32>,
    return
  }
  func.func @transform_0(%arg0: i32, %arg1: i32) -> (i32, i32, i32) {
    %c0_i32 = arith.constant 0 : i32
    %c0_i32_0 = arith.constant 0 : i32
    %c0_i32_1 = arith.constant 0 : i32
    return %arg1, %c0_i32, %c0_i32_0 : i32, i32, i32
  }
  func.func @transform_1(%arg0: i32, %arg1: i32) -> (i32, i32, i32) {
    %c0_i32 = arith.constant 0 : i32
    %c0_i32_0 = arith.constant 0 : i32
    %c0_i32_1 = arith.constant 0 : i32
    return %c0_i32, %c0_i32_0, %arg0 : i32, i32, i32
  }
  func.func @transform_2(%arg0: i32, %arg1: i32) -> (i32, i32) {
    %c0_i32 = arith.constant 0 : i32
    return %arg1, %arg0 : i32, i32
  }
  func.func @transform_3(%arg0: i32, %arg1: i32) -> (i32, i32, i32) {
    %c0_i32 = arith.constant 0 : i32
    %c0_i32_0 = arith.constant 0 : i32
    return %arg1, %c0_i32, %arg0 : i32, i32, i32
  }
  func.func @transform_4(%arg0: i32, %arg1: i32) -> (i32, i32, i32) {
    %c0_i32 = arith.constant 0 : i32
    %c0_i32_0 = arith.constant 0 : i32
    return %arg1, %c0_i32, %arg0 : i32, i32, i32
  }
}

module attributes {stable_mosaic.version = 11 : i64} {
  func.func @_conv_kernel(%arg0: i32, %arg1: i32, %arg2: memref<1x64x128xbf16, #tpu.memory_space<vmem>>, %arg3: memref<4x128x128xbf16, #tpu.memory_space<vmem>>, %arg4: memref<56x128xbf16, #tpu.memory_space<vmem>>, %arg5: memref<1x1x128xf32, #tpu.memory_space<vmem>>, %arg6: memref<1x1x128xf32, #tpu.memory_space<vmem>>) attributes {dimension_semantics = [#tpu.dimension_semantics<parallel>, #tpu.dimension_semantics<parallel>], iteration_bounds = array<i64: 1, 1>, scalar_prefetch = 0 : i64, scratch_operands = 0 : i64, tpu.core_type = #tpu.core_type<tc>, window_params = [{transform_indices = @transform_0, window_bounds = array<i64: 1, 64, 128>}, {transform_indices = @transform_1, window_bounds = array<i64: 4, 128, 128>}, {transform_indices = @transform_2, window_bounds = array<i64: 56, 128>}, {transform_indices = @transform_3, window_bounds = array<i64: 1, 1, 128>}, {transform_indices = @transform_4, window_bounds = array<i64: 1, 1, 128>}]} {
    %c0 = arith.constant 0 : index
    %c0_0 = arith.constant 0 : index
    %c0_1 = arith.constant 0 : index
    %0 = vector.load %arg2[%c0, %c0_0, %c0_1] : memref<1x64x128xbf16, #tpu.memory_space<vmem>>, vector<1x56x128xbf16>
    %1 = vector.shape_cast %0 : vector<1x56x128xbf16> to vector<56x128xbf16>
    %c0_2 = arith.constant 0 : index
    %c0_3 = arith.constant 0 : index
    %c0_4 = arith.constant 0 : index
    %2 = vector.load %arg3[%c0_2, %c0_3, %c0_4] : memref<4x128x128xbf16, #tpu.memory_space<vmem>>, vector<1x128x128xbf16>
    %3 = vector.shape_cast %2 : vector<1x128x128xbf16> to vector<128x128xbf16>
    %cst = arith.constant dense<0.000000e+00> : vector<56x128xf32>
    %4 = tpu.matmul %1, %3, %cst {dimension_numbers = #tpu.dot_dimension_numbers<[1], [0], [0], [1], [0, 0, 1, 1], [], []>} : vector<56x128xbf16>, vector<128x128xbf16>, vector<56x128xf32> -> vector<56x128xf32>
    %c0_5 = arith.constant 0 : index
    %c1 = arith.constant 1 : index
    %c0_6 = arith.constant 0 : index
    %5 = vector.load %arg2[%c0_5, %c1, %c0_6] : memref<1x64x128xbf16, #tpu.memory_space<vmem>>, vector<1x56x128xbf16>
    %6 = vector.shape_cast %5 : vector<1x56x128xbf16> to vector<56x128xbf16>
    %c1_7 = arith.constant 1 : index
    %c0_8 = arith.constant 0 : index
    %c0_9 = arith.constant 0 : index
    %7 = vector.load %arg3[%c1_7, %c0_8, %c0_9] : memref<4x128x128xbf16, #tpu.memory_space<vmem>>, vector<1x128x128xbf16>
    %8 = vector.shape_cast %7 : vector<1x128x128xbf16> to vector<128x128xbf16>
    %cst_10 = arith.constant dense<0.000000e+00> : vector<56x128xf32>
    %9 = tpu.matmul %6, %8, %cst_10 {dimension_numbers = #tpu.dot_dimension_numbers<[1], [0], [0], [1], [0, 0, 1, 1], [], []>} : vector<56x128xbf16>, vector<128x128xbf16>, vector<56x128xf32> -> vector<56x128xf32>
    %10 = arith.addf %4, %9 : vector<56x128xf32>
    %c0_11 = arith.constant 0 : index
    %c5 = arith.constant 5 : index
    %c0_12 = arith.constant 0 : index
    %11 = vector.load %arg2[%c0_11, %c5, %c0_12] : memref<1x64x128xbf16, #tpu.memory_space<vmem>>, vector<1x56x128xbf16>
    %12 = vector.shape_cast %11 : vector<1x56x128xbf16> to vector<56x128xbf16>
    %c2 = arith.constant 2 : index
    %c0_13 = arith.constant 0 : index
    %c0_14 = arith.constant 0 : index
    %13 = vector.load %arg3[%c2, %c0_13, %c0_14] : memref<4x128x128xbf16, #tpu.memory_space<vmem>>, vector<1x128x128xbf16>
    %14 = vector.shape_cast %13 : vector<1x128x128xbf16> to vector<128x128xbf16>
    %cst_15 = arith.constant dense<0.000000e+00> : vector<56x128xf32>
    %15 = tpu.matmul %12, %14, %cst_15 {dimension_numbers = #tpu.dot_dimension_numbers<[1], [0], [0], [1], [0, 0, 1, 1], [], []>} : vector<56x128xbf16>, vector<128x128xbf16>, vector<56x128xf32> -> vector<56x128xf32>
    %16 = arith.addf %10, %15 : vector<56x128xf32>
    %c0_16 = arith.constant 0 : index
    %c6 = arith.constant 6 : index
    %c0_17 = arith.constant 0 : index
    %17 = vector.load %arg2[%c0_16, %c6, %c0_17] : memref<1x64x128xbf16, #tpu.memory_space<vmem>>, vector<1x56x128xbf16>
    %18 = vector.shape_cast %17 : vector<1x56x128xbf16> to vector<56x128xbf16>
    %c3 = arith.constant 3 : index
    %c0_18 = arith.constant 0 : index
    %c0_19 = arith.constant 0 : index
    %19 = vector.load %arg3[%c3, %c0_18, %c0_19] : memref<4x128x128xbf16, #tpu.memory_space<vmem>>, vector<1x128x128xbf16>
    %20 = vector.shape_cast %19 : vector<1x128x128xbf16> to vector<128x128xbf16>
    %cst_20 = arith.constant dense<0.000000e+00> : vector<56x128xf32>
    %21 = tpu.matmul %18, %20, %cst_20 {dimension_numbers = #tpu.dot_dimension_numbers<[1], [0], [0], [1], [0, 0, 1, 1], [], []>} : vector<56x128xbf16>, vector<128x128xbf16>, vector<56x128xf32> -> vector<56x128xf32>
    %22 = arith.addf %16, %21 : vector<56x128xf32>
    %23 = arith.truncf %22 : vector<56x128xf32> to vector<56x128xbf16>
    %c0_21 = arith.constant 0 : index
    %c0_22 = arith.constant 0 : index
    %24 = vector.load %arg4[%c0_21, %c0_22] : memref<56x128xbf16, #tpu.memory_space<vmem>>, vector<56x128xbf16>
    tpu.vector_store %arg4[%c0_21, %c0_22], %23 {strides = array<i32>} : memref<56x128xbf16, #tpu.memory_space<vmem>>, vector<56x128xbf16>,
    %c56_i32 = arith.constant 56 : i32
    %25 = arith.muli %arg1, %c56_i32 : i32
    %26 = tpu.iota {dimensions = array<i32: 0>} : vector<56x1xi32>
    %27 = vector.broadcast %25 : i32 to vector<56x1xi32>
    %28 = arith.addi %27, %26 : vector<56x1xi32>
    %29 = arith.sitofp %28 : vector<56x1xi32> to vector<56x1xf32>
    %cst_23 = arith.constant 5.000000e-01 : f32
    %30 = vector.broadcast %cst_23 : f32 to vector<56x1xf32>
    %31 = arith.addf %29, %30 : vector<56x1xf32>
    %cst_24 = arith.constant 4.000000e-02 : f32
    %32 = vector.broadcast %cst_24 : f32 to vector<56x1xf32>
    %33 = arith.mulf %31, %32 : vector<56x1xf32>
    %34 = math.floor %33 : vector<56x1xf32>
    %cst_25 = arith.constant 2.500000e+01 : f32
    %35 = vector.broadcast %cst_25 : f32 to vector<56x1xf32>
    %36 = arith.mulf %34, %35 : vector<56x1xf32>
    %37 = arith.subf %29, %36 : vector<56x1xf32>
    %cst_26 = arith.constant 5.000000e-01 : f32
    %38 = vector.broadcast %cst_26 : f32 to vector<56x1xf32>
    %39 = arith.addf %37, %38 : vector<56x1xf32>
    %cst_27 = arith.constant 2.000000e-01 : f32
    %40 = vector.broadcast %cst_27 : f32 to vector<56x1xf32>
    %41 = arith.mulf %39, %40 : vector<56x1xf32>
    %42 = math.floor %41 : vector<56x1xf32>
    %cst_28 = arith.constant 5.000000e+00 : f32
    %43 = vector.broadcast %cst_28 : f32 to vector<56x1xf32>
    %44 = arith.mulf %42, %43 : vector<56x1xf32>
    %45 = arith.subf %37, %44 : vector<56x1xf32>
    %cst_29 = arith.constant 5.000000e+01 : f32
    %46 = vector.broadcast %cst_29 : f32 to vector<56x1xf32>
    %47 = arith.cmpf olt, %29, %46 : vector<56x1xf32>
    %cst_30 = arith.constant 4.000000e+00 : f32
    %48 = vector.broadcast %cst_30 : f32 to vector<56x1xf32>
    %49 = arith.cmpf olt, %42, %48 : vector<56x1xf32>
    %50 = arith.andi %47, %49 : vector<56x1xi1>
    %cst_31 = arith.constant 4.000000e+00 : f32
    %51 = vector.broadcast %cst_31 : f32 to vector<56x1xf32>
    %52 = arith.cmpf olt, %45, %51 : vector<56x1xf32>
    %53 = arith.andi %50, %52 : vector<56x1xi1>
    %54 = arith.extui %53 : vector<56x1xi1> to vector<56x1xi32>
    %55 = arith.sitofp %54 : vector<56x1xi32> to vector<56x1xf32>
    %56 = vector.broadcast %55 : vector<56x1xf32> to vector<56x128xf32>
    %57 = arith.mulf %22, %56 : vector<56x128xf32>
    %cst_32 = arith.constant dense<0.000000e+00> : vector<128xf32>
    %58 = vector.multi_reduction <add>, %57, %cst_32 [0] : vector<56x128xf32> to vector<128xf32>
    %59 = vector.shape_cast %58 : vector<128xf32> to vector<1x128xf32>
    %60 = vector.shape_cast %59 : vector<1x128xf32> to vector<1x1x128xf32>
    %c0_33 = arith.constant 0 : index
    %c0_34 = arith.constant 0 : index
    %c0_35 = arith.constant 0 : index
    %61 = vector.load %arg5[%c0_33, %c0_34, %c0_35] : memref<1x1x128xf32, #tpu.memory_space<vmem>>, vector<1x1x128xf32>
    tpu.vector_store %arg5[%c0_33, %c0_34, %c0_35], %60 {strides = array<i32>} : memref<1x1x128xf32, #tpu.memory_space<vmem>>, vector<1x1x128xf32>,
    %62 = arith.mulf %57, %22 : vector<56x128xf32>
    %cst_36 = arith.constant dense<0.000000e+00> : vector<128xf32>
    %63 = vector.multi_reduction <add>, %62, %cst_36 [0] : vector<56x128xf32> to vector<128xf32>
    %64 = vector.shape_cast %63 : vector<128xf32> to vector<1x128xf32>
    %65 = vector.shape_cast %64 : vector<1x128xf32> to vector<1x1x128xf32>
    %c0_37 = arith.constant 0 : index
    %c0_38 = arith.constant 0 : index
    %c0_39 = arith.constant 0 : index
    %66 = vector.load %arg6[%c0_37, %c0_38, %c0_39] : memref<1x1x128xf32, #tpu.memory_space<vmem>>, vector<1x1x128xf32>
    tpu.vector_store %arg6[%c0_37, %c0_38, %c0_39], %65 {strides = array<i32>} : memref<1x1x128xf32, #tpu.memory_space<vmem>>, vector<1x1x128xf32>,
    return
  }
  func.func @transform_0(%arg0: i32, %arg1: i32) -> (i32, i32, i32) {
    %c0_i32 = arith.constant 0 : i32
    %c0_i32_0 = arith.constant 0 : i32
    %c0_i32_1 = arith.constant 0 : i32
    return %arg1, %c0_i32, %c0_i32_0 : i32, i32, i32
  }
  func.func @transform_1(%arg0: i32, %arg1: i32) -> (i32, i32, i32) {
    %c0_i32 = arith.constant 0 : i32
    %c0_i32_0 = arith.constant 0 : i32
    %c0_i32_1 = arith.constant 0 : i32
    return %c0_i32, %c0_i32_0, %arg0 : i32, i32, i32
  }
  func.func @transform_2(%arg0: i32, %arg1: i32) -> (i32, i32) {
    %c0_i32 = arith.constant 0 : i32
    return %arg1, %arg0 : i32, i32
  }
  func.func @transform_3(%arg0: i32, %arg1: i32) -> (i32, i32, i32) {
    %c0_i32 = arith.constant 0 : i32
    %c0_i32_0 = arith.constant 0 : i32
    return %arg1, %c0_i32, %arg0 : i32, i32, i32
  }
  func.func @transform_4(%arg0: i32, %arg1: i32) -> (i32, i32, i32) {
    %c0_i32 = arith.constant 0 : i32
    %c0_i32_0 = arith.constant 0 : i32
    return %arg1, %c0_i32, %arg0 : i32, i32, i32
  }
}

module attributes {stable_mosaic.version = 11 : i64} {
  func.func @_conv_kernel(%arg0: i32, %arg1: i32, %arg2: memref<1x128x64xbf16, #tpu.memory_space<vmem>>, %arg3: memref<16x64x128xbf16, #tpu.memory_space<vmem>>, %arg4: memref<96x128xbf16, #tpu.memory_space<vmem>>, %arg5: memref<1x1x128xf32, #tpu.memory_space<vmem>>, %arg6: memref<1x1x128xf32, #tpu.memory_space<vmem>>) attributes {dimension_semantics = [#tpu.dimension_semantics<parallel>, #tpu.dimension_semantics<parallel>], iteration_bounds = array<i64: 1, 1>, scalar_prefetch = 0 : i64, scratch_operands = 0 : i64, tpu.core_type = #tpu.core_type<tc>, window_params = [{transform_indices = @transform_0, window_bounds = array<i64: 1, 128, 64>}, {transform_indices = @transform_1, window_bounds = array<i64: 16, 64, 128>}, {transform_indices = @transform_2, window_bounds = array<i64: 96, 128>}, {transform_indices = @transform_3, window_bounds = array<i64: 1, 1, 128>}, {transform_indices = @transform_4, window_bounds = array<i64: 1, 1, 128>}]} {
    %c0 = arith.constant 0 : index
    %c0_0 = arith.constant 0 : index
    %c0_1 = arith.constant 0 : index
    %0 = vector.load %arg2[%c0, %c0_0, %c0_1] : memref<1x128x64xbf16, #tpu.memory_space<vmem>>, vector<1x96x64xbf16>
    %1 = vector.shape_cast %0 : vector<1x96x64xbf16> to vector<96x64xbf16>
    %c0_2 = arith.constant 0 : index
    %c0_3 = arith.constant 0 : index
    %c0_4 = arith.constant 0 : index
    %2 = vector.load %arg3[%c0_2, %c0_3, %c0_4] : memref<16x64x128xbf16, #tpu.memory_space<vmem>>, vector<1x64x128xbf16>
    %3 = vector.shape_cast %2 : vector<1x64x128xbf16> to vector<64x128xbf16>
    %cst = arith.constant dense<0.000000e+00> : vector<96x128xf32>
    %4 = tpu.matmul %1, %3, %cst {dimension_numbers = #tpu.dot_dimension_numbers<[1], [0], [0], [1], [0, 0, 1, 1], [], []>} : vector<96x64xbf16>, vector<64x128xbf16>, vector<96x128xf32> -> vector<96x128xf32>
    %c0_5 = arith.constant 0 : index
    %c1 = arith.constant 1 : index
    %c0_6 = arith.constant 0 : index
    %5 = vector.load %arg2[%c0_5, %c1, %c0_6] : memref<1x128x64xbf16, #tpu.memory_space<vmem>>, vector<1x96x64xbf16>
    %6 = vector.shape_cast %5 : vector<1x96x64xbf16> to vector<96x64xbf16>
    %c1_7 = arith.constant 1 : index
    %c0_8 = arith.constant 0 : index
    %c0_9 = arith.constant 0 : index
    %7 = vector.load %arg3[%c1_7, %c0_8, %c0_9] : memref<16x64x128xbf16, #tpu.memory_space<vmem>>, vector<1x64x128xbf16>
    %8 = vector.shape_cast %7 : vector<1x64x128xbf16> to vector<64x128xbf16>
    %cst_10 = arith.constant dense<0.000000e+00> : vector<96x128xf32>
    %9 = tpu.matmul %6, %8, %cst_10 {dimension_numbers = #tpu.dot_dimension_numbers<[1], [0], [0], [1], [0, 0, 1, 1], [], []>} : vector<96x64xbf16>, vector<64x128xbf16>, vector<96x128xf32> -> vector<96x128xf32>
    %10 = arith.addf %4, %9 : vector<96x128xf32>
    %c0_11 = arith.constant 0 : index
    %c2 = arith.constant 2 : index
    %c0_12 = arith.constant 0 : index
    %11 = vector.load %arg2[%c0_11, %c2, %c0_12] : memref<1x128x64xbf16, #tpu.memory_space<vmem>>, vector<1x96x64xbf16>
    %12 = vector.shape_cast %11 : vector<1x96x64xbf16> to vector<96x64xbf16>
    %c2_13 = arith.constant 2 : index
    %c0_14 = arith.constant 0 : index
    %c0_15 = arith.constant 0 : index
    %13 = vector.load %arg3[%c2_13, %c0_14, %c0_15] : memref<16x64x128xbf16, #tpu.memory_space<vmem>>, vector<1x64x128xbf16>
    %14 = vector.shape_cast %13 : vector<1x64x128xbf16> to vector<64x128xbf16>
    %cst_16 = arith.constant dense<0.000000e+00> : vector<96x128xf32>
    %15 = tpu.matmul %12, %14, %cst_16 {dimension_numbers = #tpu.dot_dimension_numbers<[1], [0], [0], [1], [0, 0, 1, 1], [], []>} : vector<96x64xbf16>, vector<64x128xbf16>, vector<96x128xf32> -> vector<96x128xf32>
    %16 = arith.addf %10, %15 : vector<96x128xf32>
    %c0_17 = arith.constant 0 : index
    %c3 = arith.constant 3 : index
    %c0_18 = arith.constant 0 : index
    %17 = vector.load %arg2[%c0_17, %c3, %c0_18] : memref<1x128x64xbf16, #tpu.memory_space<vmem>>, vector<1x96x64xbf16>
    %18 = vector.shape_cast %17 : vector<1x96x64xbf16> to vector<96x64xbf16>
    %c3_19 = arith.constant 3 : index
    %c0_20 = arith.constant 0 : index
    %c0_21 = arith.constant 0 : index
    %19 = vector.load %arg3[%c3_19, %c0_20, %c0_21] : memref<16x64x128xbf16, #tpu.memory_space<vmem>>, vector<1x64x128xbf16>
    %20 = vector.shape_cast %19 : vector<1x64x128xbf16> to vector<64x128xbf16>
    %cst_22 = arith.constant dense<0.000000e+00> : vector<96x128xf32>
    %21 = tpu.matmul %18, %20, %cst_22 {dimension_numbers = #tpu.dot_dimension_numbers<[1], [0], [0], [1], [0, 0, 1, 1], [], []>} : vector<96x64xbf16>, vector<64x128xbf16>, vector<96x128xf32> -> vector<96x128xf32>
    %22 = arith.addf %16, %21 : vector<96x128xf32>
    %c0_23 = arith.constant 0 : index
    %c8 = arith.constant 8 : index
    %c0_24 = arith.constant 0 : index
    %23 = vector.load %arg2[%c0_23, %c8, %c0_24] : memref<1x128x64xbf16, #tpu.memory_space<vmem>>, vector<1x96x64xbf16>
    %24 = vector.shape_cast %23 : vector<1x96x64xbf16> to vector<96x64xbf16>
    %c4 = arith.constant 4 : index
    %c0_25 = arith.constant 0 : index
    %c0_26 = arith.constant 0 : index
    %25 = vector.load %arg3[%c4, %c0_25, %c0_26] : memref<16x64x128xbf16, #tpu.memory_space<vmem>>, vector<1x64x128xbf16>
    %26 = vector.shape_cast %25 : vector<1x64x128xbf16> to vector<64x128xbf16>
    %cst_27 = arith.constant dense<0.000000e+00> : vector<96x128xf32>
    %27 = tpu.matmul %24, %26, %cst_27 {dimension_numbers = #tpu.dot_dimension_numbers<[1], [0], [0], [1], [0, 0, 1, 1], [], []>} : vector<96x64xbf16>, vector<64x128xbf16>, vector<96x128xf32> -> vector<96x128xf32>
    %28 = arith.addf %22, %27 : vector<96x128xf32>
    %c0_28 = arith.constant 0 : index
    %c9 = arith.constant 9 : index
    %c0_29 = arith.constant 0 : index
    %29 = vector.load %arg2[%c0_28, %c9, %c0_29] : memref<1x128x64xbf16, #tpu.memory_space<vmem>>, vector<1x96x64xbf16>
    %30 = vector.shape_cast %29 : vector<1x96x64xbf16> to vector<96x64xbf16>
    %c5 = arith.constant 5 : index
    %c0_30 = arith.constant 0 : index
    %c0_31 = arith.constant 0 : index
    %31 = vector.load %arg3[%c5, %c0_30, %c0_31] : memref<16x64x128xbf16, #tpu.memory_space<vmem>>, vector<1x64x128xbf16>
    %32 = vector.shape_cast %31 : vector<1x64x128xbf16> to vector<64x128xbf16>
    %cst_32 = arith.constant dense<0.000000e+00> : vector<96x128xf32>
    %33 = tpu.matmul %30, %32, %cst_32 {dimension_numbers = #tpu.dot_dimension_numbers<[1], [0], [0], [1], [0, 0, 1, 1], [], []>} : vector<96x64xbf16>, vector<64x128xbf16>, vector<96x128xf32> -> vector<96x128xf32>
    %34 = arith.addf %28, %33 : vector<96x128xf32>
    %c0_33 = arith.constant 0 : index
    %c10 = arith.constant 10 : index
    %c0_34 = arith.constant 0 : index
    %35 = vector.load %arg2[%c0_33, %c10, %c0_34] : memref<1x128x64xbf16, #tpu.memory_space<vmem>>, vector<1x96x64xbf16>
    %36 = vector.shape_cast %35 : vector<1x96x64xbf16> to vector<96x64xbf16>
    %c6 = arith.constant 6 : index
    %c0_35 = arith.constant 0 : index
    %c0_36 = arith.constant 0 : index
    %37 = vector.load %arg3[%c6, %c0_35, %c0_36] : memref<16x64x128xbf16, #tpu.memory_space<vmem>>, vector<1x64x128xbf16>
    %38 = vector.shape_cast %37 : vector<1x64x128xbf16> to vector<64x128xbf16>
    %cst_37 = arith.constant dense<0.000000e+00> : vector<96x128xf32>
    %39 = tpu.matmul %36, %38, %cst_37 {dimension_numbers = #tpu.dot_dimension_numbers<[1], [0], [0], [1], [0, 0, 1, 1], [], []>} : vector<96x64xbf16>, vector<64x128xbf16>, vector<96x128xf32> -> vector<96x128xf32>
    %40 = arith.addf %34, %39 : vector<96x128xf32>
    %c0_38 = arith.constant 0 : index
    %c11 = arith.constant 11 : index
    %c0_39 = arith.constant 0 : index
    %41 = vector.load %arg2[%c0_38, %c11, %c0_39] : memref<1x128x64xbf16, #tpu.memory_space<vmem>>, vector<1x96x64xbf16>
    %42 = vector.shape_cast %41 : vector<1x96x64xbf16> to vector<96x64xbf16>
    %c7 = arith.constant 7 : index
    %c0_40 = arith.constant 0 : index
    %c0_41 = arith.constant 0 : index
    %43 = vector.load %arg3[%c7, %c0_40, %c0_41] : memref<16x64x128xbf16, #tpu.memory_space<vmem>>, vector<1x64x128xbf16>
    %44 = vector.shape_cast %43 : vector<1x64x128xbf16> to vector<64x128xbf16>
    %cst_42 = arith.constant dense<0.000000e+00> : vector<96x128xf32>
    %45 = tpu.matmul %42, %44, %cst_42 {dimension_numbers = #tpu.dot_dimension_numbers<[1], [0], [0], [1], [0, 0, 1, 1], [], []>} : vector<96x64xbf16>, vector<64x128xbf16>, vector<96x128xf32> -> vector<96x128xf32>
    %46 = arith.addf %40, %45 : vector<96x128xf32>
    %c0_43 = arith.constant 0 : index
    %c16 = arith.constant 16 : index
    %c0_44 = arith.constant 0 : index
    %47 = vector.load %arg2[%c0_43, %c16, %c0_44] : memref<1x128x64xbf16, #tpu.memory_space<vmem>>, vector<1x96x64xbf16>
    %48 = vector.shape_cast %47 : vector<1x96x64xbf16> to vector<96x64xbf16>
    %c8_45 = arith.constant 8 : index
    %c0_46 = arith.constant 0 : index
    %c0_47 = arith.constant 0 : index
    %49 = vector.load %arg3[%c8_45, %c0_46, %c0_47] : memref<16x64x128xbf16, #tpu.memory_space<vmem>>, vector<1x64x128xbf16>
    %50 = vector.shape_cast %49 : vector<1x64x128xbf16> to vector<64x128xbf16>
    %cst_48 = arith.constant dense<0.000000e+00> : vector<96x128xf32>
    %51 = tpu.matmul %48, %50, %cst_48 {dimension_numbers = #tpu.dot_dimension_numbers<[1], [0], [0], [1], [0, 0, 1, 1], [], []>} : vector<96x64xbf16>, vector<64x128xbf16>, vector<96x128xf32> -> vector<96x128xf32>
    %52 = arith.addf %46, %51 : vector<96x128xf32>
    %c0_49 = arith.constant 0 : index
    %c17 = arith.constant 17 : index
    %c0_50 = arith.constant 0 : index
    %53 = vector.load %arg2[%c0_49, %c17, %c0_50] : memref<1x128x64xbf16, #tpu.memory_space<vmem>>, vector<1x96x64xbf16>
    %54 = vector.shape_cast %53 : vector<1x96x64xbf16> to vector<96x64xbf16>
    %c9_51 = arith.constant 9 : index
    %c0_52 = arith.constant 0 : index
    %c0_53 = arith.constant 0 : index
    %55 = vector.load %arg3[%c9_51, %c0_52, %c0_53] : memref<16x64x128xbf16, #tpu.memory_space<vmem>>, vector<1x64x128xbf16>
    %56 = vector.shape_cast %55 : vector<1x64x128xbf16> to vector<64x128xbf16>
    %cst_54 = arith.constant dense<0.000000e+00> : vector<96x128xf32>
    %57 = tpu.matmul %54, %56, %cst_54 {dimension_numbers = #tpu.dot_dimension_numbers<[1], [0], [0], [1], [0, 0, 1, 1], [], []>} : vector<96x64xbf16>, vector<64x128xbf16>, vector<96x128xf32> -> vector<96x128xf32>
    %58 = arith.addf %52, %57 : vector<96x128xf32>
    %c0_55 = arith.constant 0 : index
    %c18 = arith.constant 18 : index
    %c0_56 = arith.constant 0 : index
    %59 = vector.load %arg2[%c0_55, %c18, %c0_56] : memref<1x128x64xbf16, #tpu.memory_space<vmem>>, vector<1x96x64xbf16>
    %60 = vector.shape_cast %59 : vector<1x96x64xbf16> to vector<96x64xbf16>
    %c10_57 = arith.constant 10 : index
    %c0_58 = arith.constant 0 : index
    %c0_59 = arith.constant 0 : index
    %61 = vector.load %arg3[%c10_57, %c0_58, %c0_59] : memref<16x64x128xbf16, #tpu.memory_space<vmem>>, vector<1x64x128xbf16>
    %62 = vector.shape_cast %61 : vector<1x64x128xbf16> to vector<64x128xbf16>
    %cst_60 = arith.constant dense<0.000000e+00> : vector<96x128xf32>
    %63 = tpu.matmul %60, %62, %cst_60 {dimension_numbers = #tpu.dot_dimension_numbers<[1], [0], [0], [1], [0, 0, 1, 1], [], []>} : vector<96x64xbf16>, vector<64x128xbf16>, vector<96x128xf32> -> vector<96x128xf32>
    %64 = arith.addf %58, %63 : vector<96x128xf32>
    %c0_61 = arith.constant 0 : index
    %c19 = arith.constant 19 : index
    %c0_62 = arith.constant 0 : index
    %65 = vector.load %arg2[%c0_61, %c19, %c0_62] : memref<1x128x64xbf16, #tpu.memory_space<vmem>>, vector<1x96x64xbf16>
    %66 = vector.shape_cast %65 : vector<1x96x64xbf16> to vector<96x64xbf16>
    %c11_63 = arith.constant 11 : index
    %c0_64 = arith.constant 0 : index
    %c0_65 = arith.constant 0 : index
    %67 = vector.load %arg3[%c11_63, %c0_64, %c0_65] : memref<16x64x128xbf16, #tpu.memory_space<vmem>>, vector<1x64x128xbf16>
    %68 = vector.shape_cast %67 : vector<1x64x128xbf16> to vector<64x128xbf16>
    %cst_66 = arith.constant dense<0.000000e+00> : vector<96x128xf32>
    %69 = tpu.matmul %66, %68, %cst_66 {dimension_numbers = #tpu.dot_dimension_numbers<[1], [0], [0], [1], [0, 0, 1, 1], [], []>} : vector<96x64xbf16>, vector<64x128xbf16>, vector<96x128xf32> -> vector<96x128xf32>
    %70 = arith.addf %64, %69 : vector<96x128xf32>
    %c0_67 = arith.constant 0 : index
    %c24 = arith.constant 24 : index
    %c0_68 = arith.constant 0 : index
    %71 = vector.load %arg2[%c0_67, %c24, %c0_68] : memref<1x128x64xbf16, #tpu.memory_space<vmem>>, vector<1x96x64xbf16>
    %72 = vector.shape_cast %71 : vector<1x96x64xbf16> to vector<96x64xbf16>
    %c12 = arith.constant 12 : index
    %c0_69 = arith.constant 0 : index
    %c0_70 = arith.constant 0 : index
    %73 = vector.load %arg3[%c12, %c0_69, %c0_70] : memref<16x64x128xbf16, #tpu.memory_space<vmem>>, vector<1x64x128xbf16>
    %74 = vector.shape_cast %73 : vector<1x64x128xbf16> to vector<64x128xbf16>
    %cst_71 = arith.constant dense<0.000000e+00> : vector<96x128xf32>
    %75 = tpu.matmul %72, %74, %cst_71 {dimension_numbers = #tpu.dot_dimension_numbers<[1], [0], [0], [1], [0, 0, 1, 1], [], []>} : vector<96x64xbf16>, vector<64x128xbf16>, vector<96x128xf32> -> vector<96x128xf32>
    %76 = arith.addf %70, %75 : vector<96x128xf32>
    %c0_72 = arith.constant 0 : index
    %c25 = arith.constant 25 : index
    %c0_73 = arith.constant 0 : index
    %77 = vector.load %arg2[%c0_72, %c25, %c0_73] : memref<1x128x64xbf16, #tpu.memory_space<vmem>>, vector<1x96x64xbf16>
    %78 = vector.shape_cast %77 : vector<1x96x64xbf16> to vector<96x64xbf16>
    %c13 = arith.constant 13 : index
    %c0_74 = arith.constant 0 : index
    %c0_75 = arith.constant 0 : index
    %79 = vector.load %arg3[%c13, %c0_74, %c0_75] : memref<16x64x128xbf16, #tpu.memory_space<vmem>>, vector<1x64x128xbf16>
    %80 = vector.shape_cast %79 : vector<1x64x128xbf16> to vector<64x128xbf16>
    %cst_76 = arith.constant dense<0.000000e+00> : vector<96x128xf32>
    %81 = tpu.matmul %78, %80, %cst_76 {dimension_numbers = #tpu.dot_dimension_numbers<[1], [0], [0], [1], [0, 0, 1, 1], [], []>} : vector<96x64xbf16>, vector<64x128xbf16>, vector<96x128xf32> -> vector<96x128xf32>
    %82 = arith.addf %76, %81 : vector<96x128xf32>
    %c0_77 = arith.constant 0 : index
    %c26 = arith.constant 26 : index
    %c0_78 = arith.constant 0 : index
    %83 = vector.load %arg2[%c0_77, %c26, %c0_78] : memref<1x128x64xbf16, #tpu.memory_space<vmem>>, vector<1x96x64xbf16>
    %84 = vector.shape_cast %83 : vector<1x96x64xbf16> to vector<96x64xbf16>
    %c14 = arith.constant 14 : index
    %c0_79 = arith.constant 0 : index
    %c0_80 = arith.constant 0 : index
    %85 = vector.load %arg3[%c14, %c0_79, %c0_80] : memref<16x64x128xbf16, #tpu.memory_space<vmem>>, vector<1x64x128xbf16>
    %86 = vector.shape_cast %85 : vector<1x64x128xbf16> to vector<64x128xbf16>
    %cst_81 = arith.constant dense<0.000000e+00> : vector<96x128xf32>
    %87 = tpu.matmul %84, %86, %cst_81 {dimension_numbers = #tpu.dot_dimension_numbers<[1], [0], [0], [1], [0, 0, 1, 1], [], []>} : vector<96x64xbf16>, vector<64x128xbf16>, vector<96x128xf32> -> vector<96x128xf32>
    %88 = arith.addf %82, %87 : vector<96x128xf32>
    %c0_82 = arith.constant 0 : index
    %c27 = arith.constant 27 : index
    %c0_83 = arith.constant 0 : index
    %89 = vector.load %arg2[%c0_82, %c27, %c0_83] : memref<1x128x64xbf16, #tpu.memory_space<vmem>>, vector<1x96x64xbf16>
    %90 = vector.shape_cast %89 : vector<1x96x64xbf16> to vector<96x64xbf16>
    %c15 = arith.constant 15 : index
    %c0_84 = arith.constant 0 : index
    %c0_85 = arith.constant 0 : index
    %91 = vector.load %arg3[%c15, %c0_84, %c0_85] : memref<16x64x128xbf16, #tpu.memory_space<vmem>>, vector<1x64x128xbf16>
    %92 = vector.shape_cast %91 : vector<1x64x128xbf16> to vector<64x128xbf16>
    %cst_86 = arith.constant dense<0.000000e+00> : vector<96x128xf32>
    %93 = tpu.matmul %90, %92, %cst_86 {dimension_numbers = #tpu.dot_dimension_numbers<[1], [0], [0], [1], [0, 0, 1, 1], [], []>} : vector<96x64xbf16>, vector<64x128xbf16>, vector<96x128xf32> -> vector<96x128xf32>
    %94 = arith.addf %88, %93 : vector<96x128xf32>
    %95 = arith.truncf %94 : vector<96x128xf32> to vector<96x128xbf16>
    %c0_87 = arith.constant 0 : index
    %c0_88 = arith.constant 0 : index
    %96 = vector.load %arg4[%c0_87, %c0_88] : memref<96x128xbf16, #tpu.memory_space<vmem>>, vector<96x128xbf16>
    tpu.vector_store %arg4[%c0_87, %c0_88], %95 {strides = array<i32>} : memref<96x128xbf16, #tpu.memory_space<vmem>>, vector<96x128xbf16>,
    %c96_i32 = arith.constant 96 : i32
    %97 = arith.muli %arg1, %c96_i32 : i32
    %98 = tpu.iota {dimensions = array<i32: 0>} : vector<96x1xi32>
    %99 = vector.broadcast %97 : i32 to vector<96x1xi32>
    %100 = arith.addi %99, %98 : vector<96x1xi32>
    %101 = arith.sitofp %100 : vector<96x1xi32> to vector<96x1xf32>
    %cst_89 = arith.constant 5.000000e-01 : f32
    %102 = vector.broadcast %cst_89 : f32 to vector<96x1xf32>
    %103 = arith.addf %101, %102 : vector<96x1xf32>
    %cst_90 = arith.constant 0.020833334 : f32
    %104 = vector.broadcast %cst_90 : f32 to vector<96x1xf32>
    %105 = arith.mulf %103, %104 : vector<96x1xf32>
    %106 = math.floor %105 : vector<96x1xf32>
    %cst_91 = arith.constant 4.800000e+01 : f32
    %107 = vector.broadcast %cst_91 : f32 to vector<96x1xf32>
    %108 = arith.mulf %106, %107 : vector<96x1xf32>
    %109 = arith.subf %101, %108 : vector<96x1xf32>
    %cst_92 = arith.constant 5.000000e-01 : f32
    %110 = vector.broadcast %cst_92 : f32 to vector<96x1xf32>
    %111 = arith.addf %109, %110 : vector<96x1xf32>
    %cst_93 = arith.constant 1.250000e-01 : f32
    %112 = vector.broadcast %cst_93 : f32 to vector<96x1xf32>
    %113 = arith.mulf %111, %112 : vector<96x1xf32>
    %114 = math.floor %113 : vector<96x1xf32>
    %cst_94 = arith.constant 8.000000e+00 : f32
    %115 = vector.broadcast %cst_94 : f32 to vector<96x1xf32>
    %116 = arith.mulf %114, %115 : vector<96x1xf32>
    %117 = arith.subf %109, %116 : vector<96x1xf32>
    %cst_95 = arith.constant 9.600000e+01 : f32
    %118 = vector.broadcast %cst_95 : f32 to vector<96x1xf32>
    %119 = arith.cmpf olt, %101, %118 : vector<96x1xf32>
    %cst_96 = arith.constant 3.000000e+00 : f32
    %120 = vector.broadcast %cst_96 : f32 to vector<96x1xf32>
    %121 = arith.cmpf olt, %114, %120 : vector<96x1xf32>
    %122 = arith.andi %119, %121 : vector<96x1xi1>
    %cst_97 = arith.constant 5.000000e+00 : f32
    %123 = vector.broadcast %cst_97 : f32 to vector<96x1xf32>
    %124 = arith.cmpf olt, %117, %123 : vector<96x1xf32>
    %125 = arith.andi %122, %124 : vector<96x1xi1>
    %126 = arith.extui %125 : vector<96x1xi1> to vector<96x1xi32>
    %127 = arith.sitofp %126 : vector<96x1xi32> to vector<96x1xf32>
    %128 = vector.broadcast %127 : vector<96x1xf32> to vector<96x128xf32>
    %129 = arith.mulf %94, %128 : vector<96x128xf32>
    %cst_98 = arith.constant dense<0.000000e+00> : vector<128xf32>
    %130 = vector.multi_reduction <add>, %129, %cst_98 [0] : vector<96x128xf32> to vector<128xf32>
    %131 = vector.shape_cast %130 : vector<128xf32> to vector<1x128xf32>
    %132 = vector.shape_cast %131 : vector<1x128xf32> to vector<1x1x128xf32>
    %c0_99 = arith.constant 0 : index
    %c0_100 = arith.constant 0 : index
    %c0_101 = arith.constant 0 : index
    %133 = vector.load %arg5[%c0_99, %c0_100, %c0_101] : memref<1x1x128xf32, #tpu.memory_space<vmem>>, vector<1x1x128xf32>
    tpu.vector_store %arg5[%c0_99, %c0_100, %c0_101], %132 {strides = array<i32>} : memref<1x1x128xf32, #tpu.memory_space<vmem>>, vector<1x1x128xf32>,
    %134 = arith.mulf %129, %94 : vector<96x128xf32>
    %cst_102 = arith.constant dense<0.000000e+00> : vector<128xf32>
    %135 = vector.multi_reduction <add>, %134, %cst_102 [0] : vector<96x128xf32> to vector<128xf32>
    %136 = vector.shape_cast %135 : vector<128xf32> to vector<1x128xf32>
    %137 = vector.shape_cast %136 : vector<1x128xf32> to vector<1x1x128xf32>
    %c0_103 = arith.constant 0 : index
    %c0_104 = arith.constant 0 : index
    %c0_105 = arith.constant 0 : index
    %138 = vector.load %arg6[%c0_103, %c0_104, %c0_105] : memref<1x1x128xf32, #tpu.memory_space<vmem>>, vector<1x1x128xf32>
    tpu.vector_store %arg6[%c0_103, %c0_104, %c0_105], %137 {strides = array<i32>} : memref<1x1x128xf32, #tpu.memory_space<vmem>>, vector<1x1x128xf32>,
    return
  }
  func.func @transform_0(%arg0: i32, %arg1: i32) -> (i32, i32, i32) {
    %c0_i32 = arith.constant 0 : i32
    %c0_i32_0 = arith.constant 0 : i32
    %c0_i32_1 = arith.constant 0 : i32
    return %arg1, %c0_i32, %c0_i32_0 : i32, i32, i32
  }
  func.func @transform_1(%arg0: i32, %arg1: i32) -> (i32, i32, i32) {
    %c0_i32 = arith.constant 0 : i32
    %c0_i32_0 = arith.constant 0 : i32
    %c0_i32_1 = arith.constant 0 : i32
    return %c0_i32, %c0_i32_0, %arg0 : i32, i32, i32
  }
  func.func @transform_2(%arg0: i32, %arg1: i32) -> (i32, i32) {
    %c0_i32 = arith.constant 0 : i32
    return %arg1, %arg0 : i32, i32
  }
  func.func @transform_3(%arg0: i32, %arg1: i32) -> (i32, i32, i32) {
    %c0_i32 = arith.constant 0 : i32
    %c0_i32_0 = arith.constant 0 : i32
    return %arg1, %c0_i32, %arg0 : i32, i32, i32
  }
  func.func @transform_4(%arg0: i32, %arg1: i32) -> (i32, i32, i32) {
    %c0_i32 = arith.constant 0 : i32
    %c0_i32_0 = arith.constant 0 : i32
    return %arg1, %c0_i32, %arg0 : i32, i32, i32
  }
}

module attributes {stable_mosaic.version = 11 : i64} {
  func.func @_conv_kernel(%arg0: i32, %arg1: i32, %arg2: memref<1x128x128xbf16, #tpu.memory_space<vmem>>, %arg3: memref<16x128x128xbf16, #tpu.memory_space<vmem>>, %arg4: memref<1x128xf32, #tpu.memory_space<vmem>>, %arg5: memref<104x128xf32, #tpu.memory_space<vmem>>) attributes {dimension_semantics = [#tpu.dimension_semantics<parallel>, #tpu.dimension_semantics<parallel>], iteration_bounds = array<i64: 1, 1>, scalar_prefetch = 0 : i64, scratch_operands = 0 : i64, tpu.core_type = #tpu.core_type<tc>, window_params = [{transform_indices = @transform_0, window_bounds = array<i64: 1, 128, 128>}, {transform_indices = @transform_1, window_bounds = array<i64: 16, 128, 128>}, {transform_indices = @transform_2, window_bounds = array<i64: 1, 128>}, {transform_indices = @transform_3, window_bounds = array<i64: 104, 128>}]} {
    %c0 = arith.constant 0 : index
    %c0_0 = arith.constant 0 : index
    %c0_1 = arith.constant 0 : index
    %0 = vector.load %arg2[%c0, %c0_0, %c0_1] : memref<1x128x128xbf16, #tpu.memory_space<vmem>>, vector<1x104x128xbf16>
    %1 = vector.shape_cast %0 : vector<1x104x128xbf16> to vector<104x128xbf16>
    %c0_2 = arith.constant 0 : index
    %c0_3 = arith.constant 0 : index
    %c0_4 = arith.constant 0 : index
    %2 = vector.load %arg3[%c0_2, %c0_3, %c0_4] : memref<16x128x128xbf16, #tpu.memory_space<vmem>>, vector<1x128x128xbf16>
    %3 = vector.shape_cast %2 : vector<1x128x128xbf16> to vector<128x128xbf16>
    %cst = arith.constant dense<0.000000e+00> : vector<104x128xf32>
    %4 = tpu.matmul %1, %3, %cst {dimension_numbers = #tpu.dot_dimension_numbers<[1], [0], [0], [1], [0, 0, 1, 1], [], []>} : vector<104x128xbf16>, vector<128x128xbf16>, vector<104x128xf32> -> vector<104x128xf32>
    %c0_5 = arith.constant 0 : index
    %c1 = arith.constant 1 : index
    %c0_6 = arith.constant 0 : index
    %5 = vector.load %arg2[%c0_5, %c1, %c0_6] : memref<1x128x128xbf16, #tpu.memory_space<vmem>>, vector<1x104x128xbf16>
    %6 = vector.shape_cast %5 : vector<1x104x128xbf16> to vector<104x128xbf16>
    %c1_7 = arith.constant 1 : index
    %c0_8 = arith.constant 0 : index
    %c0_9 = arith.constant 0 : index
    %7 = vector.load %arg3[%c1_7, %c0_8, %c0_9] : memref<16x128x128xbf16, #tpu.memory_space<vmem>>, vector<1x128x128xbf16>
    %8 = vector.shape_cast %7 : vector<1x128x128xbf16> to vector<128x128xbf16>
    %cst_10 = arith.constant dense<0.000000e+00> : vector<104x128xf32>
    %9 = tpu.matmul %6, %8, %cst_10 {dimension_numbers = #tpu.dot_dimension_numbers<[1], [0], [0], [1], [0, 0, 1, 1], [], []>} : vector<104x128xbf16>, vector<128x128xbf16>, vector<104x128xf32> -> vector<104x128xf32>
    %10 = arith.addf %4, %9 : vector<104x128xf32>
    %c0_11 = arith.constant 0 : index
    %c2 = arith.constant 2 : index
    %c0_12 = arith.constant 0 : index
    %11 = vector.load %arg2[%c0_11, %c2, %c0_12] : memref<1x128x128xbf16, #tpu.memory_space<vmem>>, vector<1x104x128xbf16>
    %12 = vector.shape_cast %11 : vector<1x104x128xbf16> to vector<104x128xbf16>
    %c2_13 = arith.constant 2 : index
    %c0_14 = arith.constant 0 : index
    %c0_15 = arith.constant 0 : index
    %13 = vector.load %arg3[%c2_13, %c0_14, %c0_15] : memref<16x128x128xbf16, #tpu.memory_space<vmem>>, vector<1x128x128xbf16>
    %14 = vector.shape_cast %13 : vector<1x128x128xbf16> to vector<128x128xbf16>
    %cst_16 = arith.constant dense<0.000000e+00> : vector<104x128xf32>
    %15 = tpu.matmul %12, %14, %cst_16 {dimension_numbers = #tpu.dot_dimension_numbers<[1], [0], [0], [1], [0, 0, 1, 1], [], []>} : vector<104x128xbf16>, vector<128x128xbf16>, vector<104x128xf32> -> vector<104x128xf32>
    %16 = arith.addf %10, %15 : vector<104x128xf32>
    %c0_17 = arith.constant 0 : index
    %c3 = arith.constant 3 : index
    %c0_18 = arith.constant 0 : index
    %17 = vector.load %arg2[%c0_17, %c3, %c0_18] : memref<1x128x128xbf16, #tpu.memory_space<vmem>>, vector<1x104x128xbf16>
    %18 = vector.shape_cast %17 : vector<1x104x128xbf16> to vector<104x128xbf16>
    %c3_19 = arith.constant 3 : index
    %c0_20 = arith.constant 0 : index
    %c0_21 = arith.constant 0 : index
    %19 = vector.load %arg3[%c3_19, %c0_20, %c0_21] : memref<16x128x128xbf16, #tpu.memory_space<vmem>>, vector<1x128x128xbf16>
    %20 = vector.shape_cast %19 : vector<1x128x128xbf16> to vector<128x128xbf16>
    %cst_22 = arith.constant dense<0.000000e+00> : vector<104x128xf32>
    %21 = tpu.matmul %18, %20, %cst_22 {dimension_numbers = #tpu.dot_dimension_numbers<[1], [0], [0], [1], [0, 0, 1, 1], [], []>} : vector<104x128xbf16>, vector<128x128xbf16>, vector<104x128xf32> -> vector<104x128xf32>
    %22 = arith.addf %16, %21 : vector<104x128xf32>
    %c0_23 = arith.constant 0 : index
    %c7 = arith.constant 7 : index
    %c0_24 = arith.constant 0 : index
    %23 = vector.load %arg2[%c0_23, %c7, %c0_24] : memref<1x128x128xbf16, #tpu.memory_space<vmem>>, vector<1x104x128xbf16>
    %24 = vector.shape_cast %23 : vector<1x104x128xbf16> to vector<104x128xbf16>
    %c4 = arith.constant 4 : index
    %c0_25 = arith.constant 0 : index
    %c0_26 = arith.constant 0 : index
    %25 = vector.load %arg3[%c4, %c0_25, %c0_26] : memref<16x128x128xbf16, #tpu.memory_space<vmem>>, vector<1x128x128xbf16>
    %26 = vector.shape_cast %25 : vector<1x128x128xbf16> to vector<128x128xbf16>
    %cst_27 = arith.constant dense<0.000000e+00> : vector<104x128xf32>
    %27 = tpu.matmul %24, %26, %cst_27 {dimension_numbers = #tpu.dot_dimension_numbers<[1], [0], [0], [1], [0, 0, 1, 1], [], []>} : vector<104x128xbf16>, vector<128x128xbf16>, vector<104x128xf32> -> vector<104x128xf32>
    %28 = arith.addf %22, %27 : vector<104x128xf32>
    %c0_28 = arith.constant 0 : index
    %c8 = arith.constant 8 : index
    %c0_29 = arith.constant 0 : index
    %29 = vector.load %arg2[%c0_28, %c8, %c0_29] : memref<1x128x128xbf16, #tpu.memory_space<vmem>>, vector<1x104x128xbf16>
    %30 = vector.shape_cast %29 : vector<1x104x128xbf16> to vector<104x128xbf16>
    %c5 = arith.constant 5 : index
    %c0_30 = arith.constant 0 : index
    %c0_31 = arith.constant 0 : index
    %31 = vector.load %arg3[%c5, %c0_30, %c0_31] : memref<16x128x128xbf16, #tpu.memory_space<vmem>>, vector<1x128x128xbf16>
    %32 = vector.shape_cast %31 : vector<1x128x128xbf16> to vector<128x128xbf16>
    %cst_32 = arith.constant dense<0.000000e+00> : vector<104x128xf32>
    %33 = tpu.matmul %30, %32, %cst_32 {dimension_numbers = #tpu.dot_dimension_numbers<[1], [0], [0], [1], [0, 0, 1, 1], [], []>} : vector<104x128xbf16>, vector<128x128xbf16>, vector<104x128xf32> -> vector<104x128xf32>
    %34 = arith.addf %28, %33 : vector<104x128xf32>
    %c0_33 = arith.constant 0 : index
    %c9 = arith.constant 9 : index
    %c0_34 = arith.constant 0 : index
    %35 = vector.load %arg2[%c0_33, %c9, %c0_34] : memref<1x128x128xbf16, #tpu.memory_space<vmem>>, vector<1x104x128xbf16>
    %36 = vector.shape_cast %35 : vector<1x104x128xbf16> to vector<104x128xbf16>
    %c6 = arith.constant 6 : index
    %c0_35 = arith.constant 0 : index
    %c0_36 = arith.constant 0 : index
    %37 = vector.load %arg3[%c6, %c0_35, %c0_36] : memref<16x128x128xbf16, #tpu.memory_space<vmem>>, vector<1x128x128xbf16>
    %38 = vector.shape_cast %37 : vector<1x128x128xbf16> to vector<128x128xbf16>
    %cst_37 = arith.constant dense<0.000000e+00> : vector<104x128xf32>
    %39 = tpu.matmul %36, %38, %cst_37 {dimension_numbers = #tpu.dot_dimension_numbers<[1], [0], [0], [1], [0, 0, 1, 1], [], []>} : vector<104x128xbf16>, vector<128x128xbf16>, vector<104x128xf32> -> vector<104x128xf32>
    %40 = arith.addf %34, %39 : vector<104x128xf32>
    %c0_38 = arith.constant 0 : index
    %c10 = arith.constant 10 : index
    %c0_39 = arith.constant 0 : index
    %41 = vector.load %arg2[%c0_38, %c10, %c0_39] : memref<1x128x128xbf16, #tpu.memory_space<vmem>>, vector<1x104x128xbf16>
    %42 = vector.shape_cast %41 : vector<1x104x128xbf16> to vector<104x128xbf16>
    %c7_40 = arith.constant 7 : index
    %c0_41 = arith.constant 0 : index
    %c0_42 = arith.constant 0 : index
    %43 = vector.load %arg3[%c7_40, %c0_41, %c0_42] : memref<16x128x128xbf16, #tpu.memory_space<vmem>>, vector<1x128x128xbf16>
    %44 = vector.shape_cast %43 : vector<1x128x128xbf16> to vector<128x128xbf16>
    %cst_43 = arith.constant dense<0.000000e+00> : vector<104x128xf32>
    %45 = tpu.matmul %42, %44, %cst_43 {dimension_numbers = #tpu.dot_dimension_numbers<[1], [0], [0], [1], [0, 0, 1, 1], [], []>} : vector<104x128xbf16>, vector<128x128xbf16>, vector<104x128xf32> -> vector<104x128xf32>
    %46 = arith.addf %40, %45 : vector<104x128xf32>
    %c0_44 = arith.constant 0 : index
    %c14 = arith.constant 14 : index
    %c0_45 = arith.constant 0 : index
    %47 = vector.load %arg2[%c0_44, %c14, %c0_45] : memref<1x128x128xbf16, #tpu.memory_space<vmem>>, vector<1x104x128xbf16>
    %48 = vector.shape_cast %47 : vector<1x104x128xbf16> to vector<104x128xbf16>
    %c8_46 = arith.constant 8 : index
    %c0_47 = arith.constant 0 : index
    %c0_48 = arith.constant 0 : index
    %49 = vector.load %arg3[%c8_46, %c0_47, %c0_48] : memref<16x128x128xbf16, #tpu.memory_space<vmem>>, vector<1x128x128xbf16>
    %50 = vector.shape_cast %49 : vector<1x128x128xbf16> to vector<128x128xbf16>
    %cst_49 = arith.constant dense<0.000000e+00> : vector<104x128xf32>
    %51 = tpu.matmul %48, %50, %cst_49 {dimension_numbers = #tpu.dot_dimension_numbers<[1], [0], [0], [1], [0, 0, 1, 1], [], []>} : vector<104x128xbf16>, vector<128x128xbf16>, vector<104x128xf32> -> vector<104x128xf32>
    %52 = arith.addf %46, %51 : vector<104x128xf32>
    %c0_50 = arith.constant 0 : index
    %c15 = arith.constant 15 : index
    %c0_51 = arith.constant 0 : index
    %53 = vector.load %arg2[%c0_50, %c15, %c0_51] : memref<1x128x128xbf16, #tpu.memory_space<vmem>>, vector<1x104x128xbf16>
    %54 = vector.shape_cast %53 : vector<1x104x128xbf16> to vector<104x128xbf16>
    %c9_52 = arith.constant 9 : index
    %c0_53 = arith.constant 0 : index
    %c0_54 = arith.constant 0 : index
    %55 = vector.load %arg3[%c9_52, %c0_53, %c0_54] : memref<16x128x128xbf16, #tpu.memory_space<vmem>>, vector<1x128x128xbf16>
    %56 = vector.shape_cast %55 : vector<1x128x128xbf16> to vector<128x128xbf16>
    %cst_55 = arith.constant dense<0.000000e+00> : vector<104x128xf32>
    %57 = tpu.matmul %54, %56, %cst_55 {dimension_numbers = #tpu.dot_dimension_numbers<[1], [0], [0], [1], [0, 0, 1, 1], [], []>} : vector<104x128xbf16>, vector<128x128xbf16>, vector<104x128xf32> -> vector<104x128xf32>
    %58 = arith.addf %52, %57 : vector<104x128xf32>
    %c0_56 = arith.constant 0 : index
    %c16 = arith.constant 16 : index
    %c0_57 = arith.constant 0 : index
    %59 = vector.load %arg2[%c0_56, %c16, %c0_57] : memref<1x128x128xbf16, #tpu.memory_space<vmem>>, vector<1x104x128xbf16>
    %60 = vector.shape_cast %59 : vector<1x104x128xbf16> to vector<104x128xbf16>
    %c10_58 = arith.constant 10 : index
    %c0_59 = arith.constant 0 : index
    %c0_60 = arith.constant 0 : index
    %61 = vector.load %arg3[%c10_58, %c0_59, %c0_60] : memref<16x128x128xbf16, #tpu.memory_space<vmem>>, vector<1x128x128xbf16>
    %62 = vector.shape_cast %61 : vector<1x128x128xbf16> to vector<128x128xbf16>
    %cst_61 = arith.constant dense<0.000000e+00> : vector<104x128xf32>
    %63 = tpu.matmul %60, %62, %cst_61 {dimension_numbers = #tpu.dot_dimension_numbers<[1], [0], [0], [1], [0, 0, 1, 1], [], []>} : vector<104x128xbf16>, vector<128x128xbf16>, vector<104x128xf32> -> vector<104x128xf32>
    %64 = arith.addf %58, %63 : vector<104x128xf32>
    %c0_62 = arith.constant 0 : index
    %c17 = arith.constant 17 : index
    %c0_63 = arith.constant 0 : index
    %65 = vector.load %arg2[%c0_62, %c17, %c0_63] : memref<1x128x128xbf16, #tpu.memory_space<vmem>>, vector<1x104x128xbf16>
    %66 = vector.shape_cast %65 : vector<1x104x128xbf16> to vector<104x128xbf16>
    %c11 = arith.constant 11 : index
    %c0_64 = arith.constant 0 : index
    %c0_65 = arith.constant 0 : index
    %67 = vector.load %arg3[%c11, %c0_64, %c0_65] : memref<16x128x128xbf16, #tpu.memory_space<vmem>>, vector<1x128x128xbf16>
    %68 = vector.shape_cast %67 : vector<1x128x128xbf16> to vector<128x128xbf16>
    %cst_66 = arith.constant dense<0.000000e+00> : vector<104x128xf32>
    %69 = tpu.matmul %66, %68, %cst_66 {dimension_numbers = #tpu.dot_dimension_numbers<[1], [0], [0], [1], [0, 0, 1, 1], [], []>} : vector<104x128xbf16>, vector<128x128xbf16>, vector<104x128xf32> -> vector<104x128xf32>
    %70 = arith.addf %64, %69 : vector<104x128xf32>
    %c0_67 = arith.constant 0 : index
    %c21 = arith.constant 21 : index
    %c0_68 = arith.constant 0 : index
    %71 = vector.load %arg2[%c0_67, %c21, %c0_68] : memref<1x128x128xbf16, #tpu.memory_space<vmem>>, vector<1x104x128xbf16>
    %72 = vector.shape_cast %71 : vector<1x104x128xbf16> to vector<104x128xbf16>
    %c12 = arith.constant 12 : index
    %c0_69 = arith.constant 0 : index
    %c0_70 = arith.constant 0 : index
    %73 = vector.load %arg3[%c12, %c0_69, %c0_70] : memref<16x128x128xbf16, #tpu.memory_space<vmem>>, vector<1x128x128xbf16>
    %74 = vector.shape_cast %73 : vector<1x128x128xbf16> to vector<128x128xbf16>
    %cst_71 = arith.constant dense<0.000000e+00> : vector<104x128xf32>
    %75 = tpu.matmul %72, %74, %cst_71 {dimension_numbers = #tpu.dot_dimension_numbers<[1], [0], [0], [1], [0, 0, 1, 1], [], []>} : vector<104x128xbf16>, vector<128x128xbf16>, vector<104x128xf32> -> vector<104x128xf32>
    %76 = arith.addf %70, %75 : vector<104x128xf32>
    %c0_72 = arith.constant 0 : index
    %c22 = arith.constant 22 : index
    %c0_73 = arith.constant 0 : index
    %77 = vector.load %arg2[%c0_72, %c22, %c0_73] : memref<1x128x128xbf16, #tpu.memory_space<vmem>>, vector<1x104x128xbf16>
    %78 = vector.shape_cast %77 : vector<1x104x128xbf16> to vector<104x128xbf16>
    %c13 = arith.constant 13 : index
    %c0_74 = arith.constant 0 : index
    %c0_75 = arith.constant 0 : index
    %79 = vector.load %arg3[%c13, %c0_74, %c0_75] : memref<16x128x128xbf16, #tpu.memory_space<vmem>>, vector<1x128x128xbf16>
    %80 = vector.shape_cast %79 : vector<1x128x128xbf16> to vector<128x128xbf16>
    %cst_76 = arith.constant dense<0.000000e+00> : vector<104x128xf32>
    %81 = tpu.matmul %78, %80, %cst_76 {dimension_numbers = #tpu.dot_dimension_numbers<[1], [0], [0], [1], [0, 0, 1, 1], [], []>} : vector<104x128xbf16>, vector<128x128xbf16>, vector<104x128xf32> -> vector<104x128xf32>
    %82 = arith.addf %76, %81 : vector<104x128xf32>
    %c0_77 = arith.constant 0 : index
    %c23 = arith.constant 23 : index
    %c0_78 = arith.constant 0 : index
    %83 = vector.load %arg2[%c0_77, %c23, %c0_78] : memref<1x128x128xbf16, #tpu.memory_space<vmem>>, vector<1x104x128xbf16>
    %84 = vector.shape_cast %83 : vector<1x104x128xbf16> to vector<104x128xbf16>
    %c14_79 = arith.constant 14 : index
    %c0_80 = arith.constant 0 : index
    %c0_81 = arith.constant 0 : index
    %85 = vector.load %arg3[%c14_79, %c0_80, %c0_81] : memref<16x128x128xbf16, #tpu.memory_space<vmem>>, vector<1x128x128xbf16>
    %86 = vector.shape_cast %85 : vector<1x128x128xbf16> to vector<128x128xbf16>
    %cst_82 = arith.constant dense<0.000000e+00> : vector<104x128xf32>
    %87 = tpu.matmul %84, %86, %cst_82 {dimension_numbers = #tpu.dot_dimension_numbers<[1], [0], [0], [1], [0, 0, 1, 1], [], []>} : vector<104x128xbf16>, vector<128x128xbf16>, vector<104x128xf32> -> vector<104x128xf32>
    %88 = arith.addf %82, %87 : vector<104x128xf32>
    %c0_83 = arith.constant 0 : index
    %c24 = arith.constant 24 : index
    %c0_84 = arith.constant 0 : index
    %89 = vector.load %arg2[%c0_83, %c24, %c0_84] : memref<1x128x128xbf16, #tpu.memory_space<vmem>>, vector<1x104x128xbf16>
    %90 = vector.shape_cast %89 : vector<1x104x128xbf16> to vector<104x128xbf16>
    %c15_85 = arith.constant 15 : index
    %c0_86 = arith.constant 0 : index
    %c0_87 = arith.constant 0 : index
    %91 = vector.load %arg3[%c15_85, %c0_86, %c0_87] : memref<16x128x128xbf16, #tpu.memory_space<vmem>>, vector<1x128x128xbf16>
    %92 = vector.shape_cast %91 : vector<1x128x128xbf16> to vector<128x128xbf16>
    %cst_88 = arith.constant dense<0.000000e+00> : vector<104x128xf32>
    %93 = tpu.matmul %90, %92, %cst_88 {dimension_numbers = #tpu.dot_dimension_numbers<[1], [0], [0], [1], [0, 0, 1, 1], [], []>} : vector<104x128xbf16>, vector<128x128xbf16>, vector<104x128xf32> -> vector<104x128xf32>
    %94 = arith.addf %88, %93 : vector<104x128xf32>
    %c0_89 = arith.constant 0 : index
    %c0_90 = arith.constant 0 : index
    %95 = vector.load %arg4[%c0_89, %c0_90] : memref<1x128xf32, #tpu.memory_space<vmem>>, vector<1x128xf32>
    %96 = vector.broadcast %95 : vector<1x128xf32> to vector<104x128xf32>
    %97 = arith.addf %94, %96 : vector<104x128xf32>
    %c0_91 = arith.constant 0 : index
    %c0_92 = arith.constant 0 : index
    %98 = vector.load %arg5[%c0_91, %c0_92] : memref<104x128xf32, #tpu.memory_space<vmem>>, vector<104x128xf32>
    tpu.vector_store %arg5[%c0_91, %c0_92], %97 {strides = array<i32>} : memref<104x128xf32, #tpu.memory_space<vmem>>, vector<104x128xf32>,
    return
  }
  func.func @transform_0(%arg0: i32, %arg1: i32) -> (i32, i32, i32) {
    %c0_i32 = arith.constant 0 : i32
    %c0_i32_0 = arith.constant 0 : i32
    %c0_i32_1 = arith.constant 0 : i32
    return %arg1, %c0_i32, %c0_i32_0 : i32, i32, i32
  }
  func.func @transform_1(%arg0: i32, %arg1: i32) -> (i32, i32, i32) {
    %c0_i32 = arith.constant 0 : i32
    %c0_i32_0 = arith.constant 0 : i32
    %c0_i32_1 = arith.constant 0 : i32
    return %c0_i32, %c0_i32_0, %arg0 : i32, i32, i32
  }
  func.func @transform_2(%arg0: i32, %arg1: i32) -> (i32, i32) {
    %c0_i32 = arith.constant 0 : i32
    %c0_i32_0 = arith.constant 0 : i32
    return %c0_i32, %arg0 : i32, i32
  }
  func.func @transform_3(%arg0: i32, %arg1: i32) -> (i32, i32) {
    %c0_i32 = arith.constant 0 : i32
    return %arg1, %arg0 : i32, i32
  }
}

</mosaic_0001>

<bundles_post_ra>
// kernel: discriminator_forward.5
= control target key start
LH: loop header
LB: loop body
LE: loop exit
PB: predicated region body
PF: predicated region fallthrough
CT: control target
= control target key end

     0   :  { %s4914_s12 = smov 0   ;;  %s4916_s13 = smov 0   ;;  %s5668_s0 = inlined_call_operand.vmem [shape: bf16[2,536,16], index: 0, kind: input, shape index: {}]   ;;  %s5669_s1 = inlined_call_operand.vmem [shape: bf16[4,16,128], index: 1, kind: input, shape index: {}]   ;;  %s5670_s2 = inlined_call_operand.vmem [shape: f32[1,128], index: 2, kind: input, shape index: {}]   ;;  %s5671_s3 = inlined_call_operand.vmem [shape: bf16[1024,128], index: 3, kind: output, shape index: {}]  }
   0x1   :  { %s4918_s14 = smov 0  }
   0x2 LB: > { %s22_s15 = sadd.s32 1, %s4888_s13  ;;  %p3634_p0 = scmp.ge.s32.totalorder %s4892_s14, 1  ;;  %s4892_s14 = sphi %s4918_s14, %s13_s14   ;;  %s4888_s13 = sphi %s4916_s13, %s5684_s13   ;;  %s4884_s12 = sphi %s4914_s12, %s5683_s12  }
   0x3   : > { %p23_p1 = scmp.ge.s32.totalorder %s22_s15, 2  ;;  %p168_p2 = scmp.lt.s32.totalorder %s4892_s14, 3 }
   0x5   : > { %s5686_s15 = smov (%p23_p1, %s22_s15), 0  ;;  %p169_p3 = pnand %p3634_p0, %p168_p2 }
   0x7   : > { %172 = sbr.rel (%p169_p3) target bundleno = 506 (0x1fa), region = 32 }
   0xe   : > { %v4778_v0 = vld [vmem:[%s5669_s1 + $0x8] sm:$0xff]   ;;  %p202_p4 = scmp.lt.s32.totalorder %s4884_s12, 1  ;;  %v4779_v1 = vld [vmem:[%s5669_s1 + $0x10] sm:$0xff]   ;;  %v4782_v2 = vld [vmem:[%s5669_s1] sm:$0xff]   ;;  %vm457_vm0 = vsmask.f32 7424 }
   0xf   : > { %4297 = vmatprep.subr.bf16.mxu1 %v4778_v0  ;;  %4429 = vmatprep.subr.bf16.mxu0 %v4779_v1  ;;  %v4948_v3 = vld [vmem:[%s5669_s1 + $0x18] sm:$0xff]   ;;  %vm724_vm1 = vcmask 130048   ;;  %vm2422_vm2 = vcmask 1046528   ;;  %s3636_s29 = sshll.u32 %s4884_s12, 6 }
  0x10   : > { %s203_s20 = scalar_select %p202_p4, %s4884_s12, 1  ;;  %4298 = vmatpush3.bf16.msra.mxu1 %v4778_v0  ;;  %4430 = vmatpush3.bf16.msra.mxu0 %v4779_v1 }
  0x11   : > { %4363 = vmatprep.subr.bf16.mxu1 %v4782_v2  ;;  %4495 = vmatprep.subr.bf16.mxu0 %v4948_v3  ;;  %p215_p5 = scmp.lt.s32.totalorder %s3636_s29, 127 }
  0x12   : > { %s4753_s23 = smul.u32 268, %s203_s20 }
  0x13   : > { %s5688_s29 = smov (!%p215_p5, %s3636_s29), 127 }
  0x14   : > { %s4953_s28 = scalar_lea.vmem %s5668_s0, %s4753_s23  ;;  %s3637_s5 = sshll.u32 %s5688_s29, 2 }
  0x15   : > { %v4780_v4 = vld [vmem:[%s4953_s28] sm:$0xff]   ;;  %v4781_v5 = vld [vmem:[%s4953_s28 + $0x8] sm:$0xff]   ;;  %v4784_v13 = vld [vmem:[%s4953_s28 + $0x10] sm:$0xff]   ;;  %s5565_s8 = scalar_lea.vmem %s5671_s3, %s3637_s5 }
  0x16   : > { %v1469_v6 = vld [vmem:[%s4953_s28 + $0x8] sm:$0xf]  ;;  %v1470_v7 = vld [vmem:[%s4953_s28 + $0xc] sm:$0xf]  ;;  %v459_v8 = vshrl.u32 %v4780_v4, 16  ;;  %v461_v9 = vshll.u32 %v4780_v4, 16 }
  0x17   : > { %v466_v10 = vshll.u32 %v4781_v5, 16  ;;  %v470_v11 = vshrl.u32 %v4781_v5, 16  ;;  %v3741_v12 = vcombine.low %v1469_v6, %v1470_v7  ;;  %v4786_v16 = vld [vmem:[%s4953_s28 + $0x10] sm:$0xff]   ;;  %v4787_v17 = vld [vmem:[%s4953_s28 + $0x18] sm:$0xff]   ;;  %v1708_v20 = vshll.u32 %v4784_v13, 16  ;;  %v4789_v33 = vld [vmem:[%s4953_s28 + $0x20] sm:$0xff]  }
  0x18   : > { %v463_v14 = vrot.slane %v461_v9, 1  ;;  %v1712_v21 = vshrl.u32 %v4784_v13, 16  ;;  %v474_v24 = vshll.u32 %v4786_v16, 16  ;;  %v1716_v25 = vshll.u32 %v4787_v17, 16  ;;  %v4788_v28 = vld [vmem:[%s4953_s28 + $0x18] sm:$0xff]   ;;  %v4790_v38 = vld [vmem:[%s4953_s28 + $0x20] sm:$0xff]  }
  0x19   : > { %v468_v15 = vrot.slane %v466_v10, 1  ;;  %v1701_v18 = vshrl.u32 %v3741_v12, 16  ;;  %v1703_v19 = vshll.u32 %v3741_v12, 16  ;;  %v1710_v27 = vrot.slane %v1708_v20, 1  ;;  %v4791_v43 = vld [vmem:[%s4953_s28 + $0x28] sm:$0xff]   ;;  %v4793_v53 = vld [vmem:[%s4953_s28 + $0x30] sm:$0xff]  }
  0x1a   : > { %v464_v22 = vor.u32 %v463_v14, %v459_v8  ;;  %v478_v29 = vshrl.u32 %v4786_v16, 16  ;;  %v476_v31 = vrot.slane %v474_v24, 1  ;;  %v1718_v32 = vrot.slane %v1716_v25, 1  ;;  %v4792_v52 = vld [vmem:[%s4953_s28 + $0x28] sm:$0xff]   ;;  %v4794_v0 = vld [vmem:[%s4953_s28 + $0x30] sm:$0xff]   ;;  %v4795_v5 = vld [vmem:[%s4953_s28 + $0x38] sm:$0xff]  }
  0x1b   : > { %v472_v23 = vor.u32 %v470_v11, %v468_v15  ;;  %v1705_v26 = vrot.slane %v1703_v19, 1  ;;  %v1720_v34 = vshrl.u32 %v4787_v17, 16  ;;  %v1714_v36 = vor.u32 %v1712_v21, %v1710_v27  ;;  %v4796_v12 = vld [vmem:[%s4953_s28 + $0x38] sm:$0xff]   ;;  %v4797_v14 = vld [vmem:[%s4953_s28 + $0x40] sm:$0xff]  }
  0x1c   : > { %v469_v30 = vsel %vm457_vm0, %v464_v22, %v468_v15  ;;  %v482_v37 = vshll.u32 %v4788_v28, 16  ;;  %v480_v40 = vor.u32 %v478_v29, %v476_v31  ;;  %v1724_v42 = vshll.u32 %v4789_v33, 16  ;;  %v4799_v22 = vld [vmem:[%s4953_s28 + $0x48] sm:$0xff]  }
  0x1d   : > { %4299 = vmatprep.mubr.msk.bf16.mxu1 %vm724_vm1, %v469_v30  ;;  %v1706_v35 = vor.u32 %v1705_v26, %v1701_v18  ;;  %v477_v39 = vsel %vm457_vm0, %v472_v23, %v476_v31  ;;  %v1722_v41 = vor.u32 %v1720_v34, %v1718_v32  ;;  %v1719_v45 = vsel %vm457_vm0, %v1714_v36, %v1718_v32  ;;  %v4798_v18 = vld [vmem:[%s4953_s28 + $0x40] sm:$0xff]   ;;  %v4800_v31 = vld [vmem:[%s4953_s28 + $0x48] sm:$0xff]   ;;  %v4801_v32 = vld [vmem:[%s4953_s28 + $0x50] sm:$0xff]  }
  0x1e   : > { %4300 = vmatmul.mubr.msk.bf16.vlgmr.msra.gmra.mrb[0].mxu1 %vm724_vm1, %v477_v39  ;;  %v484_v46 = vrot.slane %v482_v37, 1  ;;  %v486_v47 = vshrl.u32 %v4788_v28, 16  ;;  %v1726_v48 = vrot.slane %v1724_v42, 1  ;;  %v490_v49 = vshll.u32 %v4790_v38, 16  ;;  %v4802_v42 = vld [vmem:[%s4953_s28 + $0x50] sm:$0xff]  }
  0x1f   : > { %v1711_v44 = vsel %vm457_vm0, %v1706_v35, %v1710_v27  ;;  %4364 = vmatpush3.bf16.msra.mxu1 %v4782_v2  ;;  %v1728_v50 = vshrl.u32 %v4789_v33, 16  ;;  %v1732_v51 = vshll.u32 %v4791_v43, 16  ;;  %v494_v56 = vshrl.u32 %v4790_v38, 16 }
  0x20   : > { %4431 = vmatprep.mubr.msk.bf16.mxu0 %vm724_vm1, %v1711_v44  ;;  %v485_v54 = vsel %vm457_vm0, %v480_v40, %v484_v46  ;;  %v488_v55 = vor.u32 %v486_v47, %v484_v46  ;;  %v1736_v57 = vshrl.u32 %v4791_v43, 16  ;;  %v1727_v58 = vsel %vm457_vm0, %v1722_v41, %v1726_v48 }
  0x21   : > { %4432 = vmatmul.mubr.msk.bf16.vlgmr.msra.gmra.mrb[0].mxu0 %vm724_vm1, %v1719_v45  ;;  %4303 = vmatprep.mubr.msk.bf16.mxu1 %vm724_vm1, %v485_v54  ;;  %v492_v59 = vrot.slane %v490_v49, 1  ;;  %v1730_v60 = vor.u32 %v1728_v50, %v1726_v48  ;;  %v1734_v61 = vrot.slane %v1732_v51, 1  ;;  %v498_v62 = vshll.u32 %v4792_v52, 16  ;;  %v5006_v48 = vld [vmem:[%s4953_s28 + $0x58] sm:$0xff]  }
  0x22   : > { %4496 = vmatpush3.bf16.msra.mxu0 %v4948_v3  ;;  %4435 = vmatprep.mubr.msk.bf16.mxu0 %vm724_vm1, %v1727_v58  ;;  %v1740_v63 = vshll.u32 %v4793_v53, 16  ;;  %v502_v3 = vshrl.u32 %v4792_v52, 16  ;;  %v506_v8 = vshll.u32 %v4794_v0, 16  ;;  %v1744_v9 = vshrl.u32 %v4793_v53, 16  ;;  %v5010_v51 = vld [vmem:[%s4953_s28 + $0x58] sm:$0xff]  }
  0x23   : > { %v493_v1 = vsel %vm457_vm0, %v488_v55, %v492_v59  ;;  %v496_v2 = vor.u32 %v494_v56, %v492_v59  ;;  %v1738_v4 = vor.u32 %v1736_v57, %v1734_v61  ;;  %v500_v6 = vrot.slane %v498_v62, 1  ;;  %v5014_v56 = vld [vmem:[%s4953_s28 + $0x60] sm:$0xff]  }
  0x24   : > { %v1742_v7 = vrot.slane %v1740_v63, 1  ;;  %v1735_v10 = vsel %vm457_vm0, %v1730_v60, %v1734_v61  ;;  %v1748_v11 = vshll.u32 %v4795_v5, 16  ;;  %v510_v13 = vshrl.u32 %v4794_v0, 16 }
  0x25   : > { %v501_v15 = vsel %vm457_vm0, %v496_v2, %v500_v6  ;;  %v508_v17 = vrot.slane %v506_v8, 1  ;;  %v504_v19 = vor.u32 %v502_v3, %v500_v6  ;;  %v514_v20 = vshll.u32 %v4796_v12, 16  ;;  %v5030_v8 = vld [vmem:[%s4953_s28 + $0x68] sm:$0xff]  }
  0x26   : > { %4304 = vmatmul.mubr.msk.bf16.gmra.mrb[4].mxu1 %vm724_vm1, %v493_v1  ;;  %v1743_v16 = vsel %vm457_vm0, %v1738_v4, %v1742_v7  ;;  %v1752_v21 = vshrl.u32 %v4795_v5, 16  ;;  %v1750_v23 = vrot.slane %v1748_v11, 1  ;;  %v1756_v25 = vshll.u32 %v4797_v14, 16  ;;  %v5026_v5 = vld [vmem:[%s4953_s28 + $0x60] sm:$0xff]   ;;  %v5034_v11 = vld [vmem:[%s4953_s28 + $0x68] sm:$0xff]  }
  0x27   : > { %4307 = vmatprep.mubr.msk.bf16.mxu1 %vm724_vm1, %v501_v15  ;;  %v512_v24 = vor.u32 %v510_v13, %v508_v17  ;;  %v1746_v26 = vor.u32 %v1744_v9, %v1742_v7  ;;  %v516_v27 = vrot.slane %v514_v20, 1  ;;  %v522_v28 = vshll.u32 %v4798_v18, 16 }
  0x28   : > { %v1754_v29 = vor.u32 %v1752_v21, %v1750_v23  ;;  %v1758_v30 = vrot.slane %v1756_v25, 1  ;;  %v509_v33 = vsel %vm457_vm0, %v504_v19, %v508_v17  ;;  %v518_v34 = vshrl.u32 %v4796_v12, 16 }
  0x29   : > { %4436 = vmatmul.mubr.msk.bf16.gmra.mrb[4].mxu0 %vm724_vm1, %v1735_v10  ;;  %v1764_v35 = vshll.u32 %v4799_v22, 16  ;;  %v517_v36 = vsel %vm457_vm0, %v512_v24, %v516_v27  ;;  %v526_v37 = vshrl.u32 %v4798_v18, 16  ;;  %v530_v38 = vshll.u32 %v4800_v31, 16 }
  0x2a   : > { %4439 = vmatprep.mubr.msk.bf16.mxu0 %vm724_vm1, %v1743_v16  ;;  %v1751_v39 = vsel %vm457_vm0, %v1746_v26, %v1750_v23  ;;  %v524_v40 = vrot.slane %v522_v28, 1  ;;  %v1760_v41 = vshrl.u32 %v4797_v14, 16  ;;  %v1759_v43 = vsel %vm457_vm0, %v1754_v29, %v1758_v30  ;;  %v5039_v16 = vld [vmem:[%s4953_s28 + $0x70] sm:$0xff]  }
  0x2b   : > { %v1768_v44 = vshrl.u32 %v4799_v22, 16  ;;  %v1772_v45 = vshll.u32 %v4801_v32, 16  ;;  %v520_v46 = vor.u32 %v518_v34, %v516_v27  ;;  %v1766_v47 = vrot.slane %v1764_v35, 1  ;;  %v5051_v26 = vld [vmem:[%s4953_s28 + $0x70] sm:$0xff]   ;;  %v5062_v35 = vld [vmem:[%s4953_s28 + $0x78] sm:$0xff]  }
  0x2c   : > { %v528_v49 = vor.u32 %v526_v37, %v524_v40  ;;  %v532_v50 = vrot.slane %v530_v38, 1  ;;  %v1762_v52 = vor.u32 %v1760_v41, %v1758_v30  ;;  %v538_v53 = vshll.u32 %v4802_v42, 16  ;;  %v5067_v38 = vld [vmem:[%s4953_s28 + $0x80] sm:$0xff]  }
  0x2d   : > { %v1770_v54 = vor.u32 %v1768_v44, %v1766_v47  ;;  %v1774_v55 = vrot.slane %v1772_v45, 1  ;;  %v525_v57 = vsel %vm457_vm0, %v520_v46, %v524_v40  ;;  %v534_v58 = vshrl.u32 %v4800_v31, 16 }
  0x2e   : > { %4308 = vmatmul.mubr.msk.bf16.gmra.mrb[8].mxu1 %vm724_vm1, %v509_v33  ;;  %v1780_v59 = vshll.u32 %v5006_v48, 16  ;;  %v533_v60 = vsel %vm457_vm0, %v528_v49, %v532_v50  ;;  %v542_v61 = vshrl.u32 %v4802_v42, 16  ;;  %v546_v62 = vshll.u32 %v5010_v51, 16 }
  0x2f   : > { %4311 = vmatprep.mubr.msk.bf16.mxu1 %vm724_vm1, %v517_v36  ;;  %v1767_v63 = vsel %vm457_vm0, %v1762_v52, %v1766_v47  ;;  %v540_v0 = vrot.slane %v538_v53, 1  ;;  %v1776_v1 = vshrl.u32 %v4801_v32, 16  ;;  %v1784_v2 = vshrl.u32 %v5006_v48, 16  ;;  %v5058_v32 = vld [vmem:[%s4953_s28 + $0x78] sm:$0xff]  }
  0x30   : > { %v1775_v4 = vsel %vm457_vm0, %v1770_v54, %v1774_v55  ;;  %v1788_v3 = vshll.u32 %v5014_v56, 16  ;;  %v536_v6 = vor.u32 %v534_v58, %v532_v50  ;;  %v1782_v7 = vrot.slane %v1780_v59, 1  ;;  %v5086_v59 = vld [vmem:[%s4953_s28 + $0x88] sm:$0xff]  }
  0x31   : > { %4440 = vmatmul.mubr.msk.bf16.gmra.mrb[8].mxu0 %vm724_vm1, %v1751_v39  ;;  %v544_v9 = vor.u32 %v542_v61, %v540_v0  ;;  %v548_v10 = vrot.slane %v546_v62, 1  ;;  %v1778_v12 = vor.u32 %v1776_v1, %v1774_v55  ;;  %v554_v15 = vshll.u32 %v5026_v5, 16  ;;  %v5082_v55 = vld [vmem:[%s4953_s28 + $0x80] sm:$0xff]   ;;  %v5090_v62 = vld [vmem:[%s4953_s28 + $0x88] sm:$0xff]  }
  0x32   : > { %4443 = vmatprep.mubr.msk.bf16.mxu0 %vm724_vm1, %v1759_v43  ;;  %v1786_v13 = vor.u32 %v1784_v2, %v1782_v7  ;;  %v1790_v14 = vrot.slane %v1788_v3, 1  ;;  %v541_v17 = vsel %vm457_vm0, %v536_v6, %v540_v0  ;;  %v550_v18 = vshrl.u32 %v5010_v51, 16 }
  0x33   : > { %v1796_v19 = vshll.u32 %v5030_v8, 16  ;;  %v549_v20 = vsel %vm457_vm0, %v544_v9, %v548_v10  ;;  %v1792_v21 = vshrl.u32 %v5014_v56, 16  ;;  %v558_v22 = vshrl.u32 %v5026_v5, 16 }
  0x34   : > { %v562_v23 = vshll.u32 %v5034_v11, 16  ;;  %v1783_v24 = vsel %vm457_vm0, %v1778_v12, %v1782_v7  ;;  %v1800_v25 = vshrl.u32 %v5030_v8, 16  ;;  %v1791_v27 = vsel %vm457_vm0, %v1786_v13, %v1790_v14 }
  0x35   : > { %v556_v28 = vrot.slane %v554_v15, 1  ;;  %v1804_v29 = vshll.u32 %v5039_v16, 16  ;;  %v552_v30 = vor.u32 %v550_v18, %v548_v10  ;;  %v1798_v31 = vrot.slane %v1796_v19, 1 }
  0x36   : > { %4312 = vmatmul.mubr.msk.bf16.gmra.mrb[12].mxu1 %vm724_vm1, %v525_v57  ;;  %v564_v34 = vrot.slane %v562_v23, 1  ;;  %v1794_v36 = vor.u32 %v1792_v21, %v1790_v14  ;;  %v570_v37 = vshll.u32 %v5051_v26, 16  ;;  %v566_v42 = vshrl.u32 %v5034_v11, 16 }
  0x37   : > { %4315 = vmatprep.mubr.msk.bf16.mxu1 %vm724_vm1, %v533_v60  ;;  %v560_v33 = vor.u32 %v558_v22, %v556_v28  ;;  %v1802_v39 = vor.u32 %v1800_v25, %v1798_v31  ;;  %v1806_v40 = vrot.slane %v1804_v29, 1  ;;  %v557_v41 = vsel %vm457_vm0, %v552_v30, %v556_v28  ;;  %v5114_v22 = vld [vmem:[%s4953_s28 + $0x98] sm:$0xff]   ;;  %v5122_v29 = vld [vmem:[%s4953_s28 + $0xa0] sm:$0xff]  }
  0x38   : > { %v1812_v43 = vshll.u32 %v5058_v32, 16  ;;  %v1808_v45 = vshrl.u32 %v5039_v16, 16  ;;  %v574_v46 = vshrl.u32 %v5051_v26, 16  ;;  %v578_v47 = vshll.u32 %v5062_v35, 16 }
  0x39   : > { %4444 = vmatmul.mubr.msk.bf16.gmra.mrb[12].mxu0 %vm724_vm1, %v1767_v63  ;;  %v565_v44 = vsel %vm457_vm0, %v560_v33, %v564_v34  ;;  %v1799_v49 = vsel %vm457_vm0, %v1794_v36, %v1798_v31  ;;  %v572_v50 = vrot.slane %v570_v37, 1  ;;  %v1820_v52 = vshll.u32 %v5067_v38, 16 }
  0x3a   : > { %4447 = vmatprep.mubr.msk.bf16.mxu0 %vm724_vm1, %v1775_v4  ;;  %v1807_v53 = vsel %vm457_vm0, %v1802_v39, %v1806_v40  ;;  %v1816_v54 = vshrl.u32 %v5058_v32, 16  ;;  %v568_v57 = vor.u32 %v566_v42, %v564_v34  ;;  %v1814_v58 = vrot.slane %v1812_v43, 1  ;;  %v5095_v4 = vld [vmem:[%s4953_s28 + $0x90] sm:$0xff]  }
  0x3b   : > { %v576_v60 = vor.u32 %v574_v46, %v572_v50  ;;  %v580_v61 = vrot.slane %v578_v47, 1  ;;  %v1810_v63 = vor.u32 %v1808_v45, %v1806_v40  ;;  %v1822_v0 = vrot.slane %v1820_v52, 1 }
  0x3c   : > { %v1818_v1 = vor.u32 %v1816_v54, %v1814_v58  ;;  %v586_v2 = vshll.u32 %v5082_v55, 16  ;;  %v573_v3 = vsel %vm457_vm0, %v568_v57, %v572_v50  ;;  %v582_v6 = vshrl.u32 %v5062_v35, 16  ;;  %v5143_v57 = vld [vmem:[%s4953_s28 + $0xa8] sm:$0xff]  }
  0x3d   : > { %v1828_v7 = vshll.u32 %v5086_v59, 16  ;;  %v581_v9 = vsel %vm457_vm0, %v576_v60, %v580_v61  ;;  %v590_v10 = vshrl.u32 %v5082_v55, 16  ;;  %v594_v12 = vshll.u32 %v5090_v62, 16 }
  0x3e   : > { %4316 = vmatmul.mubr.msk.bf16.gmra.mrb[16].mxu1 %vm724_vm1, %v541_v17  ;;  %v1815_v13 = vsel %vm457_vm0, %v1810_v63, %v1814_v58  ;;  %v1824_v14 = vshrl.u32 %v5067_v38, 16  ;;  %v1823_v15 = vsel %vm457_vm0, %v1818_v1, %v1822_v0  ;;  %v588_v17 = vrot.slane %v586_v2, 1  ;;  %v5146_v58 = vld [vmem:[%s4953_s28 + $0xa8] sm:$0xff]   ;;  %v5151_v1 = vld [vmem:[%s4953_s28 + $0xb0] sm:$0xff]  }
  0x3f   : > { %4319 = vmatprep.mubr.msk.bf16.mxu1 %vm724_vm1, %v549_v20  ;;  %v1832_v18 = vshrl.u32 %v5086_v59, 16  ;;  %v1836_v19 = vshll.u32 %v5095_v4, 16  ;;  %v5110_v20 = vld [vmem:[%s4953_s28 + $0x90] sm:$0xff]   ;;  %v584_v21 = vor.u32 %v582_v6, %v580_v61  ;;  %v1830_v23 = vrot.slane %v1828_v7, 1 }
  0x40   : > { %v596_v25 = vrot.slane %v594_v12, 1  ;;  %v1826_v28 = vor.u32 %v1824_v14, %v1822_v0  ;;  %v602_v33 = vshll.u32 %v5110_v20, 16  ;;  %v598_v36 = vshrl.u32 %v5090_v62, 16  ;;  %v5157_v7 = vld [vmem:[%s4953_s28 + $0xb0] sm:$0xff]  }
  0x41   : > { %4448 = vmatmul.mubr.msk.bf16.gmra.mrb[16].mxu0 %vm724_vm1, %v1783_v24  ;;  %v592_v24 = vor.u32 %v590_v10, %v588_v17  ;;  %v1834_v30 = vor.u32 %v1832_v18, %v1830_v23  ;;  %v1838_v31 = vrot.slane %v1836_v19, 1  ;;  %v589_v34 = vsel %vm457_vm0, %v584_v21, %v588_v17  ;;  %v5169_v21 = vld [vmem:[%s4953_s28 + $0xb8] sm:$0xff]  }
  0x42   : > { %4451 = vmatprep.mubr.msk.bf16.mxu0 %vm724_vm1, %v1791_v27  ;;  %v5118_v27 = vld [vmem:[%s4953_s28 + $0x98] sm:$0xff]   ;;  %v1844_v37 = vshll.u32 %v5114_v22, 16  ;;  %v606_v40 = vshrl.u32 %v5110_v20, 16  ;;  %v1831_v42 = vsel %vm457_vm0, %v1826_v28, %v1830_v23  ;;  %v1840_v43 = vshrl.u32 %v5095_v4, 16 }
  0x43   : > { %v597_v39 = vsel %vm457_vm0, %v592_v24, %v596_v25  ;;  %v1839_v45 = vsel %vm457_vm0, %v1834_v30, %v1838_v31  ;;  %v604_v46 = vrot.slane %v602_v33, 1  ;;  %v1848_v47 = vshrl.u32 %v5114_v22, 16  ;;  %v5178_v33 = vld [vmem:[%s4953_s28 + $0xb8] sm:$0xff]  }
  0x44   : > { %v600_v50 = vor.u32 %v598_v36, %v596_v25  ;;  %v1846_v52 = vrot.slane %v1844_v37, 1  ;;  %v1842_v60 = vor.u32 %v1840_v43, %v1838_v31  ;;  %v1860_v10 = vshll.u32 %v5143_v57, 16  ;;  %v5174_v25 = vld [vmem:[%s4953_s28 + $0xc0] sm:$0xff]  }
  0x45   : > { %v626_v12 = vshll.u32 %v5146_v58, 16  ;;  %v1856_v14 = vshrl.u32 %v5122_v29, 16  ;;  %v1864_v18 = vshrl.u32 %v5143_v57, 16  ;;  %v1868_v19 = vshll.u32 %v5151_v1, 16 }
  0x46   : > { %4320 = vmatmul.mubr.msk.bf16.gmra.mrb[20].mxu1 %vm724_vm1, %v557_v41  ;;  %v610_v41 = vshll.u32 %v5118_v27, 16  ;;  %v1850_v63 = vor.u32 %v1848_v47, %v1846_v52  ;;  %v605_v2 = vsel %vm457_vm0, %v600_v50, %v604_v46  ;;  %v634_v24 = vshll.u32 %v5157_v7, 16 }
  0x47   : > { %4323 = vmatprep.mubr.msk.bf16.mxu1 %vm724_vm1, %v565_v44  ;;  %v1852_v44 = vshll.u32 %v5122_v29, 16  ;;  %v1862_v28 = vrot.slane %v1860_v10, 1  ;;  %v628_v31 = vrot.slane %v626_v12, 1  ;;  %v630_v36 = vshrl.u32 %v5146_v58, 16 }
  0x48   : > { %v612_v54 = vrot.slane %v610_v41, 1  ;;  %v638_v37 = vshrl.u32 %v5157_v7, 16  ;;  %v5184_v41 = vld [vmem:[%s4953_s28 + $0xc0] sm:$0xff]   ;;  %v636_v43 = vrot.slane %v634_v24, 1  ;;  %v1876_v50 = vshll.u32 %v5178_v33, 16 }
  0x49   : > { %4452 = vmatmul.mubr.msk.bf16.gmra.mrb[20].mxu0 %vm724_vm1, %v1799_v49  ;;  %v5138_v49 = vld [vmem:[%s4953_s28 + $0xa0] sm:$0xff]   ;;  %v1854_v61 = vrot.slane %v1852_v44, 1  ;;  %v642_v44 = vshll.u32 %v5169_v21, 16  ;;  %v1888_v12 = vshrl.u32 %v5174_v25, 16 }
  0x4a   : > { %4455 = vmatprep.mubr.msk.bf16.mxu0 %vm724_vm1, %v1807_v53  ;;  %v608_v53 = vor.u32 %v606_v40, %v604_v46  ;;  %v618_v0 = vshll.u32 %v5138_v49, 16  ;;  %v622_v6 = vshrl.u32 %v5138_v49, 16  ;;  %v1870_v40 = vrot.slane %v1868_v19, 1  ;;  %v5190_v46 = vld [vmem:[%s4953_s28 + $0xc8] sm:$0xff]  }
  0x4c   : > { %v620_v17 = vrot.slane %v618_v0, 1 }
  0x4e   : > { %4324 = vmatmul.mubr.msk.bf16.gmra.mrb[24].mxu1 %vm724_vm1, %v573_v3  ;;  %v614_v3 = vshrl.u32 %v5118_v27, 16  ;;  %v624_v30 = vor.u32 %v622_v6, %v620_v17  ;;  %v650_v6 = vshll.u32 %v5184_v41, 16 }
  0x4f   : > { %4327 = vmatprep.mubr.msk.bf16.mxu1 %vm724_vm1, %v581_v9  ;;  %v613_v9 = vsel %vm457_vm0, %v608_v53, %v612_v54 }
  0x50   : > { %v616_v23 = vor.u32 %v614_v3, %v612_v54  ;;  %v629_v47 = vsel %vm457_vm0, %v624_v30, %v628_v31  ;;  %v632_v54 = vor.u32 %v630_v36, %v628_v31  ;;  %v646_v3 = vshrl.u32 %v5169_v21, 16 }
  0x51   : > { %4456 = vmatmul.mubr.msk.bf16.gmra.mrb[24].mxu0 %vm724_vm1, %v1815_v13  ;;  %v1847_v13 = vsel %vm457_vm0, %v1842_v60, %v1846_v52  ;;  %v5195_v52 = vld [vmem:[%s4953_s28 + $0xc8] sm:$0xff]   ;;  %v1872_v60 = vshrl.u32 %v5151_v1, 16  ;;  %v652_v31 = vrot.slane %v650_v6, 1 }
  0x52   : > { %4459 = vmatprep.mubr.msk.bf16.mxu0 %vm724_vm1, %v1823_v15  ;;  %v1855_v15 = vsel %vm457_vm0, %v1850_v63, %v1854_v61  ;;  %v5201_v63 = vld [vmem:[%s4953_s28 + $0xd0] sm:$0xff]  }
  0x53   : > { %v1874_v19 = vor.u32 %v1872_v60, %v1870_v40  ;;  %v1900_v24 = vshll.u32 %v5201_v63, 16 }
  0x56   : > { %4328 = vmatmul.mubr.msk.bf16.gmra.mrb[28].mxu1 %vm724_vm1, %v589_v34  ;;  %v1858_v34 = vor.u32 %v1856_v14, %v1854_v61  ;;  %v1880_v61 = vshrl.u32 %v5178_v33, 16  ;;  %v1878_v14 = vrot.slane %v1876_v50, 1 }
  0x57   : > { %4331 = vmatprep.mubr.msk.bf16.mxu1 %vm724_vm1, %v597_v39  ;;  %v1866_v39 = vor.u32 %v1864_v18, %v1862_v28  ;;  %v5214_v18 = vld [vmem:[%s4953_s28 + $0xd0] sm:$0xff]  }
  0x58   : > { %v1863_v53 = vsel %vm457_vm0, %v1858_v34, %v1862_v28  ;;  %v637_v28 = vsel %vm457_vm0, %v632_v54, %v636_v43  ;;  %v1882_v30 = vor.u32 %v1880_v61, %v1878_v14  ;;  %v5221_v34 = vld [vmem:[%s4953_s28 + $0xd8] sm:$0xff]   ;;  %v666_v50 = vshll.u32 %v5214_v18, 16 }
  0x59   : > { %4460 = vmatmul.mubr.msk.bf16.gmra.mrb[28].mxu0 %vm724_vm1, %v1831_v42  ;;  %v621_v42 = vsel %vm457_vm0, %v616_v23, %v620_v17  ;;  %v1871_v0 = vsel %vm457_vm0, %v1866_v39, %v1870_v40  ;;  %v658_v17 = vshll.u32 %v5195_v52, 16  ;;  %v1896_v23 = vshrl.u32 %v5190_v46, 16 }
  0x5a   : > { %4463 = vmatprep.mubr.msk.bf16.mxu0 %vm724_vm1, %v1839_v45  ;;  %v1884_v45 = vshll.u32 %v5174_v25, 16  ;;  %v1902_v54 = vrot.slane %v1900_v24, 1  ;;  %v1908_v61 = vshll.u32 %v5221_v34, 16 }
  0x5b   : > { %v660_v40 = vrot.slane %v658_v17, 1  ;;  %v1912_v17 = vshrl.u32 %v5221_v34, 16 }
  0x5c   : > { %v1886_v10 = vrot.slane %v1884_v45, 1  ;;  %v1910_v24 = vrot.slane %v1908_v61, 1 }
  0x5e   : > { %4332 = vmatmul.mubr.msk.bf16.gmra.mrb[32].mxu1 %vm724_vm1, %v605_v2  ;;  %v640_v2 = vor.u32 %v638_v37, %v636_v43  ;;  %v1890_v39 = vor.u32 %v1888_v12, %v1886_v10  ;;  %v1879_v43 = vsel %vm457_vm0, %v1874_v19, %v1878_v14  ;;  %v1887_v60 = vsel %vm457_vm0, %v1882_v30, %v1886_v10 }
  0x5f   : > { %4335 = vmatprep.mubr.msk.bf16.mxu1 %vm724_vm1, %v613_v9  ;;  %v644_v9 = vrot.slane %v642_v44, 1  ;;  %v5225_v44 = vld [vmem:[%s4953_s28 + $0xd8] sm:$0xff]   ;;  %v668_v10 = vrot.slane %v666_v50, 1  ;;  %v1904_v14 = vshrl.u32 %v5201_v63, 16  ;;  %v5672_v19 = vrot.slane %v5014_v56, 1 }
  0x60   : > { %v674_v6 = vshll.u32 %v5225_v44, 16  ;;  %v2450_v30 = vrot.slane %v5058_v32, 1  ;;  %v5266_v32 = vld [vmem:[%s4953_s28 + $0xe0] sm:$0xff]   ;;  %v2460_v50 = vrot.slane %v5122_v29, 1 }
  0x61   : > { %4464 = vmatmul.mubr.msk.bf16.gmra.mrb[32].mxu0 %vm724_vm1, %v1847_v13  ;;  %v1892_v13 = vshll.u32 %v5190_v46, 16  ;;  %v645_v36 = vsel %vm457_vm0, %v640_v2, %v644_v9  ;;  %v648_v37 = vor.u32 %v646_v3, %v644_v9  ;;  %v670_v3 = vshrl.u32 %v5214_v18, 16  ;;  %v5239_v9 = vld [vmem:[%s4953_s28 + $0xe0] sm:$0xff]   ;;  %5676 = vst [vmem:[#allocation2_spill] sm:$0xff] %v5266_v32 }
  0x62   : > { %4467 = vmatprep.mubr.msk.bf16.mxu0 %vm724_vm1, %v1855_v15  ;;  %v654_v15 = vshrl.u32 %v5184_v41, 16 }
  0x64   : > { %v656_v45 = vor.u32 %v654_v15, %v652_v31 }
  0x66   : > { %4336 = vmatmul.mubr.msk.bf16.gmra.mrb[36].mxu1 %vm724_vm1, %v621_v42  ;;  %v1894_v42 = vrot.slane %v1892_v13, 1  ;;  %v661_v12 = vsel %vm457_vm0, %v656_v45, %v660_v40  ;;  %v2452_v45 = vrot.slane %v5067_v38, 1 }
  0x67   : > { %4339 = vmatprep.mubr.msk.bf16.mxu1 %vm724_vm1, %v629_v47  ;;  %v662_v47 = vshrl.u32 %v5195_v52, 16 }
  0x68   : > { %v1895_v2 = vsel %vm457_vm0, %v1890_v39, %v1894_v42 }
  0x69   : > { %4468 = vmatmul.mubr.msk.bf16.gmra.mrb[36].mxu0 %vm724_vm1, %v1863_v53  ;;  %v1898_v53 = vor.u32 %v1896_v23, %v1894_v42  ;;  %v664_v13 = vor.u32 %v662_v47, %v660_v40  ;;  %v2446_v23 = vrot.slane %v5030_v8, 1  ;;  %v2456_v40 = vrot.slane %v5095_v4, 1 }
  0x6a   : > { %4471 = vmatprep.mubr.msk.bf16.mxu0 %vm724_vm1, %v1871_v0  ;;  %v653_v0 = vsel %vm457_vm0, %v648_v37, %v652_v31  ;;  %v672_v31 = vor.u32 %v670_v3, %v668_v10  ;;  %v1916_v37 = vshll.u32 %v5239_v9, 16  ;;  %v2458_v47 = vrot.slane %v5114_v22, 1 }
  0x6b   : > { %v1903_v15 = vsel %vm457_vm0, %v1898_v53, %v1902_v54  ;;  %v5255_v39 = vsel %vm2422_vm2, %v5672_v19, %v2446_v23  ;;  %v5274_v53 = vsel %vm2422_vm2, %v2450_v30, %v2452_v45  ;;  %v2468_v3 = vrot.slane %v5174_v25, 1 }
  0x6c   : > { %v5286_v22 = vsel %vm2422_vm2, %v2456_v40, %v2458_v47  ;;  %v5289_v29 = vsel %vm2422_vm2, %v2458_v47, %v2460_v50  ;;  %v669_v25 = vsel %vm457_vm0, %v664_v13, %v668_v10  ;;  %v1920_v47 = vshrl.u32 %v5239_v9, 16 }
  0x6d   : > { %v2474_v13 = vrot.slane %v5221_v34, 1 }
  0x6e   : > { %4340 = vmatmul.mubr.msk.bf16.gmra.mrb[40].mxu1 %vm724_vm1, %v637_v28  ;;  %v2448_v28 = vrot.slane %v5039_v16, 1  ;;  %v2454_v16 = vrot.slane %v5086_v59, 1  ;;  %v2464_v59 = vrot.slane %v5151_v1, 1  ;;  %v5296_v1 = vld [vmem:[%s4953_s28 + $0xe8] sm:$0xff]  }
  0x6f   : > { %4343 = vmatprep.mubr.msk.bf16.mxu1 %vm724_vm1, %v645_v36  ;;  %v676_v36 = vrot.slane %v674_v6, 1  ;;  %v2470_v6 = vrot.slane %v5190_v46, 1  ;;  %v678_v46 = vshrl.u32 %v5225_v44, 16 }
  0x70   : > { %v5258_v42 = vsel %vm2422_vm2, %v2446_v23, %v2448_v28  ;;  %v5261_v8 = vsel %vm2422_vm2, %v2448_v28, %v2450_v30  ;;  %v5277_v38 = vsel %vm2422_vm2, %v2452_v45, %v2454_v16  ;;  %v5283_v4 = vsel %vm2422_vm2, %v2454_v16, %v2456_v40  ;;  %v5313_v45 = vld [vmem:[%s4953_s28 + $0xf0] sm:$0xff]  }
  0x71   : > { %4472 = vmatmul.mubr.msk.bf16.gmra.mrb[40].mxu0 %vm724_vm1, %v1879_v43  ;;  %v2462_v43 = vrot.slane %v5143_v57, 1  ;;  %v682_v23 = vshll.u32 %v5266_v32, 16  ;;  %v1914_v28 = vor.u32 %v1912_v17, %v1910_v24  ;;  %v1918_v30 = vrot.slane %v1916_v37, 1 }
  0x72   : > { %4475 = vmatprep.mubr.msk.bf16.mxu0 %vm724_vm1, %v1887_v60  ;;  %v2466_v60 = vrot.slane %v5178_v33, 1  ;;  %v5299_v33 = vld [vmem:[%s4953_s28 + $0xe8] sm:$0xff]   ;;  %v5319_v40 = vsel %vm2422_vm2, %v2468_v3, %v2470_v6 }
  0x73   : > { %v5292_v57 = vsel %vm2422_vm2, %v2460_v50, %v2462_v43  ;;  %5677 = vst [vmem:[#allocation3_spill] sm:$0xff] %v5299_v33  ;;  %v5302_v61 = vsel %vm2422_vm2, %v2462_v43, %v2464_v59  ;;  %v690_v17 = vshll.u32 %v5299_v33, 16  ;;  %v1919_v10 = vsel %vm457_vm0, %v1914_v28, %v1918_v30 }
  0x74   : > { %v5316_v16 = vsel %vm2422_vm2, %v2466_v60, %v2468_v3  ;;  %v684_v50 = vrot.slane %v682_v23, 1  ;;  %v1932_v43 = vshll.u32 %v5313_v45, 16  ;;  %v5349_v23 = vld [vmem:[%s4953_s28 + $0xf8] sm:$0xff]   ;;  %v2476_v28 = vrot.slane %v5239_v9, 1 }
  0x76   : > { %4344 = vmatmul.mubr.msk.bf16.gmra.mrb[44].mxu1 %vm724_vm1, %v653_v0  ;;  %v5305_v0 = vsel %vm2422_vm2, %v2464_v59, %v2466_v60  ;;  %v5338_v59 = vld [vmem:[%s4953_s28 + $0xf0] sm:$0xff]  }
  0x77   : > { %4347 = vmatprep.mubr.msk.bf16.mxu1 %vm724_vm1, %v661_v12  ;;  %v1906_v12 = vor.u32 %v1904_v14, %v1902_v54  ;;  %v1924_v14 = vshll.u32 %v5296_v1, 16  ;;  %5678 = vst [vmem:[#allocation4_spill] sm:$0xff] %v5338_v59 }
  0x79   : > { %4476 = vmatmul.mubr.msk.bf16.gmra.mrb[44].mxu0 %vm724_vm1, %v1895_v2  ;;  %v2472_v2 = vrot.slane %v5201_v63, 1  ;;  %v677_v63 = vsel %vm457_vm0, %v672_v31, %v676_v36  ;;  %v1911_v37 = vsel %vm457_vm0, %v1906_v12, %v1910_v24  ;;  %v1928_v31 = vshrl.u32 %v5296_v1, 16  ;;  %v5346_v12 = vld [vmem:[%s4953_s28 + $0xf8] sm:$0xff]  }
  0x7a   : > { %4479 = vmatprep.mubr.msk.bf16.mxu0 %vm724_vm1, %v1903_v15  ;;  %v686_v15 = vshrl.u32 %v5266_v32, 16  ;;  %v680_v24 = vor.u32 %v678_v46, %v676_v36  ;;  %v1926_v34 = vrot.slane %v1924_v14, 1  ;;  %v698_v36 = vshll.u32 %v5338_v59, 16 }
  0x7b   : > { %v5324_v54 = vsel %vm2422_vm2, %v2470_v6, %v2472_v2  ;;  %v5342_v60 = vsel %vm2422_vm2, %v2472_v2, %v2474_v13  ;;  %v692_v6 = vrot.slane %v690_v17, 1  ;;  %v5355_v2 = vld [vmem:[%s4953_s28 + $0x100] sm:$0xff]   ;;  %v5358_v46 = vsel %vm2422_vm2, %v2474_v13, %v2476_v28 }
  0x7c   : > { %v688_v3 = vor.u32 %v686_v15, %v684_v50  ;;  %v1930_v19 = vor.u32 %v1928_v31, %v1926_v34  ;;  %v685_v14 = vsel %vm457_vm0, %v680_v24, %v684_v50  ;;  %v694_v15 = vshrl.u32 %v5299_v33, 16  ;;  %v4847_v33 = vld [vmem:[%s4953_s28 + $0x108] ss:$0 sps:$4 sm:$0x11]  }
  0x7d   : > { %v1940_v9 = vshll.u32 %v5346_v12, 16  ;;  %v2478_v13 = vrot.slane %v5296_v1, 1  ;;  %v700_v31 = vrot.slane %v698_v36, 1  ;;  %v1948_v24 = vshll.u32 %v5355_v2, 16 }
  0x7e   : > { %4348 = vmatmul.mubr.msk.bf16.gmra.mrb[48].mxu1 %vm724_vm1, %v669_v25  ;;  %v1922_v25 = vor.u32 %v1920_v47, %v1918_v30  ;;  %v693_v17 = vsel %vm457_vm0, %v688_v3, %v692_v6  ;;  %v702_v30 = vshrl.u32 %v5338_v59, 16  ;;  %v696_v3 = vor.u32 %v694_v15, %v692_v6  ;;  %v4846_v59 = vld [vmem:[%s4953_s28 + $0x100] ss:$0 sps:$4 sm:$0x11]  }
  0x7f   : > { %4351 = vmatprep.mubr.msk.bf16.mxu1 %vm724_vm1, %v677_v63  ;;  %v1934_v63 = vrot.slane %v1932_v43, 1  ;;  %v1944_v43 = vshrl.u32 %v5346_v12, 16  ;;  %v1942_v1 = vrot.slane %v1940_v9, 1  ;;  %v710_v15 = vshrl.u32 %v5349_v23, 16  ;;  %v2415_v9 = vld [vmem:[%s4953_s28 + $0x8] sm:$0xe] }
  0x80   : > { %v1927_v47 = vsel %vm457_vm0, %v1922_v25, %v1926_v34  ;;  %v5376_v34 = vsel %vm2422_vm2, %v2476_v28, %v2478_v13  ;;  %v704_v25 = vor.u32 %v702_v30, %v700_v31  ;;  %v701_v28 = vsel %vm457_vm0, %v696_v3, %v700_v31 }
  0x81   : > { %4480 = vmatmul.mubr.msk.bf16.gmra.mrb[48].mxu0 %vm724_vm1, %v1911_v37  ;;  %v706_v37 = vshll.u32 %v5349_v23, 16  ;;  %v1935_v50 = vsel %vm457_vm0, %v1930_v19, %v1934_v63  ;;  %v2480_v19 = vrot.slane %v5313_v45, 1  ;;  %v1946_v32 = vor.u32 %v1944_v43, %v1942_v1 }
  0x82   : > { %4483 = vmatprep.mubr.msk.bf16.mxu0 %vm724_vm1, %v1919_v10  ;;  %v1936_v10 = vshrl.u32 %v5313_v45, 16  ;;  %v2484_v3 = vrot.slane %v5355_v2, 1 }
  0x83   : > { %v5383_v6 = vsel %vm2422_vm2, %v2478_v13, %v2480_v19 }
  0x84   : > { %v1938_v36 = vor.u32 %v1936_v10, %v1934_v63  ;;  %v1956_v63 = vshll.u32 %v4847_v33, 16  ;;  %v2482_v10 = vrot.slane %v5346_v12, 1 }
  0x86   : > { %4352 = vmatmul.mubr.msk.bf16.gmra.mrb[52].mxu1 %vm724_vm1, %v685_v14  ;;  %v708_v14 = vrot.slane %v706_v37, 1  ;;  %v1943_v45 = vsel %vm457_vm0, %v1938_v36, %v1942_v1  ;;  %v1952_v37 = vshrl.u32 %v5355_v2, 16  ;;  %v1958_v1 = vrot.slane %v1956_v63, 1  ;;  %v4854_v63 = vld [vmem:[%s4953_s28 + $0x8] sm:$0xff]  }
  0x87   : > { %4355 = vmatprep.mubr.msk.bf16.mxu1 %vm724_vm1, %v693_v17  ;;  %v1950_v17 = vrot.slane %v1948_v24, 1  ;;  %v5397_v24 = vsel %vm2422_vm2, %v2480_v19, %v2482_v10 }
  0x88   : > { %v709_v30 = vsel %vm457_vm0, %v704_v25, %v708_v14  ;;  %v4850_v25 = vld [vmem:[%s4953_s28 + $0x10] sm:$0xff]  }
  0x89   : > { %4484 = vmatmul.mubr.msk.bf16.gmra.mrb[52].mxu0 %vm724_vm1, %v1927_v47  ;;  %v714_v47 = vshll.u32 %v4846_v59, 16  ;;  %v1951_v13 = vsel %vm457_vm0, %v1946_v32, %v1950_v17  ;;  %v712_v59 = vor.u32 %v710_v15, %v708_v14  ;;  %v1954_v12 = vor.u32 %v1952_v37, %v1950_v17  ;;  %v4851_v17 = vld [vmem:[%s4953_s28] sm:$0xff]  }
  0x8a   : > { %4487 = vmatprep.mubr.msk.bf16.mxu0 %vm724_vm1, %v1935_v50  ;;  %v4849_v50 = vld [vmem:[%s4953_s28 + $0xc] sm:$0xf]  ;;  %v2424_v36 = vrot.slane %v4850_v25, 1  ;;  %v5404_v14 = vsel %vm2422_vm2, %v2482_v10, %v2484_v3  ;;  %v2486_v15 = vrot.slane %v4847_v33, 1  ;;  %v4853_v33 = vld [vmem:[%s4953_s28 + $0x20] sm:$0xff]   ;;  %v4860_v25 = vld [vmem:[%s4953_s28 + $0x38] sm:$0xff]  }
  0x8b   : > { %v3809_v31 = vcombine.low %v2415_v9, %v4849_v50  ;;  %v716_v43 = vrot.slane %v714_v47, 1  ;;  %v4852_v9 = vld [vmem:[%s4953_s28 + $0x18] sm:$0xff]   ;;  %v4856_v50 = vld [vmem:[%s4953_s28 + $0x28] sm:$0xff]  }
  0x8c   : > { %v5413_v47 = vsel %vm2422_vm2, %v2484_v3, %v2486_v15 }
  0x8d   : > { %v2423_v32 = vrot.slane %v3809_v31, 1  ;;  %v717_v19 = vsel %vm457_vm0, %v712_v59, %v716_v43  ;;  %v2430_v31 = vrot.slane %v4856_v50, 1  ;;  %v4857_v59 = vld [vmem:[%s4953_s28 + $0x30] sm:$0xff]   ;;  %v4867_v50 = vld [vmem:[%s4953_s28 + $0x40] sm:$0xff]  }
  0x8e   : > { %4356 = vmatmul.mubr.msk.bf16.gmra.mrb[56].mxu1 %vm724_vm1, %v701_v28  ;;  %v1959_v28 = vsel %vm457_vm0, %v1954_v12, %v1958_v1  ;;  %v2432_v43 = vrot.slane %v4857_v59, 1  ;;  %v4858_v12 = vld [vmem:[%s4953_s28 + $0x18] sm:$0xff]  }
  0x8f   : > { %4359 = vmatprep.mubr.msk.bf16.mxu1 %vm724_vm1, %v709_v30  ;;  %v2425_v2 = vsel %vm2422_vm2, %v2423_v32, %v2424_v36  ;;  %v2426_v30 = vrot.slane %v4852_v9, 1  ;;  %v4859_v32 = vld [vmem:[%s4953_s28 + $0x20] sm:$0xff]   ;;  %v4863_v9 = vld [vmem:[%s4953_s28 + $0x30] sm:$0xff]  }
  0x90   : > { %v2433_v1 = vsel %vm2422_vm2, %v2430_v31, %v2432_v43 }
  0x91   : > { %4488 = vmatmul.mubr.msk.bf16.gmra.mrb[56].mxu0 %vm724_vm1, %v1943_v45  ;;  %v2428_v45 = vrot.slane %v4853_v33, 1  ;;  %v2427_v37 = vsel %vm2422_vm2, %v2424_v36, %v2426_v30  ;;  %v2434_v36 = vrot.slane %v4860_v25, 1 }
  0x92   : > { %4491 = vmatprep.mubr.msk.bf16.mxu0 %vm724_vm1, %v1951_v13  ;;  %v4855_v13 = vld [vmem:[%s4953_s28 + $0x10] sm:$0xff]  }
  0x93   : > { %v2429_v10 = vsel %vm2422_vm2, %v2426_v30, %v2428_v45  ;;  %v2431_v3 = vsel %vm2422_vm2, %v2428_v45, %v2430_v31  ;;  %v2435_v15 = vsel %vm2422_vm2, %v2432_v43, %v2434_v36  ;;  %v4864_v30 = vld [vmem:[%s4953_s28 + $0x48] sm:$0xff]   ;;  %v4865_v45 = vld [vmem:[%s4953_s28 + $0x50] sm:$0xff]   ;;  %v2442_v31 = vrot.slane %v5006_v48, 1  ;;  %v5680_v48 = vld [vmem:[#allocation2_spill] sm:$0xff] }
  0x94   : > { %v2438_v33 = vrot.slane %v4864_v30, 1  ;;  %v4868_v43 = vld [vmem:[%s4953_s28 + $0x48] sm:$0xff]  }
  0x96   : > { %4360 = vmatmul.mubr.msk.bf16.gmra.mrb[60].mxu1 %vm724_vm1, %v717_v19  ;;  %v4861_v19 = vld [vmem:[%s4953_s28 + $0x40] sm:$0xff]  }
  0x97   : > { %4365 = vmatprep.mubr.msk.bf16.mxu1 %vm724_vm1, %v4851_v17 }
  0x99   : > { %4492 = vmatmul.mubr.msk.bf16.gmra.mrb[60].mxu0 %vm724_vm1, %v1959_v28  ;;  %v2436_v28 = vrot.slane %v4861_v19, 1 }
  0x9a   : > { %4497 = vmatprep.mubr.msk.bf16.mxu0 %vm724_vm1, %v2425_v2  ;;  %v4862_v2 = vld [vmem:[%s4953_s28 + $0x28] sm:$0xff]  }
  0x9b   : > { %v2437_v17 = vsel %vm2422_vm2, %v2434_v36, %v2436_v28 }
  0x9e   : > { %4366 = vmatmul.mubr.msk.bf16.vlgmr.msra.gmra.mrb[0].mxu1 %vm724_vm1, %v4854_v63  ;;  %v2439_v63 = vsel %vm2422_vm2, %v2436_v28, %v2438_v33 }
  0x9f   : > { %4369 = vmatprep.mubr.msk.bf16.mxu1 %vm724_vm1, %v4855_v13 }
  0xa1   : > { %4498 = vmatmul.mubr.msk.bf16.vlgmr.msra.gmra.mrb[0].mxu0 %vm724_vm1, %v2427_v37  ;;  %v2440_v37 = vrot.slane %v4865_v45, 1 }
  0xa2   : > { %4501 = vmatprep.mubr.msk.bf16.mxu0 %vm724_vm1, %v2429_v10  ;;  %v4866_v10 = vld [vmem:[%s4953_s28 + $0x38] sm:$0xff]  }
  0xa3   : > { %v2441_v13 = vsel %vm2422_vm2, %v2438_v33, %v2440_v37  ;;  %v2443_v59 = vsel %vm2422_vm2, %v2440_v37, %v2442_v31 }
  0xa6   : > { %4370 = vmatmul.mubr.msk.bf16.gmra.mrb[4].mxu1 %vm724_vm1, %v4858_v12 }
  0xa7   : > { %4373 = vmatprep.mubr.msk.bf16.mxu1 %vm724_vm1, %v4859_v32 }
  0xa9   : > { %4502 = vmatmul.mubr.msk.bf16.gmra.mrb[4].mxu0 %vm724_vm1, %v2431_v3  ;;  %v5679_v3 = vrot.slane %v5014_v56, 1  ;;  %v5682_v56 = vld [vmem:[#allocation4_spill] sm:$0xff] }
  0xaa   : > { %4505 = vmatprep.mubr.msk.bf16.mxu0 %vm724_vm1, %v2433_v1  ;;  %v4869_v1 = vld [vmem:[%s4953_s28 + $0x50] sm:$0xff]  }
  0xab   : > { %v2445_v12 = vsel %vm2422_vm2, %v2442_v31, %v5679_v3 }
  0xae   : > { %4374 = vmatmul.mubr.msk.bf16.gmra.mrb[8].mxu1 %vm724_vm1, %v4862_v2 }
  0xaf   : > { %4377 = vmatprep.mubr.msk.bf16.mxu1 %vm724_vm1, %v4863_v9 }
  0xb1   : > { %4506 = vmatmul.mubr.msk.bf16.gmra.mrb[8].mxu0 %vm724_vm1, %v2435_v15 }
  0xb2   : > { %4509 = vmatprep.mubr.msk.bf16.mxu0 %vm724_vm1, %v2437_v17 }
  0xb6   : > { %4378 = vmatmul.mubr.msk.bf16.gmra.mrb[12].mxu1 %vm724_vm1, %v4866_v10 }
  0xb7   : > { %4381 = vmatprep.mubr.msk.bf16.mxu1 %vm724_vm1, %v4867_v50 }
  0xb9   : > { %4510 = vmatmul.mubr.msk.bf16.gmra.mrb[12].mxu0 %vm724_vm1, %v2439_v63 }
  0xba   : > { %4513 = vmatprep.mubr.msk.bf16.mxu0 %vm724_vm1, %v2441_v13 }
  0xbe   : > { %4382 = vmatmul.mubr.msk.bf16.gmra.mrb[16].mxu1 %vm724_vm1, %v4868_v43 }
  0xbf   : > { %4385 = vmatprep.mubr.msk.bf16.mxu1 %vm724_vm1, %v4869_v1 }
  0xc1   : > { %4514 = vmatmul.mubr.msk.bf16.gmra.mrb[16].mxu0 %vm724_vm1, %v2443_v59 }
  0xc2   : > { %4517 = vmatprep.mubr.msk.bf16.mxu0 %vm724_vm1, %v2445_v12 }
  0xc6   : > { %4386 = vmatmul.mubr.msk.bf16.gmra.mrb[20].mxu1 %vm724_vm1, %v5010_v51  ;;  %v5681_v51 = vld [vmem:[#allocation3_spill] sm:$0xff] }
  0xc7   : > { %4389 = vmatprep.mubr.msk.bf16.mxu1 %vm724_vm1, %v5026_v5 }
  0xc9   : > { %4518 = vmatmul.mubr.msk.bf16.gmra.mrb[20].mxu0 %vm724_vm1, %v5255_v39 }
  0xca   : > { %4521 = vmatprep.mubr.msk.bf16.mxu0 %vm724_vm1, %v5258_v42 }
  0xce   : > { %4390 = vmatmul.mubr.msk.bf16.gmra.mrb[24].mxu1 %vm724_vm1, %v5034_v11 }
  0xcf   : > { %4393 = vmatprep.mubr.msk.bf16.mxu1 %vm724_vm1, %v5051_v26 }
  0xd1   : > { %4522 = vmatmul.mubr.msk.bf16.gmra.mrb[24].mxu0 %vm724_vm1, %v5261_v8 }
  0xd2   : > { %4525 = vmatprep.mubr.msk.bf16.mxu0 %vm724_vm1, %v5274_v53 }
  0xd6   : > { %4394 = vmatmul.mubr.msk.bf16.gmra.mrb[28].mxu1 %vm724_vm1, %v5062_v35  ;;  %v5556_v35 = vld [vmem:[%s5670_s2] ss:$0 sm:$0xff] }
  0xd7   : > { %4397 = vmatprep.mubr.msk.bf16.mxu1 %vm724_vm1, %v5082_v55 }
  0xd9   : > { %4526 = vmatmul.mubr.msk.bf16.gmra.mrb[28].mxu0 %vm724_vm1, %v5277_v38 }
  0xda   : > { %4529 = vmatprep.mubr.msk.bf16.mxu0 %vm724_vm1, %v5283_v4 }
  0xde   : > { %4398 = vmatmul.mubr.msk.bf16.gmra.mrb[32].mxu1 %vm724_vm1, %v5090_v62 }
  0xdf   : > { %4401 = vmatprep.mubr.msk.bf16.mxu1 %vm724_vm1, %v5110_v20 }
  0xe1   : > { %4530 = vmatmul.mubr.msk.bf16.gmra.mrb[32].mxu0 %vm724_vm1, %v5286_v22 }
  0xe2   : > { %4533 = vmatprep.mubr.msk.bf16.mxu0 %vm724_vm1, %v5289_v29 }
  0xe6   : > { %4402 = vmatmul.mubr.msk.bf16.gmra.mrb[36].mxu1 %vm724_vm1, %v5118_v27 }
  0xe7   : > { %4405 = vmatprep.mubr.msk.bf16.mxu1 %vm724_vm1, %v5138_v49 }
  0xe9   : > { %4534 = vmatmul.mubr.msk.bf16.gmra.mrb[36].mxu0 %vm724_vm1, %v5292_v57 }
  0xea   : > { %4537 = vmatprep.mubr.msk.bf16.mxu0 %vm724_vm1, %v5302_v61 }
  0xee   : > { %4406 = vmatmul.mubr.msk.bf16.gmra.mrb[40].mxu1 %vm724_vm1, %v5146_v58 }
  0xef   : > { %4409 = vmatprep.mubr.msk.bf16.mxu1 %vm724_vm1, %v5157_v7 }
  0xf1   : > { %4538 = vmatmul.mubr.msk.bf16.gmra.mrb[40].mxu0 %vm724_vm1, %v5305_v0 }
  0xf2   : > { %4541 = vmatprep.mubr.msk.bf16.mxu0 %vm724_vm1, %v5316_v16 }
  0xf6   : > { %4410 = vmatmul.mubr.msk.bf16.gmra.mrb[44].mxu1 %vm724_vm1, %v5169_v21 }
  0xf7   : > { %4413 = vmatprep.mubr.msk.bf16.mxu1 %vm724_vm1, %v5184_v41 }
  0xf9   : > { %4542 = vmatmul.mubr.msk.bf16.gmra.mrb[44].mxu0 %vm724_vm1, %v5319_v40 }
  0xfa   : > { %4545 = vmatprep.mubr.msk.bf16.mxu0 %vm724_vm1, %v5324_v54 }
  0xfe   : > { %4414 = vmatmul.mubr.msk.bf16.gmra.mrb[48].mxu1 %vm724_vm1, %v5195_v52 }
  0xff   : > { %4417 = vmatprep.mubr.msk.bf16.mxu1 %vm724_vm1, %v5214_v18 }
 0x101   : > { %4546 = vmatmul.mubr.msk.bf16.gmra.mrb[48].mxu0 %vm724_vm1, %v5342_v60 }
 0x102   : > { %4549 = vmatprep.mubr.msk.bf16.mxu0 %vm724_vm1, %v5358_v46 }
 0x106   : > { %4418 = vmatmul.mubr.msk.bf16.gmra.mrb[52].mxu1 %vm724_vm1, %v5225_v44 }
 0x107   : > { %4421 = vmatprep.mubr.msk.bf16.mxu1 %vm724_vm1, %v5680_v48 }
 0x109   : > { %4550 = vmatmul.mubr.msk.bf16.gmra.mrb[52].mxu0 %vm724_vm1, %v5376_v34 }
 0x10a   : > { %4553 = vmatprep.mubr.msk.bf16.mxu0 %vm724_vm1, %v5383_v6 }
 0x10e   : > { %4422 = vmatmul.mubr.msk.bf16.gmra.mrb[56].mxu1 %vm724_vm1, %v5681_v51 }
 0x10f   : > { %4425 = vmatprep.mubr.msk.bf16.mxu1 %vm724_vm1, %v5682_v56 }
 0x111   : > { %4554 = vmatmul.mubr.msk.bf16.gmra.mrb[56].mxu0 %vm724_vm1, %v5397_v24 }
 0x112   : > { %4557 = vmatprep.mubr.msk.bf16.mxu0 %vm724_vm1, %v5404_v14 }
 0x116   : > { %4426 = vmatmul.mubr.msk.bf16.gmra.mrb[60].mxu1 %vm724_vm1, %v5349_v23 }
 0x119   : > { %4558 = vmatmul.mubr.msk.bf16.gmra.mrb[60].mxu0 %vm724_vm1, %v5413_v47 }
 0x171   : > { %v4367_v5 = vpop.f32.mrb[0].mxu1 }
 0x172   : > { %v1214_v11 = vpop.f32.mrb[1].mxu1 }
 0x173   : > { %v4368_v55 = vpop.f32.mrb[2].mxu1 }
 0x174   : > { %v4499_v26 = vpop.f32.mrb[0].mxu0  ;;  %v1217_v27 = vpop.f32.mrb[3].mxu1 }
 0x175   : > { %v4561_v62 = vadd.f32 %v4499_v26, %v4367_v5  ;;  %v2624_v20 = vpop.f32.mrb[1].mxu0 }
 0x176   : > { %v4562_v49 = vadd.f32 %v2624_v20, %v1214_v11  ;;  %v4500_v58 = vpop.f32.mrb[2].mxu0 }
 0x177   : > { %v2952_v7 = vadd.f32 %v4561_v62, %v5556_v35  ;;  %v4563_v21 = vadd.f32 %v4500_v58, %v4368_v55  ;;  %v2627_v41 = vpop.f32.mrb[3].mxu0 }
 0x178   : > { %v2950_v52 = vadd.f32 %v4562_v49, %v5556_v35  ;;  %v4564_v18 = vadd.f32 %v2627_v41, %v1217_v27 }
 0x179   : > { %v3080_v44 = vmul.f32 0.2, %v2952_v7  ;;  %v2953_v39 = vadd.f32 %v4563_v21, %v5556_v35  ;;  %vm3016_vm3 = vcmp.ge.f32.partialorder %v2952_v7, 0.0  ;;  %v4371_v53 = vpop.f32.mrb[4].mxu1 }
 0x17a   : > { %v3078_v42 = vmul.f32 0.2, %v2950_v52  ;;  %v2951_v8 = vadd.f32 %v4564_v18, %v5556_v35  ;;  %vm3014_vm4 = vcmp.ge.f32.partialorder %v2950_v52, 0.0  ;;  %v1230_v4 = vpop.f32.mrb[5].mxu1 }
 0x17b   : > { %vm3017_vm5 = vcmp.ge.f32.partialorder %v2953_v39, 0.0  ;;  %v3081_v38 = vmul.f32 0.2, %v2953_v39  ;;  %v4372_v57 = vpop.f32.mrb[6].mxu1  ;;  %v3144_v61 = vsel %vm3016_vm3, %v2952_v7, %v3080_v44 }
 0x17c   : > { %vm3015_vm6 = vcmp.ge.f32.partialorder %v2951_v8, 0.0  ;;  %v3079_v22 = vmul.f32 0.2, %v2951_v8  ;;  %v4503_v29 = vpop.f32.mrb[4].mxu0  ;;  %v1233_v54 = vpop.f32.mrb[7].mxu1  ;;  %v3142_v60 = vsel %vm3014_vm4, %v2950_v52, %v3078_v42 }
 0x17d   : > { %v3145_v0 = vsel %vm3017_vm5, %v2953_v39, %v3081_v38  ;;  %v4565_v16 = vadd.f32 %v4503_v29, %v4371_v53  ;;  %v2640_v40 = vpop.f32.mrb[5].mxu0 }
 0x17e   : > { %v3982_v23 = vpack.c.bf16 %v3145_v0, %v3144_v61  ;;  %v3143_v46 = vsel %vm3015_vm6, %v2951_v8, %v3079_v22  ;;  %v4566_v34 = vadd.f32 %v2640_v40, %v1230_v4  ;;  %v4504_v6 = vpop.f32.mrb[6].mxu0 }
 0x17f   : > { %v3977_v24 = vpack.c.bf16 %v3143_v46, %v3142_v60  ;;  %v2956_v14 = vadd.f32 %v4565_v16, %v5556_v35  ;;  %v4567_v47 = vadd.f32 %v4504_v6, %v4372_v57  ;;  %v2643_v32 = vpop.f32.mrb[7].mxu0 }
 0x180   : > { %4134 = vst [vmem:[%s5565_s8 + $0x8] sm:$0xff] %v3982_v23   ;;  %v2954_v25 = vadd.f32 %v4566_v34, %v5556_v35  ;;  %v4568_v36 = vadd.f32 %v2643_v32, %v1233_v54 }
 0x181   : > { %3978 = vst [vmem:[%s5565_s8] sm:$0xff] %v3977_v24   ;;  %v3084_v19 = vmul.f32 0.2, %v2956_v14  ;;  %v2957_v28 = vadd.f32 %v4567_v47, %v5556_v35  ;;  %vm3020_vm7 = vcmp.ge.f32.partialorder %v2956_v14, 0.0  ;;  %v4375_v17 = vpop.f32.mrb[8].mxu1 }
 0x182   : > { %v3082_v15 = vmul.f32 0.2, %v2954_v25  ;;  %v2955_v2 = vadd.f32 %v4568_v36, %v5556_v35  ;;  %vm3018_vm8 = vcmp.ge.f32.partialorder %v2954_v25, 0.0  ;;  %v1246_v30 = vpop.f32.mrb[9].mxu1 }
 0x183   : > { %vm3021_vm9 = vcmp.ge.f32.partialorder %v2957_v28, 0.0  ;;  %v3085_v9 = vmul.f32 0.2, %v2957_v28  ;;  %v4376_v37 = vpop.f32.mrb[10].mxu1  ;;  %v3148_v63 = vsel %vm3020_vm7, %v2956_v14, %v3084_v19 }
 0x184   : > { %vm3019_vm10 = vcmp.ge.f32.partialorder %v2955_v2, 0.0  ;;  %v3083_v33 = vmul.f32 0.2, %v2955_v2  ;;  %v4507_v45 = vpop.f32.mrb[8].mxu0  ;;  %v1249_v31 = vpop.f32.mrb[11].mxu1  ;;  %v3146_v59 = vsel %vm3018_vm8, %v2954_v25, %v3082_v15 }
 0x185   : > { %v3149_v10 = vsel %vm3021_vm9, %v2957_v28, %v3085_v9  ;;  %v4569_v13 = vadd.f32 %v4507_v45, %v4375_v17  ;;  %v2656_v50 = vpop.f32.mrb[9].mxu0 }
 0x186   : > { %v3992_v43 = vpack.c.bf16 %v3149_v10, %v3148_v63  ;;  %v3147_v3 = vsel %vm3019_vm10, %v2955_v2, %v3083_v33  ;;  %v4570_v12 = vadd.f32 %v2656_v50, %v1246_v30  ;;  %v4508_v1 = vpop.f32.mrb[10].mxu0 }
 0x187   : > { %v3987_v48 = vpack.c.bf16 %v3147_v3, %v3146_v59  ;;  %v2960_v51 = vadd.f32 %v4569_v13, %v5556_v35  ;;  %v4571_v56 = vadd.f32 %v4508_v1, %v4376_v37  ;;  %v2659_v5 = vpop.f32.mrb[11].mxu0 }
 0x188   : > { %4136 = vst [vmem:[%s5565_s8 + $0x18] sm:$0xff] %v3992_v43   ;;  %v2958_v11 = vadd.f32 %v4570_v12, %v5556_v35  ;;  %v4572_v26 = vadd.f32 %v2659_v5, %v1249_v31 }
 0x189   : > { %4135 = vst [vmem:[%s5565_s8 + $0x10] sm:$0xff] %v3987_v48   ;;  %v3088_v55 = vmul.f32 0.2, %v2960_v51  ;;  %v2961_v62 = vadd.f32 %v4571_v56, %v5556_v35  ;;  %vm3024_vm11 = vcmp.ge.f32.partialorder %v2960_v51, 0.0  ;;  %v4379_v49 = vpop.f32.mrb[12].mxu1 }
 0x18a   : > { %v3086_v20 = vmul.f32 0.2, %v2958_v11  ;;  %v2959_v27 = vadd.f32 %v4572_v26, %v5556_v35  ;;  %vm3022_vm12 = vcmp.ge.f32.partialorder %v2958_v11, 0.0  ;;  %v1262_v7 = vpop.f32.mrb[13].mxu1 }
 0x18b   : > { %vm3025_vm13 = vcmp.ge.f32.partialorder %v2961_v62, 0.0  ;;  %v3089_v58 = vmul.f32 0.2, %v2961_v62  ;;  %v4380_v52 = vpop.f32.mrb[14].mxu1  ;;  %v3152_v18 = vsel %vm3024_vm11, %v2960_v51, %v3088_v55 }
 0x18c   : > { %vm3023_vm14 = vcmp.ge.f32.partialorder %v2959_v27, 0.0  ;;  %v3087_v21 = vmul.f32 0.2, %v2959_v27  ;;  %v4511_v41 = vpop.f32.mrb[12].mxu0  ;;  %v1265_v8 = vpop.f32.mrb[15].mxu1  ;;  %v3150_v53 = vsel %vm3022_vm12, %v2958_v11, %v3086_v20 }
 0x18d   : > { %v3153_v44 = vsel %vm3025_vm13, %v2961_v62, %v3089_v58  ;;  %v4573_v39 = vadd.f32 %v4511_v41, %v4379_v49  ;;  %v2672_v42 = vpop.f32.mrb[13].mxu0 }
 0x18e   : > { %v4002_v38 = vpack.c.bf16 %v3153_v44, %v3152_v18  ;;  %v3151_v4 = vsel %vm3023_vm14, %v2959_v27, %v3087_v21  ;;  %v4574_v22 = vadd.f32 %v2672_v42, %v1262_v7  ;;  %v4512_v29 = vpop.f32.mrb[14].mxu0 }
 0x18f   : > { %v3997_v57 = vpack.c.bf16 %v3151_v4, %v3150_v53  ;;  %v2964_v61 = vadd.f32 %v4573_v39, %v5556_v35  ;;  %v4575_v0 = vadd.f32 %v4512_v29, %v4380_v52  ;;  %v2675_v16 = vpop.f32.mrb[15].mxu0 }
 0x190   : > { %4138 = vst [vmem:[%s5565_s8 + $0x28] sm:$0xff] %v4002_v38   ;;  %v2962_v40 = vadd.f32 %v4574_v22, %v5556_v35  ;;  %v4576_v54 = vadd.f32 %v2675_v16, %v1265_v8 }
 0x191   : > { %4137 = vst [vmem:[%s5565_s8 + $0x20] sm:$0xff] %v3997_v57   ;;  %v3092_v60 = vmul.f32 0.2, %v2964_v61  ;;  %v2965_v23 = vadd.f32 %v4575_v0, %v5556_v35  ;;  %vm3028_vm15 = vcmp.ge.f32.partialorder %v2964_v61, 0.0  ;;  %v4383_v6 = vpop.f32.mrb[16].mxu1 }
 0x192   : > { %v3090_v46 = vmul.f32 0.2, %v2962_v40  ;;  %v2963_v34 = vadd.f32 %v4576_v54, %v5556_v35  ;;  %vm3026_vm0 = vcmp.ge.f32.partialorder %v2962_v40, 0.0  ;;  %v1278_v14 = vpop.f32.mrb[17].mxu1 }
 0x193   : > { %vm3029_vm1 = vcmp.ge.f32.partialorder %v2965_v23, 0.0  ;;  %v3093_v24 = vmul.f32 0.2, %v2965_v23  ;;  %v4384_v25 = vpop.f32.mrb[18].mxu1  ;;  %v3156_v36 = vsel %vm3028_vm15, %v2964_v61, %v3092_v60 }
 0x194   : > { %vm3027_vm2 = vcmp.ge.f32.partialorder %v2963_v34, 0.0  ;;  %v3091_v47 = vmul.f32 0.2, %v2963_v34  ;;  %v4515_v32 = vpop.f32.mrb[16].mxu0  ;;  %v1281_v2 = vpop.f32.mrb[19].mxu1  ;;  %v3154_v17 = vsel %vm3026_vm0, %v2962_v40, %v3090_v46 }
 0x195   : > { %v3157_v19 = vsel %vm3029_vm1, %v2965_v23, %v3093_v24  ;;  %v4577_v28 = vadd.f32 %v4515_v32, %v4383_v6  ;;  %v2688_v15 = vpop.f32.mrb[17].mxu0 }
 0x196   : > { %v4012_v9 = vpack.c.bf16 %v3157_v19, %v3156_v36  ;;  %v3155_v30 = vsel %vm3027_vm2, %v2963_v34, %v3091_v47  ;;  %v4578_v33 = vadd.f32 %v2688_v15, %v1278_v14  ;;  %v4516_v45 = vpop.f32.mrb[18].mxu0 }
 0x197   : > { %v4007_v37 = vpack.c.bf16 %v3155_v30, %v3154_v17  ;;  %v2968_v63 = vadd.f32 %v4577_v28, %v5556_v35  ;;  %v4579_v10 = vadd.f32 %v4516_v45, %v4384_v25  ;;  %v2691_v13 = vpop.f32.mrb[19].mxu0 }
 0x198   : > { %4140 = vst [vmem:[%s5565_s8 + $0x38] sm:$0xff] %v4012_v9   ;;  %v2966_v50 = vadd.f32 %v4578_v33, %v5556_v35  ;;  %v4580_v31 = vadd.f32 %v2691_v13, %v1281_v2 }
 0x199   : > { %4139 = vst [vmem:[%s5565_s8 + $0x30] sm:$0xff] %v4007_v37   ;;  %v3096_v59 = vmul.f32 0.2, %v2968_v63  ;;  %v2969_v43 = vadd.f32 %v4579_v10, %v5556_v35  ;;  %vm3032_vm3 = vcmp.ge.f32.partialorder %v2968_v63, 0.0  ;;  %v4387_v1 = vpop.f32.mrb[20].mxu1 }
 0x19a   : > { %v3094_v3 = vmul.f32 0.2, %v2966_v50  ;;  %v2967_v12 = vadd.f32 %v4580_v31, %v5556_v35  ;;  %vm3030_vm4 = vcmp.ge.f32.partialorder %v2966_v50, 0.0  ;;  %v1294_v51 = vpop.f32.mrb[21].mxu1 }
 0x19b   : > { %vm3033_vm5 = vcmp.ge.f32.partialorder %v2969_v43, 0.0  ;;  %v3097_v48 = vmul.f32 0.2, %v2969_v43  ;;  %v4388_v11 = vpop.f32.mrb[22].mxu1  ;;  %v3160_v26 = vsel %vm3032_vm3, %v2968_v63, %v3096_v59 }
 0x19c   : > { %vm3031_vm6 = vcmp.ge.f32.partialorder %v2967_v12, 0.0  ;;  %v3095_v56 = vmul.f32 0.2, %v2967_v12  ;;  %v4519_v5 = vpop.f32.mrb[20].mxu0  ;;  %v1297_v27 = vpop.f32.mrb[23].mxu1  ;;  %v3158_v49 = vsel %vm3030_vm4, %v2966_v50, %v3094_v3 }
 0x19d   : > { %v3161_v55 = vsel %vm3033_vm5, %v2969_v43, %v3097_v48  ;;  %v4581_v62 = vadd.f32 %v4519_v5, %v4387_v1  ;;  %v2704_v20 = vpop.f32.mrb[21].mxu0 }
 0x19e   : > { %v4022_v58 = vpack.c.bf16 %v3161_v55, %v3160_v26  ;;  %v3159_v7 = vsel %vm3031_vm6, %v2967_v12, %v3095_v56  ;;  %v4582_v21 = vadd.f32 %v2704_v20, %v1294_v51  ;;  %v4520_v41 = vpop.f32.mrb[22].mxu0 }
 0x19f   : > { %v4017_v52 = vpack.c.bf16 %v3159_v7, %v3158_v49  ;;  %v2972_v18 = vadd.f32 %v4581_v62, %v5556_v35  ;;  %v4583_v44 = vadd.f32 %v4520_v41, %v4388_v11  ;;  %v2707_v39 = vpop.f32.mrb[23].mxu0 }
 0x1a0   : > { %4142 = vst [vmem:[%s5565_s8 + $0x48] sm:$0xff] %v4022_v58   ;;  %v2970_v42 = vadd.f32 %v4582_v21, %v5556_v35  ;;  %v4584_v8 = vadd.f32 %v2707_v39, %v1297_v27 }
 0x1a1   : > { %4141 = vst [vmem:[%s5565_s8 + $0x40] sm:$0xff] %v4017_v52   ;;  %v3100_v53 = vmul.f32 0.2, %v2972_v18  ;;  %v2973_v38 = vadd.f32 %v4583_v44, %v5556_v35  ;;  %vm3036_vm7 = vcmp.ge.f32.partialorder %v2972_v18, 0.0  ;;  %v4391_v29 = vpop.f32.mrb[24].mxu1 }
 0x1a2   : > { %v3098_v4 = vmul.f32 0.2, %v2970_v42  ;;  %v2971_v22 = vadd.f32 %v4584_v8, %v5556_v35  ;;  %vm3034_vm8 = vcmp.ge.f32.partialorder %v2970_v42, 0.0  ;;  %v1310_v61 = vpop.f32.mrb[25].mxu1 }
 0x1a3   : > { %vm3037_vm9 = vcmp.ge.f32.partialorder %v2973_v38, 0.0  ;;  %v3101_v57 = vmul.f32 0.2, %v2973_v38  ;;  %v4392_v40 = vpop.f32.mrb[26].mxu1  ;;  %v3164_v54 = vsel %vm3036_vm7, %v2972_v18, %v3100_v53 }
 0x1a4   : > { %vm3035_vm10 = vcmp.ge.f32.partialorder %v2971_v22, 0.0  ;;  %v3099_v0 = vmul.f32 0.2, %v2971_v22  ;;  %v4523_v16 = vpop.f32.mrb[24].mxu0  ;;  %v1313_v34 = vpop.f32.mrb[27].mxu1  ;;  %v3162_v6 = vsel %vm3034_vm8, %v2970_v42, %v3098_v4 }
 0x1a5   : > { %v3165_v60 = vsel %vm3037_vm9, %v2973_v38, %v3101_v57  ;;  %v4585_v23 = vadd.f32 %v4523_v16, %v4391_v29  ;;  %v2720_v46 = vpop.f32.mrb[25].mxu0 }
 0x1a6   : > { %v4032_v24 = vpack.c.bf16 %v3165_v60, %v3164_v54  ;;  %v3163_v14 = vsel %vm3035_vm10, %v2971_v22, %v3099_v0  ;;  %v4586_v47 = vadd.f32 %v2720_v46, %v1310_v61  ;;  %v4524_v32 = vpop.f32.mrb[26].mxu0 }
 0x1a7   : > { %v4027_v25 = vpack.c.bf16 %v3163_v14, %v3162_v6  ;;  %v2976_v36 = vadd.f32 %v4585_v23, %v5556_v35  ;;  %v4587_v19 = vadd.f32 %v4524_v32, %v4392_v40  ;;  %v2723_v28 = vpop.f32.mrb[27].mxu0 }
 0x1a8   : > { %4144 = vst [vmem:[%s5565_s8 + $0x58] sm:$0xff] %v4032_v24   ;;  %v2974_v15 = vadd.f32 %v4586_v47, %v5556_v35  ;;  %v4588_v2 = vadd.f32 %v2723_v28, %v1313_v34 }
 0x1a9   : > { %4143 = vst [vmem:[%s5565_s8 + $0x50] sm:$0xff] %v4027_v25   ;;  %v3104_v17 = vmul.f32 0.2, %v2976_v36  ;;  %v2977_v9 = vadd.f32 %v4587_v19, %v5556_v35  ;;  %vm3040_vm11 = vcmp.ge.f32.partialorder %v2976_v36, 0.0  ;;  %v4395_v45 = vpop.f32.mrb[28].mxu1 }
 0x1aa   : > { %v3102_v30 = vmul.f32 0.2, %v2974_v15  ;;  %v2975_v33 = vadd.f32 %v4588_v2, %v5556_v35  ;;  %vm3038_vm12 = vcmp.ge.f32.partialorder %v2974_v15, 0.0  ;;  %v1326_v63 = vpop.f32.mrb[29].mxu1 }
 0x1ab   : > { %vm3041_vm13 = vcmp.ge.f32.partialorder %v2977_v9, 0.0  ;;  %v3105_v37 = vmul.f32 0.2, %v2977_v9  ;;  %v4396_v50 = vpop.f32.mrb[30].mxu1  ;;  %v3168_v31 = vsel %vm3040_vm11, %v2976_v36, %v3104_v17 }
 0x1ac   : > { %vm3039_vm14 = vcmp.ge.f32.partialorder %v2975_v33, 0.0  ;;  %v3103_v10 = vmul.f32 0.2, %v2975_v33  ;;  %v4527_v13 = vpop.f32.mrb[28].mxu0  ;;  %v1329_v12 = vpop.f32.mrb[31].mxu1  ;;  %v3166_v1 = vsel %vm3038_vm12, %v2974_v15, %v3102_v30 }
 0x1ad   : > { %v3169_v59 = vsel %vm3041_vm13, %v2977_v9, %v3105_v37  ;;  %v4589_v43 = vadd.f32 %v4527_v13, %v4395_v45  ;;  %v2736_v3 = vpop.f32.mrb[29].mxu0 }
 0x1ae   : > { %v4042_v48 = vpack.c.bf16 %v3169_v59, %v3168_v31  ;;  %v3167_v51 = vsel %vm3039_vm14, %v2975_v33, %v3103_v10  ;;  %v4590_v56 = vadd.f32 %v2736_v3, %v1326_v63  ;;  %v4528_v5 = vpop.f32.mrb[30].mxu0 }
 0x1af   : > { %v4037_v11 = vpack.c.bf16 %v3167_v51, %v3166_v1  ;;  %v2980_v26 = vadd.f32 %v4589_v43, %v5556_v35  ;;  %v4591_v55 = vadd.f32 %v4528_v5, %v4396_v50  ;;  %v2739_v62 = vpop.f32.mrb[31].mxu0 }
 0x1b0   : > { %4146 = vst [vmem:[%s5565_s8 + $0x68] sm:$0xff] %v4042_v48   ;;  %v2978_v20 = vadd.f32 %v4590_v56, %v5556_v35  ;;  %v4592_v27 = vadd.f32 %v2739_v62, %v1329_v12 }
 0x1b1   : > { %4145 = vst [vmem:[%s5565_s8 + $0x60] sm:$0xff] %v4037_v11   ;;  %v3108_v49 = vmul.f32 0.2, %v2980_v26  ;;  %v2981_v58 = vadd.f32 %v4591_v55, %v5556_v35  ;;  %vm3044_vm15 = vcmp.ge.f32.partialorder %v2980_v26, 0.0  ;;  %v4399_v41 = vpop.f32.mrb[32].mxu1 }
 0x1b2   : > { %v3106_v7 = vmul.f32 0.2, %v2978_v20  ;;  %v2979_v21 = vadd.f32 %v4592_v27, %v5556_v35  ;;  %vm3042_vm0 = vcmp.ge.f32.partialorder %v2978_v20, 0.0  ;;  %v1342_v18 = vpop.f32.mrb[33].mxu1 }
 0x1b3   : > { %vm3045_vm1 = vcmp.ge.f32.partialorder %v2981_v58, 0.0  ;;  %v3109_v52 = vmul.f32 0.2, %v2981_v58  ;;  %v4400_v42 = vpop.f32.mrb[34].mxu1  ;;  %v3172_v8 = vsel %vm3044_vm15, %v2980_v26, %v3108_v49 }
 0x1b4   : > { %vm3043_vm2 = vcmp.ge.f32.partialorder %v2979_v21, 0.0  ;;  %v3107_v44 = vmul.f32 0.2, %v2979_v21  ;;  %v4531_v39 = vpop.f32.mrb[32].mxu0  ;;  %v1345_v22 = vpop.f32.mrb[35].mxu1  ;;  %v3170_v29 = vsel %vm3042_vm0, %v2978_v20, %v3106_v7 }
 0x1b5   : > { %v3173_v53 = vsel %vm3045_vm1, %v2981_v58, %v3109_v52  ;;  %v4593_v38 = vadd.f32 %v4531_v39, %v4399_v41  ;;  %v2752_v4 = vpop.f32.mrb[33].mxu0 }
 0x1b6   : > { %v4052_v57 = vpack.c.bf16 %v3173_v53, %v3172_v8  ;;  %v3171_v61 = vsel %vm3043_vm2, %v2979_v21, %v3107_v44  ;;  %v4594_v0 = vadd.f32 %v2752_v4, %v1342_v18  ;;  %v4532_v16 = vpop.f32.mrb[34].mxu0 }
 0x1b7   : > { %v4047_v40 = vpack.c.bf16 %v3171_v61, %v3170_v29  ;;  %v2984_v54 = vadd.f32 %v4593_v38, %v5556_v35  ;;  %v4595_v60 = vadd.f32 %v4532_v16, %v4400_v42  ;;  %v2755_v23 = vpop.f32.mrb[35].mxu0 }
 0x1b8   : > { %4148 = vst [vmem:[%s5565_s8 + $0x78] sm:$0xff] %v4052_v57   ;;  %v2982_v46 = vadd.f32 %v4594_v0, %v5556_v35  ;;  %v4596_v34 = vadd.f32 %v2755_v23, %v1345_v22 }
 0x1b9   : > { %4147 = vst [vmem:[%s5565_s8 + $0x70] sm:$0xff] %v4047_v40   ;;  %v3112_v6 = vmul.f32 0.2, %v2984_v54  ;;  %v2985_v24 = vadd.f32 %v4595_v60, %v5556_v35  ;;  %vm3048_vm3 = vcmp.ge.f32.partialorder %v2984_v54, 0.0  ;;  %v4403_v32 = vpop.f32.mrb[36].mxu1 }
 0x1ba   : > { %v3110_v14 = vmul.f32 0.2, %v2982_v46  ;;  %v2983_v47 = vadd.f32 %v4596_v34, %v5556_v35  ;;  %vm3046_vm4 = vcmp.ge.f32.partialorder %v2982_v46, 0.0  ;;  %v1358_v36 = vpop.f32.mrb[37].mxu1 }
 0x1bb   : > { %vm3049_vm5 = vcmp.ge.f32.partialorder %v2985_v24, 0.0  ;;  %v3113_v25 = vmul.f32 0.2, %v2985_v24  ;;  %v4404_v15 = vpop.f32.mrb[38].mxu1  ;;  %v3176_v2 = vsel %vm3048_vm3, %v2984_v54, %v3112_v6 }
 0x1bc   : > { %vm3047_vm6 = vcmp.ge.f32.partialorder %v2983_v47, 0.0  ;;  %v3111_v19 = vmul.f32 0.2, %v2983_v47  ;;  %v4535_v28 = vpop.f32.mrb[36].mxu0  ;;  %v1361_v33 = vpop.f32.mrb[39].mxu1  ;;  %v3174_v45 = vsel %vm3046_vm4, %v2982_v46, %v3110_v14 }
 0x1bd   : > { %v3177_v17 = vsel %vm3049_vm5, %v2985_v24, %v3113_v25  ;;  %v4597_v9 = vadd.f32 %v4535_v28, %v4403_v32  ;;  %v2768_v30 = vpop.f32.mrb[37].mxu0 }
 0x1be   : > { %v4062_v37 = vpack.c.bf16 %v3177_v17, %v3176_v2  ;;  %v3175_v63 = vsel %vm3047_vm6, %v2983_v47, %v3111_v19  ;;  %v4598_v10 = vadd.f32 %v2768_v30, %v1358_v36  ;;  %v4536_v13 = vpop.f32.mrb[38].mxu0 }
 0x1bf   : > { %v4057_v50 = vpack.c.bf16 %v3175_v63, %v3174_v45  ;;  %v2988_v31 = vadd.f32 %v4597_v9, %v5556_v35  ;;  %v4599_v59 = vadd.f32 %v4536_v13, %v4404_v15  ;;  %v2771_v43 = vpop.f32.mrb[39].mxu0 }
 0x1c0   : > { %4150 = vst [vmem:[%s5565_s8 + $0x88] sm:$0xff] %v4062_v37   ;;  %v2986_v3 = vadd.f32 %v4598_v10, %v5556_v35  ;;  %v4600_v12 = vadd.f32 %v2771_v43, %v1361_v33 }
 0x1c1   : > { %4149 = vst [vmem:[%s5565_s8 + $0x80] sm:$0xff] %v4057_v50   ;;  %v3116_v1 = vmul.f32 0.2, %v2988_v31  ;;  %v2989_v48 = vadd.f32 %v4599_v59, %v5556_v35  ;;  %vm3052_vm7 = vcmp.ge.f32.partialorder %v2988_v31, 0.0  ;;  %v4407_v5 = vpop.f32.mrb[40].mxu1 }
 0x1c2   : > { %v3114_v51 = vmul.f32 0.2, %v2986_v3  ;;  %v2987_v56 = vadd.f32 %v4600_v12, %v5556_v35  ;;  %vm3050_vm8 = vcmp.ge.f32.partialorder %v2986_v3, 0.0  ;;  %v1374_v26 = vpop.f32.mrb[41].mxu1 }
 0x1c3   : > { %vm3053_vm9 = vcmp.ge.f32.partialorder %v2989_v48, 0.0  ;;  %v3117_v11 = vmul.f32 0.2, %v2989_v48  ;;  %v4408_v20 = vpop.f32.mrb[42].mxu1  ;;  %v3180_v27 = vsel %vm3052_vm7, %v2988_v31, %v3116_v1 }
 0x1c4   : > { %vm3051_vm10 = vcmp.ge.f32.partialorder %v2987_v56, 0.0  ;;  %v3115_v55 = vmul.f32 0.2, %v2987_v56  ;;  %v4539_v62 = vpop.f32.mrb[40].mxu0  ;;  %v1377_v21 = vpop.f32.mrb[43].mxu1  ;;  %v3178_v41 = vsel %vm3050_vm8, %v2986_v3, %v3114_v51 }
 0x1c5   : > { %v3181_v49 = vsel %vm3053_vm9, %v2989_v48, %v3117_v11  ;;  %v4601_v58 = vadd.f32 %v4539_v62, %v4407_v5  ;;  %v2784_v7 = vpop.f32.mrb[41].mxu0 }
 0x1c6   : > { %v4072_v52 = vpack.c.bf16 %v3181_v49, %v3180_v27  ;;  %v3179_v18 = vsel %vm3051_vm10, %v2987_v56, %v3115_v55  ;;  %v4602_v44 = vadd.f32 %v2784_v7, %v1374_v26  ;;  %v4540_v39 = vpop.f32.mrb[42].mxu0 }
 0x1c7   : > { %v4067_v42 = vpack.c.bf16 %v3179_v18, %v3178_v41  ;;  %v2992_v8 = vadd.f32 %v4601_v58, %v5556_v35  ;;  %v4603_v53 = vadd.f32 %v4540_v39, %v4408_v20  ;;  %v2787_v38 = vpop.f32.mrb[43].mxu0 }
 0x1c8   : > { %4152 = vst [vmem:[%s5565_s8 + $0x98] sm:$0xff] %v4072_v52   ;;  %v2990_v4 = vadd.f32 %v4602_v44, %v5556_v35  ;;  %v4604_v22 = vadd.f32 %v2787_v38, %v1377_v21 }
 0x1c9   : > { %4151 = vst [vmem:[%s5565_s8 + $0x90] sm:$0xff] %v4067_v42   ;;  %v3120_v29 = vmul.f32 0.2, %v2992_v8  ;;  %v2993_v57 = vadd.f32 %v4603_v53, %v5556_v35  ;;  %vm3056_vm11 = vcmp.ge.f32.partialorder %v2992_v8, 0.0  ;;  %v4411_v16 = vpop.f32.mrb[44].mxu1 }
 0x1ca   : > { %v3118_v61 = vmul.f32 0.2, %v2990_v4  ;;  %v2991_v0 = vadd.f32 %v4604_v22, %v5556_v35  ;;  %vm3054_vm12 = vcmp.ge.f32.partialorder %v2990_v4, 0.0  ;;  %v1390_v54 = vpop.f32.mrb[45].mxu1 }
 0x1cb   : > { %vm3057_vm13 = vcmp.ge.f32.partialorder %v2993_v57, 0.0  ;;  %v3121_v40 = vmul.f32 0.2, %v2993_v57  ;;  %v4412_v46 = vpop.f32.mrb[46].mxu1  ;;  %v3184_v34 = vsel %vm3056_vm11, %v2992_v8, %v3120_v29 }
 0x1cc   : > { %vm3055_vm14 = vcmp.ge.f32.partialorder %v2991_v0, 0.0  ;;  %v3119_v60 = vmul.f32 0.2, %v2991_v0  ;;  %v4543_v23 = vpop.f32.mrb[44].mxu0  ;;  %v1393_v47 = vpop.f32.mrb[47].mxu1  ;;  %v3182_v32 = vsel %vm3054_vm12, %v2990_v4, %v3118_v61 }
 0x1cd   : > { %v3185_v6 = vsel %vm3057_vm13, %v2993_v57, %v3121_v40  ;;  %v4605_v24 = vadd.f32 %v4543_v23, %v4411_v16  ;;  %v2800_v14 = vpop.f32.mrb[45].mxu0 }
 0x1ce   : > { %v4082_v25 = vpack.c.bf16 %v3185_v6, %v3184_v34  ;;  %v3183_v36 = vsel %vm3055_vm14, %v2991_v0, %v3119_v60  ;;  %v4606_v19 = vadd.f32 %v2800_v14, %v1390_v54  ;;  %v4544_v28 = vpop.f32.mrb[46].mxu0 }
 0x1cf   : > { %v4077_v15 = vpack.c.bf16 %v3183_v36, %v3182_v32  ;;  %v2996_v2 = vadd.f32 %v4605_v24, %v5556_v35  ;;  %v4607_v17 = vadd.f32 %v4544_v28, %v4412_v46  ;;  %v2803_v9 = vpop.f32.mrb[47].mxu0 }
 0x1d0   : > { %4154 = vst [vmem:[%s5565_s8 + $0xa8] sm:$0xff] %v4082_v25   ;;  %v2994_v30 = vadd.f32 %v4606_v19, %v5556_v35  ;;  %v4608_v33 = vadd.f32 %v2803_v9, %v1393_v47 }
 0x1d1   : > { %4153 = vst [vmem:[%s5565_s8 + $0xa0] sm:$0xff] %v4077_v15   ;;  %v3124_v45 = vmul.f32 0.2, %v2996_v2  ;;  %v2997_v37 = vadd.f32 %v4607_v17, %v5556_v35  ;;  %vm3060_vm15 = vcmp.ge.f32.partialorder %v2996_v2, 0.0  ;;  %v4415_v13 = vpop.f32.mrb[48].mxu1 }
 0x1d2   : > { %v3122_v63 = vmul.f32 0.2, %v2994_v30  ;;  %v2995_v10 = vadd.f32 %v4608_v33, %v5556_v35  ;;  %vm3058_vm0 = vcmp.ge.f32.partialorder %v2994_v30, 0.0  ;;  %v1406_v31 = vpop.f32.mrb[49].mxu1 }
 0x1d3   : > { %vm3061_vm1 = vcmp.ge.f32.partialorder %v2997_v37, 0.0  ;;  %v3125_v50 = vmul.f32 0.2, %v2997_v37  ;;  %v4416_v3 = vpop.f32.mrb[50].mxu1  ;;  %v3188_v12 = vsel %vm3060_vm15, %v2996_v2, %v3124_v45 }
 0x1d4   : > { %vm3059_vm2 = vcmp.ge.f32.partialorder %v2995_v10, 0.0  ;;  %v3123_v59 = vmul.f32 0.2, %v2995_v10  ;;  %v4547_v43 = vpop.f32.mrb[48].mxu0  ;;  %v1409_v56 = vpop.f32.mrb[51].mxu1  ;;  %v3186_v5 = vsel %vm3058_vm0, %v2994_v30, %v3122_v63 }
 0x1d5   : > { %v3189_v1 = vsel %vm3061_vm1, %v2997_v37, %v3125_v50  ;;  %v4609_v48 = vadd.f32 %v4547_v43, %v4415_v13  ;;  %v2816_v51 = vpop.f32.mrb[49].mxu0 }
 0x1d6   : > { %v4092_v11 = vpack.c.bf16 %v3189_v1, %v3188_v12  ;;  %v3187_v26 = vsel %vm3059_vm2, %v2995_v10, %v3123_v59  ;;  %v4610_v55 = vadd.f32 %v2816_v51, %v1406_v31  ;;  %v4548_v62 = vpop.f32.mrb[50].mxu0 }
 0x1d7   : > { %v4087_v20 = vpack.c.bf16 %v3187_v26, %v3186_v5  ;;  %v3000_v27 = vadd.f32 %v4609_v48, %v5556_v35  ;;  %v4611_v49 = vadd.f32 %v4548_v62, %v4416_v3  ;;  %v2819_v58 = vpop.f32.mrb[51].mxu0 }
 0x1d8   : > { %4156 = vst [vmem:[%s5565_s8 + $0xb8] sm:$0xff] %v4092_v11   ;;  %v2998_v7 = vadd.f32 %v4610_v55, %v5556_v35  ;;  %v4612_v21 = vadd.f32 %v2819_v58, %v1409_v56 }
 0x1d9   : > { %4155 = vst [vmem:[%s5565_s8 + $0xb0] sm:$0xff] %v4087_v20   ;;  %v3128_v41 = vmul.f32 0.2, %v3000_v27  ;;  %v3001_v52 = vadd.f32 %v4611_v49, %v5556_v35  ;;  %vm3064_vm3 = vcmp.ge.f32.partialorder %v3000_v27, 0.0  ;;  %v4419_v39 = vpop.f32.mrb[52].mxu1 }
 0x1da   : > { %v3126_v18 = vmul.f32 0.2, %v2998_v7  ;;  %v2999_v44 = vadd.f32 %v4612_v21, %v5556_v35  ;;  %vm3062_vm4 = vcmp.ge.f32.partialorder %v2998_v7, 0.0  ;;  %v1422_v8 = vpop.f32.mrb[53].mxu1 }
 0x1db   : > { %vm3065_vm5 = vcmp.ge.f32.partialorder %v3001_v52, 0.0  ;;  %v3129_v42 = vmul.f32 0.2, %v3001_v52  ;;  %v4420_v4 = vpop.f32.mrb[54].mxu1  ;;  %v3192_v22 = vsel %vm3064_vm3, %v3000_v27, %v3128_v41 }
 0x1dc   : > { %vm3063_vm6 = vcmp.ge.f32.partialorder %v2999_v44, 0.0  ;;  %v3127_v53 = vmul.f32 0.2, %v2999_v44  ;;  %v4551_v38 = vpop.f32.mrb[52].mxu0  ;;  %v1425_v0 = vpop.f32.mrb[55].mxu1  ;;  %v3190_v16 = vsel %vm3062_vm4, %v2998_v7, %v3126_v18 }
 0x1dd   : > { %v3193_v29 = vsel %vm3065_vm5, %v3001_v52, %v3129_v42  ;;  %v4613_v57 = vadd.f32 %v4551_v38, %v4419_v39  ;;  %v2832_v61 = vpop.f32.mrb[53].mxu0 }
 0x1de   : > { %v4102_v40 = vpack.c.bf16 %v3193_v29, %v3192_v22  ;;  %v3191_v54 = vsel %vm3063_vm6, %v2999_v44, %v3127_v53  ;;  %v4614_v60 = vadd.f32 %v2832_v61, %v1422_v8  ;;  %v4552_v23 = vpop.f32.mrb[54].mxu0 }
 0x1df   : > { %v4097_v46 = vpack.c.bf16 %v3191_v54, %v3190_v16  ;;  %v3004_v34 = vadd.f32 %v4613_v57, %v5556_v35  ;;  %v4615_v6 = vadd.f32 %v4552_v23, %v4420_v4  ;;  %v2835_v24 = vpop.f32.mrb[55].mxu0 }
 0x1e0   : > { %4158 = vst [vmem:[%s5565_s8 + $0xc8] sm:$0xff] %v4102_v40   ;;  %v3002_v14 = vadd.f32 %v4614_v60, %v5556_v35  ;;  %v4616_v47 = vadd.f32 %v2835_v24, %v1425_v0 }
 0x1e1   : > { %4157 = vst [vmem:[%s5565_s8 + $0xc0] sm:$0xff] %v4097_v46   ;;  %v3132_v32 = vmul.f32 0.2, %v3004_v34  ;;  %v3005_v25 = vadd.f32 %v4615_v6, %v5556_v35  ;;  %vm3068_vm7 = vcmp.ge.f32.partialorder %v3004_v34, 0.0  ;;  %v4423_v28 = vpop.f32.mrb[56].mxu1 }
 0x1e2   : > { %v3130_v36 = vmul.f32 0.2, %v3002_v14  ;;  %v3003_v19 = vadd.f32 %v4616_v47, %v5556_v35  ;;  %vm3066_vm8 = vcmp.ge.f32.partialorder %v3002_v14, 0.0  ;;  %v1438_v2 = vpop.f32.mrb[57].mxu1 }
 0x1e3   : > { %vm3069_vm9 = vcmp.ge.f32.partialorder %v3005_v25, 0.0  ;;  %v3133_v15 = vmul.f32 0.2, %v3005_v25  ;;  %v4424_v30 = vpop.f32.mrb[58].mxu1  ;;  %v3196_v33 = vsel %vm3068_vm7, %v3004_v34, %v3132_v32 }
 0x1e4   : > { %vm3067_vm10 = vcmp.ge.f32.partialorder %v3003_v19, 0.0  ;;  %v3131_v17 = vmul.f32 0.2, %v3003_v19  ;;  %v4555_v9 = vpop.f32.mrb[56].mxu0  ;;  %v1441_v10 = vpop.f32.mrb[59].mxu1  ;;  %v3194_v13 = vsel %vm3066_vm8, %v3002_v14, %v3130_v36 }
 0x1e5   : > { %v3197_v45 = vsel %vm3069_vm9, %v3005_v25, %v3133_v15  ;;  %v4617_v37 = vadd.f32 %v4555_v9, %v4423_v28  ;;  %v2848_v63 = vpop.f32.mrb[57].mxu0 }
 0x1e6   : > { %v4112_v50 = vpack.c.bf16 %v3197_v45, %v3196_v33  ;;  %v3195_v31 = vsel %vm3067_vm10, %v3003_v19, %v3131_v17  ;;  %v4618_v59 = vadd.f32 %v2848_v63, %v1438_v2  ;;  %v4556_v43 = vpop.f32.mrb[58].mxu0 }
 0x1e7   : > { %v4107_v3 = vpack.c.bf16 %v3195_v31, %v3194_v13  ;;  %v3008_v12 = vadd.f32 %v4617_v37, %v5556_v35  ;;  %v4619_v1 = vadd.f32 %v4556_v43, %v4424_v30  ;;  %v2851_v48 = vpop.f32.mrb[59].mxu0 }
 0x1e8   : > { %4160 = vst [vmem:[%s5565_s8 + $0xd8] sm:$0xff] %v4112_v50   ;;  %v3006_v51 = vadd.f32 %v4618_v59, %v5556_v35  ;;  %v4620_v56 = vadd.f32 %v2851_v48, %v1441_v10 }
 0x1e9   : > { %4159 = vst [vmem:[%s5565_s8 + $0xd0] sm:$0xff] %v4107_v3   ;;  %v3136_v5 = vmul.f32 0.2, %v3008_v12  ;;  %v3009_v11 = vadd.f32 %v4619_v1, %v5556_v35  ;;  %vm3072_vm11 = vcmp.ge.f32.partialorder %v3008_v12, 0.0  ;;  %v4427_v62 = vpop.f32.mrb[60].mxu1 }
 0x1ea   : > { %v3134_v26 = vmul.f32 0.2, %v3006_v51  ;;  %v3007_v55 = vadd.f32 %v4620_v56, %v5556_v35  ;;  %vm3070_vm12 = vcmp.ge.f32.partialorder %v3006_v51, 0.0  ;;  %v1454_v27 = vpop.f32.mrb[61].mxu1 }
 0x1eb   : > { %vm3073_vm13 = vcmp.ge.f32.partialorder %v3009_v11, 0.0  ;;  %v3137_v20 = vmul.f32 0.2, %v3009_v11  ;;  %v4428_v7 = vpop.f32.mrb[62].mxu1  ;;  %v3200_v21 = vsel %vm3072_vm11, %v3008_v12, %v3136_v5 }
 0x1ec   : > { %vm3071_vm14 = vcmp.ge.f32.partialorder %v3007_v55, 0.0  ;;  %v3135_v49 = vmul.f32 0.2, %v3007_v55  ;;  %v4559_v58 = vpop.f32.mrb[60].mxu0  ;;  %v1457_v44 = vpop.f32.mrb[63].mxu1  ;;  %v3198_v39 = vsel %vm3070_vm12, %v3006_v51, %v3134_v26 }
 0x1ed   : > { %v3201_v41 = vsel %vm3073_vm13, %v3009_v11, %v3137_v20  ;;  %v4621_v52 = vadd.f32 %v4559_v58, %v4427_v62  ;;  %v2864_v18 = vpop.f32.mrb[61].mxu0 }
 0x1ee   : > { %v4122_v42 = vpack.c.bf16 %v3201_v41, %v3200_v21  ;;  %v3199_v8 = vsel %vm3071_vm14, %v3007_v55, %v3135_v49  ;;  %v4622_v53 = vadd.f32 %v2864_v18, %v1454_v27  ;;  %v4560_v38 = vpop.f32.mrb[62].mxu0 }
 0x1ef   : > { %v4117_v4 = vpack.c.bf16 %v3199_v8, %v3198_v39  ;;  %v3012_v22 = vadd.f32 %v4621_v52, %v5556_v35  ;;  %v4623_v29 = vadd.f32 %v4560_v38, %v4428_v7  ;;  %v2867_v57 = vpop.f32.mrb[63].mxu0 }
 0x1f0   : > { %4162 = vst [vmem:[%s5565_s8 + $0xe8] sm:$0xff] %v4122_v42   ;;  %v3010_v61 = vadd.f32 %v4622_v53, %v5556_v35  ;;  %v4624_v0 = vadd.f32 %v2867_v57, %v1457_v44 }
 0x1f1   : > { %4161 = vst [vmem:[%s5565_s8 + $0xe0] sm:$0xff] %v4117_v4   ;;  %v3140_v16 = vmul.f32 0.2, %v3012_v22  ;;  %v3013_v40 = vadd.f32 %v4623_v29, %v5556_v35  ;;  %vm3076_vm15 = vcmp.ge.f32.partialorder %v3012_v22, 0.0 }
 0x1f2   : > { %v3138_v54 = vmul.f32 0.2, %v3010_v61  ;;  %v3011_v60 = vadd.f32 %v4624_v0, %v5556_v35  ;;  %vm3074_vm0 = vcmp.ge.f32.partialorder %v3010_v61, 0.0 }
 0x1f3   : > { %vm3077_vm1 = vcmp.ge.f32.partialorder %v3013_v40, 0.0  ;;  %v3141_v23 = vmul.f32 0.2, %v3013_v40  ;;  %v3204_v34 = vsel %vm3076_vm15, %v3012_v22, %v3140_v16 }
 0x1f4   : > { %vm3075_vm2 = vcmp.ge.f32.partialorder %v3011_v60, 0.0  ;;  %v3139_v46 = vmul.f32 0.2, %v3011_v60  ;;  %v3202_v24 = vsel %vm3074_vm0, %v3010_v61, %v3138_v54 }
 0x1f5   : > { %v3205_v6 = vsel %vm3077_vm1, %v3013_v40, %v3141_v23 }
 0x1f6   : > { %v4132_v14 = vpack.c.bf16 %v3205_v6, %v3204_v34  ;;  %v3203_v47 = vsel %vm3075_vm2, %v3011_v60, %v3139_v46 }
 0x1f7   : > { %v4127_v32 = vpack.c.bf16 %v3203_v47, %v3202_v24 }
 0x1f8   : > { %4164 = vst [vmem:[%s5565_s8 + $0xf8] sm:$0xff] %v4132_v14  }
 0x1f9   : > { %4163 = vst [vmem:[%s5565_s8 + $0xf0] sm:$0xff] %v4127_v32  }
 0x1fa PF: > { %s13_s14 = sadd.s32 1, %s4892_s14   ;;  %s5683_s12 = smov %s4888_s13 }
 0x1fb   : > { %p10_p6 = scmp.ge.s32.totalorder %s13_s14, 4   ;;  %s5684_s13 = smov %s5686_s15 }
 0x1fd   :  { %12 = sbr.rel (!%p10_p6) target bundleno = 2 (0x2), region = 71 }

// kernel: discriminator_forward.6
= control target key start
LH: loop header
LB: loop body
LE: loop exit
PB: predicated region body
PF: predicated region fallthrough
CT: control target
= control target key end

     0   :  { %v2433_v0 = vmov 0.0   ;;  %vm2434_vm0 = vmmov 0   ;;  %vm109_vm1 = vsmask.f32 7424  ;;  %vm221_vm2 = vcmask 523264   ;;  %s3673_s1 = inlined_call_operand.vmem [shape: bf16[4,64,128], index: 1, kind: input, shape index: {}]   ;;  %s3674_s0 = inlined_call_operand.vmem [shape: bf16[1,184,64], index: 0, kind: input, shape index: {}]   ;;  %s3675_s2 = inlined_call_operand.vmem [shape: bf16[168,128], index: 2, kind: output, shape index: {0}]   ;;  %s3676_s3 = inlined_call_operand.vmem [shape: f32[1,1,128], index: 3, kind: output, shape index: {1}]   ;;  %s3677_s4 = inlined_call_operand.vmem [shape: f32[1,1,128], index: 4, kind: output, shape index: {2}]  }
   0x1   :  { %2074 = vmatprep.subr.bf16.mxu1 %v2433_v0  ;;  %2178 = vmatprep.subr.bf16.mxu0 %v2433_v0  ;;  %v2393_v1 = vld [vmem:[%s3673_s1 + $0x20] sm:$0xff]   ;;  %v2395_v3 = vld [vmem:[%s3673_s1 + $0x28] sm:$0xff]   ;;  %v2397_v5 = vld [vmem:[%s3673_s1 + $0x30] sm:$0xff]   ;;  %vm927_vm3 = vcmask 1046528  }
   0x2   :  { %v2394_v2 = vld [vmem:[%s3673_s1 + $0x40] sm:$0xff]   ;;  %2082 = vmatprep.mubr.msk.bf16.mxu1 %vm2434_vm0, %v2433_v0  ;;  %2186 = vmatprep.mubr.msk.bf16.mxu0 %vm2434_vm0, %v2433_v0  ;;  %v2396_v4 = vld [vmem:[%s3673_s1 + $0x48] sm:$0xff]   ;;  %v2398_v6 = vld [vmem:[%s3673_s1 + $0x50] sm:$0xff]  }
   0x3   :  { %2075 = vmatpush3.bf16.msra.mxu1 %v2393_v1  ;;  %2179 = vmatpush3.bf16.msra.mxu0 %v2394_v2  ;;  %v2399_v7 = vld [vmem:[%s3673_s1 + $0x38] sm:$0xff]   ;;  %v2497_v9 = vld [vmem:[%s3674_s0] sm:$0xff]   ;;  %v2502_v10 = vld [vmem:[%s3674_s0 + $0x8] sm:$0xff]  }
   0x4   :  { %2076 = vmatprep.subr.bf16.mxu1 %v2433_v0  ;;  %2180 = vmatprep.subr.bf16.mxu0 %v2433_v0  ;;  %v2400_v8 = vld [vmem:[%s3673_s1 + $0x58] sm:$0xff]   ;;  %v543_v11 = vld [vmem:[%s3674_s0 + $0x4] sm:$0xf]  ;;  %v2510_v12 = vld [vmem:[%s3674_s0 + $0x8] sm:$0xf]  ;;  %v111_v13 = vshrl.u32 %v2497_v9, 16 }
   0x5   :  { %v113_v14 = vshll.u32 %v2497_v9, 16  ;;  %v118_v15 = vshll.u32 %v2502_v10, 16  ;;  %v1842_v16 = vcombine.low %v543_v11, %v2510_v12  ;;  %v2520_v17 = vld [vmem:[%s3674_s0 + $0xc] sm:$0xff]   ;;  %v2405_v22 = vld [vmem:[%s3673_s1] sm:$0xff]   ;;  %v122_v24 = vshrl.u32 %v2502_v10, 16  ;;  %v2541_v30 = vld [vmem:[%s3674_s0 + $0x14] sm:$0xff]  }
   0x6   :  { %v637_v23 = vshll.u32 %v2520_v17, 16  ;;  %v2532_v27 = vld [vmem:[%s3674_s0 + $0x10] sm:$0xff]   ;;  %v2406_v29 = vld [vmem:[%s3673_s1 + $0x60] sm:$0xff]   ;;  %v641_v34 = vshrl.u32 %v2520_v17, 16  ;;  %v645_v35 = vshll.u32 %v2541_v30, 16  ;;  %v2554_v39 = vld [vmem:[%s3674_s0 + $0x18] sm:$0xff]  }
   0x7   :  { %2077 = vmatpush3.bf16.msra.mxu1 %v2395_v3  ;;  %2181 = vmatpush3.bf16.msra.mxu0 %v2396_v4  ;;  %v115_v18 = vrot.slane %v113_v14, 1  ;;  %v120_v19 = vrot.slane %v118_v15, 1  ;;  %v630_v20 = vshrl.u32 %v1842_v16, 16  ;;  %v632_v21 = vshll.u32 %v1842_v16, 16  ;;  %v2411_v40 = vld [vmem:[%s3673_s1 + $0x8] sm:$0xff]   ;;  %v2563_v41 = vld [vmem:[%s3674_s0 + $0x1c] sm:$0xff]  }
   0x8   :  { %2078 = vmatprep.subr.bf16.mxu1 %v2433_v0  ;;  %2182 = vmatprep.subr.bf16.mxu0 %v2433_v0  ;;  %v639_v28 = vrot.slane %v637_v23, 1  ;;  %v126_v33 = vshll.u32 %v2532_v27, 16  ;;  %v647_v43 = vrot.slane %v645_v35, 1  ;;  %v2412_v44 = vld [vmem:[%s3673_s1 + $0x68] sm:$0xff]   ;;  %v130_v46 = vshrl.u32 %v2532_v27, 16  ;;  %v2583_v51 = vld [vmem:[%s3674_s0 + $0x20] sm:$0xff]  }
   0x9   :  { %v116_v25 = vor.u32 %v115_v18, %v111_v13  ;;  %v634_v26 = vrot.slane %v632_v21, 1  ;;  %v124_v37 = vor.u32 %v122_v24, %v120_v19  ;;  %v134_v47 = vshll.u32 %v2554_v39, 16  ;;  %v2588_v52 = vld [vmem:[%s3674_s0 + $0x24] sm:$0xff]   ;;  %v2419_v58 = vld [vmem:[%s3673_s1 + $0x10] sm:$0xff]  }
   0xa   :  { %v128_v38 = vrot.slane %v126_v33, 1  ;;  %v643_v42 = vor.u32 %v641_v34, %v639_v28  ;;  %v649_v49 = vshrl.u32 %v2541_v30, 16  ;;  %v653_v50 = vshll.u32 %v2563_v41, 16  ;;  %v2597_v55 = vld [vmem:[%s3674_s0 + $0x28] sm:$0xff]   ;;  %v2420_v62 = vld [vmem:[%s3673_s1 + $0x70] sm:$0xff]   ;;  %v2428_v33 = vld [vmem:[%s3673_s1 + $0x78] sm:$0xff]  }
   0xb   :  { %2079 = vmatpush3.bf16.msra.mxu1 %v2397_v5  ;;  %2183 = vmatpush3.bf16.msra.mxu0 %v2398_v6  ;;  %v121_v31 = vsel %vm109_vm1, %v116_v25, %v120_v19  ;;  %v635_v32 = vor.u32 %v634_v26, %v630_v20  ;;  %v136_v54 = vrot.slane %v134_v47, 1  ;;  %v138_v59 = vshrl.u32 %v2554_v39, 16  ;;  %v2618_v4 = vld [vmem:[%s3674_s0 + $0x2c] sm:$0xff]   ;;  %v2634_v14 = vld [vmem:[%s3674_s0 + $0x44] sm:$0xff]  }
   0xc   :  { %2080 = vmatprep.subr.bf16.mxu1 %v2433_v0  ;;  %2184 = vmatprep.subr.bf16.mxu0 %v2433_v0  ;;  %v129_v45 = vsel %vm109_vm1, %v124_v37, %v128_v38  ;;  %v648_v48 = vsel %vm109_vm1, %v643_v42, %v647_v43  ;;  %v132_v53 = vor.u32 %v130_v46, %v128_v38  ;;  %v655_v57 = vrot.slane %v653_v50, 1  ;;  %v2623_v5 = vld [vmem:[%s3674_s0 + $0x30] sm:$0xff]   ;;  %v2639_v15 = vld [vmem:[%s3674_s0 + $0x48] sm:$0xff]   ;;  %v914_v50 = vld [vmem:[%s3674_s0 + $0x4] sm:$0xe] }
   0xd   :  { %v640_v36 = vsel %vm109_vm1, %v635_v32, %v639_v28  ;;  %v651_v56 = vor.u32 %v649_v49, %v647_v43  ;;  %v142_v60 = vshll.u32 %v2583_v51, 16  ;;  %v661_v61 = vshll.u32 %v2588_v52, 16  ;;  %v2655_v25 = vld [vmem:[%s3674_s0 + $0x4c] sm:$0xff]   ;;  %v2427_v28 = vld [vmem:[%s3673_s1 + $0x18] sm:$0xff]  }
   0xe   :  { %v137_v63 = vsel %vm109_vm1, %v132_v53, %v136_v54  ;;  %v657_v1 = vshrl.u32 %v2563_v41, 16  ;;  %v150_v2 = vshll.u32 %v2597_v55, 16  ;;  %v665_v13 = vshrl.u32 %v2588_v52, 16  ;;  %v2675_v38 = vld [vmem:[%s3674_s0 + $0x50] sm:$0xf] }
   0xf   :  { %2081 = vmatpush3.bf16.msra.mxu1 %v2399_v7  ;;  %2185 = vmatpush3.bf16.msra.mxu0 %v2400_v8  ;;  %v656_v3 = vsel %vm109_vm1, %v651_v56, %v655_v57  ;;  %v144_v6 = vrot.slane %v142_v60, 1  ;;  %v146_v7 = vshrl.u32 %v2583_v51, 16  ;;  %v140_v8 = vor.u32 %v138_v59, %v136_v54  ;;  %v2694_v49 = vld [vmem:[%s3674_s0 + $0x54] sm:$0x1f]  }
  0x10   :  { %2126 = vmatprep.subr.bf16.mxu1 %v2433_v0  ;;  %2230 = vmatprep.subr.bf16.mxu0 %v2433_v0  ;;  %v663_v11 = vrot.slane %v661_v61, 1  ;;  %v659_v16 = vor.u32 %v657_v1, %v655_v57  ;;  %v2642_v18 = vrot.slane %v150_v2, 1  ;;  %v154_v19 = vshrl.u32 %v2597_v55, 16  ;;  %v2418_v56 = vld [vmem:[%s3674_s0 + $0x34] sm:$0xff]  }
  0x11   :  { %v669_v20 = vshll.u32 %v2618_v4, 16  ;;  %v158_v21 = vshll.u32 %v2623_v5, 16  ;;  %v693_v23 = vshll.u32 %v2634_v14, 16  ;;  %v182_v24 = vshll.u32 %v2639_v15, 16 }
  0x12   :  { %2083 = vmatmul.mubr.msk.bf16.vlgmr.msra.gmra.mrb[0].mxu1 %vm221_vm2, %v121_v31  ;;  %2187 = vmatmul.mubr.msk.bf16.vlgmr.msra.gmra.mrb[0].mxu0 %vm221_vm2, %v640_v36  ;;  %v697_v26 = vshrl.u32 %v2634_v14, 16  ;;  %v148_v31 = vor.u32 %v146_v7, %v144_v6  ;;  %v701_v35 = vshll.u32 %v2655_v25, 16  ;;  %v664_v36 = vsel %vm109_vm1, %v659_v16, %v663_v11 }
  0x13   :  { %2127 = vmatpush3.bf16.msra.mxu1 %v2405_v22  ;;  %2086 = vmatprep.mubr.msk.bf16.mxu1 %vm2434_vm0, %v2433_v0  ;;  %v673_v22 = vshrl.u32 %v2618_v4, 16  ;;  %v2662_v32 = vrot.slane %v693_v23, 1  ;;  %v2667_v34 = vrot.slane %v182_v24, 1  ;;  %v186_v42 = vshrl.u32 %v2639_v15, 16 }
  0x14   :  { %2128 = vmatprep.subr.bf16.mxu1 %v2433_v0  ;;  %2231 = vmatpush3.bf16.msra.mxu0 %v2406_v29  ;;  %v145_v29 = vsel %vm109_vm1, %v140_v8, %v144_v6  ;;  %v705_v43 = vshrl.u32 %v2655_v25, 16  ;;  %v929_v46 = vrot.slane %v2520_v17, 1  ;;  %v153_v47 = vsel %vm109_vm1, %v148_v31, %v2642_v18 }
  0x15   :  { %2190 = vmatprep.mubr.msk.bf16.mxu0 %vm2434_vm0, %v2433_v0  ;;  %2232 = vmatprep.subr.bf16.mxu0 %v2433_v0  ;;  %v699_v37 = vor.u32 %v697_v26, %v2662_v32  ;;  %v931_v53 = vrot.slane %v2541_v30, 1  ;;  %v933_v17 = vrot.slane %v2563_v41, 1  ;;  %v671_v54 = vrot.slane %v669_v20, 1  ;;  %v2715_v30 = vld [vmem:[%s3674_s0 + $0x3c] sm:$0xff]  }
  0x16   :  { %v709_v60 = vshll.u32 %v2694_v49, 16  ;;  %v1876_v61 = vcombine.low %v914_v50, %v2510_v12  ;;  %v935_v2 = vrot.slane %v2588_v52, 1  ;;  %v939_v8 = vrot.slane %v2418_v56, 1 }
  0x17   :  { %2129 = vmatpush3.bf16.msra.mxu1 %v2411_v40  ;;  %v44_v40 = vld [vmem:[%s3674_s0 + $0x54] sm:$0x1]  ;;  %v2725_v1 = vsel %vm927_vm3, %v931_v53, %v933_v17  ;;  %v945_v31 = vrot.slane %v2655_v25, 1 }
  0x18   :  { %2130 = vmatprep.subr.bf16.mxu1 %v2433_v0  ;;  %2233 = vmatpush3.bf16.msra.mxu0 %v2412_v44  ;;  %v703_v44 = vrot.slane %v701_v35, 1  ;;  %v2729_v6 = vrot.slane %v709_v60, 1  ;;  %v928_v7 = vrot.slane %v1876_v61, 1  ;;  %v2737_v16 = vsel %vm927_vm3, %v933_v17, %v935_v2 }
  0x19   :  { %2234 = vmatprep.subr.bf16.mxu0 %v2433_v0  ;;  %v156_v35 = vor.u32 %v154_v19, %v2642_v18  ;;  %v675_v19 = vor.u32 %v673_v22, %v671_v54  ;;  %v2797_v22 = vld [vmem:[%s3674_s0 + $0x40] sm:$0xff]  }
  0x1a   :  { %2087 = vmatmul.mubr.msk.bf16.gmra.mrb[4].mxu1 %vm221_vm2, %v129_v45  ;;  %2191 = vmatmul.mubr.msk.bf16.gmra.mrb[4].mxu0 %vm221_vm2, %v648_v48  ;;  %v2684_v45 = vcombine.low %v2675_v38, %v44_v40  ;;  %v667_v48 = vor.u32 %v665_v13, %v663_v11  ;;  %v2706_v57 = vsel %vm109_vm1, %v699_v37, %v703_v44  ;;  %v941_v11 = vrot.slane %v2715_v30, 1  ;;  %v2768_v37 = vld [vmem:[%s3674_s0 + $0x38] sm:$0xff]  }
  0x1b   :  { %2090 = vmatprep.mubr.msk.bf16.mxu1 %vm2434_vm0, %v2433_v0  ;;  %2194 = vmatprep.mubr.msk.bf16.mxu0 %vm2434_vm0, %v2433_v0  ;;  %v707_v41 = vor.u32 %v705_v43, %v703_v44  ;;  %v677_v13 = vshll.u32 %v2418_v56, 16  ;;  %v2746_v24 = vsel %vm927_vm3, %v928_v7, %v929_v46  ;;  %v166_v43 = vshll.u32 %v2768_v37, 16 }
  0x1c   :  { %2131 = vmatpush3.bf16.msra.mxu1 %v2419_v58  ;;  %2235 = vmatpush3.bf16.msra.mxu0 %v2420_v62  ;;  %v188_v58 = vor.u32 %v186_v42, %v2667_v34  ;;  %v190_v59 = vshll.u32 %v2684_v45, 16  ;;  %v2720_v62 = vsel %vm927_vm3, %v929_v46, %v931_v53  ;;  %v672_v52 = vsel %vm109_vm1, %v667_v48, %v671_v54 }
  0x1d   :  { %2132 = vmatprep.subr.bf16.mxu1 %v2433_v0  ;;  %2236 = vmatprep.subr.bf16.mxu0 %v2433_v0  ;;  %v712_v23 = vsel %vm109_vm1, %v707_v41, %v2729_v6  ;;  %v162_v42 = vshrl.u32 %v2623_v5, 16  ;;  %v681_v46 = vshrl.u32 %v2418_v56, 16  ;;  %v170_v54 = vshrl.u32 %v2768_v37, 16 }
  0x1e   :  { %v174_v56 = vshll.u32 %v2797_v22, 16 }
  0x20   :  { %2133 = vmatpush3.bf16.msra.mxu1 %v2427_v28  ;;  %2237 = vmatpush3.bf16.msra.mxu0 %v2428_v33  ;;  %v2753_v28 = vsel %vm927_vm3, %v939_v8, %v941_v11  ;;  %v947_v33 = vrot.slane %v2694_v49, 1  ;;  %v176_v60 = vrot.slane %v174_v56, 1 }
  0x22   :  { %2091 = vmatmul.mubr.msk.bf16.gmra.mrb[8].mxu1 %vm221_vm2, %v137_v63  ;;  %2195 = vmatmul.mubr.msk.bf16.gmra.mrb[8].mxu0 %vm221_vm2, %v656_v3  ;;  %v2722_v63 = vrot.slane %v190_v59, 1  ;;  %v937_v3 = vrot.slane %v2618_v4, 1  ;;  %v2780_v18 = vsel %vm927_vm3, %v945_v31, %v947_v33  ;;  %v168_v4 = vrot.slane %v166_v43, 1 }
  0x23   :  { %2094 = vmatprep.mubr.msk.bf16.mxu1 %vm2434_vm0, %v2433_v0  ;;  %2198 = vmatprep.mubr.msk.bf16.mxu0 %vm2434_vm0, %v2433_v0  ;;  %v689_v59 = vshrl.u32 %v2715_v30, 16 }
  0x24   :  { %v2734_v12 = vsel %vm109_vm1, %v188_v58, %v2722_v63  ;;  %v2740_v20 = vsel %vm927_vm3, %v935_v2, %v937_v3  ;;  %v2749_v26 = vsel %vm927_vm3, %v937_v3, %v939_v8  ;;  %v172_v41 = vor.u32 %v170_v54, %v168_v4 }
  0x25   :  { %v178_v3 = vshrl.u32 %v2797_v22, 16 }
  0x26   :  { %v177_v2 = vsel %vm109_vm1, %v172_v41, %v176_v60 }
  0x27   :  { %v180_v7 = vor.u32 %v178_v3, %v176_v60 }
  0x29   :  { %v185_v8 = vsel %vm109_vm1, %v180_v7, %v2667_v34  ;;  %v713_v34 = vshrl.u32 %v2694_v49, 16 }
  0x2a   :  { %2095 = vmatmul.mubr.msk.bf16.gmra.mrb[12].mxu1 %vm221_vm2, %v145_v29  ;;  %2199 = vmatmul.mubr.msk.bf16.gmra.mrb[12].mxu0 %vm221_vm2, %v664_v36  ;;  %v943_v29 = vrot.slane %v2634_v14, 1  ;;  %v160_v36 = vrot.slane %v158_v21, 1  ;;  %v679_v21 = vrot.slane %v677_v13, 1 }
  0x2b   :  { %2098 = vmatprep.mubr.msk.bf16.mxu1 %vm2434_vm0, %v2433_v0  ;;  %2202 = vmatprep.mubr.msk.bf16.mxu0 %vm2434_vm0, %v2433_v0 }
  0x2c   :  { %v2772_v14 = vsel %vm927_vm3, %v941_v11, %v943_v29  ;;  %v2775_v25 = vsel %vm927_vm3, %v943_v29, %v945_v31  ;;  %v161_v40 = vsel %vm109_vm1, %v156_v35, %v160_v36  ;;  %v680_v44 = vsel %vm109_vm1, %v675_v19, %v679_v21 }
  0x2d   :  { %v164_v48 = vor.u32 %v162_v42, %v160_v36  ;;  %v683_v50 = vor.u32 %v681_v46, %v679_v21  ;;  %v715_v11 = vor.u32 %v713_v34, %v2729_v6 }
  0x2f   :  { %v169_v17 = vsel %vm109_vm1, %v164_v48, %v168_v4 }
  0x32   :  { %2099 = vmatmul.mubr.msk.bf16.gmra.mrb[16].mxu1 %vm221_vm2, %v153_v47  ;;  %2203 = vmatmul.mubr.msk.bf16.gmra.mrb[16].mxu0 %vm221_vm2, %v672_v52  ;;  %v685_v47 = vshll.u32 %v2715_v30, 16 }
  0x33   :  { %2102 = vmatprep.mubr.msk.bf16.mxu1 %vm2434_vm0, %v2433_v0  ;;  %2206 = vmatprep.mubr.msk.bf16.mxu0 %vm2434_vm0, %v2433_v0 }
  0x34   :  { %v687_v53 = vrot.slane %v685_v47, 1 }
  0x36   :  { %v688_v58 = vsel %vm109_vm1, %v683_v50, %v687_v53  ;;  %v691_v61 = vor.u32 %v689_v59, %v687_v53 }
  0x38   :  { %v696_v30 = vsel %vm109_vm1, %v691_v61, %v2662_v32  ;;  %v194_v32 = vshrl.u32 %v2684_v45, 16 }
  0x3a   :  { %2103 = vmatmul.mubr.msk.bf16.gmra.mrb[20].mxu1 %vm221_vm2, %v161_v40  ;;  %2207 = vmatmul.mubr.msk.bf16.gmra.mrb[20].mxu0 %vm221_vm2, %v680_v44 }
  0x3b   :  { %2106 = vmatprep.mubr.msk.bf16.mxu1 %vm2434_vm0, %v2433_v0  ;;  %2210 = vmatprep.mubr.msk.bf16.mxu0 %vm2434_vm0, %v2433_v0 }
  0x42   :  { %2107 = vmatmul.mubr.msk.bf16.gmra.mrb[24].mxu1 %vm221_vm2, %v169_v17  ;;  %2211 = vmatmul.mubr.msk.bf16.gmra.mrb[24].mxu0 %vm221_vm2, %v688_v58 }
  0x43   :  { %2110 = vmatprep.mubr.msk.bf16.mxu1 %vm2434_vm0, %v2433_v0  ;;  %2214 = vmatprep.mubr.msk.bf16.mxu0 %vm2434_vm0, %v2433_v0 }
  0x4a   :  { %2111 = vmatmul.mubr.msk.bf16.gmra.mrb[28].mxu1 %vm221_vm2, %v177_v2  ;;  %2215 = vmatmul.mubr.msk.bf16.gmra.mrb[28].mxu0 %vm221_vm2, %v696_v30 }
  0x4b   :  { %2114 = vmatprep.mubr.msk.bf16.mxu1 %vm2434_vm0, %v2433_v0  ;;  %2218 = vmatprep.mubr.msk.bf16.mxu0 %vm2434_vm0, %v2433_v0 }
  0x52   :  { %2115 = vmatmul.mubr.msk.bf16.gmra.mrb[32].mxu1 %vm221_vm2, %v185_v8  ;;  %2219 = vmatmul.mubr.msk.bf16.gmra.mrb[32].mxu0 %vm221_vm2, %v2706_v57  ;;  %v196_v57 = vor.u32 %v194_v32, %v2722_v63 }
  0x53   :  { %2118 = vmatprep.mubr.msk.bf16.mxu1 %vm2434_vm0, %v2433_v0  ;;  %2222 = vmatprep.mubr.msk.bf16.mxu0 %vm2434_vm0, %v2433_v0 }
  0x5a   :  { %2119 = vmatmul.mubr.msk.bf16.gmra.mrb[36].mxu1 %vm221_vm2, %v2734_v12  ;;  %2223 = vmatmul.mubr.msk.bf16.gmra.mrb[36].mxu0 %vm221_vm2, %v712_v23 }
  0x5b   :  { %2122 = vmatprep.mubr.msk.bf16.mxu1 %vm2434_vm0, %v2433_v0  ;;  %2226 = vmatprep.mubr.msk.bf16.mxu0 %vm2434_vm0, %v2433_v0 }
  0x62   :  { %2123 = vmatmul.mubr.msk.bf16.gmra.mrb[40].mxu1 %vm221_vm2, %v196_v57  ;;  %2227 = vmatmul.mubr.msk.bf16.gmra.mrb[40].mxu0 %vm221_vm2, %v715_v11 }
  0x63   :  { %2134 = vmatprep.mubr.msk.bf16.mxu1 %vm2434_vm0, %v2433_v0  ;;  %2238 = vmatprep.mubr.msk.bf16.mxu0 %vm2434_vm0, %v2433_v0 }
  0x6a   :  { %2135 = vmatmul.mubr.msk.bf16.vlgmr.msra.gmra.mrb[0].mxu1 %vm221_vm2, %v2497_v9  ;;  %2239 = vmatmul.mubr.msk.bf16.vlgmr.msra.gmra.mrb[0].mxu0 %vm221_vm2, %v2746_v24  ;;  %v1818_v9 = vcombine.low %v2675_v38, %v2675_v38 }
  0x6b   :  { %2138 = vmatprep.mubr.msk.bf16.mxu1 %vm2434_vm0, %v2433_v0  ;;  %2242 = vmatprep.mubr.msk.bf16.mxu0 %vm2434_vm0, %v2433_v0 }
  0x72   :  { %2139 = vmatmul.mubr.msk.bf16.gmra.mrb[4].mxu1 %vm221_vm2, %v2502_v10  ;;  %2243 = vmatmul.mubr.msk.bf16.gmra.mrb[4].mxu0 %vm221_vm2, %v2720_v62  ;;  %v1254_v10 = vlaneseq }
  0x73   :  { %2142 = vmatprep.mubr.msk.bf16.mxu1 %vm2434_vm0, %v2433_v0  ;;  %2246 = vmatprep.mubr.msk.bf16.mxu0 %vm2434_vm0, %v2433_v0 }
  0x7a   :  { %2143 = vmatmul.mubr.msk.bf16.gmra.mrb[8].mxu1 %vm221_vm2, %v2532_v27  ;;  %2247 = vmatmul.mubr.msk.bf16.gmra.mrb[8].mxu0 %vm221_vm2, %v2725_v1  ;;  %v2935_v27 = vshrl.u32 %v1254_v10, 7 }
  0x7b   :  { %2146 = vmatprep.mubr.msk.bf16.mxu1 %vm2434_vm0, %v2433_v0  ;;  %2250 = vmatprep.mubr.msk.bf16.mxu0 %vm2434_vm0, %v2433_v0 }
  0x7c   :  { %v1258_v45 = vadd.s32 24, %v2935_v27  ;;  %v1259_v49 = vadd.s32 32, %v2935_v27  ;;  %v1260_v63 = vadd.s32 40, %v2935_v27  ;;  %v1261_v36 = vadd.s32 48, %v2935_v27 }
  0x7d   :  { %v1263_v48 = vadd.s32 64, %v2935_v27 }
  0x7e   :  { %v2952_v13 = vcvt.s32.f32 %v1258_v45  ;;  %v2954_v12 = vcvt.s32.f32 %v1259_v49  ;;  %v2966_v42 = vcvt.s32.f32 %v1261_v36 }
  0x7f   :  { %v2982_v41 = vcvt.s32.f32 %v1263_v48 }
  0x80   :  { %v1322_v24 = vadd.f32 0.5, %v2952_v13  ;;  %v1325_v17 = vadd.f32 0.5, %v2966_v42  ;;  %vm1533_vm3 = vcmp.lt.f32.partialorder %v2954_v12, 162.0 }
  0x81   :  { %v1327_v57 = vadd.f32 0.5, %v2982_v41 }
  0x82   :  { %2147 = vmatmul.mubr.msk.bf16.gmra.mrb[12].mxu1 %vm221_vm2, %v2554_v39  ;;  %2251 = vmatmul.mubr.msk.bf16.gmra.mrb[12].mxu0 %vm221_vm2, %v2737_v16  ;;  %v1256_v39 = vadd.s32 8, %v2935_v27  ;;  %v1343_v35 = vmul.f32 0.012345679, %v1322_v24  ;;  %v1346_v30 = vmul.f32 0.012345679, %v1325_v17 }
  0x83   :  { %2150 = vmatprep.mubr.msk.bf16.mxu1 %vm2434_vm0, %v2433_v0  ;;  %2254 = vmatprep.mubr.msk.bf16.mxu0 %vm2434_vm0, %v2433_v0 }
  0x84   :  { %v1364_v40 = vfloor.f32 %v1343_v35 }
  0x86   :  { %v1385_v53 = vmul.f32 81.0, %v1364_v40 }
  0x88   :  { %v2988_v3 = vsub.f32 %v2952_v13, %v1385_v53 }
  0x8a   :  { %2151 = vmatmul.mubr.msk.bf16.gmra.mrb[16].mxu1 %vm221_vm2, %v2583_v51  ;;  %2255 = vmatmul.mubr.msk.bf16.gmra.mrb[16].mxu0 %vm221_vm2, %v2740_v20  ;;  %v1257_v51 = vadd.s32 16, %v2935_v27  ;;  %v2956_v20 = vcvt.s32.f32 %v1260_v63  ;;  %v1348_v63 = vmul.f32 0.012345679, %v1327_v57 }
  0x8b   :  { %2154 = vmatprep.mubr.msk.bf16.mxu1 %vm2434_vm0, %v2433_v0  ;;  %2258 = vmatprep.mubr.msk.bf16.mxu0 %vm2434_vm0, %v2433_v0 }
  0x8c   :  { %v1324_v29 = vadd.f32 0.5, %v2956_v20 }
  0x92   :  { %2155 = vmatmul.mubr.msk.bf16.gmra.mrb[20].mxu1 %vm221_vm2, %v2597_v55  ;;  %2259 = vmatmul.mubr.msk.bf16.gmra.mrb[20].mxu0 %vm221_vm2, %v2749_v26  ;;  %v2940_v55 = vcvt.s32.f32 %v2935_v27  ;;  %v1323_v26 = vadd.f32 0.5, %v2954_v12 }
  0x93   :  { %2158 = vmatprep.mubr.msk.bf16.mxu1 %vm2434_vm0, %v2433_v0  ;;  %2262 = vmatprep.mubr.msk.bf16.mxu0 %vm2434_vm0, %v2433_v0 }
  0x94   :  { %v1319_v38 = vadd.f32 0.5, %v2940_v55  ;;  %vm1529_vm4 = vcmp.lt.f32.partialorder %v2940_v55, 162.0 }
  0x96   :  { %v1340_v6 = vmul.f32 0.012345679, %v1319_v38 }
  0x98   :  { %v1361_v23 = vfloor.f32 %v1340_v6 }
  0x9a   :  { %2159 = vmatmul.mubr.msk.bf16.gmra.mrb[24].mxu1 %vm221_vm2, %v2623_v5  ;;  %2263 = vmatmul.mubr.msk.bf16.gmra.mrb[24].mxu0 %vm221_vm2, %v2753_v28  ;;  %v2942_v5 = vcvt.s32.f32 %v1256_v39  ;;  %v1427_v39 = vadd.f32 0.5, %v2988_v3 }
  0x9b   :  { %2162 = vmatprep.mubr.msk.bf16.mxu1 %vm2434_vm0, %v2433_v0  ;;  %2266 = vmatprep.mubr.msk.bf16.mxu0 %vm2434_vm0, %v2433_v0 }
  0x9c   :  { %v1320_v62 = vadd.f32 0.5, %v2942_v5  ;;  %vm1530_vm6 = vcmp.lt.f32.partialorder %v2942_v5, 162.0 }
  0x9e   :  { %v1341_v16 = vmul.f32 0.012345679, %v1320_v62 }
  0xa0   :  { %v1362_v28 = vfloor.f32 %v1341_v16  ;;  %v1265_v16 = vadd.s32 80, %v2935_v27 }
  0xa2   :  { %2163 = vmatmul.mubr.msk.bf16.gmra.mrb[28].mxu1 %vm221_vm2, %v2768_v37  ;;  %2267 = vmatmul.mubr.msk.bf16.gmra.mrb[28].mxu0 %vm221_vm2, %v2772_v14  ;;  %v1344_v37 = vmul.f32 0.012345679, %v1323_v26  ;;  %v1262_v14 = vadd.s32 56, %v2935_v27 }
  0xa3   :  { %2166 = vmatprep.mubr.msk.bf16.mxu1 %vm2434_vm0, %v2433_v0  ;;  %2270 = vmatprep.mubr.msk.bf16.mxu0 %vm2434_vm0, %v2433_v0 }
  0xa4   :  { %v1365_v43 = vfloor.f32 %v1344_v37  ;;  %v2968_v44 = vcvt.s32.f32 %v1262_v14  ;;  %v3002_v37 = vcvt.s32.f32 %v1265_v16  ;;  %v1266_v14 = vadd.s32 88, %v2935_v27 }
  0xa6   :  { %v1386_v54 = vmul.f32 81.0, %v1365_v43  ;;  %v1326_v56 = vadd.f32 0.5, %v2968_v44  ;;  %v1329_v17 = vadd.f32 0.5, %v3002_v37 }
  0xa8   :  { %v2991_v7 = vsub.f32 %v2954_v12, %v1386_v54  ;;  %v1347_v8 = vmul.f32 0.012345679, %v1326_v56  ;;  %v3021_v54 = vcvt.s32.f32 %v1266_v14 }
  0xaa   :  { %2167 = vmatmul.mubr.msk.bf16.gmra.mrb[32].mxu1 %vm221_vm2, %v2797_v22  ;;  %2271 = vmatmul.mubr.msk.bf16.gmra.mrb[32].mxu0 %vm221_vm2, %v2775_v25  ;;  %v1383_v25 = vmul.f32 81.0, %v1362_v28  ;;  %v1264_v22 = vadd.s32 72, %v2935_v27  ;;  %v1428_v38 = vadd.f32 0.5, %v2991_v7  ;;  %v1368_v45 = vfloor.f32 %v1347_v8 }
  0xab   :  { %2170 = vmatprep.mubr.msk.bf16.mxu1 %vm2434_vm0, %v2433_v0  ;;  %2274 = vmatprep.mubr.msk.bf16.mxu0 %vm2434_vm0, %v2433_v0 }
  0xac   :  { %v2971_v46 = vsub.f32 %v2942_v5, %v1383_v25  ;;  %v2985_v61 = vcvt.s32.f32 %v1264_v22  ;;  %v1449_v26 = vmul.f32 0.11111111, %v1428_v38  ;;  %v1389_v28 = vmul.f32 81.0, %v1368_v45 }
  0xae   :  { %v1425_v58 = vadd.f32 0.5, %v2971_v46  ;;  %v1470_v43 = vfloor.f32 %v1449_v26 }
  0xb0   :  { %v1446_v32 = vmul.f32 0.11111111, %v1425_v58 }
  0xb2   :  { %2171 = vmatmul.mubr.msk.bf16.gmra.mrb[36].mxu1 %vm221_vm2, %v2639_v15  ;;  %2275 = vmatmul.mubr.msk.bf16.gmra.mrb[36].mxu0 %vm221_vm2, %v2780_v18  ;;  %v2944_v15 = vcvt.s32.f32 %v1257_v51  ;;  %v1345_v18 = vmul.f32 0.012345679, %v1324_v29  ;;  %v1367_v51 = vfloor.f32 %v1346_v30  ;;  %v1467_v49 = vfloor.f32 %v1446_v32 }
  0xb3   :  { %2174 = vmatprep.mubr.msk.bf16.mxu1 %vm2434_vm0, %v2433_v0  ;;  %2278 = vmatprep.mubr.msk.bf16.mxu0 %vm2434_vm0, %v2433_v0  ;;  %vm1532_vm0 = vcmp.lt.f32.partialorder %v2952_v13, 162.0 }
  0xb4   :  { %v1321_v1 = vadd.f32 0.5, %v2944_v15  ;;  %v1366_v47 = vfloor.f32 %v1345_v18  ;;  %v1388_v24 = vmul.f32 81.0, %v1367_v51  ;;  %v1488_v29 = vmul.f32 9.0, %v1467_v49 }
  0xb5   :  { %vm1551_vm7 = vcmp.lt.f32.partialorder %v1467_v49, 8.0  ;;  %vm1531_vm8 = vcmp.lt.f32.partialorder %v2944_v15, 162.0 }
  0xb6   :  { %v1342_v52 = vmul.f32 0.012345679, %v1321_v1  ;;  %v1387_v59 = vmul.f32 81.0, %v1366_v47  ;;  %v3015_v47 = vsub.f32 %v2968_v44, %v1389_v28  ;;  %v1509_v48 = vsub.f32 %v2971_v46, %v1488_v29  ;;  %vm3048_vm13 = vmand %vm1530_vm6, %vm1551_vm7 }
  0xb7   :  { %vm1534_vm6 = vcmp.lt.f32.partialorder %v2956_v20, 162.0 }
  0xb8   :  { %v1363_v31 = vfloor.f32 %v1342_v52  ;;  %v2994_v34 = vsub.f32 %v2956_v20, %v1387_v59  ;;  %v1491_v59 = vmul.f32 9.0, %v1470_v43  ;;  %v1431_v46 = vadd.f32 0.5, %v3015_v47 }
  0xb9   :  { %vm3039_vm12 = vcmp.lt.f32.partialorder %v1509_v48, 8.0 }
  0xba   :  { %2175 = vmatmul.mubr.msk.bf16.gmra.mrb[40].mxu1 %vm221_vm2, %v1818_v9  ;;  %2279 = vmatmul.mubr.msk.bf16.gmra.mrb[40].mxu0 %vm221_vm2, %v947_v33  ;;  %v1382_v33 = vmul.f32 81.0, %v1361_v23  ;;  %v1384_v19 = vmul.f32 81.0, %v1363_v31  ;;  %v1328_v9 = vadd.f32 0.5, %v2985_v61  ;;  %v1429_v62 = vadd.f32 0.5, %v2994_v34 }
  0xbb   :  { %v1448_v23 = vmul.f32 0.11111111, %v1427_v39  ;;  %v1452_v45 = vmul.f32 0.11111111, %v1431_v46 }
  0xbc   :  { %v2964_v21 = vsub.f32 %v2940_v55, %v1382_v33  ;;  %v2975_v4 = vsub.f32 %v2944_v15, %v1384_v19  ;;  %v1349_v6 = vmul.f32 0.012345679, %v1328_v9  ;;  %v1450_v31 = vmul.f32 0.11111111, %v1429_v62 }
  0xbd   :  { %v1369_v33 = vfloor.f32 %v1348_v63  ;;  %v1469_v18 = vfloor.f32 %v1448_v23  ;;  %v3007_v19 = vsub.f32 %v2966_v42, %v1388_v24  ;;  %v1350_v9 = vmul.f32 0.012345679, %v1329_v17 }
  0xbe   :  { %v1424_v50 = vadd.f32 0.5, %v2964_v21  ;;  %v1426_v60 = vadd.f32 0.5, %v2975_v4  ;;  %v1370_v36 = vfloor.f32 %v1349_v6  ;;  %v1471_v22 = vfloor.f32 %v1450_v31 }
  0xbf   :  { %v1490_v56 = vmul.f32 9.0, %v1469_v18  ;;  %v1430_v58 = vadd.f32 0.5, %v3007_v19  ;;  %vm3068_vm1 = vcmp.lt.f32.partialorder %v1469_v18, 8.0  ;;  %v1512_v15 = vsub.f32 %v2991_v7, %v1491_v59 }
  0xc0   :  { %v1445_v2 = vmul.f32 0.11111111, %v1424_v50  ;;  %v1447_v11 = vmul.f32 0.11111111, %v1426_v60  ;;  %v1391_v53 = vmul.f32 81.0, %v1370_v36  ;;  %v1267_v60 = vadd.s32 96, %v2935_v27 }
  0xc1   :  { %v1492_v8 = vmul.f32 9.0, %v1471_v22  ;;  %v1511_v5 = vsub.f32 %v2988_v3, %v1490_v56  ;;  %v1451_v38 = vmul.f32 0.11111111, %v1430_v58  ;;  %v1371_v63 = vfloor.f32 %v1350_v9 }
  0xc2   :  { %v1466_v10 = vfloor.f32 %v1445_v2  ;;  %v1468_v1 = vfloor.f32 %v1447_v11  ;;  %v3057_v11 = vsub.f32 %v2985_v61, %v1391_v53  ;;  %v3078_v49 = vcvt.s32.f32 %v1267_v60 }
  0xc3   :  { %v1513_v3 = vsub.f32 %v2994_v34, %v1492_v8  ;;  %v1472_v16 = vfloor.f32 %v1451_v38  ;;  %vm3111_vm2 = vcmp.lt.f32.partialorder %v1512_v15, 8.0  ;;  %v1473_v13 = vfloor.f32 %v1452_v45 }
  0xc4   :  { %v1487_v52 = vmul.f32 9.0, %v1466_v10  ;;  %v1489_v35 = vmul.f32 9.0, %v1468_v1  ;;  %vm3010_vm5 = vcmp.lt.f32.partialorder %v1466_v10, 8.0  ;;  %vm1552_vm9 = vcmp.lt.f32.partialorder %v1468_v1, 8.0 }
  0xc5   :  { %vm3031_vm10 = vmand %vm1529_vm4, %vm3010_vm5  ;;  %v1330_v10 = vadd.f32 0.5, %v3021_v54  ;;  %vm1554_vm5 = vcmp.lt.f32.partialorder %v1470_v43, 8.0  ;;  %v1433_v7 = vadd.f32 0.5, %v3057_v11  ;;  %vm3100_vm4 = vcmp.lt.f32.partialorder %v1511_v5, 8.0 }
  0xc6   :  { %v1508_v25 = vsub.f32 %v2964_v21, %v1487_v52  ;;  %v1390_v21 = vmul.f32 81.0, %v1369_v33  ;;  %v1510_v50 = vsub.f32 %v2975_v4, %v1489_v35  ;;  %vm3062_vm15 = vmand %vm1531_vm8, %vm1552_vm9  ;;  %vm1555_vm8 = vcmp.lt.f32.partialorder %v1471_v22, 8.0 }
  0xc7   :  { %v1351_v1 = vmul.f32 0.012345679, %v1330_v10  ;;  %vm3096_vm9 = vmand %vm1532_vm0, %vm3068_vm1  ;;  %v1268_v52 = vadd.s32 104, %v2935_v27  ;;  %v1331_v26 = vadd.f32 0.5, %v3078_v49  ;;  %vm3122_vm1 = vcmp.lt.f32.partialorder %v1513_v3, 8.0 }
  0xc8   :  { %vm3035_vm11 = vcmp.lt.f32.partialorder %v1508_v25, 8.0  ;;  %v3044_v32 = vsub.f32 %v2982_v41, %v1390_v21  ;;  %vm3052_vm14 = vcmp.lt.f32.partialorder %v1510_v50, 8.0  ;;  %vm3107_vm7 = vmand %vm1533_vm3, %vm1554_vm5  ;;  %v3130_v31 = vmul.f32 0.11111111, %v1433_v7 }
  0xc9   :  { %vm3118_vm0 = vmand %vm1534_vm6, %vm1555_vm8  ;;  %v1392_v33 = vmul.f32 81.0, %v1371_v63  ;;  %v1372_v35 = vfloor.f32 %v1351_v1  ;;  %v1493_v20 = vmul.f32 9.0, %v1472_v16  ;;  %v3136_v36 = vcvt.s32.f32 %v1268_v52 }
  0xca   :  { %v1432_v62 = vadd.f32 0.5, %v3044_v32  ;;  %vm1616_vm3 = vmand %vm3096_vm9, %vm3100_vm4  ;;  %v1494_v14 = vmul.f32 9.0, %v1473_v13  ;;  %v1352_v25 = vmul.f32 0.012345679, %v1331_v26  ;;  %v1475_v50 = vfloor.f32 %v3130_v31 }
  0xcb   :  { %vm1617_vm5 = vmand %vm3107_vm7, %vm3111_vm2  ;;  %v3163_v21 = vsel %vm1616_vm3, 1.0, %v2433_v0  ;;  %v3167_v53 = vsub.f32 %v3002_v37, %v1392_v33  ;;  %v1393_v17 = vmul.f32 81.0, %v1372_v35  ;;  %v1514_v46 = vsub.f32 %v3007_v19, %v1493_v20 }
  0xcc   :  { %v1453_v12 = vmul.f32 0.11111111, %v1432_v62  ;;  %vm1618_vm6 = vmand %vm3118_vm0, %vm3122_vm1  ;;  %v3175_v58 = vsel %vm1617_vm5, 1.0, %v2433_v0  ;;  %v1332_v60 = vadd.f32 0.5, %v3136_v36  ;;  %v1515_v8 = vsub.f32 %v3015_v47, %v1494_v14 }
  0xcd   :  { %vm3706_vm4 = vmand %vm3031_vm10, %vm3035_vm11  ;;  %v3178_v59 = vsel %vm1618_vm6, 1.0, %v2433_v0  ;;  %vm1535_vm10 = vcmp.lt.f32.partialorder %v2966_v42, 162.0  ;;  %vm3183_vm11 = vcmp.lt.f32.partialorder %v1472_v16, 8.0  ;;  %v1373_v55 = vfloor.f32 %v1352_v25 }
  0xce   :  { %v1913_v18 = vsel %vm3706_vm4, 1.0, %v2433_v0  ;;  %vm3707_vm8 = vmand %vm3048_vm13, %vm3039_vm12  ;;  %v1474_v48 = vfloor.f32 %v1453_v12  ;;  %vm1536_vm12 = vcmp.lt.f32.partialorder %v2968_v44, 162.0  ;;  %vm3189_vm13 = vcmp.lt.f32.partialorder %v1473_v13, 8.0 }
  0xcf   :  { %v1914_v40 = vsel %vm3707_vm8, 1.0, %v2433_v0  ;;  %vm3708_vm9 = vmand %vm3062_vm15, %vm3052_vm14  ;;  %v1496_v51 = vmul.f32 9.0, %v1475_v50  ;;  %v1434_v38 = vadd.f32 0.5, %v3167_v53  ;;  %v3195_v15 = vsub.f32 %v3021_v54, %v1393_v17 }
  0xd0   :  { %v3160_v43 = vsel %vm3708_vm9, 1.0, %v2433_v0  ;;  %v1495_v39 = vmul.f32 9.0, %v1474_v48  ;;  %v1269_v47 = vadd.s32 112, %v2935_v27  ;;  %vm3202_vm14 = vmand %vm1535_vm10, %vm3183_vm11  ;;  %vm3206_vm15 = vcmp.lt.f32.partialorder %v1514_v46, 8.0 }
  0xd1   :  { %v1353_v1 = vmul.f32 0.012345679, %v1332_v60  ;;  %vm3210_vm2 = vcmp.lt.f32.partialorder %v1515_v8, 8.0  ;;  %vm1537_vm7 = vcmp.lt.f32.partialorder %v2982_v41, 162.0  ;;  %v1394_v6 = vmul.f32 81.0, %v1373_v55  ;;  %vm3220_vm0 = vmand %vm1536_vm12, %vm3189_vm13 }
  0xd2   :  { %v1270_v16 = vadd.s32 120, %v2935_v27  ;;  %v1516_v24 = vsub.f32 %v3044_v32, %v1495_v39  ;;  %vm3225_vm1 = vcmp.lt.f32.partialorder %v1474_v48, 8.0  ;;  %vm1619_vm3 = vmand %vm3202_vm14, %vm3206_vm15  ;;  %v1517_v28 = vsub.f32 %v3057_v11, %v1496_v51 }
  0xd3   :  { %v3234_v29 = vmul.f32 0.11111111, %v1434_v38  ;;  %v1435_v44 = vadd.f32 0.5, %v3195_v15  ;;  %v3237_v12 = vcvt.s32.f32 %v1269_v47  ;;  %v1374_v20 = vfloor.f32 %v1353_v1  ;;  %vm1620_vm4 = vmand %vm3220_vm0, %vm3210_vm2 }
  0xd4   :  { %vm1538_vm5 = vcmp.lt.f32.partialorder %v2985_v61, 162.0  ;;  %vm3243_vm6 = vcmp.lt.f32.partialorder %v1475_v50, 8.0  ;;  %v3258_v46 = vsel %vm1619_vm3, 1.0, %v2433_v0  ;;  %vm3264_vm8 = vcmp.lt.f32.partialorder %v1516_v24, 8.0  ;;  %vm3272_vm9 = vmand %vm1537_vm7, %vm3225_vm1 }
  0xd5   :  { %v3277_v30 = vmul.f32 0.11111111, %v1435_v44  ;;  %v1333_v8 = vadd.f32 0.5, %v3237_v12  ;;  %v1271_v55 = vadd.s32 128, %v2935_v27  ;;  %vm3286_vm10 = vmand %vm1538_vm5, %vm3243_vm6  ;;  %vm3290_vm11 = vcmp.lt.f32.partialorder %v1517_v28, 8.0 }
  0xd6   :  { %v1395_v39 = vmul.f32 81.0, %v1374_v20  ;;  %v1272_v38 = vadd.s32 136, %v2935_v27  ;;  %vm1621_vm12 = vmand %vm3272_vm9, %vm3264_vm8  ;;  %vm1539_vm14 = vcmp.lt.f32.partialorder %v3002_v37, 162.0  ;;  %vm1540_vm2 = vcmp.lt.f32.partialorder %v3021_v54, 162.0 }
  0xd7   :  { %vm1622_vm13 = vmand %vm3286_vm10, %vm3290_vm11  ;;  %v1477_v63 = vfloor.f32 %v3277_v30  ;;  %v1354_v1 = vmul.f32 0.012345679, %v1333_v8  ;;  %v3312_v34 = vcvt.s32.f32 %v1271_v55  ;;  %v1274_v55 = vadd.s32 152, %v2935_v27 }
  0xd8   :  { %v3322_v28 = vcvt.s32.f32 %v1272_v38  ;;  %vm1541_vm5 = vcmp.lt.f32.partialorder %v3078_v49, 162.0  ;;  %vm1542_vm9 = vcmp.lt.f32.partialorder %v3136_v36, 162.0 }
  0xd9   :  { %v1335_v11 = vadd.f32 0.5, %v3312_v34  ;;  %vm3372_vm0 = vcmp.lt.f32.partialorder %v1477_v63, 8.0 }
  0xda   :  { %v1336_v8 = vadd.f32 0.5, %v3322_v28 }
 0x13d   :  { %v457_v22 = vpop.f32.mrb[0].mxu1  ;;  %v1040_v4 = vpop.f32.mrb[0].mxu0 }
 0x13e   :  { %v2136_v56 = vpop.f32.mrb[1].mxu1  ;;  %v2282_v57 = vadd.f32 %v1040_v4, %v457_v22  ;;  %v2240_v9 = vpop.f32.mrb[1].mxu0 }
 0x13f   :  { %v460_v2 = vpop.f32.mrb[2].mxu1  ;;  %v1043_v5 = vpop.f32.mrb[2].mxu0 }
 0x140   :  { %v2137_v10 = vpop.f32.mrb[3].mxu1  ;;  %v1676_v45 = vmul.f32 %v2282_v57, %v1913_v18  ;;  %v2283_v3 = vadd.f32 %v1043_v5, %v460_v2  ;;  %v2241_v62 = vpop.f32.mrb[3].mxu0  ;;  %v3248_v18 = vsub.f32 %v3078_v49, %v1394_v6  ;;  %v1476_v2 = vfloor.f32 %v3234_v29 }
 0x141   :  { %v3295_v5 = vsel %vm1620_vm4, 1.0, %v2433_v0  ;;  %vm3428_vm4 = vmand %vm1540_vm2, %vm3372_vm0 }
 0x142   :  { %v1958_v52 = vpack.c.bf16 %v2283_v3, %v2282_v57  ;;  %v1677_v42 = vmul.f32 %v2283_v3, %v1914_v40  ;;  %v1724_v31 = vmul.f32 %v2282_v57, %v1676_v45  ;;  %v3250_v40 = vcvt.s32.f32 %v1270_v16 }
 0x143   :  { %v3309_v7 = vmul.f32 9.0, %v1476_v2  ;;  %vm3351_vm15 = vcmp.lt.f32.partialorder %v1476_v2, 8.0 }
 0x144   :  { %1959 = vst [vmem:[%s3675_s2] sm:$0xff] %v1958_v52   ;;  %v1697_v32 = vadd.f32 %v1677_v42, %v1676_v45  ;;  %v1725_v33 = vmul.f32 %v2283_v3, %v1677_v42  ;;  %v1334_v51 = vadd.f32 0.5, %v3250_v40  ;;  %v3318_v42 = vsub.f32 %v3136_v36, %v1395_v39  ;;  %vm3406_vm3 = vmand %vm1539_vm14, %vm3351_vm15 }
 0x145   :  { %v465_v26 = vpop.f32.mrb[4].mxu1  ;;  %v1048_v14 = vpop.f32.mrb[4].mxu0  ;;  %v1518_v50 = vsub.f32 %v3167_v53, %v3309_v7  ;;  %v1357_v7 = vmul.f32 0.012345679, %v1336_v8 }
 0x146   :  { %v2140_v35 = vpop.f32.mrb[5].mxu1  ;;  %v1745_v48 = vadd.f32 %v1725_v33, %v1724_v31  ;;  %v2284_v22 = vadd.f32 %v1048_v14, %v465_v26  ;;  %v2244_v17 = vpop.f32.mrb[5].mxu0  ;;  %v1355_v26 = vmul.f32 0.012345679, %v1334_v51  ;;  %v3330_v33 = vsel %vm1621_vm12, 1.0, %v2433_v0 }
 0x147   :  { %v468_v25 = vpop.f32.mrb[6].mxu1  ;;  %v1051_v60 = vpop.f32.mrb[6].mxu0  ;;  %v3338_v35 = vsel %vm1622_vm13, 1.0, %v2433_v0  ;;  %v1498_v14 = vmul.f32 9.0, %v1477_v63  ;;  %vm3368_vm7 = vcmp.lt.f32.partialorder %v1518_v50, 8.0 }
 0x148   :  { %v2141_v56 = vpop.f32.mrb[7].mxu1  ;;  %v1678_v57 = vmul.f32 %v2284_v22, %v3160_v43  ;;  %v2285_v9 = vadd.f32 %v1051_v60, %v468_v25  ;;  %v2245_v10 = vpop.f32.mrb[7].mxu0  ;;  %v1436_v43 = vadd.f32 0.5, %v3248_v18  ;;  %v1375_v25 = vfloor.f32 %v1354_v1  ;;  %vm1623_vm10 = vmand %vm3406_vm3, %vm3368_vm7 }
 0x149   :  { %v1437_v60 = vadd.f32 0.5, %v3318_v42  ;;  %v1376_v30 = vfloor.f32 %v1355_v26  ;;  %v1519_v53 = vsub.f32 %v3195_v15, %v1498_v14  ;;  %v3366_v1 = vcvt.s32.f32 %v1274_v55 }
 0x14a   :  { %v1698_v47 = vadd.f32 %v1697_v32, %v1678_v57  ;;  %v1726_v61 = vmul.f32 %v2284_v22, %v1678_v57  ;;  %v1963_v45 = vpack.c.bf16 %v2285_v9, %v2284_v22  ;;  %v1679_v3 = vmul.f32 %v2285_v9, %v3163_v21 }
 0x14b   :  { %v3320_v13 = vmul.f32 0.11111111, %v1436_v43  ;;  %v1396_v39 = vmul.f32 81.0, %v1375_v25  ;;  %v1356_v43 = vmul.f32 0.012345679, %v1335_v11  ;;  %vm3382_vm1 = vcmp.lt.f32.partialorder %v1519_v53, 8.0 }
 0x14c   :  { %v1746_v6 = vadd.f32 %v1745_v48, %v1726_v61  ;;  %2005 = vst [vmem:[%s3675_s2 + $0x8] sm:$0xff] %v1963_v45   ;;  %v1699_v21 = vadd.f32 %v1698_v47, %v1679_v3  ;;  %v1727_v16 = vmul.f32 %v2285_v9, %v1679_v3  ;;  %v1273_v48 = vadd.s32 144, %v2935_v27  ;;  %vm1624_vm12 = vmand %vm3428_vm4, %vm3382_vm1 }
 0x14d   :  { %v473_v62 = vpop.f32.mrb[8].mxu1  ;;  %v1056_v23 = vpop.f32.mrb[8].mxu0  ;;  %v1478_v4 = vfloor.f32 %v3320_v13  ;;  %v3361_v45 = vmul.f32 0.11111111, %v1437_v60  ;;  %vm1543_vm7 = vcmp.lt.f32.partialorder %v3237_v12, 162.0  ;;  %vm1544_vm3 = vcmp.lt.f32.partialorder %v3250_v40, 162.0 }
 0x14e   :  { %v2144_v52 = vpop.f32.mrb[9].mxu1  ;;  %v1747_v29 = vadd.f32 %v1746_v6, %v1727_v16  ;;  %v2286_v44 = vadd.f32 %v1056_v23, %v473_v62  ;;  %v2248_v31 = vpop.f32.mrb[9].mxu0  ;;  %v3356_v51 = vcvt.s32.f32 %v1273_v48  ;;  %v1397_v62 = vmul.f32 81.0, %v1376_v30 }
 0x14f   :  { %v476_v24 = vpop.f32.mrb[10].mxu1  ;;  %v1059_v20 = vpop.f32.mrb[10].mxu0  ;;  %v1499_v15 = vmul.f32 9.0, %v1478_v4  ;;  %v1479_v63 = vfloor.f32 %v3361_v45  ;;  %vm3413_vm6 = vcmp.lt.f32.partialorder %v1478_v4, 8.0  ;;  %v1924_v23 = vsel %vm1624_vm12, 1.0, %v2433_v0 }
 0x150   :  { %v2145_v32 = vpop.f32.mrb[11].mxu1  ;;  %v1680_v22 = vmul.f32 %v2286_v44, %v3175_v58  ;;  %v2287_v17 = vadd.f32 %v1059_v20, %v476_v24  ;;  %v2249_v56 = vpop.f32.mrb[11].mxu0  ;;  %v1337_v31 = vadd.f32 0.5, %v3356_v51  ;;  %vm3452_vm11 = vmand %vm1541_vm5, %vm3413_vm6 }
 0x151   :  { %v1275_v32 = vadd.s32 160, %v2935_v27  ;;  %v1520_v48 = vsub.f32 %v3248_v18, %v1499_v15  ;;  %v1338_v56 = vadd.f32 0.5, %v3366_v1  ;;  %v1500_v53 = vmul.f32 9.0, %v1479_v63 }
 0x152   :  { %v1700_v57 = vadd.f32 %v1699_v21, %v1680_v22  ;;  %v1728_v9 = vmul.f32 %v2286_v44, %v1680_v22  ;;  %v1968_v10 = vpack.c.bf16 %v2287_v17, %v2286_v44  ;;  %v1681_v41 = vmul.f32 %v2287_v17, %v3178_v59 }
 0x153   :  { %v1377_v44 = vfloor.f32 %v1356_v43  ;;  %v3389_v22 = vsub.f32 %v3250_v40, %v1397_v62  ;;  %vm3432_vm8 = vcmp.lt.f32.partialorder %v1520_v48, 8.0  ;;  %vm3467_vm13 = vcmp.lt.f32.partialorder %v1479_v63, 8.0 }
 0x154   :  { %v1748_v38 = vadd.f32 %v1747_v29, %v1728_v9  ;;  %2006 = vst [vmem:[%s3675_s2 + $0x10] sm:$0xff] %v1968_v10   ;;  %v1701_v47 = vadd.f32 %v1700_v57, %v1681_v41  ;;  %v1729_v59 = vmul.f32 %v2287_v17, %v1681_v41  ;;  %v3377_v29 = vsub.f32 %v3237_v12, %v1396_v39  ;;  %vm1625_vm14 = vmand %vm3452_vm11, %vm3432_vm8 }
 0x155   :  { %v481_v58 = vpop.f32.mrb[12].mxu1  ;;  %v1064_v2 = vpop.f32.mrb[12].mxu0  ;;  %v1378_v17 = vfloor.f32 %v1357_v7  ;;  %v1398_v55 = vmul.f32 81.0, %v1377_v44  ;;  %v1358_v57 = vmul.f32 0.012345679, %v1337_v31  ;;  %v3394_v9 = vcvt.s32.f32 %v1275_v32  ;;  %vm3497_vm2 = vmand %vm1542_vm9, %vm3467_vm13 }
 0x156   :  { %v2148_v61 = vpop.f32.mrb[13].mxu1  ;;  %v1749_v6 = vadd.f32 %v1748_v38, %v1729_v59  ;;  %v2288_v21 = vadd.f32 %v1064_v2, %v481_v58  ;;  %v2252_v16 = vpop.f32.mrb[13].mxu0  ;;  %v1438_v8 = vadd.f32 0.5, %v3377_v29  ;;  %v1439_v43 = vadd.f32 0.5, %v3389_v22 }
 0x157   :  { %v484_v3 = vpop.f32.mrb[14].mxu1  ;;  %v1067_v26 = vpop.f32.mrb[14].mxu0  ;;  %v1399_v38 = vmul.f32 81.0, %v1378_v17  ;;  %v1379_v19 = vfloor.f32 %v1358_v57  ;;  %v1339_v37 = vadd.f32 0.5, %v3394_v9  ;;  %v1925_v36 = vsel %vm1625_vm14, 1.0, %v2433_v0 }
 0x158   :  { %v2149_v52 = vpop.f32.mrb[15].mxu1  ;;  %v1682_v20 = vmul.f32 %v2288_v21, %v3258_v46  ;;  %v2289_v14 = vadd.f32 %v1067_v26, %v484_v3  ;;  %v2253_v25 = vpop.f32.mrb[15].mxu0  ;;  %v3442_v24 = vmul.f32 0.11111111, %v1439_v43  ;;  %vm1545_vm11 = vcmp.lt.f32.partialorder %v3312_v34, 162.0 }
 0x159   :  { %v3445_v54 = vsub.f32 %v3322_v28, %v1399_v38  ;;  %vm1546_vm14 = vcmp.lt.f32.partialorder %v3322_v28, 162.0 }
 0x15a   :  { %v1702_v50 = vadd.f32 %v1701_v47, %v1682_v20  ;;  %v1730_v27 = vmul.f32 %v2288_v21, %v1682_v20  ;;  %v1973_v60 = vpack.c.bf16 %v2289_v14, %v2288_v21  ;;  %v1683_v46 = vmul.f32 %v2289_v14, %v3295_v5 }
 0x15b   :  { %v1359_v47 = vmul.f32 0.012345679, %v1338_v56  ;;  %v3420_v21 = vsub.f32 %v3312_v34, %v1398_v55  ;;  %v1400_v56 = vmul.f32 81.0, %v1379_v19  ;;  %v1481_v45 = vfloor.f32 %v3442_v24 }
 0x15c   :  { %v1750_v10 = vadd.f32 %v1749_v6, %v1730_v27  ;;  %2007 = vst [vmem:[%s3675_s2 + $0x18] sm:$0xff] %v1973_v60   ;;  %v1703_v18 = vadd.f32 %v1702_v50, %v1683_v46  ;;  %v1731_v41 = vmul.f32 %v2289_v14, %v1683_v46  ;;  %v3417_v6 = vmul.f32 0.11111111, %v1438_v8 }
 0x15d   :  { %v489_v30 = vpop.f32.mrb[16].mxu1  ;;  %v1072_v39 = vpop.f32.mrb[16].mxu0  ;;  %v1380_v44 = vfloor.f32 %v1359_v47  ;;  %v1440_v17 = vadd.f32 0.5, %v3420_v21  ;;  %v1923_v8 = vsel %vm1623_vm10, 1.0, %v2433_v0  ;;  %v1441_v63 = vadd.f32 0.5, %v3445_v54 }
 0x15e   :  { %v2152_v58 = vpop.f32.mrb[17].mxu1  ;;  %v1751_v59 = vadd.f32 %v1750_v10, %v1731_v41  ;;  %v2290_v61 = vadd.f32 %v1072_v39, %v489_v30  ;;  %v2256_v2 = vpop.f32.mrb[17].mxu0  ;;  %v1480_v48 = vfloor.f32 %v3417_v6  ;;  %v3504_v11 = vsub.f32 %v3356_v51, %v1400_v56 }
 0x15f   :  { %v492_v5 = vpop.f32.mrb[18].mxu1  ;;  %v1075_v7 = vpop.f32.mrb[18].mxu0  ;;  %v1401_v57 = vmul.f32 81.0, %v1380_v44  ;;  %v3501_v38 = vmul.f32 0.11111111, %v1440_v17  ;;  %vm1565_vm5 = vcmp.lt.f32.partialorder %v1481_v45, 8.0 }
 0x160   :  { %v2153_v3 = vpop.f32.mrb[19].mxu1  ;;  %v1684_v16 = vmul.f32 %v2290_v61, %v3330_v33  ;;  %v2291_v52 = vadd.f32 %v1075_v7, %v492_v5  ;;  %v2257_v26 = vpop.f32.mrb[19].mxu0  ;;  %v1521_v33 = vsub.f32 %v3318_v42, %v1500_v53  ;;  %v1501_v43 = vmul.f32 9.0, %v1480_v48  ;;  %vm3548_vm8 = vmand %vm1544_vm3, %vm1565_vm5 }
 0x161   :  { %v1502_v3 = vmul.f32 9.0, %v1481_v45  ;;  %v3513_v15 = vmul.f32 0.11111111, %v1441_v63  ;;  %v3516_v62 = vsub.f32 %v3366_v1, %v1401_v57  ;;  %v1482_v26 = vfloor.f32 %v3501_v38 }
 0x162   :  { %v1704_v31 = vadd.f32 %v1703_v18, %v1684_v16  ;;  %v1732_v32 = vmul.f32 %v2290_v61, %v1684_v16  ;;  %v1978_v20 = vpack.c.bf16 %v2291_v52, %v2290_v61  ;;  %v1685_v14 = vmul.f32 %v2291_v52, %v3338_v35 }
 0x163   :  { %v1360_v35 = vmul.f32 0.012345679, %v1339_v37  ;;  %vm3489_vm15 = vcmp.lt.f32.partialorder %v1521_v33, 8.0  ;;  %v1442_v13 = vadd.f32 0.5, %v3504_v11  ;;  %vm1564_vm1 = vcmp.lt.f32.partialorder %v1480_v48, 8.0 }
 0x164   :  { %v1752_v50 = vadd.f32 %v1751_v59, %v1732_v32  ;;  %2008 = vst [vmem:[%s3675_s2 + $0x20] sm:$0xff] %v1978_v20   ;;  %v1705_v49 = vadd.f32 %v1704_v31, %v1685_v14  ;;  %v1733_v27 = vmul.f32 %v2291_v52, %v1685_v14  ;;  %vm1626_vm0 = vmand %vm3497_vm2, %vm3489_vm15  ;;  %v1522_v52 = vsub.f32 %v3377_v29, %v1501_v43 }
 0x165   :  { %v497_v42 = vpop.f32.mrb[20].mxu1  ;;  %v1080_v30 = vpop.f32.mrb[20].mxu0  ;;  %v1381_v47 = vfloor.f32 %v1360_v35  ;;  %v1926_v14 = vsel %vm1626_vm0, 1.0, %v2433_v0  ;;  %v1523_v29 = vsub.f32 %v3389_v22, %v1502_v3  ;;  %v1483_v25 = vfloor.f32 %v3513_v15  ;;  %vm3535_vm6 = vmand %vm1543_vm7, %vm1564_vm1 }
 0x166   :  { %v2156_v60 = vpop.f32.mrb[21].mxu1  ;;  %v1753_v10 = vadd.f32 %v1752_v50, %v1733_v27  ;;  %v2292_v18 = vadd.f32 %v1080_v30, %v497_v42  ;;  %v2260_v41 = vpop.f32.mrb[21].mxu0  ;;  %v1443_v42 = vadd.f32 0.5, %v3516_v62  ;;  %vm3539_vm4 = vcmp.lt.f32.partialorder %v1522_v52, 8.0 }
 0x167   :  { %v500_v55 = vpop.f32.mrb[22].mxu1  ;;  %v1083_v39 = vpop.f32.mrb[22].mxu0  ;;  %v1402_v4 = vmul.f32 81.0, %v1381_v47  ;;  %v1503_v27 = vmul.f32 9.0, %v1482_v26  ;;  %v3543_v60 = vmul.f32 0.11111111, %v1442_v13  ;;  %vm1627_vm10 = vmand %vm3535_vm6, %vm3539_vm4 }
 0x168   :  { %v2157_v58 = vpop.f32.mrb[23].mxu1  ;;  %v1686_v59 = vmul.f32 %v2292_v18, %v1923_v8  ;;  %v2293_v61 = vadd.f32 %v1083_v39, %v500_v55  ;;  %v2261_v2 = vpop.f32.mrb[23].mxu0  ;;  %vm3552_vm9 = vcmp.lt.f32.partialorder %v1523_v29, 8.0  ;;  %v1504_v45 = vmul.f32 9.0, %v1483_v25 }
 0x169   :  { %v3546_v46 = vsub.f32 %v3394_v9, %v1402_v4  ;;  %v3556_v63 = vmul.f32 0.11111111, %v1443_v42  ;;  %v1524_v58 = vsub.f32 %v3420_v21, %v1503_v27  ;;  %v1484_v53 = vfloor.f32 %v3543_v60  ;;  %vm1628_vm12 = vmand %vm3548_vm8, %vm3552_vm9 }
 0x16a   :  { %v1706_v7 = vadd.f32 %v1705_v49, %v1686_v59  ;;  %v1734_v6 = vmul.f32 %v2292_v18, %v1686_v59  ;;  %v1983_v19 = vpack.c.bf16 %v2293_v61, %v2292_v18  ;;  %v1687_v37 = vmul.f32 %v2293_v61, %v1924_v23 }
 0x16b   :  { %v1444_v39 = vadd.f32 0.5, %v3546_v46  ;;  %vm1566_vm13 = vcmp.lt.f32.partialorder %v1482_v26, 8.0  ;;  %v1927_v59 = vsel %vm1627_vm10, 1.0, %v2433_v0  ;;  %v1525_v2 = vsub.f32 %v3445_v54, %v1504_v45 }
 0x16c   :  { %v1754_v33 = vadd.f32 %v1753_v10, %v1734_v6  ;;  %2009 = vst [vmem:[%s3675_s2 + $0x28] sm:$0xff] %v1983_v19   ;;  %v1707_v24 = vadd.f32 %v1706_v7, %v1687_v37  ;;  %v1735_v44 = vmul.f32 %v2293_v61, %v1687_v37  ;;  %vm1567_vm15 = vcmp.lt.f32.partialorder %v1483_v25, 8.0  ;;  %vm3580_vm2 = vmand %vm1545_vm11, %vm1566_vm13 }
 0x16d   :  { %v505_v16 = vpop.f32.mrb[24].mxu1  ;;  %v1088_v32 = vpop.f32.mrb[24].mxu0  ;;  %v1928_v37 = vsel %vm1628_vm12, 1.0, %v2433_v0  ;;  %vm3584_vm7 = vcmp.lt.f32.partialorder %v1524_v58, 8.0  ;;  %v1505_v52 = vmul.f32 9.0, %v1484_v53  ;;  %vm3588_vm0 = vmand %vm1546_vm14, %vm1567_vm15  ;;  %vm3592_vm1 = vcmp.lt.f32.partialorder %v1525_v2, 8.0 }
 0x16e   :  { %v2160_v31 = vpop.f32.mrb[25].mxu1  ;;  %v1755_v17 = vadd.f32 %v1754_v33, %v1735_v44  ;;  %v2294_v56 = vadd.f32 %v1088_v32, %v505_v16  ;;  %v2264_v35 = vpop.f32.mrb[25].mxu0  ;;  %v1465_v26 = vmul.f32 0.11111111, %v1444_v39  ;;  %vm1629_vm3 = vmand %vm3580_vm2, %vm3584_vm7  ;;  %vm1547_vm5 = vcmp.lt.f32.partialorder %v3356_v51, 162.0 }
 0x16f   :  { %v508_v20 = vpop.f32.mrb[26].mxu1  ;;  %v1091_v49 = vpop.f32.mrb[26].mxu0  ;;  %v1526_v29 = vsub.f32 %v3504_v11, %v1505_v52  ;;  %vm1630_vm6 = vmand %vm3588_vm0, %vm3592_vm1  ;;  %vm1568_vm4 = vcmp.lt.f32.partialorder %v1484_v53, 8.0  ;;  %v1929_v11 = vsel %vm1629_vm3, 1.0, %v2433_v0  ;;  %vm1548_vm8 = vcmp.lt.f32.partialorder %v3366_v1, 162.0 }
 0x170   :  { %v2161_v50 = vpop.f32.mrb[27].mxu1  ;;  %v1688_v30 = vmul.f32 %v2294_v56, %v1925_v36  ;;  %v2295_v40 = vadd.f32 %v1091_v49, %v508_v20  ;;  %v2265_v8 = vpop.f32.mrb[27].mxu0  ;;  %v1485_v36 = vfloor.f32 %v3556_v63  ;;  %v1486_v25 = vfloor.f32 %v1465_v26  ;;  %vm3615_vm10 = vmand %vm1547_vm5, %vm1568_vm4 }
 0x171   :  { %v1930_v8 = vsel %vm1630_vm6, 1.0, %v2433_v0  ;;  %vm3619_vm11 = vcmp.lt.f32.partialorder %v1526_v29, 8.0  ;;  %vm1549_vm15 = vcmp.lt.f32.partialorder %v3394_v9, 162.0 }
 0x172   :  { %v1708_v57 = vadd.f32 %v1707_v24, %v1688_v30  ;;  %v1736_v10 = vmul.f32 %v2294_v56, %v1688_v30  ;;  %v1988_v18 = vpack.c.bf16 %v2295_v40, %v2294_v56  ;;  %v1689_v41 = vmul.f32 %v2295_v40, %v1926_v14  ;;  %vm1631_vm14 = vmand %vm3615_vm10, %vm3619_vm11 }
 0x173   :  { %v1506_v34 = vmul.f32 9.0, %v1485_v36  ;;  %vm1569_vm9 = vcmp.lt.f32.partialorder %v1485_v36, 8.0  ;;  %vm1570_vm7 = vcmp.lt.f32.partialorder %v1486_v25, 8.0 }
 0x174   :  { %v1756_v5 = vadd.f32 %v1755_v17, %v1736_v10  ;;  %2010 = vst [vmem:[%s3675_s2 + $0x30] sm:$0xff] %v1988_v18   ;;  %v1709_v43 = vadd.f32 %v1708_v57, %v1689_v41  ;;  %v1737_v38 = vmul.f32 %v2295_v40, %v1689_v41  ;;  %vm3623_vm12 = vmand %vm1548_vm8, %vm1569_vm9 }
 0x175   :  { %v513_v23 = vpop.f32.mrb[28].mxu1  ;;  %v1096_v21 = vpop.f32.mrb[28].mxu0  ;;  %v1527_v48 = vsub.f32 %v3516_v62, %v1506_v34  ;;  %v1507_v62 = vmul.f32 9.0, %v1486_v25  ;;  %vm3648_vm0 = vmand %vm1549_vm15, %vm1570_vm7 }
 0x176   :  { %v2164_v47 = vpop.f32.mrb[29].mxu1  ;;  %v1757_v3 = vadd.f32 %v1756_v5, %v1737_v38  ;;  %v2296_v15 = vadd.f32 %v1096_v21, %v513_v23  ;;  %v2268_v7 = vpop.f32.mrb[29].mxu0  ;;  %v1931_v21 = vsel %vm1631_vm14, 1.0, %v2433_v0 }
 0x177   :  { %v516_v61 = vpop.f32.mrb[30].mxu1  ;;  %v1099_v19 = vpop.f32.mrb[30].mxu0  ;;  %vm3627_vm13 = vcmp.lt.f32.partialorder %v1527_v48, 8.0  ;;  %v1528_v53 = vsub.f32 %v3546_v46, %v1507_v62 }
 0x178   :  { %v2165_v6 = vpop.f32.mrb[31].mxu1  ;;  %v1690_v13 = vmul.f32 %v2296_v15, %v1927_v59  ;;  %v2297_v4 = vadd.f32 %v1099_v19, %v516_v61  ;;  %v2269_v33 = vpop.f32.mrb[31].mxu0  ;;  %vm1632_vm2 = vmand %vm3623_vm12, %vm3627_vm13 }
 0x179   :  { %vm3652_vm1 = vcmp.lt.f32.partialorder %v1528_v53, 8.0 }
 0x17a   :  { %v1710_v44 = vadd.f32 %v1709_v43, %v1690_v13  ;;  %v1738_v31 = vmul.f32 %v2296_v15, %v1690_v13  ;;  %v1993_v32 = vpack.c.bf16 %v2297_v4, %v2296_v15  ;;  %v1691_v20 = vmul.f32 %v2297_v4, %v1928_v37  ;;  %vm1633_vm3 = vmand %vm3648_vm0, %vm3652_vm1 }
 0x17b   :  { %v1932_v15 = vsel %vm1632_vm2, 1.0, %v2433_v0 }
 0x17c   :  { %v1758_v42 = vadd.f32 %v1757_v3, %v1738_v31  ;;  %2011 = vst [vmem:[%s3675_s2 + $0x38] sm:$0xff] %v1993_v32   ;;  %v1711_v17 = vadd.f32 %v1710_v44, %v1691_v20  ;;  %v1739_v56 = vmul.f32 %v2297_v4, %v1691_v20  ;;  %v1933_v44 = vsel %vm1633_vm3, 1.0, %v2433_v0 }
 0x17d   :  { %v521_v14 = vpop.f32.mrb[32].mxu1  ;;  %v1104_v50 = vpop.f32.mrb[32].mxu0 }
 0x17e   :  { %v2168_v35 = vpop.f32.mrb[33].mxu1  ;;  %v1759_v22 = vadd.f32 %v1758_v42, %v1739_v56  ;;  %v2298_v27 = vadd.f32 %v1104_v50, %v521_v14  ;;  %v2272_v60 = vpop.f32.mrb[33].mxu0 }
 0x17f   :  { %v524_v49 = vpop.f32.mrb[34].mxu1  ;;  %v1107_v40 = vpop.f32.mrb[34].mxu0 }
 0x180   :  { %v2169_v30 = vpop.f32.mrb[35].mxu1  ;;  %v1692_v45 = vmul.f32 %v2298_v27, %v1929_v11  ;;  %v2299_v63 = vadd.f32 %v1107_v40, %v524_v49  ;;  %v2273_v57 = vpop.f32.mrb[35].mxu0 }
 0x182   :  { %v1712_v51 = vadd.f32 %v1711_v17, %v1692_v45  ;;  %v1740_v18 = vmul.f32 %v2298_v27, %v1692_v45  ;;  %v1998_v41 = vpack.c.bf16 %v2299_v63, %v2298_v27  ;;  %v1693_v23 = vmul.f32 %v2299_v63, %v1930_v8 }
 0x184   :  { %v1760_v39 = vadd.f32 %v1759_v22, %v1740_v18  ;;  %2012 = vst [vmem:[%s3675_s2 + $0x40] sm:$0xff] %v1998_v41   ;;  %v1713_v5 = vadd.f32 %v1712_v51, %v1693_v23  ;;  %v1741_v43 = vmul.f32 %v2299_v63, %v1693_v23 }
 0x185   :  { %v529_v58 = vpop.f32.mrb[36].mxu1  ;;  %v1112_v47 = vpop.f32.mrb[36].mxu0 }
 0x186   :  { %v2172_v38 = vpop.f32.mrb[37].mxu1  ;;  %v1761_v59 = vadd.f32 %v1760_v39, %v1741_v43  ;;  %v2300_v61 = vadd.f32 %v1112_v47, %v529_v58  ;;  %v2276_v2 = vpop.f32.mrb[37].mxu0 }
 0x187   :  { %v532_v46 = vpop.f32.mrb[38].mxu1  ;;  %v1115_v3 = vpop.f32.mrb[38].mxu0 }
 0x188   :  { %v2173_v36 = vpop.f32.mrb[39].mxu1  ;;  %v1694_v19 = vmul.f32 %v2300_v61, %v1931_v21  ;;  %v2301_v37 = vadd.f32 %v1115_v3, %v532_v46  ;;  %v2277_v16 = vpop.f32.mrb[39].mxu0 }
 0x18a   :  { %v1714_v54 = vadd.f32 %v1713_v5, %v1694_v19  ;;  %v1742_v52 = vmul.f32 %v2300_v61, %v1694_v19  ;;  %v2003_v26 = vpack.c.bf16 %v2301_v37, %v2300_v61  ;;  %v1695_v13 = vmul.f32 %v2301_v37, %v1932_v15 }
 0x18c   :  { %v1762_v4 = vadd.f32 %v1761_v59, %v1742_v52  ;;  %2013 = vst [vmem:[%s3675_s2 + $0x48] sm:$0xff] %v2003_v26   ;;  %v1715_v33 = vadd.f32 %v1714_v54, %v1695_v13  ;;  %v1743_v28 = vmul.f32 %v2301_v37, %v1695_v13 }
 0x18d   :  { %v537_v9 = vpop.f32.mrb[40].mxu1  ;;  %v1120_v34 = vpop.f32.mrb[40].mxu0 }
 0x18e   :  { %v2176_v24 = vpop.f32.mrb[41].mxu1  ;;  %v1763_v32 = vadd.f32 %v1762_v4, %v1743_v28  ;;  %v2302_v20 = vadd.f32 %v1120_v34, %v537_v9  ;;  %v2280_v14 = vpop.f32.mrb[41].mxu0 }
 0x18f   :  { %v540_v31 = vpop.f32.mrb[42].mxu1  ;;  %v1123_v25 = vpop.f32.mrb[42].mxu0 }
 0x190   :  { %v2177_v29 = vpop.f32.mrb[43].mxu1  ;;  %v1954_v42 = vpack.c.bf16 %v2302_v20, %v2302_v20  ;;  %v1696_v17 = vmul.f32 %v2302_v20, %v1933_v44  ;;  %v2281_v56 = vpop.f32.mrb[43].mxu0 }
 0x192   :  { %1252 = vst [vmem:[%s3675_s2 + $0x50] sm:$0xf] %v1954_v42  ;;  %v1716_v35 = vadd.f32 %v1715_v33, %v1696_v17  ;;  %v1744_v50 = vmul.f32 %v2302_v20, %v1696_v17 }
 0x194   :  { %v1717_v11 = vrot.slane %v1716_v35, 4  ;;  %v1764_v49 = vadd.f32 %v1763_v32, %v1744_v50 }
 0x196   :  { %v1718_v48 = vadd.f32 %v1717_v11, %v1716_v35  ;;  %v1765_v22 = vrot.slane %v1764_v49, 4 }
 0x198   :  { %v1719_v0 = vrot.slane %v1718_v48, 2  ;;  %v1766_v27 = vadd.f32 %v1765_v22, %v1764_v49 }
 0x19a   :  { %v1720_v60 = vadd.f32 %v1719_v0, %v1718_v48  ;;  %v1767_v30 = vrot.slane %v1766_v27, 2 }
 0x19c   :  { %v1721_v40 = vrot.slane %v1720_v60, 1  ;;  %v1768_v8 = vadd.f32 %v1767_v30, %v1766_v27 }
 0x19e   :  { %v1722_v55 = vadd.f32 %v1721_v40, %v1720_v60  ;;  %v1769_v12 = vrot.slane %v1768_v8, 1 }
 0x1a0   :  { %1723 = vst [vmem:[%s3676_s3] sm:$0x1] %v1722_v55  ;;  %v1770_v62 = vadd.f32 %v1769_v12, %v1768_v8 }
 0x1a2   :  { %1771 = vst [vmem:[%s3677_s4] sm:$0x1] %v1770_v62 }

// kernel: discriminator_forward.7
= control target key start
LH: loop header
LB: loop body
LE: loop exit
PB: predicated region body
PF: predicated region fallthrough
CT: control target
= control target key end

     0   :  { %vm83_vm0 = vsmask.f32 7424  ;;  %vm390_vm1 = vsmask.f32 5376  ;;  %vm560_vm2 = vcmask 1044480   ;;  %s1639_s1 = inlined_call_operand.vmem [shape: bf16[4,128,128], index: 1, kind: input, shape index: {}]   ;;  %s1640_s0 = inlined_call_operand.vmem [shape: bf16[1,64,128], index: 0, kind: input, shape index: {}]   ;;  %s1641_s2 = inlined_call_operand.vmem [shape: bf16[56,128], index: 2, kind: output, shape index: {0}]   ;;  %s1642_s3 = inlined_call_operand.vmem [shape: f32[1,1,128], index: 3, kind: output, shape index: {1}]   ;;  %s1643_s4 = inlined_call_operand.vmem [shape: f32[1,1,128], index: 4, kind: output, shape index: {2}]  }
   0x1   :  { %v1219_v0 = vld [vmem:[%s1639_s1 + $0x40] sm:$0xff]   ;;  %v1221_v2 = vld [vmem:[%s1639_s1 + $0x48] sm:$0xff]   ;;  %v1223_v4 = vld [vmem:[%s1639_s1 + $0x50] sm:$0xff]  }
   0x2   :  { %v1220_v1 = vld [vmem:[%s1639_s1 + $0x80] sm:$0xff]   ;;  %1099 = vmatprep.subr.bf16.mxu1 %v1219_v0  ;;  %v1222_v3 = vld [vmem:[%s1639_s1 + $0x88] sm:$0xff]   ;;  %v1224_v5 = vld [vmem:[%s1639_s1 + $0x90] sm:$0xff]  }
   0x3   :  { %1147 = vmatprep.subr.bf16.mxu0 %v1220_v1  ;;  %1100 = vmatpush3.bf16.msra.mxu1 %v1219_v0  ;;  %v1225_v6 = vld [vmem:[%s1639_s1 + $0x58] sm:$0xff]   ;;  %v1227_v8 = vld [vmem:[%s1639_s1 + $0x60] sm:$0xff]   ;;  %v1229_v10 = vld [vmem:[%s1639_s1 + $0x68] sm:$0xff]  }
   0x4   :  { %1148 = vmatpush3.bf16.msra.mxu0 %v1220_v1  ;;  %1101 = vmatprep.subr.bf16.mxu1 %v1221_v2  ;;  %v1226_v7 = vld [vmem:[%s1639_s1 + $0x98] sm:$0xff]   ;;  %v1228_v9 = vld [vmem:[%s1639_s1 + $0xa0] sm:$0xff]   ;;  %v1230_v11 = vld [vmem:[%s1639_s1 + $0xa8] sm:$0xff]  }
   0x5   :  { %1149 = vmatprep.subr.bf16.mxu0 %v1222_v3  ;;  %v38_v12 = vld [vmem:[%s1640_s0] sm:$0xf]  ;;  %v1330_v13 = vld [vmem:[%s1640_s0 + $0x4] sm:$0xf]  ;;  %v1336_v15 = vld [vmem:[%s1640_s0 + $0x8] sm:$0xff]  }
   0x6   :  { %v938_v14 = vcombine.low %v38_v12, %v1330_v13  ;;  %v1231_v16 = vld [vmem:[%s1639_s1 + $0x70] sm:$0xff]   ;;  %v365_v17 = vld [vmem:[%s1640_s0] sm:$0xc]  ;;  %v92_v20 = vshll.u32 %v1336_v15, 16  ;;  %v96_v21 = vshrl.u32 %v1336_v15, 16  ;;  %v1233_v33 = vld [vmem:[%s1639_s1 + $0x78] sm:$0xff]  }
   0x7   :  { %1102 = vmatpush3.bf16.msra.mxu1 %v1221_v2  ;;  %v1232_v22 = vld [vmem:[%s1639_s1 + $0xb0] sm:$0xff]   ;;  %v978_v23 = vcombine.low %v365_v17, %v1330_v13  ;;  %v1234_v34 = vld [vmem:[%s1639_s1 + $0xb8] sm:$0xff]   ;;  %v1237_v45 = vld [vmem:[%s1639_s1] sm:$0xff]  }
   0x8   :  { %1150 = vmatpush3.bf16.msra.mxu0 %v1222_v3  ;;  %1103 = vmatprep.subr.bf16.mxu1 %v1223_v4  ;;  %v85_v18 = vshrl.u32 %v938_v14, 16  ;;  %v87_v19 = vshll.u32 %v938_v14, 16  ;;  %v94_v25 = vrot.slane %v92_v20, 1  ;;  %v399_v26 = vrot.slane %v96_v21, 2  ;;  %v1353_v30 = vld [vmem:[%s1640_s0 + $0x10] sm:$0xff]   ;;  %v1239_v48 = vld [vmem:[%s1639_s1 + $0xc0] sm:$0xff]  }
   0x9   :  { %1151 = vmatprep.subr.bf16.mxu0 %v1224_v5  ;;  %v400_v27 = vrot.slane %v92_v20, 3  ;;  %v392_v28 = vshrl.u32 %v978_v23, 16  ;;  %v395_v29 = vshll.u32 %v978_v23, 16  ;;  %v100_v37 = vshll.u32 %v1353_v30, 16  ;;  %v1241_v50 = vld [vmem:[%s1639_s1 + $0x8] sm:$0xff]   ;;  %v1243_v58 = vld [vmem:[%s1639_s1 + $0x10] sm:$0xff]  }
   0xa   :  { %v89_v24 = vrot.slane %v87_v19, 1  ;;  %v104_v38 = vshrl.u32 %v1353_v30, 16  ;;  %v98_v43 = vor.u32 %v96_v21, %v94_v25  ;;  %v1242_v52 = vld [vmem:[%s1639_s1 + $0xc8] sm:$0xff]   ;;  %v44_v53 = vld [vmem:[%s1640_s0 + $0x18] sm:$0xf]  ;;  %v1244_v0 = vld [vmem:[%s1639_s1 + $0xd0] sm:$0xff]  }
   0xb   :  { %1104 = vmatpush3.bf16.msra.mxu1 %v1223_v4  ;;  %v401_v32 = vor.u32 %v400_v27, %v399_v26  ;;  %v394_v35 = vrot.slane %v392_v28, 2  ;;  %v397_v36 = vrot.slane %v395_v29, 3  ;;  %v404_v42 = vrot.slane %v100_v37, 3  ;;  %v45_v54 = vld [vmem:[%s1640_s0 + $0x1c] sm:$0x1]  ;;  %v1257_v14 = vld [vmem:[%s1640_s0] sm:$0xff]  }
   0xc   :  { %1152 = vmatpush3.bf16.msra.mxu0 %v1224_v5  ;;  %1105 = vmatprep.subr.bf16.mxu1 %v1225_v6  ;;  %v90_v31 = vor.u32 %v89_v24, %v85_v18  ;;  %v403_v41 = vrot.slane %v104_v38, 2  ;;  %v102_v44 = vrot.slane %v100_v37, 1  ;;  %v366_v55 = vld [vmem:[%s1640_s0 + $0x1c] sm:$0x7]  ;;  %v941_v56 = vcombine.low %v44_v53, %v45_v54  ;;  %v1247_v17 = vld [vmem:[%s1639_s1 + $0x20] sm:$0xff]   ;;  %v1249_v18 = vld [vmem:[%s1639_s1 + $0x28] sm:$0xff]  }
   0xd   :  { %1153 = vmatprep.subr.bf16.mxu0 %v1226_v7  ;;  %v398_v40 = vor.u32 %v397_v36, %v394_v35  ;;  %v1388_v57 = vcombine.low %v44_v53, %v366_v55  ;;  %v1245_v4 = vld [vmem:[%s1639_s1 + $0x18] sm:$0xff]   ;;  %v1250_v19 = vld [vmem:[%s1639_s1 + $0xe8] sm:$0xff]   ;;  %v1253_v20 = vld [vmem:[%s1639_s1 + $0x30] sm:$0xff]   ;;  %v564_v24 = vrot.slane %v1353_v30, 3 }
   0xe   :  { %v95_v39 = vsel %vm83_vm0, %v90_v31, %v94_v25  ;;  %v405_v47 = vor.u32 %v404_v42, %v403_v41  ;;  %v103_v49 = vsel %vm83_vm0, %v98_v43, %v102_v44  ;;  %v106_v59 = vor.u32 %v104_v38, %v102_v44  ;;  %v1254_v21 = vld [vmem:[%s1639_s1 + $0xf0] sm:$0xff]   ;;  %v1256_v23 = vld [vmem:[%s1639_s1 + $0xf8] sm:$0xff]   ;;  %v1259_v26 = vld [vmem:[%s1640_s0 + $0x8] sm:$0xff]  }
   0xf   :  { %1106 = vmatpush3.bf16.msra.mxu1 %v1225_v6  ;;  %1115 = vmatprep.mubr.bf16.mxu1 %v95_v39  ;;  %v402_v46 = vsel %vm390_vm1, %v398_v40, %v401_v32  ;;  %v108_v60 = vshll.u32 %v941_v56, 16  ;;  %v408_v61 = vshrl.u32 %v1388_v57, 16  ;;  %v411_v62 = vshll.u32 %v1388_v57, 16  ;;  %v1260_v27 = vld [vmem:[%s1640_s0 + $0x10] sm:$0xff]   ;;  %v1261_v30 = vld [vmem:[%s1640_s0 + $0x18] ss:$0 sps:$4 sm:$0xff]  }
  0x10   :  { %1154 = vmatpush3.bf16.msra.mxu0 %v1226_v7  ;;  %1107 = vmatprep.subr.bf16.mxu1 %v1227_v8  ;;  %v406_v51 = vsel %vm390_vm1, %v401_v32, %v405_v47  ;;  %v112_v63 = vshrl.u32 %v941_v56, 16  ;;  %v566_v25 = vrot.slane %v1388_v57, 3  ;;  %v728_v31 = vlaneseq }
  0x11   :  { %1155 = vmatprep.subr.bf16.mxu0 %v1228_v9  ;;  %1163 = vmatprep.mubr.bf16.mxu0 %v402_v46  ;;  %v110_v1 = vrot.slane %v108_v60, 1  ;;  %v410_v2 = vrot.slane %v408_v61, 2  ;;  %v413_v3 = vrot.slane %v411_v62, 3 }
  0x12   :  { %v567_v29 = vsel %vm560_vm2, %v564_v24, %v566_v25  ;;  %v729_v32 = vshrl.u32 %v728_v31, 7 }
  0x13   :  { %1108 = vmatpush3.bf16.msra.mxu1 %v1227_v8  ;;  %v111_v5 = vsel %vm83_vm0, %v106_v59, %v110_v1  ;;  %v414_v6 = vor.u32 %v413_v3, %v410_v2  ;;  %v114_v7 = vor.u32 %v112_v63, %v110_v1  ;;  %v539_v8 = vld [vmem:[%s1640_s0] sm:$0x8] }
  0x14   :  { %1156 = vmatpush3.bf16.msra.mxu0 %v1228_v9  ;;  %1109 = vmatprep.subr.bf16.mxu1 %v1229_v10  ;;  %v1246_v9 = vld [vmem:[%s1639_s1 + $0xd8] sm:$0xff]   ;;  %v730_v35 = vadd.s32 8, %v729_v32  ;;  %v732_v36 = vadd.s32 24, %v729_v32  ;;  %v733_v41 = vadd.s32 32, %v729_v32  ;;  %v735_v43 = vadd.s32 48, %v729_v32 }
  0x15   :  { %1157 = vmatprep.subr.bf16.mxu0 %v1230_v11  ;;  %v415_v12 = vsel %vm390_vm1, %v405_v47, %v414_v6  ;;  %v734_v46 = vadd.s32 40, %v729_v32 }
  0x16   :  { %v1457_v39 = vcvt.s32.f32 %v730_v35  ;;  %v1459_v40 = vcvt.s32.f32 %v732_v36 }
  0x17   :  { %1110 = vmatpush3.bf16.msra.mxu1 %v1229_v10  ;;  %v1004_v10 = vcombine.low %v539_v8, %v1330_v13  ;;  %v1248_v13 = vld [vmem:[%s1639_s1 + $0xe0] sm:$0xff]   ;;  %v1468_v53 = vcvt.s32.f32 %v734_v46 }
  0x18   :  { %1158 = vmatpush3.bf16.msra.mxu0 %v1230_v11  ;;  %1111 = vmatprep.subr.bf16.mxu1 %v1231_v16  ;;  %v562_v11 = vrot.slane %v1336_v15, 3  ;;  %v754_v47 = vadd.f32 0.5, %v1459_v40  ;;  %vm822_vm9 = vcmp.lt.f32.partialorder %v1457_v39, 50.0  ;;  %vm824_vm12 = vcmp.lt.f32.partialorder %v1459_v40, 50.0 }
  0x19   :  { %1159 = vmatprep.subr.bf16.mxu0 %v1232_v22  ;;  %v756_v60 = vadd.f32 0.5, %v1468_v53 }
  0x1a   :  { %v565_v28 = vsel %vm560_vm2, %v562_v11, %v564_v24  ;;  %v761_v54 = vmul.f32 0.04, %v754_v47 }
  0x1b   :  { %1112 = vmatpush3.bf16.msra.mxu1 %v1231_v16  ;;  %v561_v16 = vrot.slane %v1004_v10, 3  ;;  %v763_v3 = vmul.f32 0.04, %v756_v60 }
  0x1c   :  { %1160 = vmatpush3.bf16.msra.mxu0 %v1232_v22  ;;  %1113 = vmatprep.subr.bf16.mxu1 %v1233_v33  ;;  %v1255_v22 = vld [vmem:[%s1639_s1 + $0x38] sm:$0xff]   ;;  %v768_v61 = vfloor.f32 %v761_v54 }
  0x1d   :  { %1161 = vmatprep.subr.bf16.mxu0 %v1234_v34  ;;  %v563_v15 = vsel %vm560_vm2, %v561_v16, %v562_v11  ;;  %v770_v10 = vfloor.f32 %v763_v3 }
  0x1f   :  { %1114 = vmatpush3.bf16.msra.mxu1 %v1233_v33  ;;  %v731_v33 = vadd.s32 16, %v729_v32 }
  0x20   :  { %1162 = vmatpush3.bf16.msra.mxu0 %v1234_v34  ;;  %1123 = vmatprep.subr.bf16.mxu1 %v1237_v45  ;;  %v1452_v34 = vcvt.s32.f32 %v729_v32 }
  0x21   :  { %1171 = vmatprep.subr.bf16.mxu0 %v1239_v48  ;;  %v1454_v37 = vcvt.s32.f32 %v731_v33 }
  0x22   :  { %1116 = vmatmul.mubr.bf16.vlgmr.msra.gmra.mrb[0].mxu1 %v103_v49  ;;  %v751_v38 = vadd.f32 0.5, %v1452_v34  ;;  %vm821_vm3 = vcmp.lt.f32.partialorder %v1452_v34, 50.0 }
  0x23   :  { %1124 = vmatpush3.bf16.msra.mxu1 %v1237_v45  ;;  %1164 = vmatmul.mubr.bf16.vlgmr.msra.gmra.mrb[0].mxu0 %v406_v51  ;;  %v753_v42 = vadd.f32 0.5, %v1454_v37  ;;  %v752_v45 = vadd.f32 0.5, %v1457_v39  ;;  %vm823_vm5 = vcmp.lt.f32.partialorder %v1454_v37, 50.0 }
  0x24   :  { %1172 = vmatpush3.bf16.msra.mxu0 %v1239_v48  ;;  %1125 = vmatprep.subr.bf16.mxu1 %v1241_v50  ;;  %v758_v44 = vmul.f32 0.04, %v751_v38  ;;  %v1464_v48 = vcvt.s32.f32 %v733_v41 }
  0x25   :  { %1173 = vmatprep.subr.bf16.mxu0 %v1242_v52  ;;  %1119 = vmatprep.mubr.bf16.mxu1 %v111_v5  ;;  %v760_v49 = vmul.f32 0.04, %v753_v42 }
  0x26   :  { %1167 = vmatprep.mubr.bf16.mxu0 %v415_v12  ;;  %v765_v51 = vfloor.f32 %v758_v44  ;;  %v755_v55 = vadd.f32 0.5, %v1464_v48 }
  0x27   :  { %1126 = vmatpush3.bf16.msra.mxu1 %v1241_v50  ;;  %v1466_v50 = vcvt.s32.f32 %v735_v43  ;;  %v767_v56 = vfloor.f32 %v760_v49 }
  0x28   :  { %1174 = vmatpush3.bf16.msra.mxu0 %v1242_v52  ;;  %1127 = vmatprep.subr.bf16.mxu1 %v1243_v58  ;;  %v759_v52 = vmul.f32 0.04, %v752_v45  ;;  %v762_v62 = vmul.f32 0.04, %v755_v55 }
  0x29   :  { %1175 = vmatprep.subr.bf16.mxu0 %v1244_v0  ;;  %v757_v57 = vadd.f32 0.5, %v1466_v50  ;;  %v774_v63 = vmul.f32 25.0, %v767_v56 }
  0x2a   :  { %1120 = vmatmul.mubr.bf16.gmra.mrb[4].mxu1 %v114_v7  ;;  %v766_v59 = vfloor.f32 %v759_v52  ;;  %v769_v5 = vfloor.f32 %v762_v62 }
  0x2b   :  { %1128 = vmatpush3.bf16.msra.mxu1 %v1243_v58  ;;  %1168 = vmatmul.mubr.bf16.gmra.mrb[4].mxu0 %v414_v6  ;;  %v772_v58 = vmul.f32 25.0, %v765_v51  ;;  %v781_v6 = vsub.f32 %v1454_v37, %v774_v63 }
  0x2c   :  { %1176 = vmatpush3.bf16.msra.mxu0 %v1244_v0  ;;  %1129 = vmatprep.subr.bf16.mxu1 %v1245_v4  ;;  %v764_v0 = vmul.f32 0.04, %v757_v57  ;;  %v773_v2 = vmul.f32 25.0, %v766_v59  ;;  %v776_v12 = vmul.f32 25.0, %v769_v5 }
  0x2d   :  { %1177 = vmatprep.subr.bf16.mxu0 %v1246_v9  ;;  %1139 = vmatprep.mubr.bf16.mxu1 %v1257_v14  ;;  %v779_v1 = vsub.f32 %v1452_v34, %v772_v58  ;;  %v788_v14 = vadd.f32 0.5, %v781_v6 }
  0x2e   :  { %1187 = vmatprep.mubr.bf16.mxu0 %v563_v15  ;;  %v771_v7 = vfloor.f32 %v764_v0  ;;  %v777_v15 = vmul.f32 25.0, %v770_v10  ;;  %v1262_v0 = vmov 0.0  }
  0x2f   :  { %1130 = vmatpush3.bf16.msra.mxu1 %v1245_v4  ;;  %v775_v4 = vmul.f32 25.0, %v768_v61  ;;  %v786_v8 = vadd.f32 0.5, %v779_v1 }
  0x30   :  { %1178 = vmatpush3.bf16.msra.mxu0 %v1246_v9  ;;  %1131 = vmatprep.subr.bf16.mxu1 %v1247_v17  ;;  %v780_v9 = vsub.f32 %v1457_v39, %v773_v2  ;;  %v778_v16 = vmul.f32 25.0, %v771_v7  ;;  %v1484_v24 = vsub.f32 %v1468_v53, %v777_v15 }
  0x31   :  { %1179 = vmatprep.subr.bf16.mxu0 %v1248_v13  ;;  %v782_v11 = vsub.f32 %v1459_v40, %v775_v4 }
  0x32   :  { %v791_v31 = vadd.f32 0.5, %v1484_v24 }
  0x33   :  { %1132 = vmatpush3.bf16.msra.mxu1 %v1247_v17  ;;  %v793_v17 = vmul.f32 0.2, %v786_v8 }
  0x34   :  { %1180 = vmatpush3.bf16.msra.mxu0 %v1248_v13  ;;  %1133 = vmatprep.subr.bf16.mxu1 %v1249_v18  ;;  %v787_v13 = vadd.f32 0.5, %v780_v9  ;;  %v798_v42 = vmul.f32 0.2, %v791_v31 }
  0x35   :  { %1181 = vmatprep.subr.bf16.mxu0 %v1250_v19 }
  0x36   :  { %v805_v52 = vfloor.f32 %v798_v42 }
  0x37   :  { %1134 = vmatpush3.bf16.msra.mxu1 %v1249_v18  ;;  %v789_v18 = vadd.f32 0.5, %v782_v11 }
  0x38   :  { %1182 = vmatpush3.bf16.msra.mxu0 %v1250_v19  ;;  %1135 = vmatprep.subr.bf16.mxu1 %v1253_v20  ;;  %v1478_v19 = vsub.f32 %v1464_v48, %v776_v12  ;;  %v812_v40 = vmul.f32 5.0, %v805_v52 }
  0x39   :  { %1183 = vmatprep.subr.bf16.mxu0 %v1254_v21 }
  0x3a   :  { %v819_v8 = vsub.f32 %v1484_v24, %v812_v40 }
  0x3b   :  { %1136 = vmatpush3.bf16.msra.mxu1 %v1253_v20  ;;  %v795_v20 = vmul.f32 0.2, %v788_v14 }
  0x3c   :  { %1184 = vmatpush3.bf16.msra.mxu0 %v1254_v21  ;;  %1137 = vmatprep.subr.bf16.mxu1 %v1255_v22  ;;  %v1481_v21 = vsub.f32 %v1466_v50, %v778_v16 }
  0x3d   :  { %1185 = vmatprep.subr.bf16.mxu0 %v1256_v23 }
  0x3f   :  { %1138 = vmatpush3.bf16.msra.mxu1 %v1255_v22  ;;  %v800_v22 = vfloor.f32 %v793_v17 }
  0x40   :  { %1186 = vmatpush3.bf16.msra.mxu0 %v1256_v23  ;;  %v794_v23 = vmul.f32 0.2, %v787_v13 }
  0x41   :  { %vm828_vm4 = vcmp.lt.f32.partialorder %v800_v22, 4.0 }
  0x42   :  { %1140 = vmatmul.mubr.bf16.vlgmr.msra.gmra.mrb[0].mxu1 %v1259_v26  ;;  %v790_v26 = vadd.f32 0.5, %v1478_v19  ;;  %vm1491_vm7 = vmand %vm821_vm3, %vm828_vm4 }
  0x43   :  { %1188 = vmatmul.mubr.bf16.vlgmr.msra.gmra.mrb[0].mxu0 %v565_v28  ;;  %1143 = vmatprep.mubr.bf16.mxu1 %v1260_v27  ;;  %v802_v27 = vfloor.f32 %v795_v20  ;;  %v792_v28 = vadd.f32 0.5, %v1481_v21 }
  0x44   :  { %1191 = vmatprep.mubr.bf16.mxu0 %v567_v29  ;;  %v807_v29 = vmul.f32 5.0, %v800_v22  ;;  %v797_v33 = vmul.f32 0.2, %v790_v26 }
  0x45   :  { %v809_v35 = vmul.f32 5.0, %v802_v27  ;;  %v799_v36 = vmul.f32 0.2, %v792_v28  ;;  %vm830_vm6 = vcmp.lt.f32.partialorder %v802_v27, 4.0 }
  0x46   :  { %v814_v38 = vsub.f32 %v779_v1, %v807_v29  ;;  %v804_v44 = vfloor.f32 %v797_v33  ;;  %vm1500_vm11 = vmand %vm823_vm5, %vm830_vm6  ;;  %vm825_vm6 = vcmp.lt.f32.partialorder %v1464_v48, 50.0 }
  0x47   :  { %v816_v45 = vsub.f32 %v781_v6, %v809_v35  ;;  %v806_v46 = vfloor.f32 %v799_v36 }
  0x48   :  { %vm1495_vm8 = vcmp.lt.f32.partialorder %v814_v38, 4.0  ;;  %v811_v37 = vmul.f32 5.0, %v804_v44 }
  0x49   :  { %vm1505_vm14 = vcmp.lt.f32.partialorder %v816_v45, 4.0  ;;  %vm849_vm15 = vmand %vm1491_vm7, %vm1495_vm8  ;;  %v813_v56 = vmul.f32 5.0, %v806_v46  ;;  %vm1540_vm7 = vcmp.lt.f32.partialorder %v804_v44, 4.0 }
  0x4a   :  { %1144 = vmatmul.mubr.bf16.gmra.mrb[4].mxu1 %v1261_v30  ;;  %v801_v30 = vfloor.f32 %v794_v23  ;;  %vm851_vm4 = vmand %vm1500_vm11, %vm1505_vm14  ;;  %v818_v61 = vsub.f32 %v1478_v19, %v811_v37  ;;  %v1020_v1 = vsel %vm849_vm15, 1.0, %v1262_v0 }
  0x4b   :  { %1192 = vmatmul.mubr.bf16.gmra.mrb[4].mxu0 %v566_v25  ;;  %v796_v25 = vmul.f32 0.2, %v789_v18  ;;  %v820_v2 = vsub.f32 %v1481_v21, %v813_v56  ;;  %v1022_v12 = vsel %vm851_vm4, 1.0, %v1262_v0  ;;  %vm1569_vm15 = vmand %vm825_vm6, %vm1540_vm7 }
  0x4c   :  { %v808_v41 = vmul.f32 5.0, %v801_v30  ;;  %vm829_vm10 = vcmp.lt.f32.partialorder %v801_v30, 4.0 }
  0x4d   :  { %v803_v32 = vfloor.f32 %v796_v25  ;;  %vm1513_vm0 = vmand %vm822_vm9, %vm829_vm10  ;;  %vm827_vm9 = vcmp.lt.f32.partialorder %v1466_v50, 50.0  ;;  %vm1549_vm10 = vcmp.lt.f32.partialorder %v806_v46, 4.0  ;;  %vm1590_vm14 = vcmp.lt.f32.partialorder %v820_v2, 4.0 }
  0x4e   :  { %v815_v51 = vsub.f32 %v780_v9, %v808_v41  ;;  %vm1586_vm11 = vmand %vm827_vm9, %vm1549_vm10 }
  0x4f   :  { %v810_v43 = vmul.f32 5.0, %v803_v32  ;;  %vm831_vm13 = vcmp.lt.f32.partialorder %v803_v32, 4.0  ;;  %vm855_vm4 = vmand %vm1586_vm11, %vm1590_vm14 }
  0x50   :  { %vm1517_vm1 = vcmp.lt.f32.partialorder %v815_v51, 4.0  ;;  %vm1521_vm2 = vmand %vm824_vm12, %vm831_vm13  ;;  %vm833_vm13 = vcmp.lt.f32.partialorder %v805_v52, 4.0  ;;  %vm1573_vm12 = vcmp.lt.f32.partialorder %v818_v61, 4.0  ;;  %v1026_v51 = vsel %vm855_vm4, 1.0, %v1262_v0 }
  0x51   :  { %v817_v54 = vsub.f32 %v782_v11, %v810_v43  ;;  %vm850_vm5 = vmand %vm1513_vm0, %vm1517_vm1  ;;  %vm1672_vm0 = vcmp.lt.f32.partialorder %v1468_v53, 50.0 }
  0x52   :  { %v1021_v17 = vsel %vm850_vm5, 1.0, %v1262_v0  ;;  %vm1596_vm1 = vmand %vm1672_vm0, %vm833_vm13 }
  0x53   :  { %vm1525_vm3 = vcmp.lt.f32.partialorder %v817_v54, 4.0 }
  0x54   :  { %vm852_vm8 = vmand %vm1521_vm2, %vm1525_vm3  ;;  %vm1600_vm2 = vcmp.lt.f32.partialorder %v819_v8, 4.0 }
  0x55   :  { %v1023_v19 = vsel %vm852_vm8, 1.0, %v1262_v0  ;;  %vm853_vm3 = vmand %vm1569_vm15, %vm1573_vm12 }
  0x56   :  { %vm854_vm5 = vmand %vm1596_vm1, %vm1600_vm2  ;;  %v1024_v36 = vsel %vm853_vm3, 1.0, %v1262_v0 }
  0x57   :  { %v1025_v54 = vsel %vm854_vm5, 1.0, %v1262_v0 }
 0x115   :  { %v1141_v60 = vpop.f32.mrb[0].mxu1 }
 0x116   :  { %v1189_v62 = vpop.f32.mrb[0].mxu0  ;;  %v335_v63 = vpop.f32.mrb[1].mxu1 }
 0x117   :  { %v1195_v4 = vadd.f32 %v1189_v62, %v1141_v60  ;;  %v654_v5 = vpop.f32.mrb[1].mxu0  ;;  %v1142_v6 = vpop.f32.mrb[2].mxu1 }
 0x118   :  { %v1196_v9 = vadd.f32 %v654_v5, %v335_v63  ;;  %v1190_v10 = vpop.f32.mrb[2].mxu0  ;;  %v338_v11 = vpop.f32.mrb[3].mxu1 }
 0x119   :  { %v1197_v14 = vadd.f32 %v1190_v10, %v1142_v6  ;;  %v657_v16 = vpop.f32.mrb[3].mxu0  ;;  %v872_v50 = vmul.f32 %v1195_v4, %v1022_v12 }
 0x11a   :  { %v870_v18 = vmul.f32 %v1196_v9, %v1020_v1  ;;  %v1198_v20 = vadd.f32 %v657_v16, %v338_v11 }
 0x11b   :  { %v1042_v22 = vpack.c.bf16 %v1197_v14, %v1195_v4  ;;  %v873_v53 = vmul.f32 %v1197_v14, %v1023_v19  ;;  %v892_v41 = vmul.f32 %v1195_v4, %v872_v50 }
 0x11c   :  { %v1037_v25 = vpack.c.bf16 %v1198_v20, %v1196_v9  ;;  %v871_v26 = vmul.f32 %v1198_v20, %v1021_v17  ;;  %v890_v28 = vmul.f32 %v1196_v9, %v870_v18 }
 0x11d   :  { %1049 = vst [vmem:[%s1641_s2 + $0x8] sm:$0xff] %v1042_v22   ;;  %v1145_v27 = vpop.f32.mrb[4].mxu1  ;;  %v893_v47 = vmul.f32 %v1197_v14, %v873_v53 }
 0x11e   :  { %1038 = vst [vmem:[%s1641_s2] sm:$0xff] %v1037_v25   ;;  %v877_v29 = vadd.f32 %v871_v26, %v870_v18  ;;  %v891_v30 = vmul.f32 %v1198_v20, %v871_v26  ;;  %v1193_v31 = vpop.f32.mrb[4].mxu0  ;;  %v351_v32 = vpop.f32.mrb[5].mxu1 }
 0x11f   :  { %v1199_v33 = vadd.f32 %v1193_v31, %v1145_v27  ;;  %v670_v35 = vpop.f32.mrb[5].mxu0  ;;  %v1146_v38 = vpop.f32.mrb[6].mxu1 }
 0x120   :  { %v878_v42 = vadd.f32 %v877_v29, %v872_v50  ;;  %v897_v43 = vadd.f32 %v891_v30, %v890_v28  ;;  %v1200_v44 = vadd.f32 %v670_v35, %v351_v32  ;;  %v1194_v45 = vpop.f32.mrb[6].mxu0  ;;  %v354_v46 = vpop.f32.mrb[7].mxu1 }
 0x121   :  { %v1033_v49 = vpack.c.bf16 %v1199_v33, %v1199_v33  ;;  %v673_v52 = vpop.f32.mrb[7].mxu0  ;;  %v876_v59 = vmul.f32 %v1199_v33, %v1026_v51 }
 0x122   :  { %v898_v34 = vadd.f32 %v897_v43, %v892_v41  ;;  %v874_v37 = vmul.f32 %v1200_v44, %v1024_v36  ;;  %v879_v55 = vadd.f32 %v878_v42, %v873_v53  ;;  %v1201_v56 = vadd.f32 %v673_v52, %v354_v46 }
 0x123   :  { %726 = vst [vmem:[%s1641_s2 + $0x18] sm:$0xf] %v1033_v49  ;;  %v896_v0 = vmul.f32 %v1199_v33, %v876_v59 }
 0x124   :  { %v880_v39 = vadd.f32 %v879_v55, %v874_v37  ;;  %v894_v57 = vmul.f32 %v1200_v44, %v874_v37  ;;  %v899_v40 = vadd.f32 %v898_v34, %v893_v47  ;;  %v1047_v58 = vpack.c.bf16 %v1201_v56, %v1200_v44 }
 0x125   :  { %v875_v60 = vmul.f32 %v1201_v56, %v1025_v54 }
 0x126   :  { %v900_v61 = vadd.f32 %v899_v40, %v894_v57  ;;  %1050 = vst [vmem:[%s1641_s2 + $0x10] sm:$0xff] %v1047_v58  }
 0x127   :  { %v881_v62 = vadd.f32 %v880_v39, %v875_v60  ;;  %v895_v63 = vmul.f32 %v1201_v56, %v875_v60 }
 0x129   :  { %v882_v1 = vadd.f32 %v881_v62, %v876_v59  ;;  %v901_v2 = vadd.f32 %v900_v61, %v895_v63 }
 0x12b   :  { %v883_v3 = vrot.slane %v882_v1, 4  ;;  %v902_v4 = vadd.f32 %v901_v2, %v896_v0 }
 0x12d   :  { %v884_v5 = vadd.f32 %v883_v3, %v882_v1  ;;  %v903_v6 = vrot.slane %v902_v4, 4 }
 0x12f   :  { %v885_v7 = vrot.slane %v884_v5, 2  ;;  %v904_v8 = vadd.f32 %v903_v6, %v902_v4 }
 0x131   :  { %v886_v9 = vadd.f32 %v885_v7, %v884_v5  ;;  %v905_v10 = vrot.slane %v904_v8, 2 }
 0x133   :  { %v887_v11 = vrot.slane %v886_v9, 1  ;;  %v906_v12 = vadd.f32 %v905_v10, %v904_v8 }
 0x135   :  { %v888_v14 = vadd.f32 %v887_v11, %v886_v9  ;;  %v907_v16 = vrot.slane %v906_v12, 1 }
 0x137   :  { %889 = vst [vmem:[%s1642_s3] sm:$0x1] %v888_v14  ;;  %v908_v17 = vadd.f32 %v907_v16, %v906_v12 }
 0x139   :  { %909 = vst [vmem:[%s1643_s4] sm:$0x1] %v908_v17 }

// kernel: discriminator_forward.8
= control target key start
LH: loop header
LB: loop body
LE: loop exit
PB: predicated region body
PF: predicated region fallthrough
CT: control target
= control target key end

     0   :  { %vm155_vm0 = vcmask 523264   ;;  %vm78_vm1 = vsmask.f32 7424  ;;  %vm385_vm2 = vcmask 1046528   ;;  %vm547_vm3 = vsmask.f32 6400  ;;  %s5967_s1 = inlined_call_operand.vmem [shape: bf16[16,64,128], index: 1, kind: input, shape index: {}]   ;;  %s5968_s0 = inlined_call_operand.vmem [shape: bf16[1,128,64], index: 0, kind: input, shape index: {}]   ;;  %s5969_s2 = inlined_call_operand.vmem [shape: bf16[96,128], index: 2, kind: output, shape index: {0}]   ;;  %s5970_s3 = inlined_call_operand.vmem [shape: f32[1,1,128], index: 3, kind: output, shape index: {1}]   ;;  %s5971_s4 = inlined_call_operand.vmem [shape: f32[1,1,128], index: 4, kind: output, shape index: {2}]  }
   0x1   :  { %v4384_v0 = vld [vmem:[%s5967_s1 + $0x20] sm:$0xff]   ;;  %v4386_v2 = vld [vmem:[%s5967_s1 + $0x28] sm:$0xff]   ;;  %v4388_v4 = vld [vmem:[%s5967_s1 + $0x30] sm:$0xff]  }
   0x2   :  { %v4385_v1 = vld [vmem:[%s5967_s1 + $0x100] sm:$0xff]   ;;  %3883 = vmatprep.subr.bf16.mxu1 %v4384_v0  ;;  %v4387_v3 = vld [vmem:[%s5967_s1 + $0x108] sm:$0xff]   ;;  %v4389_v5 = vld [vmem:[%s5967_s1 + $0x110] sm:$0xff]  }
   0x3   :  { %4043 = vmatprep.subr.bf16.mxu0 %v4385_v1  ;;  %3884 = vmatpush3.bf16.msra.mxu1 %v4384_v0  ;;  %v4390_v6 = vld [vmem:[%s5967_s1 + $0x38] sm:$0xff]   ;;  %v15_v7 = vld [vmem:[%s5968_s0] sm:$0xf]  ;;  %v4556_v8 = vld [vmem:[%s5968_s0 + $0x4] sm:$0xf] }
   0x4   :  { %4044 = vmatpush3.bf16.msra.mxu0 %v4385_v1  ;;  %3885 = vmatprep.subr.bf16.mxu1 %v4386_v2  ;;  %v4561_v9 = vld [vmem:[%s5968_s0 + $0x8] sm:$0xf]  ;;  %v4391_v10 = vld [vmem:[%s5967_s1 + $0x118] sm:$0xff]   ;;  %v4569_v11 = vld [vmem:[%s5968_s0 + $0xc] sm:$0xf]  ;;  %v4577_v13 = vcombine.low %v15_v7, %v4556_v8 }
   0x5   :  { %4045 = vmatprep.subr.bf16.mxu0 %v4387_v3  ;;  %v4574_v12 = vld [vmem:[%s5968_s0 + $0x10] sm:$0xf]  ;;  %v4583_v15 = vcombine.low %v4561_v9, %v4569_v11  ;;  %v4590_v17 = vld [vmem:[%s5968_s0 + $0x8] sm:$0xf]  ;;  %v875_v18 = vld [vmem:[%s5968_s0 + $0xc] sm:$0xf] }
   0x6   :  { %v876_v19 = vld [vmem:[%s5968_s0 + $0x10] sm:$0xf]  ;;  %v80_v20 = vshrl.u32 %v4577_v13, 16  ;;  %v82_v21 = vshll.u32 %v4577_v13, 16  ;;  %v877_v22 = vld [vmem:[%s5968_s0 + $0x14] sm:$0xf]  ;;  %v3486_v27 = vcombine.low %v4590_v17, %v875_v18 }
   0x7   :  { %3886 = vmatpush3.bf16.msra.mxu1 %v4386_v2  ;;  %v878_v23 = vld [vmem:[%s5968_s0 + $0x18] sm:$0xf]  ;;  %v4606_v24 = vcombine.low %v875_v18, %v876_v19  ;;  %v87_v25 = vshll.u32 %v4583_v15, 16  ;;  %v4615_v29 = vld [vmem:[%s5968_s0 + $0x14] sm:$0xf]  ;;  %v91_v31 = vshrl.u32 %v4583_v15, 16  ;;  %v3487_v35 = vcombine.low %v876_v19, %v877_v22 }
   0x8   :  { %4046 = vmatpush3.bf16.msra.mxu0 %v4387_v3  ;;  %3887 = vmatprep.subr.bf16.mxu1 %v4388_v4  ;;  %v4609_v26 = vcombine.low %v877_v22, %v878_v23  ;;  %v84_v28 = vrot.slane %v82_v21, 1  ;;  %v4402_v33 = vld [vmem:[%s5967_s1] sm:$0xff]   ;;  %v4629_v36 = vcombine.low %v4574_v12, %v4615_v29  ;;  %v4405_v40 = vld [vmem:[%s5967_s1 + $0x128] sm:$0xff]   ;;  %v4642_v41 = vld [vmem:[%s5968_s0 + $0x18] sm:$0xf] }
   0x9   :  { %4047 = vmatprep.subr.bf16.mxu0 %v4389_v5  ;;  %v89_v30 = vrot.slane %v87_v25, 1  ;;  %4051 = vmatprep.mubr.msk.bf16.mxu0 %vm155_vm0, %v3486_v27  ;;  %v4403_v34 = vld [vmem:[%s5967_s1 + $0x120] sm:$0xff]   ;;  %v4647_v42 = vld [vmem:[%s5968_s0 + $0x1c] sm:$0xf]  ;;  %v4404_v43 = vld [vmem:[%s5967_s1 + $0x8] sm:$0xff]  }
   0xa   :  { %v85_v32 = vor.u32 %v84_v28, %v80_v20  ;;  %v95_v39 = vshll.u32 %v4629_v36, 16  ;;  %v4655_v44 = vcombine.low %v4642_v41, %v4647_v42  ;;  %v99_v45 = vshrl.u32 %v4629_v36, 16  ;;  %v879_v46 = vld [vmem:[%s5968_s0 + $0x1c] sm:$0xf]  ;;  %v4664_v47 = vld [vmem:[%s5968_s0 + $0x20] sm:$0xf] }
   0xb   :  { %3888 = vmatpush3.bf16.msra.mxu1 %v4388_v4  ;;  %v93_v38 = vor.u32 %v91_v31, %v89_v30  ;;  %5991 = vst [vmem:[#allocation2_spill] sm:$0xff] %v4664_v47  ;;  %v3488_v51 = vcombine.low %v878_v23, %v879_v46  ;;  %v4671_v52 = vld [vmem:[%s5968_s0 + $0x24] sm:$0xf]  ;;  %v880_v53 = vld [vmem:[%s5968_s0 + $0x20] sm:$0xf]  ;;  %v4412_v60 = vld [vmem:[%s5967_s1 + $0x130] sm:$0xff]  }
   0xc   :  { %4048 = vmatpush3.bf16.msra.mxu0 %v4389_v5  ;;  %3889 = vmatprep.subr.bf16.mxu1 %v4390_v6  ;;  %v90_v37 = vsel %vm78_vm1, %v85_v32, %v89_v30  ;;  %v97_v49 = vrot.slane %v95_v39, 1  ;;  %v561_v50 = vrot.slane %v95_v39, 2  ;;  %5992 = vst [vmem:[#allocation3_spill] sm:$0xff] %v4671_v52  ;;  %v103_v55 = vshll.u32 %v4655_v44, 16  ;;  %v881_v59 = vld [vmem:[%s5968_s0 + $0x24] sm:$0xf] }
   0xd   :  { %4049 = vmatprep.subr.bf16.mxu0 %v4391_v10  ;;  %3891 = vmatprep.mubr.msk.bf16.mxu1 %vm155_vm0, %v90_v37  ;;  %v560_v56 = vrot.slane %v99_v45, 1  ;;  %v4681_v57 = vcombine.low %v4664_v47, %v4671_v52  ;;  %v107_v58 = vshrl.u32 %v4655_v44, 16  ;;  %v4692_v63 = vcombine.low %v879_v46, %v880_v53  ;;  %v4701_v3 = vld [vmem:[%s5968_s0 + $0x28] sm:$0xf]  ;;  %v26_v5 = vld [vmem:[%s5968_s0 + $0x2c] sm:$0xf] }
   0xe   :  { %v98_v61 = vsel %vm78_vm1, %v93_v38, %v97_v49  ;;  %v101_v62 = vor.u32 %v99_v45, %v97_v49  ;;  %v105_v0 = vrot.slane %v103_v55, 1  ;;  %v3489_v2 = vcombine.low %v880_v53, %v881_v59  ;;  %5993 = vst [vmem:[#allocation4_spill] sm:$0xff] %v4701_v3  ;;  %v882_v7 = vld [vmem:[%s5968_s0 + $0x28] sm:$0xf]  ;;  %v4411_v21 = vld [vmem:[%s5967_s1 + $0x10] sm:$0xff]   ;;  %v4419_v49 = vld [vmem:[%s5967_s1 + $0x18] sm:$0xff]  }
   0xf   :  { %3890 = vmatpush3.bf16.msra.mxu1 %v4390_v6  ;;  %v111_v1 = vshll.u32 %v4681_v57, 16  ;;  %v4703_v4 = vor.u32 %v561_v50, %v560_v56  ;;  %v115_v6 = vshrl.u32 %v4681_v57, 16  ;;  %v4723_v22 = vcombine.low %v4701_v3, %v26_v5  ;;  %v883_v23 = vld [vmem:[%s5968_s0 + $0x2c] sm:$0xf]  ;;  %v884_v32 = vld [vmem:[%s5968_s0 + $0x30] sm:$0xf] }
  0x10   :  { %4050 = vmatpush3.bf16.msra.mxu0 %v4391_v10  ;;  %3903 = vmatprep.subr.bf16.mxu1 %v4402_v33  ;;  %v106_v18 = vsel %vm78_vm1, %v101_v62, %v105_v0  ;;  %v109_v19 = vor.u32 %v107_v58, %v105_v0  ;;  %v4729_v27 = vcombine.low %v881_v59, %v882_v7  ;;  %v4734_v30 = vld [vmem:[%s5968_s0 + $0x30] ss:$0 sps:$4 sm:$0x11]   ;;  %v1461_v38 = vld [vmem:[%s5968_s0 + $0x34] sm:$0xf]  ;;  %v4426_v59 = vld [vmem:[%s5967_s1 + $0x140] sm:$0xff]  }
  0x11   :  { %4063 = vmatprep.subr.bf16.mxu0 %v4403_v34  ;;  %v113_v20 = vrot.slane %v111_v1, 1  ;;  %v3490_v28 = vcombine.low %v882_v7, %v883_v23  ;;  %v5983_v37 = vshrl.u32 %v4723_v22, 16  ;;  %v4752_v45 = vcombine.low %v883_v23, %v884_v32  ;;  %v4766_v53 = vld [vmem:[%s5968_s0 + $0xc] sm:$0xf]  ;;  %v4771_v56 = vld [vmem:[%s5968_s0 + $0x10] sm:$0xf] }
  0x12   :  { %3892 = vmatmul.mubr.msk.bf16.vlgmr.msra.gmra.mrb[0].mxu1 %vm155_vm0, %v98_v61  ;;  %v4783_v62 = vld [vmem:[%s5968_s0 + $0x14] sm:$0xf]  ;;  %v4788_v0 = vld [vmem:[%s5968_s0 + $0x18] sm:$0xf]  ;;  %v4799_v7 = vld [vmem:[%s5967_s1 + $0x40] sm:$0xff]  }
  0x13   :  { %4052 = vmatmul.mubr.msk.bf16.vlgmr.msra.gmra.mrb[0].mxu0 %vm155_vm0, %v3487_v35  ;;  %3904 = vmatpush3.bf16.msra.mxu1 %v4402_v33  ;;  %v4420_v33 = vld [vmem:[%s5967_s1 + $0x138] sm:$0xff]   ;;  %v5981_v35 = vshll.u32 %v4723_v22, 16  ;;  %v114_v39 = vsel %vm78_vm1, %v109_v19, %v113_v20  ;;  %v4806_v19 = vcombine.low %v4771_v56, %v4783_v62 }
  0x14   :  { %4064 = vmatpush3.bf16.msra.mxu0 %v4403_v34  ;;  %4055 = vmatprep.mubr.msk.bf16.mxu0 %vm155_vm0, %v3488_v51  ;;  %v117_v34 = vor.u32 %v115_v6, %v113_v20  ;;  %v3491_v51 = vcombine.low %v884_v32, %v1461_v38 }
  0x15   :  { %4065 = vmatprep.subr.bf16.mxu0 %v4405_v40  ;;  %3905 = vmatprep.subr.bf16.mxu1 %v4404_v43  ;;  %v121_v46 = vrot.slane %v5981_v35, 1 }
  0x16   :  { %3895 = vmatprep.mubr.msk.bf16.mxu1 %vm155_vm0, %v106_v18 }
  0x17   :  { %3906 = vmatpush3.bf16.msra.mxu1 %v4404_v43  ;;  %v1614_v43 = vld [vmem:[%s5968_s0 + $0x8] sm:$0xf]  ;;  %v125_v61 = vor.u32 %v5983_v37, %v121_v46 }
  0x18   :  { %4066 = vmatpush3.bf16.msra.mxu0 %v4405_v40  ;;  %v127_v40 = vshll.u32 %v4734_v30, 16  ;;  %3907 = vmatprep.subr.bf16.mxu1 %v4411_v21  ;;  %v3510_v5 = vcombine.low %v1614_v43, %v4766_v53 }
  0x19   :  { %4067 = vmatprep.subr.bf16.mxu0 %v4412_v60 }
  0x1a   :  { %v129_v50 = vrot.slane %v127_v40, 1  ;;  %3896 = vmatmul.mubr.msk.bf16.gmra.mrb[4].mxu1 %vm155_vm0, %v114_v39  ;;  %v1672_v32 = vshll.u32 %v3510_v5, 16 }
  0x1b   :  { %4056 = vmatmul.mubr.msk.bf16.gmra.mrb[4].mxu0 %vm155_vm0, %v3489_v2  ;;  %v4793_v2 = vld [vmem:[%s5968_s0 + $0x1c] sm:$0xf]  ;;  %3908 = vmatpush3.bf16.msra.mxu1 %v4411_v21  ;;  %v5980_v21 = vshrl.u32 %v4806_v19, 16 }
  0x1c   :  { %4068 = vmatpush3.bf16.msra.mxu0 %v4412_v60  ;;  %4059 = vmatprep.mubr.msk.bf16.mxu0 %vm155_vm0, %v3490_v28  ;;  %v122_v60 = vsel %vm78_vm1, %v117_v34, %v121_v46  ;;  %v4810_v20 = vcombine.low %v4788_v0, %v4793_v2  ;;  %v1670_v28 = vshrl.u32 %v3510_v5, 16  ;;  %v5979_v34 = vshll.u32 %v4806_v19, 16 }
  0x1d   :  { %4069 = vmatprep.subr.bf16.mxu0 %v4420_v33  ;;  %3899 = vmatprep.mubr.msk.bf16.mxu1 %vm155_vm0, %v122_v60  ;;  %v1674_v39 = vrot.slane %v1672_v32, 1  ;;  %v130_v46 = vsel %vm78_vm1, %v125_v61, %v129_v50  ;;  %v4827_v60 = vld [vmem:[%s5968_s0 + $0x20] sm:$0xf]  ;;  %v4842_v50 = vld [vmem:[%s5968_s0 + $0x28] sm:$0xf] }
  0x1e   :  { %3909 = vmatprep.subr.bf16.mxu1 %v4419_v49  ;;  %v5973_v38 = vshll.u32 %v4810_v20, 16  ;;  %v5978_v40 = vshrl.u32 %v4810_v20, 16  ;;  %v4847_v61 = vld [vmem:[%s5968_s0 + $0x2c] sm:$0xf]  ;;  %v4867_v32 = vld [vmem:[%s5968_s0 + $0x30] sm:$0xf] }
  0x1f   :  { %3910 = vmatpush3.bf16.msra.mxu1 %v4419_v49  ;;  %v1675_v5 = vor.u32 %v1674_v39, %v1670_v28  ;;  %v4855_v39 = vcombine.low %v4842_v50, %v4847_v61 }
  0x20   :  { %4070 = vmatpush3.bf16.msra.mxu0 %v4420_v33  ;;  %v1679_v33 = vrot.slane %v5979_v34, 1  ;;  %v1687_v43 = vrot.slane %v5973_v38, 1  ;;  %3923 = vmatprep.subr.bf16.mxu1 %v4799_v7  ;;  %v4903_v38 = vld [vmem:[%s5968_s0 + $0x38] ss:$0 sps:$4 sm:$0x11]  }
  0x21   :  { %4083 = vmatprep.subr.bf16.mxu0 %v4426_v59 }
  0x22   :  { %v1683_v28 = vor.u32 %v5980_v21, %v1679_v33  ;;  %3900 = vmatmul.mubr.msk.bf16.gmra.mrb[8].mxu1 %vm155_vm0, %v130_v46  ;;  %v1680_v54 = vsel %vm78_vm1, %v1675_v5, %v1679_v33  ;;  %v1691_v48 = vor.u32 %v5978_v40, %v1687_v43  ;;  %v5974_v33 = vshll.u32 %v4855_v39, 16  ;;  %v4878_v5 = vld [vmem:[%s5968_s0 + $0x34] sm:$0xf]  ;;  %v4435_v21 = vld [vmem:[%s5967_s1 + $0x58] sm:$0xff]  }
  0x23   :  { %4060 = vmatmul.mubr.msk.bf16.gmra.mrb[8].mxu0 %vm155_vm0, %v3491_v51  ;;  %v4832_v51 = vld [vmem:[%s5968_s0 + $0x24] sm:$0xf]  ;;  %3911 = vmatprep.mubr.msk.bf16.mxu1 %vm155_vm0, %v4577_v13  ;;  %5994 = vst [vmem:[#allocation5_spill] sm:$0xff] %v4878_v5  ;;  %v4428_v13 = vld [vmem:[%s5967_s1 + $0x148] sm:$0xff]  }
  0x24   :  { %v4837_v49 = vcombine.low %v4827_v60, %v4832_v51  ;;  %4071 = vmatprep.mubr.msk.bf16.mxu0 %vm155_vm0, %v1680_v54  ;;  %v1688_v10 = vsel %vm78_vm1, %v1683_v28, %v1687_v43  ;;  %v4889_v43 = vcombine.low %v4867_v32, %v4878_v5  ;;  %v5976_v28 = vshrl.u32 %v4855_v39, 16 }
  0x25   :  { %v1703_v23 = vrot.slane %v5974_v33, 1  ;;  %v936_v5 = vshll.u32 %v4606_v24, 16 }
  0x26   :  { %v5972_v16 = vshll.u32 %v4837_v49, 16  ;;  %v5977_v46 = vshrl.u32 %v4837_v49, 16  ;;  %v5975_v18 = vshll.u32 %v4889_v43, 16 }
  0x28   :  { %v1695_v54 = vrot.slane %v5972_v16, 1 }
  0x2a   :  { %v1696_v14 = vsel %vm78_vm1, %v1691_v48, %v1695_v54  ;;  %v1699_v16 = vor.u32 %v5977_v46, %v1695_v54  ;;  %v4427_v48 = vld [vmem:[%s5967_s1 + $0x48] sm:$0xff]   ;;  %3912 = vmatmul.mubr.msk.bf16.vlgmr.msra.gmra.mrb[0].mxu1 %vm155_vm0, %v4583_v15  ;;  %v4431_v46 = vld [vmem:[%s5967_s1 + $0x50] sm:$0xff]  }
  0x2b   :  { %4072 = vmatmul.mubr.msk.bf16.vlgmr.msra.gmra.mrb[0].mxu0 %vm155_vm0, %v1688_v10  ;;  %v1707_v10 = vor.u32 %v5976_v28, %v1703_v23  ;;  %v1856_v54 = vld [vmem:[%s5968_s0 + $0x8] sm:$0xe]  ;;  %3924 = vmatpush3.bf16.msra.mxu1 %v4799_v7  ;;  %v1717_v28 = vshll.u32 %v4903_v38, 16  ;;  %v873_v7 = vld [vmem:[%s5968_s0 + $0x4] sm:$0xf] }
  0x2c   :  { %4084 = vmatpush3.bf16.msra.mxu0 %v4426_v59  ;;  %4075 = vmatprep.mubr.msk.bf16.mxu0 %vm155_vm0, %v1696_v14  ;;  %v1711_v59 = vrot.slane %v5975_v18, 1  ;;  %v4432_v14 = vld [vmem:[%s5967_s1 + $0x150] sm:$0xff]   ;;  %v1704_v33 = vsel %vm78_vm1, %v1699_v16, %v1703_v23  ;;  %v5982_v18 = vshrl.u32 %v4889_v43, 16  ;;  %v4931_v34 = vcombine.low %v1856_v54, %v4766_v53  ;;  %v4436_v16 = vld [vmem:[%s5967_s1 + $0x158] sm:$0xff]   ;;  %v372_v23 = vld [vmem:[%s5968_s0] sm:$0xe] }
  0x2d   :  { %4085 = vmatprep.subr.bf16.mxu0 %v4428_v13  ;;  %3915 = vmatprep.mubr.msk.bf16.mxu1 %vm155_vm0, %v4629_v36  ;;  %v1719_v54 = vrot.slane %v1717_v28, 1  ;;  %v4952_v35 = vcombine.low %v372_v23, %v4556_v8  ;;  %v556_v28 = vrot.slane %v91_v31, 1 }
  0x2e   :  { %3925 = vmatprep.subr.bf16.mxu1 %v4427_v48  ;;  %v1712_v40 = vsel %vm78_vm1, %v1707_v10, %v1711_v59  ;;  %v1715_v10 = vor.u32 %v5982_v18, %v1711_v59 }
  0x2f   :  { %3926 = vmatpush3.bf16.msra.mxu1 %v4427_v48  ;;  %v3423_v48 = vcombine.low %v873_v7, %v4590_v17  ;;  %v386_v31 = vrot.slane %v4952_v35, 1  ;;  %v387_v7 = vrot.slane %v4583_v15, 1  ;;  %v1872_v15 = vrot.slane %v4810_v20, 1 }
  0x30   :  { %4086 = vmatpush3.bf16.msra.mxu0 %v4428_v13  ;;  %v557_v13 = vrot.slane %v87_v25, 2  ;;  %3927 = vmatprep.subr.bf16.mxu1 %v4431_v46  ;;  %v1869_v25 = vrot.slane %v4931_v34, 1  ;;  %v1720_v59 = vsel %vm78_vm1, %v1715_v10, %v1719_v54  ;;  %v568_v54 = vrot.slane %v115_v6, 1 }
  0x31   :  { %4087 = vmatprep.subr.bf16.mxu0 %v4432_v14  ;;  %v931_v10 = vshll.u32 %v3423_v48, 16  ;;  %v929_v37 = vshrl.u32 %v3423_v48, 16 }
  0x32   :  { %3916 = vmatmul.mubr.msk.bf16.gmra.mrb[4].mxu1 %vm155_vm0, %v4655_v44  ;;  %v4970_v23 = vor.u32 %v557_v13, %v556_v28  ;;  %v564_v13 = vrot.slane %v107_v58, 1  ;;  %v1874_v28 = vrot.slane %v4837_v49, 1  ;;  %v569_v58 = vrot.slane %v111_v1, 2 }
  0x33   :  { %4076 = vmatmul.mubr.msk.bf16.gmra.mrb[4].mxu0 %vm155_vm0, %v1704_v33  ;;  %v1870_v33 = vrot.slane %v4806_v19, 1  ;;  %3928 = vmatpush3.bf16.msra.mxu1 %v4431_v46  ;;  %v933_v52 = vrot.slane %v931_v10, 1  ;;  %v389_v1 = vrot.slane %v4629_v36, 1  ;;  %v4442_v10 = vld [vmem:[%s5967_s1 + $0x168] sm:$0xff]   ;;  %v393_v36 = vrot.slane %v4681_v57, 1 }
  0x34   :  { %4079 = vmatprep.mubr.msk.bf16.mxu0 %vm155_vm0, %v1712_v40  ;;  %4088 = vmatpush3.bf16.msra.mxu0 %v4432_v14  ;;  %v4440_v40 = vld [vmem:[%s5967_s1 + $0x160] sm:$0xff]   ;;  %v4978_v46 = vsel %vm547_vm3, %v4970_v23, %v4703_v4 }
  0x35   :  { %4089 = vmatprep.subr.bf16.mxu0 %v4436_v16  ;;  %3919 = vmatprep.mubr.msk.bf16.mxu1 %vm155_vm0, %v4681_v57  ;;  %v4439_v14 = vld [vmem:[%s5967_s1 + $0x60] sm:$0xff]   ;;  %v1871_v18 = vsel %vm385_vm2, %v1869_v25, %v1870_v33  ;;  %v388_v25 = vsel %vm385_vm2, %v386_v31, %v387_v7  ;;  %v570_v31 = vor.u32 %v569_v58, %v568_v54 }
  0x36   :  { %3929 = vmatprep.subr.bf16.mxu1 %v4435_v21  ;;  %v1873_v48 = vsel %vm385_vm2, %v1870_v33, %v1872_v15  ;;  %v390_v58 = vsel %vm385_vm2, %v387_v7, %v389_v1 }
  0x37   :  { %3930 = vmatpush3.bf16.msra.mxu1 %v4435_v21 }
  0x38   :  { %4090 = vmatpush3.bf16.msra.mxu0 %v4436_v16  ;;  %v565_v16 = vrot.slane %v103_v55, 2  ;;  %3943 = vmatprep.subr.bf16.mxu1 %v4439_v14  ;;  %v5995_v55 = vshrl.u32 %v4723_v22, 16 }
  0x39   :  { %4103 = vmatprep.subr.bf16.mxu0 %v4440_v40 }
  0x3a   :  { %v572_v21 = vrot.slane %v5995_v55, 1  ;;  %3920 = vmatmul.mubr.msk.bf16.gmra.mrb[8].mxu1 %vm155_vm0, %v4723_v22  ;;  %v1875_v55 = vsel %vm385_vm2, %v1872_v15, %v1874_v28  ;;  %v938_v15 = vrot.slane %v936_v5, 1 }
  0x3b   :  { %4080 = vmatmul.mubr.msk.bf16.gmra.mrb[8].mxu0 %vm155_vm0, %v1720_v59  ;;  %v566_v59 = vor.u32 %v565_v16, %v564_v13  ;;  %3931 = vmatprep.mubr.msk.bf16.mxu1 %vm155_vm0, %v388_v25  ;;  %v391_v13 = vrot.slane %v4655_v44, 1  ;;  %v4441_v44 = vld [vmem:[%s5967_s1 + $0x68] sm:$0xff]  }
  0x3c   :  { %4091 = vmatprep.mubr.msk.bf16.mxu0 %vm155_vm0, %v1871_v18  ;;  %v5996_v18 = vshll.u32 %v4723_v22, 16 }
  0x3d   :  { %v5002_v6 = vsel %vm547_vm3, %v4703_v4, %v566_v59  ;;  %v5015_v4 = vsel %vm547_vm3, %v566_v59, %v570_v31  ;;  %v934_v59 = vor.u32 %v933_v52, %v929_v37  ;;  %v392_v57 = vsel %vm385_vm2, %v389_v1, %v391_v13 }
  0x3e   :  { %v573_v3 = vrot.slane %v5996_v18, 2  ;;  %v1878_v18 = vrot.slane %v4889_v43, 1  ;;  %v552_v52 = vshll.u32 %v4952_v35, 16  ;;  %v2034_v37 = vshll.u32 %v4931_v34, 16 }
  0x3f   :  { %v5998_v1 = vshll.u32 %v4806_v19, 16 }
  0x40   :  { %v5011_v16 = vor.u32 %v573_v3, %v572_v21  ;;  %v1876_v3 = vrot.slane %v4855_v39, 1  ;;  %v4444_v21 = vld [vmem:[%s5967_s1 + $0x170] sm:$0xff]  }
  0x42   :  { %v5022_v33 = vsel %vm547_vm3, %v570_v31, %v5011_v16  ;;  %v2031_v31 = vshrl.u32 %v4931_v34, 16  ;;  %3932 = vmatmul.mubr.msk.bf16.vlgmr.msra.gmra.mrb[0].mxu1 %vm155_vm0, %v390_v58  ;;  %v1877_v54 = vsel %vm385_vm2, %v1874_v28, %v1876_v3  ;;  %v5999_v34 = vshll.u32 %v4609_v26, 16 }
  0x43   :  { %4092 = vmatmul.mubr.msk.bf16.vlgmr.msra.gmra.mrb[0].mxu0 %vm155_vm0, %v1873_v48  ;;  %v549_v48 = vshrl.u32 %v4952_v35, 16  ;;  %3944 = vmatpush3.bf16.msra.mxu1 %v4439_v14  ;;  %v1879_v35 = vsel %vm385_vm2, %v1876_v3, %v1878_v18  ;;  %v2036_v58 = vrot.slane %v2034_v37, 2  ;;  %v6000_v14 = vshrl.u32 %v4606_v24, 16  ;;  %v4446_v3 = vld [vmem:[%s5967_s1 + $0x178] sm:$0xff]  }
  0x44   :  { %4104 = vmatpush3.bf16.msra.mxu0 %v4440_v40  ;;  %4095 = vmatprep.mubr.msk.bf16.mxu0 %vm155_vm0, %v1875_v55  ;;  %v5997_v40 = vshrl.u32 %v4806_v19, 16  ;;  %v2039_v55 = vrot.slane %v5998_v1, 2  ;;  %v2033_v25 = vrot.slane %v2031_v31, 1  ;;  %v946_v47 = vrot.slane %v5999_v34, 1  ;;  %v4443_v19 = vld [vmem:[%s5967_s1 + $0x70] sm:$0xff]   ;;  %v4445_v34 = vld [vmem:[%s5967_s1 + $0x78] sm:$0xff]  }
  0x45   :  { %4105 = vmatprep.subr.bf16.mxu0 %v4442_v10  ;;  %3935 = vmatprep.mubr.msk.bf16.mxu1 %vm155_vm0, %v392_v57  ;;  %v942_v57 = vor.u32 %v6000_v14, %v938_v15  ;;  %v948_v28 = vshrl.u32 %v4609_v26, 16  ;;  %v394_v31 = vsel %vm385_vm2, %v391_v13, %v393_v36  ;;  %v1880_v1 = vrot.slane %v4903_v38, 1  ;;  %v4448_v38 = vld [vmem:[%s5967_s1 + $0x180] sm:$0xff]  }
  0x46   :  { %v2038_v7 = vrot.slane %v5997_v40, 1  ;;  %3945 = vmatprep.subr.bf16.mxu1 %v4441_v44  ;;  %v5057_v40 = vsel %vm78_vm1, %v934_v59, %v938_v15  ;;  %v6001_v59 = vrot.slane %v4723_v22, 1  ;;  %v551_v14 = vrot.slane %v549_v48, 1 }
  0x47   :  { %v5069_v37 = vsel %vm78_vm1, %v942_v57, %v946_v47  ;;  %3946 = vmatpush3.bf16.msra.mxu1 %v4441_v44  ;;  %v950_v13 = vor.u32 %v948_v28, %v946_v47  ;;  %v2037_v44 = vor.u32 %v2036_v58, %v2033_v25  ;;  %v397_v47 = vrot.slane %v4734_v30, 1 }
  0x48   :  { %4106 = vmatpush3.bf16.msra.mxu0 %v4442_v10  ;;  %v952_v10 = vshll.u32 %v4692_v63, 16  ;;  %v396_v15 = vsel %vm385_vm2, %v393_v36, %v6001_v59  ;;  %3947 = vmatprep.subr.bf16.mxu1 %v4443_v19  ;;  %v2040_v57 = vor.u32 %v2039_v55, %v2038_v7  ;;  %v1881_v25 = vsel %vm385_vm2, %v1878_v18, %v1880_v1 }
  0x49   :  { %4107 = vmatprep.subr.bf16.mxu0 %v4444_v21  ;;  %v6003_v48 = vshll.u32 %v4810_v20, 16  ;;  %v960_v55 = vshll.u32 %v4729_v27, 16 }
  0x4a   :  { %v954_v36 = vrot.slane %v952_v10, 1  ;;  %3936 = vmatmul.mubr.msk.bf16.gmra.mrb[4].mxu1 %vm155_vm0, %v394_v31  ;;  %v2041_v30 = vsel %vm547_vm3, %v2037_v44, %v2040_v57  ;;  %v6004_v31 = vshrl.u32 %v4837_v49, 16 }
  0x4b   :  { %4096 = vmatmul.mubr.msk.bf16.gmra.mrb[4].mxu0 %vm155_vm0, %v1877_v54  ;;  %v554_v54 = vrot.slane %v552_v52, 2  ;;  %3948 = vmatpush3.bf16.msra.mxu1 %v4443_v19  ;;  %v2043_v52 = vrot.slane %v6003_v48, 2  ;;  %v4447_v19 = vld [vmem:[%s5967_s1 + $0x80] sm:$0xff]  }
  0x4c   :  { %4099 = vmatprep.mubr.msk.bf16.mxu0 %vm155_vm0, %v1879_v35  ;;  %4108 = vmatpush3.bf16.msra.mxu0 %v4444_v21  ;;  %v6002_v35 = vshrl.u32 %v4810_v20, 16  ;;  %v956_v21 = vshrl.u32 %v4692_v63, 16  ;;  %v5096_v7 = vsel %vm78_vm1, %v950_v13, %v954_v36  ;;  %v2046_v18 = vrot.slane %v6004_v31, 1 }
  0x4d   :  { %4109 = vmatprep.subr.bf16.mxu0 %v4446_v3  ;;  %3939 = vmatprep.mubr.msk.bf16.mxu1 %vm155_vm0, %v396_v15  ;;  %v555_v58 = vor.u32 %v554_v54, %v551_v14  ;;  %v6005_v20 = vshll.u32 %v4837_v49, 16  ;;  %v962_v54 = vrot.slane %v960_v55, 1  ;;  %v1115_v49 = vld [vmem:[%s5968_s0 + $0x4] sm:$0xe] }
  0x4e   :  { %v2042_v59 = vrot.slane %v6002_v35, 1  ;;  %3949 = vmatprep.subr.bf16.mxu1 %v4445_v34  ;;  %v958_v1 = vor.u32 %v956_v21, %v954_v36  ;;  %v4450_v35 = vld [vmem:[%s5967_s1 + $0x188] sm:$0xff]  }
  0x4f   :  { %v2047_v15 = vrot.slane %v6005_v20, 2  ;;  %3950 = vmatpush3.bf16.msra.mxu1 %v4445_v34  ;;  %v559_v44 = vsel %vm547_vm3, %v555_v58, %v4970_v23  ;;  %v4454_v34 = vld [vmem:[%s5968_s0 + $0x38] ss:$0 sps:$4 sm:$0x33]   ;;  %v6009_v58 = vshrl.u32 %v4889_v43, 16 }
  0x50   :  { %4110 = vmatpush3.bf16.msra.mxu0 %v4446_v3  ;;  %v6006_v3 = vrot.slane %v4723_v22, 1  ;;  %v2044_v13 = vor.u32 %v2043_v52, %v2042_v59  ;;  %3963 = vmatprep.subr.bf16.mxu1 %v4447_v19  ;;  %v964_v22 = vshrl.u32 %v4729_v27, 16  ;;  %v6007_v59 = vshrl.u32 %v4855_v39, 16 }
  0x51   :  { %4123 = vmatprep.subr.bf16.mxu0 %v4448_v38  ;;  %v2048_v36 = vor.u32 %v2047_v15, %v2046_v18  ;;  %v5134_v48 = vsel %vm78_vm1, %v958_v1, %v962_v54  ;;  %v968_v18 = vshll.u32 %v4752_v45, 16  ;;  %v4453_v1 = vld [vmem:[%s5968_s0 + $0x30] ss:$0 sps:$4 sm:$0x33]  }
  0x52   :  { %v398_v14 = vsel %vm385_vm2, %v6006_v3, %v397_v47  ;;  %v2050_v47 = vrot.slane %v6007_v59, 1  ;;  %v2045_v52 = vsel %vm547_vm3, %v2040_v57, %v2044_v13  ;;  %v966_v31 = vor.u32 %v964_v22, %v962_v54 }
  0x53   :  { %4100 = vmatmul.mubr.msk.bf16.gmra.mrb[8].mxu0 %vm155_vm0, %v1881_v25  ;;  %3940 = vmatmul.mubr.msk.bf16.gmra.mrb[8].mxu1 %vm155_vm0, %v398_v14  ;;  %v6008_v25 = vshll.u32 %v4855_v39, 16  ;;  %v2049_v20 = vsel %vm547_vm3, %v2044_v13, %v2048_v36  ;;  %v6010_v39 = vshll.u32 %v4889_v43, 16  ;;  %v5150_v3 = vcombine.low %v1115_v49, %v4590_v17  ;;  %v4449_v43 = vld [vmem:[%s5967_s1 + $0x88] sm:$0xff]  }
  0x54   :  { %4111 = vmatprep.mubr.msk.bf16.mxu0 %vm155_vm0, %v2041_v30  ;;  %3951 = vmatprep.mubr.msk.bf16.mxu1 %vm155_vm0, %v559_v44  ;;  %v2054_v30 = vrot.slane %v6009_v58, 1  ;;  %v5154_v57 = vrot.slane %v968_v18, 1  ;;  %v1131_v14 = vrot.slane %v4609_v26, 1  ;;  %v2059_v54 = vshrl.u32 %v4454_v34, 16 }
  0x55   :  { %v2051_v23 = vrot.slane %v6008_v25, 2  ;;  %v2055_v15 = vrot.slane %v6010_v39, 2  ;;  %v2062_v44 = vshll.u32 %v4454_v34, 16  ;;  %v577_v59 = vshrl.u32 %v4453_v1, 16  ;;  %v4456_v39 = vld [vmem:[%s5967_s1 + $0x198] sm:$0xff]  }
  0x56   :  { %v5164_v17 = vsel %vm78_vm1, %v966_v31, %v5154_v57  ;;  %v580_v25 = vshll.u32 %v4453_v1, 16  ;;  %v1128_v58 = vrot.slane %v5150_v3, 1  ;;  %v2061_v31 = vrot.slane %v2059_v54, 1 }
  0x57   :  { %v2052_v13 = vor.u32 %v2051_v23, %v2050_v47  ;;  %v2056_v49 = vor.u32 %v2055_v15, %v2054_v30  ;;  %v6011_v47 = vshll.u32 %v4609_v26, 16  ;;  %v4451_v30 = vld [vmem:[%s5967_s1 + $0x90] sm:$0xff]   ;;  %v1133_v54 = vrot.slane %v4692_v63, 1  ;;  %v4455_v26 = vld [vmem:[%s5967_s1 + $0x98] sm:$0xff]  }
  0x58   :  { %v582_v1 = vrot.slane %v580_v25, 2  ;;  %v1309_v63 = vrot.slane %v964_v22, 1 }
  0x59   :  { %v1302_v23 = vrot.slane %v6011_v47, 2  ;;  %v2053_v34 = vsel %vm547_vm3, %v2048_v36, %v2052_v13  ;;  %v2057_v36 = vsel %vm547_vm3, %v2052_v13, %v2056_v49  ;;  %v5203_v13 = vsel %vm385_vm2, %v1131_v14, %v1133_v54 }
  0x5a   :  { %v1293_v47 = vshll.u32 %v5150_v3, 16 }
  0x5b   :  { %4112 = vmatmul.mubr.msk.bf16.vlgmr.msra.gmra.mrb[0].mxu0 %vm155_vm0, %v2045_v52  ;;  %v4452_v52 = vld [vmem:[%s5967_s1 + $0x190] sm:$0xff]   ;;  %3952 = vmatmul.mubr.msk.bf16.vlgmr.msra.gmra.mrb[0].mxu1 %vm155_vm0, %v4978_v46 }
  0x5c   :  { %4124 = vmatpush3.bf16.msra.mxu0 %v4448_v38  ;;  %4115 = vmatprep.mubr.msk.bf16.mxu0 %vm155_vm0, %v2049_v20  ;;  %v1129_v38 = vrot.slane %v4606_v24, 1  ;;  %v2064_v20 = vrot.slane %v2062_v44, 2  ;;  %v5198_v44 = vld [vmem:[%s5968_s0 + $0x34] ss:$0 sps:$4 sm:$0x11]  }
  0x5d   :  { %4125 = vmatprep.subr.bf16.mxu0 %v4450_v35  ;;  %3964 = vmatpush3.bf16.msra.mxu1 %v4447_v19  ;;  %v579_v19 = vrot.slane %v577_v59, 1  ;;  %v1137_v59 = vrot.slane %v4752_v45, 1 }
  0x5e   :  { %3955 = vmatprep.mubr.msk.bf16.mxu1 %vm155_vm0, %v5002_v6  ;;  %v5185_v15 = vsel %vm385_vm2, %v1128_v58, %v1129_v38  ;;  %v5188_v46 = vsel %vm385_vm2, %v1129_v38, %v1131_v14  ;;  %3965 = vmatprep.subr.bf16.mxu1 %v4449_v43  ;;  %v1301_v6 = vrot.slane %v948_v28, 1  ;;  %v1135_v58 = vrot.slane %v4729_v27, 1 }
  0x5f   :  { %v583_v25 = vor.u32 %v582_v1, %v579_v19  ;;  %v1139_v14 = vrot.slane %v5198_v44, 1  ;;  %v1290_v38 = vshrl.u32 %v5150_v3, 16  ;;  %v4459_v3 = vld [vmem:[%s5967_s1 + $0xa0] sm:$0xff]   ;;  %v1314_v27 = vrot.slane %v968_v18, 2 }
  0x60   :  { %4126 = vmatpush3.bf16.msra.mxu0 %v4450_v35  ;;  %v2065_v35 = vor.u32 %v2064_v20, %v2061_v31  ;;  %v5209_v28 = vsel %vm385_vm2, %v1133_v54, %v1135_v58  ;;  %v1303_v19 = vor.u32 %v1302_v23, %v1301_v6  ;;  %v6016_v18 = vcombine.low %v4793_v2, %v4827_v60  ;;  %v4468_v2 = vld [vmem:[%s5967_s1 + $0x1b0] sm:$0xff]  }
  0x61   :  { %4127 = vmatprep.subr.bf16.mxu0 %v4452_v52  ;;  %3966 = vmatpush3.bf16.msra.mxu1 %v4449_v43  ;;  %v4460_v43 = vld [vmem:[%s5967_s1 + $0x1a0] sm:$0xff]   ;;  %v1292_v1 = vrot.slane %v1290_v38, 1 }
  0x62   :  { %3967 = vmatprep.subr.bf16.mxu1 %v4451_v30  ;;  %v2066_v20 = vsel %vm547_vm3, %v2056_v49, %v2065_v35  ;;  %v1305_v49 = vrot.slane %v956_v21, 1  ;;  %v2355_v21 = vld [vmem:[%s5968_s0 + $0xc] sm:$0xf]  ;;  %v6014_v35 = vcombine.low %v4556_v8, %v4561_v9 }
  0x63   :  { %4116 = vmatmul.mubr.msk.bf16.gmra.mrb[4].mxu0 %vm155_vm0, %v2053_v34  ;;  %3956 = vmatmul.mubr.msk.bf16.gmra.mrb[4].mxu1 %vm155_vm0, %v5015_v4  ;;  %v6012_v34 = vshrl.u32 %v4606_v24, 16  ;;  %v1298_v4 = vrot.slane %v936_v5, 2  ;;  %v584_v24 = vsel %vm547_vm3, %v5011_v16, %v583_v25  ;;  %v6013_v5 = vcombine.low %v4766_v53, %v4771_v56  ;;  %v5256_v16 = vld [vmem:[%s5968_s0 + $0x10] sm:$0xf] }
  0x64   :  { %4119 = vmatprep.mubr.msk.bf16.mxu0 %vm155_vm0, %v2057_v36  ;;  %4128 = vmatpush3.bf16.msra.mxu0 %v4452_v52  ;;  %v5219_v52 = vsel %vm385_vm2, %v1135_v58, %v1137_v59  ;;  %v5229_v36 = vsel %vm385_vm2, %v1137_v59, %v1139_v14  ;;  %v972_v56 = vshrl.u32 %v4752_v45, 16  ;;  %v4500_v58 = vld [vmem:[%s5968_s0 + $0x34] ss:$0 sps:$4 sm:$0x33]   ;;  %v3597_v25 = vcombine.low %v2355_v21, %v5256_v16  ;;  %v6023_v21 = vld [vmem:[#allocation5_spill] sm:$0xff] }
  0x65   :  { %4129 = vmatprep.subr.bf16.mxu0 %v4456_v39  ;;  %v1297_v31 = vrot.slane %v6012_v34, 1  ;;  %3968 = vmatpush3.bf16.msra.mxu1 %v4451_v30  ;;  %v1295_v30 = vrot.slane %v1293_v47, 2  ;;  %v1318_v14 = vshrl.u32 %v4500_v58, 16  ;;  %v1321_v38 = vshll.u32 %v4500_v58, 16  ;;  %v6025_v58 = vld [vmem:[#allocation4_spill] sm:$0xff] }
  0x66   :  { %3959 = vmatprep.mubr.msk.bf16.mxu1 %vm155_vm0, %v5022_v33  ;;  %3969 = vmatprep.subr.bf16.mxu1 %v4455_v26  ;;  %v1313_v22 = vrot.slane %v972_v56, 1  ;;  %v6015_v47 = vcombine.low %v4783_v62, %v4788_v0  ;;  %v5305_v62 = vld [vmem:[%s5968_s0 + $0x14] sm:$0xff]   ;;  %v2413_v0 = vshll.u32 %v3597_v25, 16 }
  0x67   :  { %v1299_v54 = vor.u32 %v1298_v4, %v1297_v31  ;;  %v1296_v33 = vor.u32 %v1295_v30, %v1292_v1  ;;  %v1320_v31 = vrot.slane %v1318_v14, 1  ;;  %v4461_v4 = vld [vmem:[%s5967_s1 + $0xa8] sm:$0xff]   ;;  %v4467_v30 = vld [vmem:[%s5967_s1 + $0xb0] sm:$0xff]  }
  0x68   :  { %4130 = vmatpush3.bf16.msra.mxu0 %v4456_v39  ;;  %v1306_v39 = vrot.slane %v952_v10, 2  ;;  %v1310_v10 = vrot.slane %v960_v55, 2  ;;  %v4462_v55 = vld [vmem:[%s5967_s1 + $0x1a8] sm:$0xff]   ;;  %v1315_v9 = vor.u32 %v1314_v27, %v1313_v22  ;;  %v2422_v22 = vshrl.u32 %v5305_v62, 16  ;;  %v4477_v27 = vld [vmem:[%s5967_s1 + $0xc0] sm:$0xff]  }
  0x69   :  { %4143 = vmatprep.subr.bf16.mxu0 %v4460_v43  ;;  %3970 = vmatpush3.bf16.msra.mxu1 %v4455_v26  ;;  %v5246_v23 = vsel %vm547_vm3, %v1299_v54, %v1303_v19  ;;  %v5259_v53 = vsel %vm547_vm3, %v1296_v33, %v1299_v54  ;;  %v2411_v54 = vshrl.u32 %v3597_v25, 16  ;;  %v2415_v33 = vrot.slane %v2413_v0, 1 }
  0x6a   :  { %3983 = vmatprep.subr.bf16.mxu1 %v4459_v3  ;;  %v1307_v6 = vor.u32 %v1306_v39, %v1305_v49  ;;  %v1311_v59 = vor.u32 %v1310_v10, %v1309_v63  ;;  %v2202_v49 = vld [vmem:[%s5968_s0 + $0x38] sm:$0xf]  ;;  %v6024_v10 = vld [vmem:[#allocation3_spill] sm:$0xff] }
  0x6b   :  { %4120 = vmatmul.mubr.msk.bf16.gmra.mrb[8].mxu0 %vm155_vm0, %v2066_v20  ;;  %3960 = vmatmul.mubr.msk.bf16.gmra.mrb[8].mxu1 %vm155_vm0, %v584_v24  ;;  %v1323_v20 = vrot.slane %v1321_v38, 2 }
  0x6c   :  { %4131 = vmatprep.mubr.msk.bf16.mxu0 %vm155_vm0, %v6013_v5  ;;  %3971 = vmatprep.mubr.msk.bf16.mxu1 %vm155_vm0, %v6014_v35  ;;  %v5275_v26 = vsel %vm547_vm3, %v1303_v19, %v1307_v6  ;;  %v5286_v8 = vsel %vm547_vm3, %v1307_v6, %v1311_v59  ;;  %v5297_v34 = vsel %vm547_vm3, %v1311_v59, %v1315_v9  ;;  %v6021_v5 = vld [vmem:[#allocation2_spill] sm:$0xff]  ;;  %v720_v59 = vld [vmem:[%s5968_s0 + $0x30] sm:$0xf] }
  0x6d   :  { %v1324_v60 = vor.u32 %v1323_v20, %v1320_v31  ;;  %v6018_v19 = vcombine.low %v4615_v29, %v4642_v41  ;;  %v6019_v29 = vcombine.low %v4832_v51, %v4842_v50  ;;  %v5335_v41 = vld [vmem:[%s5968_s0 + $0x1c] sm:$0xff]   ;;  %v2416_v50 = vor.u32 %v2415_v33, %v2411_v54 }
  0x6e   :  { %v4473_v51 = vld [vmem:[%s5967_s1 + $0xb8] sm:$0xff]   ;;  %v6022_v39 = vcombine.low %v4647_v42, %v6021_v5  ;;  %v3578_v6 = vcombine.low %v6023_v21, %v2202_v49  ;;  %v2426_v63 = vshll.u32 %v5335_v41, 16  ;;  %v6026_v35 = vcombine.low %v6024_v10, %v6025_v58 }
  0x6f   :  { %v5319_v1 = vsel %vm547_vm3, %v1315_v9, %v1324_v60  ;;  %v4502_v9 = vld [vmem:[%s5968_s0 + $0x2c] sm:$0xf]  ;;  %v2613_v45 = vrot.slane %v5335_v41, 1 }
  0x70   :  { %v3404_v14 = vcombine.low %v4502_v9, %v720_v59  ;;  %v2428_v38 = vrot.slane %v2426_v63, 1  ;;  %v2611_v59 = vrot.slane %v5305_v62, 1 }
  0x73   :  { %4132 = vmatmul.mubr.msk.bf16.vlgmr.msra.gmra.mrb[0].mxu0 %vm155_vm0, %v6015_v47  ;;  %v5386_v47 = vld [vmem:[%s5968_s0 + $0x2c] sm:$0xff]  }
  0x74   :  { %4144 = vmatpush3.bf16.msra.mxu0 %v4460_v43  ;;  %4135 = vmatprep.mubr.msk.bf16.mxu0 %vm155_vm0, %v6016_v18  ;;  %v6017_v43 = vcombine.low %v4569_v11, %v4574_v12  ;;  %v2418_v11 = vshll.u32 %v5305_v62, 16  ;;  %v4474_v12 = vld [vmem:[%s5967_s1 + $0x1b8] sm:$0xff]   ;;  %v2442_v0 = vshll.u32 %v5386_v47, 16 }
  0x75   :  { %4145 = vmatprep.subr.bf16.mxu0 %v4462_v55 }
  0x76   :  { %3972 = vmatmul.mubr.msk.bf16.vlgmr.msra.gmra.mrb[0].mxu1 %vm155_vm0, %v6017_v43  ;;  %v2420_v24 = vrot.slane %v2418_v11, 1  ;;  %v4481_v43 = vld [vmem:[%s5967_s1 + $0x1c8] sm:$0xff]   ;;  %v2444_v33 = vrot.slane %v2442_v0, 1 }
  0x77   :  { %3984 = vmatpush3.bf16.msra.mxu1 %v4459_v3  ;;  %3975 = vmatprep.mubr.msk.bf16.mxu1 %vm155_vm0, %v6018_v19  ;;  %v6020_v3 = vcombine.low %v4847_v61, %v4867_v32  ;;  %v5352_v61 = vld [vmem:[%s5968_s0 + $0x24] sm:$0xff]  }
  0x78   :  { %3985 = vmatprep.subr.bf16.mxu1 %v4461_v4  ;;  %4146 = vmatpush3.bf16.msra.mxu0 %v4462_v55  ;;  %v4479_v32 = vld [vmem:[%s5967_s1 + $0x1c0] sm:$0xff]   ;;  %v2421_v42 = vsel %vm78_vm1, %v2416_v50, %v2420_v24  ;;  %v2430_v55 = vshrl.u32 %v5335_v41, 16  ;;  %v2434_v25 = vshll.u32 %v5352_v61, 16  ;;  %v2424_v18 = vor.u32 %v2422_v22, %v2420_v24  ;;  %v2597_v50 = vld [vmem:[%s5968_s0 + $0xc] sm:$0xe] }
  0x79   :  { %4147 = vmatprep.subr.bf16.mxu0 %v4468_v2  ;;  %v2438_v60 = vshrl.u32 %v5352_v61, 16 }
  0x7a   :  { %v2432_v31 = vor.u32 %v2430_v55, %v2428_v38  ;;  %v2436_v20 = vrot.slane %v2434_v25, 1 }
  0x7b   :  { %4136 = vmatmul.mubr.msk.bf16.gmra.mrb[4].mxu0 %vm155_vm0, %v6019_v29  ;;  %3986 = vmatpush3.bf16.msra.mxu1 %v4461_v4  ;;  %v5398_v4 = vld [vmem:[%s5968_s0 + $0x34] sm:$0xff]   ;;  %v4480_v29 = vld [vmem:[%s5967_s1 + $0xc8] sm:$0xff]  }
  0x7c   :  { %4139 = vmatprep.mubr.msk.bf16.mxu0 %vm155_vm0, %v6020_v3  ;;  %3987 = vmatprep.subr.bf16.mxu1 %v4467_v30  ;;  %v2437_v19 = vsel %vm78_vm1, %v2432_v31, %v2436_v20  ;;  %v2450_v54 = vshll.u32 %v5398_v4, 16  ;;  %v2617_v31 = vrot.slane %v5386_v47, 1 }
  0x7d   :  { %4148 = vmatpush3.bf16.msra.mxu0 %v4468_v2  ;;  %v2429_v2 = vsel %vm78_vm1, %v2424_v18, %v2428_v38  ;;  %v4492_v38 = vld [vmem:[%s5967_s1 + $0xe0] sm:$0xff]  }
  0x7e   :  { %4149 = vmatprep.subr.bf16.mxu0 %v4474_v12  ;;  %3976 = vmatmul.mubr.msk.bf16.gmra.mrb[4].mxu1 %vm155_vm0, %v6022_v39  ;;  %v2452_v49 = vrot.slane %v2450_v54, 1  ;;  %v4484_v39 = vld [vmem:[%s5967_s1 + $0xd0] sm:$0xff]  }
  0x7f   :  { %3988 = vmatpush3.bf16.msra.mxu1 %v4467_v30  ;;  %3979 = vmatprep.mubr.msk.bf16.mxu1 %vm155_vm0, %v6026_v35  ;;  %v2446_v30 = vshrl.u32 %v5386_v47, 16 }
  0x80   :  { %3989 = vmatprep.subr.bf16.mxu1 %v4473_v51 }
  0x81   :  { %4150 = vmatpush3.bf16.msra.mxu0 %v4474_v12  ;;  %v5421_v12 = vld [vmem:[%s5968_s0 + $0x3c] ss:$0 sps:$4 sm:$0x11]   ;;  %v2448_v3 = vor.u32 %v2446_v30, %v2444_v33 }
  0x82   :  { %4163 = vmatprep.subr.bf16.mxu0 %v4479_v32  ;;  %v2458_v5 = vshll.u32 %v5421_v12, 16 }
  0x83   :  { %4140 = vmatmul.mubr.msk.bf16.gmra.mrb[8].mxu0 %vm155_vm0, %v3578_v6  ;;  %3990 = vmatpush3.bf16.msra.mxu1 %v4473_v51  ;;  %v4485_v51 = vld [vmem:[%s5967_s1 + $0x1d0] sm:$0xff]   ;;  %v2453_v21 = vsel %vm78_vm1, %v2448_v3, %v2452_v49  ;;  %v976_v6 = vshll.u32 %v5198_v44, 16  ;;  %v974_v44 = vor.u32 %v972_v56, %v5154_v57  ;;  %v2615_v57 = vrot.slane %v5352_v61, 1  ;;  %v4495_v56 = vld [vmem:[%s5967_s1 + $0x1e8] sm:$0xff]  }
  0x84   :  { %4151 = vmatprep.mubr.msk.bf16.mxu0 %vm155_vm0, %v2421_v42  ;;  %4003 = vmatprep.subr.bf16.mxu1 %v4477_v27  ;;  %v2460_v58 = vrot.slane %v2458_v5, 1  ;;  %v4493_v42 = vld [vmem:[%s5967_s1 + $0x1e0] sm:$0xff]   ;;  %v2784_v5 = vrot.slane %v2426_v63, 2  ;;  %v2791_v63 = vrot.slane %v2446_v30, 1  ;;  %v2792_v61 = vrot.slane %v2442_v0, 2 }
  0x85   :  { %v2616_v18 = vsel %vm385_vm2, %v2613_v45, %v2615_v57 }
  0x86   :  { %3980 = vmatmul.mubr.msk.bf16.gmra.mrb[8].mxu1 %vm155_vm0, %v3404_v14  ;;  %v2793_v30 = vor.u32 %v2792_v61, %v2791_v63 }
  0x87   :  { %3991 = vmatprep.mubr.msk.bf16.mxu1 %vm155_vm0, %v5057_v40  ;;  %v2440_v40 = vor.u32 %v2438_v60, %v2436_v20  ;;  %v2619_v20 = vrot.slane %v5398_v4, 1 }
  0x89   :  { %v2445_v24 = vsel %vm78_vm1, %v2440_v40, %v2444_v33  ;;  %v2618_v33 = vsel %vm385_vm2, %v2615_v57, %v2617_v31  ;;  %v2620_v40 = vsel %vm385_vm2, %v2617_v31, %v2619_v20 }
  0x8b   :  { %4152 = vmatmul.mubr.msk.bf16.vlgmr.msra.gmra.mrb[0].mxu0 %vm155_vm0, %v2429_v2 }
  0x8c   :  { %4164 = vmatpush3.bf16.msra.mxu0 %v4479_v32  ;;  %4155 = vmatprep.mubr.msk.bf16.mxu0 %vm155_vm0, %v2437_v19  ;;  %v2454_v32 = vshrl.u32 %v5398_v4, 16  ;;  %v4497_v19 = vld [vmem:[%s5967_s1 + $0x1f0] sm:$0xff]  }
  0x8d   :  { %4165 = vmatprep.subr.bf16.mxu0 %v4481_v43 }
  0x8e   :  { %3992 = vmatmul.mubr.msk.bf16.vlgmr.msra.gmra.mrb[0].mxu1 %vm155_vm0, %v5069_v37  ;;  %v3622_v37 = vcombine.low %v2597_v50, %v5256_v16  ;;  %v2456_v10 = vor.u32 %v2454_v32, %v2452_v49  ;;  %v4489_v16 = vld [vmem:[%s5967_s1 + $0xd8] sm:$0xff]   ;;  %v2621_v50 = vrot.slane %v5421_v12, 1 }
  0x8f   :  { %4004 = vmatpush3.bf16.msra.mxu1 %v4477_v27  ;;  %3995 = vmatprep.mubr.msk.bf16.mxu1 %vm155_vm0, %v5096_v7  ;;  %v4490_v7 = vld [vmem:[%s5967_s1 + $0x1d8] sm:$0xff]   ;;  %v978_v27 = vrot.slane %v976_v6, 1 }
  0x90   :  { %4005 = vmatprep.subr.bf16.mxu1 %v4480_v29  ;;  %4166 = vmatpush3.bf16.msra.mxu0 %v4481_v43  ;;  %v2610_v35 = vrot.slane %v3622_v37, 1  ;;  %v2461_v9 = vsel %vm78_vm1, %v2456_v10, %v2460_v58  ;;  %v2772_v2 = vshrl.u32 %v3622_v37, 16  ;;  %v2775_v43 = vshll.u32 %v3622_v37, 16 }
  0x91   :  { %4167 = vmatprep.subr.bf16.mxu0 %v4485_v51  ;;  %v2622_v12 = vsel %vm385_vm2, %v2619_v20, %v2621_v50 }
  0x92   :  { %v2612_v14 = vsel %vm385_vm2, %v2610_v35, %v2611_v59  ;;  %v2774_v3 = vrot.slane %v2772_v2, 1  ;;  %v2777_v49 = vrot.slane %v2775_v43, 2 }
  0x93   :  { %4156 = vmatmul.mubr.msk.bf16.gmra.mrb[4].mxu0 %vm155_vm0, %v2445_v24  ;;  %4006 = vmatpush3.bf16.msra.mxu1 %v4480_v29  ;;  %v4496_v29 = vld [vmem:[%s5967_s1 + $0xf0] sm:$0xff]   ;;  %v2783_v24 = vrot.slane %v2430_v55, 1 }
  0x94   :  { %4159 = vmatprep.mubr.msk.bf16.mxu0 %vm155_vm0, %v2453_v21  ;;  %4007 = vmatprep.subr.bf16.mxu1 %v4484_v39  ;;  %v2778_v62 = vor.u32 %v2777_v49, %v2774_v3  ;;  %v2787_v21 = vrot.slane %v2438_v60, 1 }
  0x95   :  { %4168 = vmatpush3.bf16.msra.mxu0 %v4485_v51  ;;  %v2779_v51 = vrot.slane %v2422_v22, 1  ;;  %v4498_v22 = vld [vmem:[%s5967_s1 + $0xf8] sm:$0xff]  }
  0x96   :  { %4169 = vmatprep.subr.bf16.mxu0 %v4490_v7  ;;  %3996 = vmatmul.mubr.msk.bf16.gmra.mrb[4].mxu1 %vm155_vm0, %v5134_v48  ;;  %v979_v48 = vsel %vm78_vm1, %v974_v44, %v978_v27 }
  0x97   :  { %4008 = vmatpush3.bf16.msra.mxu1 %v4484_v39  ;;  %3999 = vmatprep.mubr.msk.bf16.mxu1 %vm155_vm0, %v5164_v17  ;;  %v2614_v17 = vsel %vm385_vm2, %v2611_v59, %v2613_v45 }
  0x98   :  { %4009 = vmatprep.subr.bf16.mxu1 %v4489_v16 }
  0x99   :  { %4170 = vmatpush3.bf16.msra.mxu0 %v4490_v7 }
  0x9a   :  { %4183 = vmatprep.subr.bf16.mxu0 %v4493_v42 }
  0x9b   :  { %4160 = vmatmul.mubr.msk.bf16.gmra.mrb[8].mxu0 %vm155_vm0, %v2461_v9  ;;  %4010 = vmatpush3.bf16.msra.mxu1 %v4489_v16 }
  0x9c   :  { %4171 = vmatprep.mubr.msk.bf16.mxu0 %vm155_vm0, %v2612_v14  ;;  %4023 = vmatprep.subr.bf16.mxu1 %v4492_v38 }
  0x9e   :  { %4000 = vmatmul.mubr.msk.bf16.gmra.mrb[8].mxu1 %vm155_vm0, %v979_v48 }
  0x9f   :  { %4011 = vmatprep.mubr.msk.bf16.mxu1 %vm155_vm0, %v5185_v15  ;;  %v4494_v15 = vld [vmem:[%s5967_s1 + $0xe8] sm:$0xff]  }
  0xa3   :  { %4172 = vmatmul.mubr.msk.bf16.vlgmr.msra.gmra.mrb[0].mxu0 %vm155_vm0, %v2614_v17 }
  0xa4   :  { %4184 = vmatpush3.bf16.msra.mxu0 %v4493_v42  ;;  %4175 = vmatprep.mubr.msk.bf16.mxu0 %vm155_vm0, %v2616_v18 }
  0xa5   :  { %4185 = vmatprep.subr.bf16.mxu0 %v4495_v56 }
  0xa6   :  { %4012 = vmatmul.mubr.msk.bf16.vlgmr.msra.gmra.mrb[0].mxu1 %vm155_vm0, %v5188_v46  ;;  %v2780_v46 = vrot.slane %v2418_v11, 2 }
  0xa7   :  { %4024 = vmatpush3.bf16.msra.mxu1 %v4492_v38  ;;  %4015 = vmatprep.mubr.msk.bf16.mxu1 %vm155_vm0, %v5203_v13  ;;  %v4499_v13 = vld [vmem:[%s5967_s1 + $0x1f8] sm:$0xff]  }
  0xa8   :  { %4025 = vmatprep.subr.bf16.mxu1 %v4494_v15  ;;  %4186 = vmatpush3.bf16.msra.mxu0 %v4495_v56  ;;  %v2781_v11 = vor.u32 %v2780_v46, %v2779_v51 }
  0xa9   :  { %4187 = vmatprep.subr.bf16.mxu0 %v4497_v19 }
  0xaa   :  { %v2782_v39 = vsel %vm547_vm3, %v2778_v62, %v2781_v11 }
  0xab   :  { %4176 = vmatmul.mubr.msk.bf16.gmra.mrb[4].mxu0 %vm155_vm0, %v2618_v33  ;;  %4026 = vmatpush3.bf16.msra.mxu1 %v4494_v15 }
  0xac   :  { %4179 = vmatprep.mubr.msk.bf16.mxu0 %vm155_vm0, %v2620_v40  ;;  %4027 = vmatprep.subr.bf16.mxu1 %v4496_v29 }
  0xad   :  { %4188 = vmatpush3.bf16.msra.mxu0 %v4497_v19 }
  0xae   :  { %4189 = vmatprep.subr.bf16.mxu0 %v4499_v13  ;;  %4016 = vmatmul.mubr.msk.bf16.gmra.mrb[4].mxu1 %vm155_vm0, %v5209_v28  ;;  %v2788_v28 = vrot.slane %v2434_v25, 2  ;;  %v4501_v25 = vld [vmem:[%s5968_s0 + $0x3c] ss:$0 sps:$4 sm:$0x33]  }
  0xaf   :  { %4028 = vmatpush3.bf16.msra.mxu1 %v4496_v29  ;;  %4019 = vmatprep.mubr.msk.bf16.mxu1 %vm155_vm0, %v5219_v52  ;;  %v2785_v52 = vor.u32 %v2784_v5, %v2783_v24  ;;  %v2800_v37 = vshrl.u32 %v4501_v25, 16  ;;  %v2803_v47 = vshll.u32 %v4501_v25, 16 }
  0xb0   :  { %4029 = vmatprep.subr.bf16.mxu1 %v4498_v22  ;;  %v2789_v55 = vor.u32 %v2788_v28, %v2787_v21 }
  0xb1   :  { %4190 = vmatpush3.bf16.msra.mxu0 %v4499_v13  ;;  %v2786_v41 = vsel %vm547_vm3, %v2781_v11, %v2785_v52  ;;  %v2805_v6 = vrot.slane %v2803_v47, 2 }
  0xb2   :  { %v2790_v60 = vsel %vm547_vm3, %v2785_v52, %v2789_v55  ;;  %v2794_v7 = vsel %vm547_vm3, %v2789_v55, %v2793_v30 }
  0xb3   :  { %4180 = vmatmul.mubr.msk.bf16.gmra.mrb[8].mxu0 %vm155_vm0, %v2622_v12  ;;  %4030 = vmatpush3.bf16.msra.mxu1 %v4498_v22 }
  0xb4   :  { %4191 = vmatprep.mubr.msk.bf16.mxu0 %vm155_vm0, %v2782_v39 }
  0xb6   :  { %4020 = vmatmul.mubr.msk.bf16.gmra.mrb[8].mxu1 %vm155_vm0, %v5229_v36  ;;  %v2795_v36 = vrot.slane %v2454_v32, 1  ;;  %v2802_v32 = vrot.slane %v2800_v37, 1 }
  0xb7   :  { %4031 = vmatprep.mubr.msk.bf16.mxu1 %vm155_vm0, %v5259_v53  ;;  %v2796_v53 = vrot.slane %v2450_v54, 2 }
  0xb8   :  { %v2806_v54 = vor.u32 %v2805_v6, %v2802_v32 }
  0xb9   :  { %v2797_v0 = vor.u32 %v2796_v53, %v2795_v36 }
  0xbb   :  { %4192 = vmatmul.mubr.msk.bf16.vlgmr.msra.gmra.mrb[0].mxu0 %vm155_vm0, %v2786_v41  ;;  %v2798_v4 = vsel %vm547_vm3, %v2793_v30, %v2797_v0 }
  0xbc   :  { %4195 = vmatprep.mubr.msk.bf16.mxu0 %vm155_vm0, %v2790_v60 }
  0xbe   :  { %4032 = vmatmul.mubr.msk.bf16.vlgmr.msra.gmra.mrb[0].mxu1 %vm155_vm0, %v5246_v23  ;;  %v2807_v23 = vsel %vm547_vm3, %v2797_v0, %v2806_v54 }
  0xbf   :  { %4035 = vmatprep.mubr.msk.bf16.mxu1 %vm155_vm0, %v5275_v26  ;;  %v3004_v26 = vlaneseq }
  0xc1   :  { %v3005_v10 = vshrl.u32 %v3004_v26, 7 }
  0xc3   :  { %4196 = vmatmul.mubr.msk.bf16.gmra.mrb[4].mxu0 %vm155_vm0, %v2794_v7  ;;  %v3007_v58 = vadd.s32 16, %v3005_v10  ;;  %v3008_v35 = vadd.s32 24, %v3005_v10  ;;  %v5573_v59 = vcvt.s32.f32 %v3005_v10  ;;  %v3006_v42 = vadd.s32 8, %v3005_v10 }
  0xc4   :  { %4199 = vmatprep.mubr.msk.bf16.mxu0 %vm155_vm0, %v2798_v4  ;;  %v3011_v9 = vadd.s32 48, %v3005_v10  ;;  %v3009_v38 = vadd.s32 32, %v3005_v10  ;;  %v3012_v48 = vadd.s32 56, %v3005_v10  ;;  %v3010_v18 = vadd.s32 40, %v3005_v10 }
  0xc5   :  { %v5571_v16 = vcvt.s32.f32 %v3007_v58  ;;  %v5576_v44 = vcvt.s32.f32 %v3008_v35  ;;  %v5579_v27 = vcvt.s32.f32 %v3006_v42  ;;  %v3013_v12 = vadd.s32 64, %v3005_v10 }
  0xc6   :  { %4036 = vmatmul.mubr.msk.bf16.gmra.mrb[4].mxu1 %vm155_vm0, %v5286_v8  ;;  %v5583_v17 = vcvt.s32.f32 %v3011_v9  ;;  %v5585_v20 = vcvt.s32.f32 %v3009_v38  ;;  %v5587_v15 = vcvt.s32.f32 %v3012_v48  ;;  %v5590_v40 = vcvt.s32.f32 %v3010_v18 }
  0xc7   :  { %4039 = vmatprep.mubr.msk.bf16.mxu1 %vm155_vm0, %v5297_v34  ;;  %v3044_v8 = vadd.f32 0.5, %v5571_v16  ;;  %v3042_v34 = vadd.f32 0.5, %v5573_v59  ;;  %v3043_v57 = vadd.f32 0.5, %v5579_v27  ;;  %v3014_v55 = vadd.s32 72, %v3005_v10 }
  0xc8   :  { %v3048_v19 = vadd.f32 0.5, %v5583_v17  ;;  %v3046_v3 = vadd.f32 0.5, %v5585_v20  ;;  %v3049_v49 = vadd.f32 0.5, %v5587_v15  ;;  %v3047_v22 = vadd.f32 0.5, %v5590_v40 }
  0xc9   :  { %v3056_v14 = vmul.f32 0.020833334, %v3044_v8  ;;  %v3054_v45 = vmul.f32 0.020833334, %v3042_v34  ;;  %v3055_v43 = vmul.f32 0.020833334, %v3043_v57  ;;  %v5605_v60 = vcvt.s32.f32 %v3013_v12 }
  0xca   :  { %v3060_v13 = vmul.f32 0.020833334, %v3048_v19  ;;  %v3058_v11 = vmul.f32 0.020833334, %v3046_v3  ;;  %v3061_v24 = vmul.f32 0.020833334, %v3049_v49  ;;  %v5611_v7 = vcvt.s32.f32 %v3014_v55 }
  0xcb   :  { %4200 = vmatmul.mubr.msk.bf16.gmra.mrb[8].mxu0 %vm155_vm0, %v2807_v23  ;;  %v3068_v56 = vfloor.f32 %v3056_v14  ;;  %v3066_v2 = vfloor.f32 %v3054_v45  ;;  %v3067_v46 = vfloor.f32 %v3055_v43  ;;  %v3059_v52 = vmul.f32 0.020833334, %v3047_v22 }
  0xcc   :  { %v3072_v21 = vfloor.f32 %v3060_v13  ;;  %v3070_v63 = vfloor.f32 %v3058_v11  ;;  %v3073_v61 = vfloor.f32 %v3061_v24  ;;  %v3015_v25 = vadd.s32 80, %v3005_v10 }
  0xcd   :  { %v3080_v33 = vmul.f32 48.0, %v3068_v56  ;;  %v3078_v51 = vmul.f32 48.0, %v3066_v2  ;;  %v3079_v39 = vmul.f32 48.0, %v3067_v46  ;;  %v3071_v47 = vfloor.f32 %v3059_v52 }
  0xce   :  { %4040 = vmatmul.mubr.msk.bf16.gmra.mrb[8].mxu1 %vm155_vm0, %v5319_v1  ;;  %v3045_v1 = vadd.f32 0.5, %v5576_v44  ;;  %v3084_v30 = vmul.f32 48.0, %v3072_v21  ;;  %v3016_v0 = vadd.s32 88, %v3005_v10  ;;  %v3082_v6 = vmul.f32 48.0, %v3070_v63 }
  0xcf   :  { %v5595_v50 = vsub.f32 %v5571_v16, %v3080_v33  ;;  %v5599_v5 = vsub.f32 %v5573_v59, %v3078_v51  ;;  %v5609_v53 = vsub.f32 %v5579_v27, %v3079_v39  ;;  %v3085_v4 = vmul.f32 48.0, %v3073_v61 }
  0xd0   :  { %v3057_v31 = vmul.f32 0.020833334, %v3045_v1  ;;  %v5614_v54 = vcvt.s32.f32 %v3015_v25  ;;  %v3050_v23 = vadd.f32 0.5, %v5605_v60  ;;  %v5619_v35 = vsub.f32 %v5583_v17, %v3084_v30 }
  0xd1   :  { %v3104_v28 = vadd.f32 0.5, %v5595_v50  ;;  %v3102_v36 = vadd.f32 0.5, %v5599_v5  ;;  %v3103_v58 = vadd.f32 0.5, %v5609_v53  ;;  %v3083_v8 = vmul.f32 48.0, %v3071_v47 }
  0xd2   :  { %v3069_v29 = vfloor.f32 %v3057_v31  ;;  %v5621_v34 = vcvt.s32.f32 %v3016_v0  ;;  %v3051_v10 = vadd.f32 0.5, %v5611_v7  ;;  %v5625_v14 = vsub.f32 %v5585_v20, %v3082_v6 }
  0xd3   :  { %v3116_v37 = vmul.f32 0.125, %v3104_v28  ;;  %v3114_v26 = vmul.f32 0.125, %v3102_v36  ;;  %v5628_v1 = vsub.f32 %v5587_v15, %v3085_v4  ;;  %v3052_v38 = vadd.f32 0.5, %v5614_v54 }
  0xd4   :  { %v3081_v62 = vmul.f32 48.0, %v3069_v29  ;;  %v3062_v48 = vmul.f32 0.020833334, %v3050_v23  ;;  %v3115_v57 = vmul.f32 0.125, %v3103_v58  ;;  %v3108_v56 = vadd.f32 0.5, %v5619_v35 }
  0xd5   :  { %v3128_v42 = vfloor.f32 %v3116_v37  ;;  %v3126_v45 = vfloor.f32 %v3114_v26  ;;  %v5633_v31 = vsub.f32 %v5590_v40, %v3083_v8  ;;  %v3053_v2 = vadd.f32 0.5, %v5621_v34 }
  0xd6   :  { %v5603_v41 = vsub.f32 %v5576_v44, %v3081_v62  ;;  %v3063_v43 = vmul.f32 0.020833334, %v3051_v10  ;;  %v3106_v33 = vadd.f32 0.5, %v5625_v14  ;;  %v3109_v29 = vadd.f32 0.5, %v5628_v1 }
  0xd7   :  { %v3140_v18 = vmul.f32 8.0, %v3128_v42  ;;  %v3064_v3 = vmul.f32 0.020833334, %v3052_v38  ;;  %v3074_v49 = vfloor.f32 %v3062_v48  ;;  %v3138_v51 = vmul.f32 8.0, %v3126_v45 }
  0xd8   :  { %v3105_v32 = vadd.f32 0.5, %v5603_v41  ;;  %v3127_v46 = vfloor.f32 %v3115_v57  ;;  %v3120_v13 = vmul.f32 0.125, %v3108_v56  ;;  %v3107_v62 = vadd.f32 0.5, %v5633_v31 }
  0xd9   :  { %v3152_v22 = vsub.f32 %v5595_v50, %v3140_v18  ;;  %v3065_v11 = vmul.f32 0.020833334, %v3053_v2  ;;  %v3075_v24 = vfloor.f32 %v3063_v43  ;;  %v3118_v39 = vmul.f32 0.125, %v3106_v33 }
  0xda   :  { %v3117_v9 = vmul.f32 0.125, %v3105_v32  ;;  %vm3164_vm4 = vcmp.lt.f32.partialorder %v5571_v16, 96.0  ;;  %v3121_v21 = vmul.f32 0.125, %v3109_v29  ;;  %v3076_v28 = vfloor.f32 %v3064_v3 }
  0xdb   :  { %v3086_v52 = vmul.f32 48.0, %v3074_v49  ;;  %vm5641_vm5 = vcmp.lt.f32.partialorder %v3128_v42, 3.0  ;;  %v3150_v63 = vsub.f32 %v5599_v5, %v3138_v51  ;;  %v3139_v61 = vmul.f32 8.0, %v3127_v46 }
  0xdc   :  { %v3129_v19 = vfloor.f32 %v3117_v9  ;;  %v3132_v25 = vfloor.f32 %v3120_v13  ;;  %vm5646_vm6 = vcmp.lt.f32.partialorder %v3152_v22, 5.0  ;;  %v3119_v36 = vmul.f32 0.125, %v3107_v62  ;;  %vm5664_vm10 = vmand %vm3164_vm4, %vm5641_vm5 }
  0xdd   :  { %v3077_v30 = vfloor.f32 %v3065_v11  ;;  %v3087_v37 = vmul.f32 48.0, %v3075_v24  ;;  %vm3162_vm7 = vcmp.lt.f32.partialorder %v5573_v59, 96.0  ;;  %vm5651_vm8 = vcmp.lt.f32.partialorder %v3126_v45, 3.0 }
  0xde   :  { %v3141_v12 = vmul.f32 8.0, %v3129_v19  ;;  %v3130_v32 = vfloor.f32 %v3118_v39  ;;  %vm3165_vm9 = vcmp.lt.f32.partialorder %v5576_v44, 96.0  ;;  %v3133_v5 = vfloor.f32 %v3121_v21  ;;  %vm5677_vm14 = vmand %vm3162_vm7, %vm5651_vm8 }
  0xdf   :  { %v3088_v6 = vmul.f32 48.0, %v3076_v28  ;;  %v5658_v4 = vsub.f32 %v5605_v60, %v3086_v52  ;;  %vm3177_vm11 = vcmp.lt.f32.partialorder %v3129_v19, 3.0  ;;  %v3151_v26 = vsub.f32 %v5609_v53, %v3139_v61 }
  0xe0   :  { %v3153_v0 = vsub.f32 %v5603_v41, %v3141_v12  ;;  %vm3163_vm12 = vcmp.lt.f32.partialorder %v5579_v27, 96.0  ;;  %v3144_v41 = vmul.f32 8.0, %v3132_v25  ;;  %vm3175_vm13 = vcmp.lt.f32.partialorder %v3127_v46, 3.0  ;;  %vm5691_vm1 = vmand %vm3165_vm9, %vm3177_vm11 }
  0xe1   :  { %v3131_v58 = vfloor.f32 %v3119_v36  ;;  %v3089_v42 = vmul.f32 48.0, %v3077_v30  ;;  %v5671_v8 = vsub.f32 %v5611_v7, %v3087_v37  ;;  %vm5681_vm15 = vcmp.lt.f32.partialorder %v3150_v63, 5.0  ;;  %vm5705_vm3 = vmand %vm3163_vm12, %vm3175_vm13 }
  0xe2   :  { %v3142_v53 = vmul.f32 8.0, %v3130_v32  ;;  %vm5695_vm2 = vcmp.lt.f32.partialorder %v3153_v0, 5.0  ;;  %v6041_v59 = vmov 0  ;;  %v3145_v38 = vmul.f32 8.0, %v3133_v5 }
  0xe3   :  { %v6042_v59 = vsel %vm5695_vm2, 4294967295, %v6041_v59  ;;  %v5700_v48 = vsub.f32 %v5614_v54, %v3088_v6  ;;  %v3110_v45 = vadd.f32 0.5, %v5658_v4  ;;  %v6043_v57 = vmov 0 }
  0xe4   :  { %v6044_v57 = vsel %vm5705_vm3, 4294967295, %v6043_v57  ;;  %vm5709_vm4 = vcmp.lt.f32.partialorder %v3151_v26, 5.0  ;;  %v6045_v44 = vmov 0  ;;  %v3156_v56 = vsub.f32 %v5619_v35, %v3144_v41 }
  0xe5   :  { %v6046_v44 = vsel %vm5709_vm4, 4294967295, %v6045_v44  ;;  %vm3168_vm5 = vcmp.lt.f32.partialorder %v5583_v17, 96.0  ;;  %vm3180_vm8 = vcmp.lt.f32.partialorder %v3132_v25, 3.0  ;;  %v3143_v18 = vmul.f32 8.0, %v3131_v58 }
  0xe6   :  { %v5720_v27 = vsub.f32 %v5621_v34, %v3089_v42  ;;  %v3111_v2 = vadd.f32 0.5, %v5671_v8  ;;  %v3154_v35 = vsub.f32 %v5625_v14, %v3142_v53  ;;  %vm3166_vm11 = vcmp.lt.f32.partialorder %v5585_v20, 96.0  ;;  %vm5740_vm9 = vmand %vm3168_vm5, %vm3180_vm8 }
  0xe7   :  { %vm3178_vm12 = vcmp.lt.f32.partialorder %v3130_v32, 3.0  ;;  %v3157_v43 = vsub.f32 %v5628_v1, %v3145_v38  ;;  %vm3181_vm0 = vcmp.lt.f32.partialorder %v3133_v5, 3.0  ;;  %v3112_v19 = vadd.f32 0.5, %v5700_v48 }
  0xe8   :  { %v5736_v33 = vmul.f32 0.125, %v3110_v45  ;;  %vm5744_vm2 = vcmp.lt.f32.partialorder %v3156_v56, 5.0  ;;  %vm3167_vm13 = vcmp.lt.f32.partialorder %v5590_v40, 96.0  ;;  %vm5749_vm7 = vmand %vm3166_vm11, %vm3178_vm12  ;;  %v3155_v1 = vsub.f32 %v5633_v31, %v3143_v18 }
  0xe9   :  { %vm3179_vm4 = vcmp.lt.f32.partialorder %v3131_v58, 3.0  ;;  %v3113_v3 = vadd.f32 0.5, %v5720_v27  ;;  %v5755_v17 = vmul.f32 0.125, %v3111_v2  ;;  %vm5757_vm5 = vcmp.lt.f32.partialorder %v3154_v35, 5.0 }
  0xea   :  { %vm6055_vm8 = vcmp.lt.f32.partialorder %v5587_v15, 96.0  ;;  %vm5771_vm12 = vcmp.lt.f32.partialorder %v3157_v43, 5.0  ;;  %v3124_v22 = vmul.f32 0.125, %v3112_v19  ;;  %v3134_v62 = vfloor.f32 %v5736_v33 }
  0xeb   :  { %vm5763_vm3 = vmand %vm6055_vm8, %vm3181_vm0  ;;  %vm5786_vm11 = vcmp.lt.f32.partialorder %v3155_v1, 5.0  ;;  %v5790_v39 = vmul.f32 0.125, %v3113_v3  ;;  %v3135_v21 = vfloor.f32 %v5755_v17  ;;  %v4503_v40 = vmov 0.0  }
  0xec   :  { %vm5778_vm0 = vmand %vm3167_vm13, %vm3179_vm4  ;;  %v3136_v50 = vfloor.f32 %v3124_v22  ;;  %v3146_v36 = vmul.f32 8.0, %v3134_v62 }
  0xed   :  { %vm6064_vm4 = vmand %vm5664_vm10, %vm5646_vm6  ;;  %vm6066_vm6 = vnez %v6042_v59  ;;  %v3137_v26 = vfloor.f32 %v5790_v39  ;;  %v3147_v41 = vmul.f32 8.0, %v3135_v21 }
  0xee   :  { %v3666_v52 = vsel %vm6064_vm4, 1.0, %v4503_v40  ;;  %vm6065_vm13 = vmand %vm5677_vm14, %vm5681_vm15  ;;  %vm6068_vm14 = vnez %v6044_v57  ;;  %vm6069_vm15 = vnez %v6046_v44  ;;  %v3148_v59 = vmul.f32 8.0, %v3136_v50 }
  0xef   :  { %v3664_v55 = vsel %vm6065_vm13, 1.0, %v4503_v40  ;;  %vm3217_vm8 = vmand %vm5763_vm3, %vm5771_vm12  ;;  %v3158_v38 = vsub.f32 %v5658_v4, %v3146_v36  ;;  %v3149_v43 = vmul.f32 8.0, %v3137_v26  ;;  %v3159_v19 = vsub.f32 %v5671_v8, %v3147_v41 }
  0xf0   :  { %vm6067_vm10 = vmand %vm5691_vm1, %vm6066_vm6  ;;  %v5840_v23 = vsel %vm3217_vm8, 1.0, %v4503_v40  ;;  %v3160_v17 = vsub.f32 %v5700_v48, %v3148_v59  ;;  %vm5868_vm8 = vcmp.lt.f32.partialorder %v3135_v21, 3.0 }
  0xf1   :  { %v3667_v25 = vsel %vm6067_vm10, 1.0, %v4503_v40  ;;  %vm6070_vm4 = vmand %vm6068_vm14, %vm6069_vm15  ;;  %vm5881_vm6 = vcmp.lt.f32.partialorder %v3159_v19, 5.0 }
  0xf2   :  { %v3665_v47 = vsel %vm6070_vm4, 1.0, %v4503_v40  ;;  %vm6071_vm3 = vmand %vm5740_vm9, %vm5744_vm2  ;;  %vm3172_vm2 = vcmp.lt.f32.partialorder %v5614_v54, 96.0  ;;  %vm3171_vm9 = vcmp.lt.f32.partialorder %v5611_v7, 96.0  ;;  %vm5893_vm14 = vcmp.lt.f32.partialorder %v3160_v17, 5.0 }
  0xf3   :  { %v5827_v0 = vsel %vm6071_vm3, 1.0, %v4503_v40  ;;  %vm6072_vm1 = vmand %vm5749_vm7, %vm5757_vm5  ;;  %vm3170_vm7 = vcmp.lt.f32.partialorder %v5605_v60, 96.0  ;;  %vm5851_vm5 = vcmp.lt.f32.partialorder %v3134_v62, 3.0  ;;  %vm3173_vm4 = vcmp.lt.f32.partialorder %v5621_v34, 96.0 }
  0xf4   :  { %v3668_v32 = vsel %vm6072_vm1, 1.0, %v4503_v40  ;;  %vm3215_vm12 = vmand %vm5778_vm0, %vm5786_vm11  ;;  %vm5859_vm11 = vcmp.lt.f32.partialorder %v3136_v50, 3.0  ;;  %vm5864_vm0 = vcmp.lt.f32.partialorder %v3158_v38, 5.0  ;;  %vm5902_vm3 = vcmp.lt.f32.partialorder %v3137_v26, 3.0 }
  0xf5   :  { %v3669_v9 = vsel %vm3215_vm12, 1.0, %v4503_v40  ;;  %vm5876_vm13 = vmand %vm3170_vm7, %vm5851_vm5 }
  0xf6   :  { %vm5889_vm10 = vmand %vm3171_vm9, %vm5868_vm8 }
  0xf7   :  { %vm3218_vm15 = vmand %vm5876_vm13, %vm5864_vm0 }
  0xf8   :  { %vm5910_vm1 = vmand %vm3172_vm2, %vm5859_vm11 }
  0xf9   :  { %vm3219_vm12 = vmand %vm5889_vm10, %vm5881_vm6 }
  0xfa   :  { %vm5935_vm2 = vmand %vm3173_vm4, %vm5902_vm3  ;;  %v3673_v38 = vsel %vm3219_vm12, 1.0, %v4503_v40 }
  0xfb   :  { %vm3220_vm9 = vmand %vm5910_vm1, %vm5893_vm14 }
 0x18e   :  { %v4193_v49 = vpop.f32.mrb[0].mxu0 }
 0x18f   :  { %v2884_v13 = vpop.f32.mrb[1].mxu0 }
 0x190   :  { %v4194_v11 = vpop.f32.mrb[2].mxu0 }
 0x191   :  { %v2887_v24 = vpop.f32.mrb[3].mxu0  ;;  %v4033_v28 = vpop.f32.mrb[0].mxu1 }
 0x192   :  { %v4203_v63 = vadd.f32 %v4193_v49, %v4033_v28  ;;  %v1402_v61 = vpop.f32.mrb[1].mxu1 }
 0x193   :  { %v4204_v30 = vadd.f32 %v2884_v13, %v1402_v61  ;;  %v4034_v37 = vpop.f32.mrb[2].mxu1 }
 0x194   :  { %v4205_v5 = vadd.f32 %v4194_v11, %v4034_v37  ;;  %v1405_v6 = vpop.f32.mrb[3].mxu1  ;;  %v3248_v45 = vmul.f32 %v4203_v63, %v3666_v52 }
 0x195   :  { %v3246_v58 = vmul.f32 %v4204_v30, %v3664_v55  ;;  %v4206_v42 = vadd.f32 %v2887_v24, %v1405_v6  ;;  %v3161_v24 = vsub.f32 %v5720_v27, %v3149_v43 }
 0x196   :  { %v4197_v16 = vpop.f32.mrb[4].mxu0  ;;  %v3696_v10 = vpack.c.bf16 %v4205_v5, %v4203_v63  ;;  %v3249_v18 = vmul.f32 %v4205_v5, %v3667_v25  ;;  %v3278_v51 = vmul.f32 %v4203_v63, %v3248_v45 }
 0x197   :  { %v2900_v53 = vpop.f32.mrb[5].mxu0  ;;  %v3691_v57 = vpack.c.bf16 %v4206_v42, %v4204_v30  ;;  %v3247_v44 = vmul.f32 %v4206_v42, %v3665_v47  ;;  %v3276_v4 = vmul.f32 %v4204_v30, %v3246_v58  ;;  %vm5939_vm7 = vcmp.lt.f32.partialorder %v3161_v24, 5.0 }
 0x198   :  { %v4198_v56 = vpop.f32.mrb[6].mxu0  ;;  %3718 = vst [vmem:[%s5969_s2 + $0x8] sm:$0xff] %v3696_v10   ;;  %v3279_v48 = vmul.f32 %v4205_v5, %v3249_v18  ;;  %vm3221_vm5 = vmand %vm5935_vm2, %vm5939_vm7 }
 0x199   :  { %v2903_v2 = vpop.f32.mrb[7].mxu0  ;;  %3692 = vst [vmem:[%s5969_s2] sm:$0xff] %v3691_v57   ;;  %v3258_v33 = vadd.f32 %v3247_v44, %v3246_v58  ;;  %v3277_v14 = vmul.f32 %v4206_v42, %v3247_v44  ;;  %v4037_v20 = vpop.f32.mrb[4].mxu1 }
 0x19a   :  { %v4207_v1 = vadd.f32 %v4197_v16, %v4037_v20  ;;  %v1418_v3 = vpop.f32.mrb[5].mxu1  ;;  %v3675_v20 = vsel %vm3221_vm5, 1.0, %v4503_v40 }
 0x19b   :  { %v3259_v46 = vadd.f32 %v3258_v33, %v3248_v45  ;;  %v3288_v13 = vadd.f32 %v3277_v14, %v3276_v4  ;;  %v4208_v31 = vadd.f32 %v2900_v53, %v1418_v3  ;;  %v4038_v22 = vpop.f32.mrb[6].mxu1 }
 0x19c   :  { %v4209_v11 = vadd.f32 %v4198_v56, %v4038_v22  ;;  %v1421_v15 = vpop.f32.mrb[7].mxu1 }
 0x19d   :  { %v3289_v39 = vadd.f32 %v3288_v13, %v3278_v51  ;;  %v3250_v21 = vmul.f32 %v4208_v31, %v3668_v32  ;;  %v3260_v28 = vadd.f32 %v3259_v46, %v3249_v18  ;;  %v4210_v52 = vadd.f32 %v2903_v2, %v1421_v15 }
 0x19e   :  { %v4201_v55 = vpop.f32.mrb[8].mxu0  ;;  %v3706_v63 = vpack.c.bf16 %v4209_v11, %v4207_v1  ;;  %v3252_v32 = vmul.f32 %v4207_v1, %v5827_v0  ;;  %v3672_v0 = vsel %vm3218_vm15, 1.0, %v4503_v40  ;;  %v3253_v42 = vmul.f32 %v4209_v11, %v5840_v23 }
 0x19f   :  { %v2916_v61 = vpop.f32.mrb[9].mxu0  ;;  %v3261_v7 = vadd.f32 %v3260_v28, %v3250_v21  ;;  %v3280_v50 = vmul.f32 %v4208_v31, %v3250_v21  ;;  %v3290_v36 = vadd.f32 %v3289_v39, %v3279_v48  ;;  %v3701_v30 = vpack.c.bf16 %v4210_v52, %v4208_v31 }
 0x1a0   :  { %v4202_v47 = vpop.f32.mrb[10].mxu0  ;;  %3720 = vst [vmem:[%s5969_s2 + $0x18] sm:$0xff] %v3706_v63   ;;  %v3251_v5 = vmul.f32 %v4210_v52, %v3669_v9  ;;  %v3282_v45 = vmul.f32 %v4207_v1, %v3252_v32  ;;  %v3674_v18 = vsel %vm3220_vm9, 1.0, %v4503_v40  ;;  %v3283_v43 = vmul.f32 %v4209_v11, %v3253_v42 }
 0x1a1   :  { %v2919_v6 = vpop.f32.mrb[11].mxu0  ;;  %v3291_v26 = vadd.f32 %v3290_v36, %v3280_v50  ;;  %3719 = vst [vmem:[%s5969_s2 + $0x10] sm:$0xff] %v3701_v30   ;;  %v4041_v54 = vpop.f32.mrb[8].mxu1 }
 0x1a2   :  { %v3262_v16 = vadd.f32 %v3261_v7, %v3251_v5  ;;  %v3281_v10 = vmul.f32 %v4210_v52, %v3251_v5  ;;  %v4211_v53 = vadd.f32 %v4201_v55, %v4041_v54  ;;  %v1434_v9 = vpop.f32.mrb[9].mxu1 }
 0x1a3   :  { %v4212_v34 = vadd.f32 %v2916_v61, %v1434_v9  ;;  %v4042_v59 = vpop.f32.mrb[10].mxu1 }
 0x1a4   :  { %v3263_v57 = vadd.f32 %v3262_v16, %v3252_v32  ;;  %v3292_v44 = vadd.f32 %v3291_v26, %v3281_v10  ;;  %v4213_v56 = vadd.f32 %v4202_v47, %v4042_v59  ;;  %v1437_v23 = vpop.f32.mrb[11].mxu1  ;;  %v3256_v3 = vmul.f32 %v4211_v53, %v3674_v18 }
 0x1a5   :  { %v3254_v2 = vmul.f32 %v4212_v34, %v3672_v0  ;;  %v4214_v35 = vadd.f32 %v2919_v6, %v1437_v23 }
 0x1a6   :  { %v3293_v19 = vadd.f32 %v3292_v44, %v3282_v45  ;;  %v3264_v4 = vadd.f32 %v3263_v57, %v3253_v42  ;;  %v3716_v33 = vpack.c.bf16 %v4213_v56, %v4211_v53  ;;  %v3257_v46 = vmul.f32 %v4213_v56, %v3675_v20 }
 0x1a7   :  { %v3284_v14 = vmul.f32 %v4212_v34, %v3254_v2  ;;  %v3711_v29 = vpack.c.bf16 %v4214_v35, %v4212_v34  ;;  %v3255_v1 = vmul.f32 %v4214_v35, %v3673_v38  ;;  %v3286_v31 = vmul.f32 %v4211_v53, %v3256_v3 }
 0x1a8   :  { %v3265_v17 = vadd.f32 %v3264_v4, %v3254_v2  ;;  %v3294_v49 = vadd.f32 %v3293_v19, %v3283_v43  ;;  %3722 = vst [vmem:[%s5969_s2 + $0x28] sm:$0xff] %v3716_v33   ;;  %v3287_v62 = vmul.f32 %v4213_v56, %v3257_v46 }
 0x1a9   :  { %3721 = vst [vmem:[%s5969_s2 + $0x20] sm:$0xff] %v3711_v29   ;;  %v3285_v8 = vmul.f32 %v4214_v35, %v3255_v1 }
 0x1aa   :  { %v3295_v51 = vadd.f32 %v3294_v49, %v3284_v14  ;;  %v3266_v13 = vadd.f32 %v3265_v17, %v3255_v1 }
 0x1ac   :  { %v3267_v22 = vadd.f32 %v3266_v13, %v3256_v3  ;;  %v3296_v40 = vadd.f32 %v3295_v51, %v3285_v8 }
 0x1ae   :  { %v3268_v48 = vadd.f32 %v3267_v22, %v3257_v46  ;;  %v3297_v11 = vadd.f32 %v3296_v40, %v3286_v31 }
 0x1b0   :  { %v3269_v15 = vrot.slane %v3268_v48, 4  ;;  %v3298_v24 = vadd.f32 %v3297_v11, %v3287_v62 }
 0x1b2   :  { %v3270_v12 = vadd.f32 %v3269_v15, %v3268_v48  ;;  %v3299_v39 = vrot.slane %v3298_v24, 4 }
 0x1b4   :  { %v3271_v21 = vrot.slane %v3270_v12, 2  ;;  %v3300_v28 = vadd.f32 %v3299_v39, %v3298_v24 }
 0x1b6   :  { %v3272_v52 = vadd.f32 %v3271_v21, %v3270_v12  ;;  %v3301_v55 = vrot.slane %v3300_v28, 2 }
 0x1b8   :  { %v3273_v60 = vrot.slane %v3272_v52, 1  ;;  %v3302_v63 = vadd.f32 %v3301_v55, %v3300_v28 }
 0x1ba   :  { %v3274_v27 = vadd.f32 %v3273_v60, %v3272_v52  ;;  %v3303_v61 = vrot.slane %v3302_v63, 1 }
 0x1bc   :  { %3275 = vst [vmem:[%s5970_s3] sm:$0x1] %v3274_v27  ;;  %v3304_v25 = vadd.f32 %v3303_v61, %v3302_v63 }
 0x1be   :  { %3305 = vst [vmem:[%s5971_s4] sm:$0x1] %v3304_v25 }

// kernel: discriminator_forward.9
= control target key start
LH: loop header
LB: loop body
LE: loop exit
PB: predicated region body
PF: predicated region fallthrough
CT: control target
= control target key end

     0   :  { %v4971_v0 = vmov 0.0   ;;  %vm4972_vm0 = vmmov 0   ;;  %vm97_vm1 = vsmask.f32 7424  ;;  %vm871_vm2 = vsmask.f32 4352  ;;  %s6746_s1 = inlined_call_operand.vmem [shape: bf16[16,128,128], index: 1, kind: input, shape index: {}]   ;;  %s6747_s0 = inlined_call_operand.vmem [shape: bf16[1,128,128], index: 0, kind: input, shape index: {}]   ;;  %s6748_s2 = inlined_call_operand.vmem [shape: f32[1,128], index: 2, kind: input, shape index: {}]   ;;  %s6749_s3 = inlined_call_operand.vmem [shape: f32[104,128], index: 3, kind: output, shape index: {}]  }
   0x1   :  { %4082 = vmatprep.subr.bf16.mxu0 %v4971_v0  ;;  %4126 = vmatprep.subr.bf16.mxu1 %v4971_v0  ;;  %v4788_v1 = vld [vmem:[%s6746_s1 + $0x40] sm:$0xff]   ;;  %v4790_v3 = vld [vmem:[%s6746_s1 + $0x48] sm:$0xff]   ;;  %v4792_v5 = vld [vmem:[%s6746_s1 + $0x50] sm:$0xff]   ;;  %vm461_vm3 = vcmask 1046528   ;;  %vm652_vm4 = vsmask.f32 6400 }
   0x2   :  { %v4789_v2 = vld [vmem:[%s6746_s1] sm:$0xff]   ;;  %4098 = vmatprep.mubr.msk.bf16.mxu0 %vm4972_vm0, %v4971_v0  ;;  %4142 = vmatprep.mubr.msk.bf16.mxu1 %vm4972_vm0, %v4971_v0  ;;  %v4791_v4 = vld [vmem:[%s6746_s1 + $0x8] sm:$0xff]   ;;  %v4793_v6 = vld [vmem:[%s6746_s1 + $0x10] sm:$0xff]   ;;  %vm1737_vm5 = vcmask 1044480   ;;  %vm2603_vm6 = vsmask.f32 5376 }
   0x3   :  { %4083 = vmatpush3.bf16.msra.mxu0 %v4788_v1  ;;  %4127 = vmatpush3.bf16.msra.mxu1 %v4789_v2  ;;  %v4794_v7 = vld [vmem:[%s6746_s1 + $0x58] sm:$0xff]   ;;  %v4796_v9 = vld [vmem:[%s6746_s1 + $0x60] sm:$0xff]   ;;  %v5048_v13 = vld [vmem:[%s6747_s0 + $0x8] sm:$0xf] }
   0x4   :  { %4084 = vmatprep.subr.bf16.mxu0 %v4971_v0  ;;  %4128 = vmatprep.subr.bf16.mxu1 %v4971_v0  ;;  %v4795_v8 = vld [vmem:[%s6746_s1 + $0x18] sm:$0xff]   ;;  %v4797_v10 = vld [vmem:[%s6746_s1 + $0x20] sm:$0xff]   ;;  %v5053_v14 = vld [vmem:[%s6747_s0 + $0xc] sm:$0xf] }
   0x5   :  { %v15_v11 = vld [vmem:[%s6747_s0] sm:$0xf]  ;;  %v5043_v12 = vld [vmem:[%s6747_s0 + $0x4] sm:$0xf]  ;;  %v4798_v17 = vld [vmem:[%s6746_s1 + $0x68] sm:$0xff]   ;;  %v5063_v18 = vcombine.low %v5048_v13, %v5053_v14 }
   0x6   :  { %v3434_v15 = vcombine.low %v15_v11, %v5043_v12  ;;  %v3550_v16 = vcombine.low %v5043_v12, %v5048_v13  ;;  %v4799_v19 = vld [vmem:[%s6746_s1 + $0x28] sm:$0xff]   ;;  %v4800_v21 = vld [vmem:[%s6746_s1 + $0x70] sm:$0xff]   ;;  %v4802_v29 = vld [vmem:[%s6746_s1 + $0x78] sm:$0xff]  }
   0x7   :  { %4085 = vmatpush3.bf16.msra.mxu0 %v4790_v3  ;;  %4129 = vmatpush3.bf16.msra.mxu1 %v4791_v4  ;;  %v4801_v22 = vld [vmem:[%s6746_s1 + $0x30] sm:$0xff]   ;;  %v5077_v25 = vshll.u32 %v5063_v18, 16  ;;  %v4803_v33 = vld [vmem:[%s6746_s1 + $0x38] sm:$0xff]   ;;  %v4806_v34 = vld [vmem:[%s6746_s1 + $0x80] sm:$0xff]   ;;  %v5111_v36 = vshrl.u32 %v5063_v18, 16 }
   0x8   :  { %4086 = vmatprep.subr.bf16.mxu0 %v4971_v0  ;;  %4130 = vmatprep.subr.bf16.mxu1 %v4971_v0  ;;  %v101_v20 = vshll.u32 %v3434_v15, 16  ;;  %v99_v23 = vshrl.u32 %v3434_v15, 16  ;;  %v5083_v26 = vld [vmem:[%s6747_s0 + $0x10] sm:$0xf]  ;;  %v5088_v27 = vld [vmem:[%s6747_s0 + $0x14] sm:$0xf] }
   0x9   :  { %v3551_v28 = vcombine.low %v5053_v14, %v5083_v26  ;;  %v108_v31 = vrot.slane %v5077_v25, 1  ;;  %v5099_v32 = vcombine.low %v5083_v26, %v5088_v27  ;;  %v5119_v38 = vld [vmem:[%s6747_s0 + $0x18] sm:$0xf]  ;;  %v5124_v39 = vld [vmem:[%s6747_s0 + $0x1c] sm:$0xf]  ;;  %v4807_v40 = vld [vmem:[%s6746_s1 + $0xc0] sm:$0xff]  }
   0xa   :  { %v103_v24 = vrot.slane %v101_v20, 1  ;;  %v3552_v41 = vcombine.low %v5088_v27, %v5119_v38  ;;  %v4809_v42 = vld [vmem:[%s6746_s1 + $0x88] sm:$0xff]   ;;  %v5138_v43 = vcombine.low %v5119_v38, %v5124_v39  ;;  %v5150_v47 = vld [vmem:[%s6747_s0 + $0x20] sm:$0xf]  ;;  %v5158_v48 = vld [vmem:[%s6747_s0 + $0x24] sm:$0xf] }
   0xb   :  { %4087 = vmatpush3.bf16.msra.mxu0 %v4792_v5  ;;  %4131 = vmatpush3.bf16.msra.mxu1 %v4793_v6  ;;  %v5114_v37 = vshll.u32 %v5099_v32, 16  ;;  %v112_v44 = vor.u32 %v5111_v36, %v108_v31  ;;  %v4810_v46 = vld [vmem:[%s6746_s1 + $0xc8] sm:$0xff]   ;;  %v5166_v51 = vshrl.u32 %v5099_v32, 16  ;;  %v4811_v52 = vld [vmem:[%s6746_s1 + $0x90] sm:$0xff]   ;;  %v5178_v54 = vcombine.low %v5150_v47, %v5158_v48  ;;  %v4814_v58 = vld [vmem:[%s6746_s1 + $0x98] sm:$0xff]  }
   0xc   :  { %4088 = vmatprep.subr.bf16.mxu0 %v4971_v0  ;;  %4132 = vmatprep.subr.bf16.mxu1 %v4971_v0  ;;  %v104_v30 = vor.u32 %v103_v24, %v99_v23  ;;  %v5162_v49 = vshll.u32 %v5138_v43, 16  ;;  %v4813_v53 = vld [vmem:[%s6746_s1 + $0xd0] sm:$0xff]   ;;  %v3553_v55 = vcombine.low %v5124_v39, %v5150_v47  ;;  %v5194_v59 = vshrl.u32 %v5138_v43, 16  ;;  %v4816_v61 = vld [vmem:[%s6746_s1 + $0xd8] sm:$0xff]   ;;  %v4817_v62 = vld [vmem:[%s6746_s1 + $0xa0] sm:$0xff]  }
   0xd   :  { %v116_v45 = vrot.slane %v5114_v37, 1  ;;  %v5197_v60 = vshll.u32 %v5178_v54, 16  ;;  %v5210_v1 = vld [vmem:[%s6747_s0 + $0x28] sm:$0xf]  ;;  %v5215_v2 = vld [vmem:[%s6747_s0 + $0x2c] sm:$0xf] }
   0xe   :  { %v109_v35 = vsel %vm97_vm1, %v104_v30, %v108_v31  ;;  %v124_v56 = vrot.slane %v5162_v49, 1  ;;  %v4818_v3 = vld [vmem:[%s6746_s1 + $0xe0] sm:$0xff]   ;;  %v3554_v4 = vcombine.low %v5158_v48, %v5210_v1  ;;  %v5227_v6 = vcombine.low %v5210_v1, %v5215_v2  ;;  %v4823_v23 = vld [vmem:[%s6746_s1 + $0xb0] sm:$0xff]   ;;  %v5592_v47 = vld [vmem:[%s6747_s0 + $0x8] sm:$0xf] }
   0xf   :  { %4089 = vmatpush3.bf16.msra.mxu0 %v4794_v7  ;;  %4133 = vmatpush3.bf16.msra.mxu1 %v4795_v8  ;;  %v117_v50 = vsel %vm97_vm1, %v112_v44, %v116_v45  ;;  %v120_v57 = vor.u32 %v5166_v51, %v116_v45  ;;  %v132_v5 = vrot.slane %v5197_v60, 1  ;;  %v5232_v7 = vld [vmem:[%s6747_s0 + $0x30] sm:$0xf]  ;;  %v880_v11 = vrot.slane %v5111_v36, 3  ;;  %v846_v30 = vld [vmem:[%s6747_s0] sm:$0x8] }
  0x10   :  { %4090 = vmatprep.subr.bf16.mxu0 %v4971_v0  ;;  %4134 = vmatprep.subr.bf16.mxu1 %v4971_v0  ;;  %v128_v8 = vor.u32 %v5194_v59, %v124_v56  ;;  %v884_v31 = vrot.slane %v5166_v51, 3  ;;  %v885_v45 = vrot.slane %v5114_v37, 4  ;;  %v4855_v13 = vld [vmem:[%s6746_s1 + $0x1d0] sm:$0xff]   ;;  %v4859_v14 = vld [vmem:[%s6746_s1 + $0x1a0] sm:$0xff]   ;;  %v5598_v48 = vld [vmem:[%s6747_s0 + $0xc] sm:$0xf] }
  0x11   :  { %v125_v63 = vsel %vm97_vm1, %v120_v57, %v124_v56  ;;  %v4860_v26 = vld [vmem:[%s6746_s1 + $0x1e0] sm:$0xff]   ;;  %v4866_v27 = vld [vmem:[%s6746_s1 + $0x1b0] sm:$0xff]  }
  0x12   :  { %v133_v20 = vsel %vm97_vm1, %v128_v8, %v132_v5  ;;  %v886_v56 = vor.u32 %v885_v45, %v884_v31  ;;  %v4867_v38 = vld [vmem:[%s6746_s1 + $0x1f0] sm:$0xff]   ;;  %v1245_v39 = vld [vmem:[%s6747_s0 + $0x4] sm:$0xf] }
  0x13   :  { %4091 = vmatpush3.bf16.msra.mxu0 %v4796_v9  ;;  %4135 = vmatpush3.bf16.msra.mxu1 %v4797_v10  ;;  %v44_v9 = vld [vmem:[%s6747_s0 + $0x34] sm:$0x1]  ;;  %v4820_v10 = vld [vmem:[%s6746_s1 + $0xa8] sm:$0xff]   ;;  %v5603_v1 = vld [vmem:[%s6747_s0 + $0x10] sm:$0xf] }
  0x14   :  { %4092 = vmatprep.subr.bf16.mxu0 %v4971_v0  ;;  %4136 = vmatprep.subr.bf16.mxu1 %v4971_v0 }
  0x17   :  { %4093 = vmatpush3.bf16.msra.mxu0 %v4798_v17  ;;  %4137 = vmatpush3.bf16.msra.mxu1 %v4799_v19  ;;  %v5252_v17 = vshll.u32 %v5227_v6, 16  ;;  %v881_v19 = vrot.slane %v5077_v25, 4 }
  0x18   :  { %4094 = vmatprep.subr.bf16.mxu0 %v4971_v0  ;;  %4138 = vmatprep.subr.bf16.mxu1 %v4971_v0 }
  0x19   :  { %v882_v24 = vor.u32 %v881_v19, %v880_v11 }
  0x1b   :  { %4095 = vmatpush3.bf16.msra.mxu0 %v4800_v21  ;;  %4139 = vmatpush3.bf16.msra.mxu1 %v4801_v22  ;;  %v5258_v21 = vshrl.u32 %v5178_v54, 16  ;;  %v5261_v22 = vcombine.low %v5232_v7, %v44_v9 }
  0x1c   :  { %4096 = vmatprep.subr.bf16.mxu0 %v4971_v0  ;;  %4140 = vmatprep.subr.bf16.mxu1 %v4971_v0 }
  0x1d   :  { %v146_v44 = vshll.u32 %v5261_v22, 16  ;;  %v892_v8 = vrot.slane %v5258_v21, 3 }
  0x1f   :  { %4097 = vmatpush3.bf16.msra.mxu0 %v4802_v29  ;;  %4141 = vmatpush3.bf16.msra.mxu1 %v4803_v33  ;;  %v4824_v29 = vld [vmem:[%s6746_s1 + $0xf0] sm:$0xff]   ;;  %v3555_v33 = vcombine.low %v5215_v2, %v5232_v7 }
  0x20   :  { %4170 = vmatprep.subr.bf16.mxu0 %v4971_v0  ;;  %4214 = vmatprep.subr.bf16.mxu1 %v4971_v0 }
  0x22   :  { %4099 = vmatmul.mubr.bf16.vlgmr.msra.gmra.mrb[0].mxu0 %v109_v35  ;;  %4143 = vmatmul.mubr.bf16.vlgmr.msra.gmra.mrb[0].mxu1 %v3434_v15  ;;  %v4821_v15 = vld [vmem:[%s6746_s1 + $0xe8] sm:$0xff]   ;;  %v5278_v35 = vshrl.u32 %v5227_v6, 16 }
  0x23   :  { %4171 = vmatpush3.bf16.msra.mxu0 %v4806_v34  ;;  %4215 = vmatpush3.bf16.msra.mxu1 %v4807_v40  ;;  %v140_v34 = vrot.slane %v5252_v17, 1  ;;  %v3524_v40 = vcombine.low %v846_v30, %v5043_v12  ;;  %v897_v30 = vrot.slane %v5252_v17, 4 }
  0x24   :  { %4102 = vmatprep.mubr.msk.bf16.mxu0 %vm4972_vm0, %v4971_v0  ;;  %4146 = vmatprep.mubr.msk.bf16.mxu1 %vm4972_vm0, %v4971_v0  ;;  %v896_v19 = vrot.slane %v5278_v35, 3 }
  0x25   :  { %4172 = vmatprep.subr.bf16.mxu0 %v4971_v0  ;;  %4216 = vmatprep.subr.bf16.mxu1 %v4971_v0  ;;  %v144_v11 = vor.u32 %v5278_v35, %v140_v34 }
  0x27   :  { %4173 = vmatpush3.bf16.msra.mxu0 %v4809_v42  ;;  %4217 = vmatpush3.bf16.msra.mxu1 %v4810_v46  ;;  %v136_v42 = vor.u32 %v5258_v21, %v132_v5  ;;  %v4826_v46 = vld [vmem:[%s6746_s1 + $0xb8] sm:$0xff]  }
  0x28   :  { %4174 = vmatprep.subr.bf16.mxu0 %v4971_v0  ;;  %4218 = vmatprep.subr.bf16.mxu1 %v4971_v0 }
  0x2a   :  { %4103 = vmatmul.mubr.bf16.gmra.mrb[4].mxu0 %v117_v50  ;;  %4147 = vmatmul.mubr.bf16.gmra.mrb[4].mxu1 %v5063_v18  ;;  %v4827_v50 = vld [vmem:[%s6746_s1 + $0xf8] sm:$0xff]  }
  0x2b   :  { %4106 = vmatprep.mubr.msk.bf16.mxu0 %vm4972_vm0, %v4971_v0  ;;  %4150 = vmatprep.mubr.msk.bf16.mxu1 %vm4972_vm0, %v4971_v0 }
  0x2c   :  { %4175 = vmatpush3.bf16.msra.mxu0 %v4811_v52  ;;  %4219 = vmatpush3.bf16.msra.mxu1 %v4813_v53  ;;  %v873_v52 = vshrl.u32 %v3524_v40, 16  ;;  %v876_v53 = vshll.u32 %v3524_v40, 16  ;;  %v5331_v40 = vld [vmem:[%s6747_s0 + $0x34] sm:$0xf] }
  0x2d   :  { %4176 = vmatprep.subr.bf16.mxu0 %v4971_v0  ;;  %4220 = vmatprep.subr.bf16.mxu1 %v4971_v0  ;;  %v3525_v45 = vcombine.low %v5232_v7, %v5331_v40 }
  0x2e   :  { %v875_v57 = vrot.slane %v873_v52, 3 }
  0x2f   :  { %v904_v52 = vshll.u32 %v3525_v45, 16 }
  0x30   :  { %4177 = vmatpush3.bf16.msra.mxu0 %v4814_v58  ;;  %4221 = vmatpush3.bf16.msra.mxu1 %v4816_v61  ;;  %v878_v58 = vrot.slane %v876_v53, 4  ;;  %v141_v61 = vsel %vm97_vm1, %v136_v42, %v140_v34  ;;  %v898_v34 = vor.u32 %v897_v30, %v896_v19  ;;  %v150_v53 = vshrl.u32 %v5261_v22, 16 }
  0x31   :  { %4178 = vmatprep.subr.bf16.mxu0 %v4971_v0  ;;  %4222 = vmatprep.subr.bf16.mxu1 %v4971_v0  ;;  %v662_v19 = vrot.slane %v5077_v25, 2  ;;  %v665_v25 = vrot.slane %v5166_v51, 1 }
  0x32   :  { %4107 = vmatmul.mubr.bf16.gmra.mrb[8].mxu0 %v125_v63  ;;  %4151 = vmatmul.mubr.bf16.gmra.mrb[8].mxu1 %v5099_v32  ;;  %v888_v63 = vrot.slane %v5194_v59, 3  ;;  %v879_v5 = vor.u32 %v878_v58, %v875_v57  ;;  %v906_v57 = vrot.slane %v904_v52, 4  ;;  %v4832_v52 = vld [vmem:[%s6746_s1 + $0x148] sm:$0xff]  }
  0x33   :  { %4110 = vmatprep.mubr.msk.bf16.mxu0 %vm4972_vm0, %v4971_v0  ;;  %4154 = vmatprep.mubr.msk.bf16.mxu1 %vm4972_vm0, %v4971_v0 }
  0x34   :  { %4179 = vmatpush3.bf16.msra.mxu0 %v4817_v62  ;;  %4223 = vmatpush3.bf16.msra.mxu1 %v4818_v3  ;;  %v5300_v62 = vsel %vm871_vm2, %v882_v24, %v886_v56  ;;  %v889_v3 = vrot.slane %v5162_v49, 4 }
  0x35   :  { %4180 = vmatprep.subr.bf16.mxu0 %v4971_v0  ;;  %4224 = vmatprep.subr.bf16.mxu1 %v4971_v0 }
  0x36   :  { %v890_v9 = vor.u32 %v889_v3, %v888_v63 }
  0x38   :  { %4181 = vmatpush3.bf16.msra.mxu0 %v4820_v10  ;;  %4225 = vmatpush3.bf16.msra.mxu1 %v4821_v15  ;;  %v893_v10 = vrot.slane %v5197_v60, 4  ;;  %v5310_v15 = vsel %vm871_vm2, %v879_v5, %v882_v24  ;;  %v440_v24 = vld [vmem:[%s6747_s0] sm:$0xe]  ;;  %v3449_v5 = vcombine.low %v5232_v7, %v5232_v7 }
  0x39   :  { %4182 = vmatprep.subr.bf16.mxu0 %v4971_v0  ;;  %4226 = vmatprep.subr.bf16.mxu1 %v4971_v0 }
  0x3a   :  { %4111 = vmatmul.mubr.bf16.gmra.mrb[12].mxu0 %v133_v20  ;;  %4155 = vmatmul.mubr.bf16.gmra.mrb[12].mxu1 %v5138_v43  ;;  %v148_v20 = vrot.slane %v146_v44, 1 }
  0x3b   :  { %4114 = vmatprep.mubr.msk.bf16.mxu0 %vm4972_vm0, %v4971_v0  ;;  %4158 = vmatprep.mubr.msk.bf16.mxu1 %vm4972_vm0, %v4971_v0 }
  0x3c   :  { %4183 = vmatpush3.bf16.msra.mxu0 %v4823_v23  ;;  %4227 = vmatpush3.bf16.msra.mxu1 %v4824_v29  ;;  %v5317_v23 = vsel %vm871_vm2, %v886_v56, %v890_v9  ;;  %v894_v29 = vor.u32 %v893_v10, %v892_v8  ;;  %v149_v42 = vsel %vm97_vm1, %v144_v11, %v148_v20  ;;  %v661_v11 = vrot.slane %v5111_v36, 1  ;;  %v4829_v36 = vld [vmem:[%s6746_s1 + $0x100] sm:$0xff]  }
  0x3d   :  { %4184 = vmatprep.subr.bf16.mxu0 %v4971_v0  ;;  %4228 = vmatprep.subr.bf16.mxu1 %v4971_v0  ;;  %v152_v3 = vor.u32 %v150_v53, %v148_v20  ;;  %v463_v20 = vrot.slane %v5063_v18, 1  ;;  %v4830_v18 = vld [vmem:[%s6746_s1 + $0x140] sm:$0xff]  }
  0x3e   :  { %v5326_v31 = vsel %vm871_vm2, %v890_v9, %v894_v29  ;;  %v5335_v44 = vsel %vm871_vm2, %v894_v29, %v898_v34 }
  0x40   :  { %4185 = vmatpush3.bf16.msra.mxu0 %v4826_v46  ;;  %4229 = vmatpush3.bf16.msra.mxu1 %v4827_v50  ;;  %v3474_v46 = vcombine.low %v440_v24, %v5043_v12  ;;  %v901_v50 = vshrl.u32 %v3525_v45, 16  ;;  %v663_v24 = vor.u32 %v662_v19, %v661_v11  ;;  %v666_v45 = vrot.slane %v5114_v37, 2  ;;  %v4833_v37 = vld [vmem:[%s6746_s1 + $0x110] sm:$0xff]   ;;  %v4838_v19 = vld [vmem:[%s6746_s1 + $0x160] sm:$0xff]  }
  0x41   :  { %4258 = vmatprep.subr.bf16.mxu0 %v4971_v0  ;;  %4302 = vmatprep.subr.bf16.mxu1 %v4971_v0  ;;  %v674_v11 = vrot.slane %v5197_v60, 2  ;;  %v469_v60 = vrot.slane %v5178_v54, 1  ;;  %v4853_v12 = vld [vmem:[%s6746_s1 + $0x190] sm:$0xff]  }
  0x42   :  { %4115 = vmatmul.mubr.bf16.gmra.mrb[16].mxu0 %v141_v61  ;;  %4159 = vmatmul.mubr.bf16.gmra.mrb[16].mxu1 %v5178_v54  ;;  %v903_v56 = vrot.slane %v901_v50, 3  ;;  %v654_v58 = vshrl.u32 %v3474_v46, 16  ;;  %v657_v61 = vshll.u32 %v3474_v46, 16  ;;  %v462_v29 = vrot.slane %v3474_v46, 1  ;;  %v4831_v50 = vld [vmem:[%s6746_s1 + $0x108] sm:$0xff]  }
  0x43   :  { %4118 = vmatprep.mubr.msk.bf16.mxu0 %vm4972_vm0, %v4971_v0  ;;  %4162 = vmatprep.mubr.msk.bf16.mxu1 %vm4972_vm0, %v4971_v0  ;;  %v465_v46 = vrot.slane %v5099_v32, 1  ;;  %v667_v51 = vor.u32 %v666_v45, %v665_v25  ;;  %v677_v25 = vrot.slane %v5278_v35, 1  ;;  %v4844_v35 = vld [vmem:[%s6746_s1 + $0x138] sm:$0xff]  }
  0x44   :  { %v5346_v63 = vor.u32 %v906_v57, %v903_v56  ;;  %v656_v9 = vrot.slane %v654_v58, 1  ;;  %v659_v10 = vrot.slane %v657_v61, 2  ;;  %v669_v56 = vrot.slane %v5194_v59, 1  ;;  %v4834_v58 = vld [vmem:[%s6746_s1 + $0x150] sm:$0xff]  }
  0x45   :  { %v466_v32 = vsel %vm461_vm3, %v463_v20, %v465_v46  ;;  %v668_v53 = vsel %vm652_vm4, %v663_v24, %v667_v51  ;;  %v670_v57 = vrot.slane %v5162_v49, 2  ;;  %v467_v61 = vrot.slane %v5138_v43, 1  ;;  %v4835_v49 = vld [vmem:[%s6746_s1 + $0x118] sm:$0xff]  }
  0x46   :  { %v5352_v8 = vsel %vm871_vm2, %v898_v34, %v5346_v63  ;;  %v660_v30 = vor.u32 %v659_v10, %v656_v9  ;;  %v464_v34 = vsel %vm461_vm3, %v462_v29, %v463_v20  ;;  %v4837_v9 = vld [vmem:[%s6746_s1 + $0x120] sm:$0xff]   ;;  %v471_v20 = vrot.slane %v5227_v6, 1 }
  0x47   :  { %v671_v59 = vor.u32 %v670_v57, %v669_v56  ;;  %v468_v43 = vsel %vm461_vm3, %v465_v46, %v467_v61 }
  0x49   :  { %v672_v10 = vsel %vm652_vm4, %v667_v51, %v671_v59  ;;  %v472_v51 = vsel %vm461_vm3, %v469_v60, %v471_v20 }
  0x4a   :  { %4119 = vmatmul.mubr.bf16.gmra.mrb[20].mxu0 %v149_v42  ;;  %4163 = vmatmul.mubr.bf16.gmra.mrb[20].mxu1 %v5227_v6  ;;  %v664_v42 = vsel %vm652_vm4, %v660_v30, %v663_v24  ;;  %v4839_v30 = vld [vmem:[%s6746_s1 + $0x128] sm:$0xff]   ;;  %v4842_v6 = vld [vmem:[%s6746_s1 + $0x130] sm:$0xff]  }
  0x4b   :  { %4122 = vmatprep.mubr.msk.bf16.mxu0 %vm4972_vm0, %v4971_v0  ;;  %4166 = vmatprep.mubr.msk.bf16.mxu1 %vm4972_vm0, %v4971_v0  ;;  %v4840_v24 = vld [vmem:[%s6746_s1 + $0x168] sm:$0xff]  }
  0x52   :  { %4123 = vmatmul.mubr.bf16.gmra.mrb[24].mxu0 %v152_v3  ;;  %4167 = vmatmul.mubr.bf16.gmra.mrb[24].mxu1 %v3449_v5  ;;  %v4836_v3 = vld [vmem:[%s6746_s1 + $0x158] sm:$0xff]   ;;  %v673_v5 = vrot.slane %v5258_v21, 1  ;;  %v631_v21 = vld [vmem:[%s6747_s0 + $0x34] sm:$0x3] }
  0x53   :  { %4186 = vmatprep.mubr.msk.bf16.mxu0 %vm4972_vm0, %v4971_v0  ;;  %4230 = vmatprep.mubr.msk.bf16.mxu1 %vm4972_vm0, %v4971_v0  ;;  %v3499_v54 = vcombine.low %v5232_v7, %v631_v21  ;;  %v4874_v21 = vld [vmem:[%s6746_s1 + $0x200] sm:$0xff]  }
  0x54   :  { %v675_v29 = vor.u32 %v674_v11, %v673_v5  ;;  %v5632_v5 = vld [vmem:[%s6747_s0 + $0x18] sm:$0xf] }
  0x55   :  { %v682_v45 = vshrl.u32 %v3499_v54, 16  ;;  %v685_v46 = vshll.u32 %v3499_v54, 16  ;;  %v5664_v54 = vld [vmem:[%s6747_s0 + $0x20] sm:$0xf] }
  0x5a   :  { %4187 = vmatmul.mubr.bf16.vlgmr.msra.gmra.mrb[28].mxu0 %v464_v34  ;;  %4231 = vmatmul.mubr.bf16.vlgmr.msra.gmra.mrb[28].mxu1 %v664_v42  ;;  %v676_v34 = vsel %vm652_vm4, %v671_v59, %v675_v29  ;;  %v678_v42 = vrot.slane %v5252_v17, 2  ;;  %v4845_v17 = vld [vmem:[%s6746_s1 + $0x178] sm:$0xff]   ;;  %v4851_v59 = vld [vmem:[%s6746_s1 + $0x188] sm:$0xff]  }
  0x5b   :  { %4259 = vmatpush3.bf16.msra.mxu0 %v4829_v36  ;;  %4303 = vmatpush3.bf16.msra.mxu1 %v4830_v18  ;;  %v470_v36 = vsel %vm461_vm3, %v467_v61, %v469_v60  ;;  %v4843_v18 = vld [vmem:[%s6746_s1 + $0x170] sm:$0xff]   ;;  %v4849_v61 = vld [vmem:[%s6746_s1 + $0x1c0] sm:$0xff]  }
  0x5c   :  { %4190 = vmatprep.mubr.msk.bf16.mxu0 %vm4972_vm0, %v4971_v0  ;;  %4234 = vmatprep.mubr.msk.bf16.mxu1 %vm4972_vm0, %v4971_v0 }
  0x5d   :  { %4260 = vmatprep.subr.bf16.mxu0 %v4971_v0  ;;  %4304 = vmatprep.subr.bf16.mxu1 %v4971_v0 }
  0x5f   :  { %4261 = vmatpush3.bf16.msra.mxu0 %v4831_v50  ;;  %4305 = vmatpush3.bf16.msra.mxu1 %v4832_v52  ;;  %v679_v50 = vor.u32 %v678_v42, %v677_v25  ;;  %v684_v52 = vrot.slane %v682_v45, 1 }
  0x60   :  { %4262 = vmatprep.subr.bf16.mxu0 %v4971_v0  ;;  %4306 = vmatprep.subr.bf16.mxu1 %v4971_v0 }
  0x62   :  { %4191 = vmatmul.mubr.bf16.gmra.mrb[32].mxu0 %v466_v32  ;;  %4235 = vmatmul.mubr.bf16.gmra.mrb[32].mxu1 %v668_v53  ;;  %v687_v32 = vrot.slane %v685_v46, 2  ;;  %v473_v53 = vrot.slane %v5261_v22, 1  ;;  %v4848_v22 = vld [vmem:[%s6746_s1 + $0x180] sm:$0xff]  }
  0x63   :  { %4194 = vmatprep.mubr.msk.bf16.mxu0 %vm4972_vm0, %v4971_v0  ;;  %4238 = vmatprep.mubr.msk.bf16.mxu1 %vm4972_vm0, %v4971_v0 }
  0x64   :  { %4263 = vmatpush3.bf16.msra.mxu0 %v4833_v37  ;;  %4307 = vmatpush3.bf16.msra.mxu1 %v4834_v58  ;;  %v680_v37 = vsel %vm652_vm4, %v675_v29, %v679_v50  ;;  %v688_v56 = vor.u32 %v687_v32, %v684_v52  ;;  %v474_v57 = vsel %vm461_vm3, %v471_v20, %v473_v53  ;;  %v5703_v52 = vld [vmem:[%s6747_s0 + $0x28] sm:$0xf]  ;;  %v4881_v32 = vld [vmem:[%s6746_s1 + $0x250] sm:$0xff]  }
  0x65   :  { %4264 = vmatprep.subr.bf16.mxu0 %v4971_v0  ;;  %4308 = vmatprep.subr.bf16.mxu1 %v4971_v0 }
  0x66   :  { %v689_v58 = vsel %vm652_vm4, %v679_v50, %v688_v56  ;;  %v4879_v50 = vld [vmem:[%s6746_s1 + $0x210] sm:$0xff]  }
  0x68   :  { %4265 = vmatpush3.bf16.msra.mxu0 %v4835_v49  ;;  %4309 = vmatpush3.bf16.msra.mxu1 %v4836_v3  ;;  %v4852_v49 = vld [vmem:[%s6746_s1 + $0x1c8] sm:$0xff]  }
  0x69   :  { %4266 = vmatprep.subr.bf16.mxu0 %v4971_v0  ;;  %4310 = vmatprep.subr.bf16.mxu1 %v4971_v0 }
  0x6a   :  { %4195 = vmatmul.mubr.bf16.gmra.mrb[36].mxu0 %v468_v43  ;;  %4239 = vmatmul.mubr.bf16.gmra.mrb[36].mxu1 %v672_v10  ;;  %v5627_v43 = vld [vmem:[%s6747_s0 + $0x14] sm:$0xf] }
  0x6b   :  { %4198 = vmatprep.mubr.msk.bf16.mxu0 %vm4972_vm0, %v4971_v0  ;;  %4242 = vmatprep.mubr.msk.bf16.mxu1 %vm4972_vm0, %v4971_v0  ;;  %v5641_v10 = vcombine.low %v5627_v43, %v5632_v5 }
  0x6c   :  { %4267 = vmatpush3.bf16.msra.mxu0 %v4837_v9  ;;  %4311 = vmatpush3.bf16.msra.mxu1 %v4838_v19 }
  0x6d   :  { %4268 = vmatprep.subr.bf16.mxu0 %v4971_v0  ;;  %4312 = vmatprep.subr.bf16.mxu1 %v4971_v0  ;;  %v1327_v29 = vshll.u32 %v5641_v10, 16  ;;  %v1546_v42 = vrot.slane %v5641_v10, 1  ;;  %v1331_v46 = vshrl.u32 %v5641_v10, 16 }
  0x6f   :  { %v1329_v25 = vrot.slane %v1327_v29, 1 }
  0x70   :  { %4269 = vmatpush3.bf16.msra.mxu0 %v4839_v30  ;;  %4313 = vmatpush3.bf16.msra.mxu1 %v4840_v24  ;;  %v4875_v30 = vld [vmem:[%s6746_s1 + $0x240] sm:$0xff]   ;;  %v5659_v24 = vld [vmem:[%s6747_s0 + $0x1c] sm:$0xf] }
  0x71   :  { %4270 = vmatprep.subr.bf16.mxu0 %v4971_v0  ;;  %4314 = vmatprep.subr.bf16.mxu1 %v4971_v0 }
  0x72   :  { %4199 = vmatmul.mubr.bf16.gmra.mrb[40].mxu0 %v470_v36  ;;  %4243 = vmatmul.mubr.bf16.gmra.mrb[40].mxu1 %v676_v34  ;;  %v5675_v34 = vcombine.low %v5659_v24, %v5664_v54 }
  0x73   :  { %4202 = vmatprep.mubr.msk.bf16.mxu0 %vm4972_vm0, %v4971_v0  ;;  %4246 = vmatprep.mubr.msk.bf16.mxu1 %vm4972_vm0, %v4971_v0 }
  0x74   :  { %4271 = vmatpush3.bf16.msra.mxu0 %v4842_v6  ;;  %4315 = vmatpush3.bf16.msra.mxu1 %v4843_v18  ;;  %v4877_v6 = vld [vmem:[%s6746_s1 + $0x208] sm:$0xff]  }
  0x75   :  { %4272 = vmatprep.subr.bf16.mxu0 %v4971_v0  ;;  %4316 = vmatprep.subr.bf16.mxu1 %v4971_v0  ;;  %v4878_v18 = vld [vmem:[%s6746_s1 + $0x248] sm:$0xff]  }
  0x78   :  { %4273 = vmatpush3.bf16.msra.mxu0 %v4844_v35  ;;  %4317 = vmatpush3.bf16.msra.mxu1 %v4845_v17  ;;  %v1335_v35 = vshll.u32 %v5675_v34, 16 }
  0x79   :  { %4346 = vmatprep.subr.bf16.mxu0 %v4971_v0  ;;  %4390 = vmatprep.subr.bf16.mxu1 %v4971_v0 }
  0x7a   :  { %4203 = vmatmul.mubr.bf16.gmra.mrb[44].mxu0 %v472_v51  ;;  %4247 = vmatmul.mubr.bf16.gmra.mrb[44].mxu1 %v680_v37  ;;  %v5698_v51 = vld [vmem:[%s6747_s0 + $0x24] sm:$0xf]  ;;  %v1333_v37 = vor.u32 %v1331_v46, %v1329_v25 }
  0x7b   :  { %4206 = vmatprep.mubr.msk.bf16.mxu0 %vm4972_vm0, %v4971_v0  ;;  %4250 = vmatprep.mubr.msk.bf16.mxu1 %vm4972_vm0, %v4971_v0 }
  0x82   :  { %4207 = vmatmul.mubr.bf16.gmra.mrb[48].mxu0 %v474_v57  ;;  %4251 = vmatmul.mubr.bf16.gmra.mrb[48].mxu1 %v689_v58  ;;  %v1548_v57 = vrot.slane %v5675_v34, 1  ;;  %v4882_v58 = vld [vmem:[%s6746_s1 + $0x218] sm:$0xff]  }
  0x83   :  { %4210 = vmatprep.mubr.msk.bf16.mxu0 %vm4972_vm0, %v4971_v0  ;;  %4254 = vmatprep.mubr.msk.bf16.mxu1 %vm4972_vm0, %v4971_v0 }
  0x8a   :  { %4211 = vmatmul.mubr.bf16.gmra.mrb[52].mxu0 %v473_v53  ;;  %4255 = vmatmul.mubr.bf16.gmra.mrb[52].mxu1 %v688_v56  ;;  %v1337_v53 = vrot.slane %v1335_v35, 1  ;;  %v5717_v56 = vcombine.low %v5698_v51, %v5703_v52 }
  0x8b   :  { %4274 = vmatprep.mubr.msk.bf16.mxu0 %vm4972_vm0, %v4971_v0  ;;  %4318 = vmatprep.mubr.msk.bf16.mxu1 %vm4972_vm0, %v4971_v0 }
  0x92   :  { %4275 = vmatmul.mubr.bf16.vlgmr.msra.gmra.mrb[56].mxu0 %v5310_v15  ;;  %4319 = vmatmul.mubr.bf16.vlgmr.msra.gmra.mrb[56].mxu1 %v3550_v16  ;;  %v4856_v16 = vld [vmem:[%s6746_s1 + $0x198] sm:$0xff]   ;;  %v4863_v15 = vld [vmem:[%s6746_s1 + $0x1e8] sm:$0xff]  }
  0x93   :  { %4347 = vmatpush3.bf16.msra.mxu0 %v4848_v22  ;;  %4391 = vmatpush3.bf16.msra.mxu1 %v4849_v61  ;;  %v4884_v22 = vld [vmem:[%s6746_s1 + $0x258] sm:$0xff]   ;;  %v1338_v61 = vsel %vm97_vm1, %v1333_v37, %v1337_v53 }
  0x94   :  { %4278 = vmatprep.mubr.msk.bf16.mxu0 %vm4972_vm0, %v4971_v0  ;;  %4322 = vmatprep.mubr.msk.bf16.mxu1 %vm4972_vm0, %v4971_v0 }
  0x95   :  { %4348 = vmatprep.subr.bf16.mxu0 %v4971_v0  ;;  %4392 = vmatprep.subr.bf16.mxu1 %v4971_v0 }
  0x97   :  { %4349 = vmatpush3.bf16.msra.mxu0 %v4851_v59  ;;  %4393 = vmatpush3.bf16.msra.mxu1 %v4852_v49  ;;  %v1339_v59 = vshrl.u32 %v5675_v34, 16  ;;  %v1343_v49 = vshll.u32 %v5717_v56, 16 }
  0x98   :  { %4350 = vmatprep.subr.bf16.mxu0 %v4971_v0  ;;  %4394 = vmatprep.subr.bf16.mxu1 %v4971_v0 }
  0x9a   :  { %4279 = vmatmul.mubr.bf16.gmra.mrb[60].mxu0 %v5300_v62  ;;  %4323 = vmatmul.mubr.bf16.gmra.mrb[60].mxu1 %v3551_v28  ;;  %v4858_v62 = vld [vmem:[%s6746_s1 + $0x1d8] sm:$0xff]   ;;  %v4862_v28 = vld [vmem:[%s6746_s1 + $0x1a8] sm:$0xff]  }
  0x9b   :  { %4282 = vmatprep.mubr.msk.bf16.mxu0 %vm4972_vm0, %v4971_v0  ;;  %4326 = vmatprep.mubr.msk.bf16.mxu1 %vm4972_vm0, %v4971_v0 }
  0x9c   :  { %4351 = vmatpush3.bf16.msra.mxu0 %v4853_v12  ;;  %4395 = vmatpush3.bf16.msra.mxu1 %v4855_v13  ;;  %v1549_v12 = vsel %vm461_vm3, %v1546_v42, %v1548_v57  ;;  %v4885_v13 = vld [vmem:[%s6746_s1 + $0x220] sm:$0xff]  }
  0x9d   :  { %4352 = vmatprep.subr.bf16.mxu0 %v4971_v0  ;;  %4396 = vmatprep.subr.bf16.mxu1 %v4971_v0 }
  0xa0   :  { %4353 = vmatpush3.bf16.msra.mxu0 %v4856_v16  ;;  %4397 = vmatpush3.bf16.msra.mxu1 %v4858_v62  ;;  %v5740_v16 = vld [vmem:[%s6747_s0 + $0x2c] sm:$0xf]  ;;  %v5745_v62 = vld [vmem:[%s6747_s0 + $0x30] sm:$0xf] }
  0xa1   :  { %4354 = vmatprep.subr.bf16.mxu0 %v4971_v0  ;;  %4398 = vmatprep.subr.bf16.mxu1 %v4971_v0 }
  0xa2   :  { %4283 = vmatmul.mubr.bf16.gmra.mrb[64].mxu0 %v5317_v23  ;;  %4327 = vmatmul.mubr.bf16.gmra.mrb[64].mxu1 %v3552_v41  ;;  %v4869_v41 = vld [vmem:[%s6746_s1 + $0x1b8] sm:$0xff]  }
  0xa3   :  { %4286 = vmatprep.mubr.msk.bf16.mxu0 %vm4972_vm0, %v4971_v0  ;;  %4330 = vmatprep.mubr.msk.bf16.mxu1 %vm4972_vm0, %v4971_v0  ;;  %v4870_v23 = vld [vmem:[%s6746_s1 + $0x1f8] sm:$0xff]  }
  0xa4   :  { %4355 = vmatpush3.bf16.msra.mxu0 %v4859_v14  ;;  %4399 = vmatpush3.bf16.msra.mxu1 %v4860_v26  ;;  %v4886_v14 = vld [vmem:[%s6746_s1 + $0x260] sm:$0xff]   ;;  %v1341_v26 = vor.u32 %v1339_v59, %v1337_v53 }
  0xa5   :  { %4356 = vmatprep.subr.bf16.mxu0 %v4971_v0  ;;  %4400 = vmatprep.subr.bf16.mxu1 %v4971_v0 }
  0xa8   :  { %4357 = vmatpush3.bf16.msra.mxu0 %v4862_v28  ;;  %4401 = vmatpush3.bf16.msra.mxu1 %v4863_v15  ;;  %v1345_v28 = vrot.slane %v1343_v49, 1  ;;  %v5760_v15 = vcombine.low %v5740_v16, %v5745_v62 }
  0xa9   :  { %4358 = vmatprep.subr.bf16.mxu0 %v4971_v0  ;;  %4402 = vmatprep.subr.bf16.mxu1 %v4971_v0 }
  0xaa   :  { %4287 = vmatmul.mubr.bf16.gmra.mrb[68].mxu0 %v5326_v31  ;;  %4331 = vmatmul.mubr.bf16.gmra.mrb[68].mxu1 %v3553_v55  ;;  %v3581_v55 = vcombine.low %v1245_v39, %v5592_v47  ;;  %v1347_v39 = vshrl.u32 %v5717_v56, 16 }
  0xab   :  { %4290 = vmatprep.mubr.msk.bf16.mxu0 %vm4972_vm0, %v4971_v0  ;;  %4334 = vmatprep.mubr.msk.bf16.mxu1 %vm4972_vm0, %v4971_v0 }
  0xac   :  { %4359 = vmatpush3.bf16.msra.mxu0 %v4866_v27  ;;  %4403 = vmatpush3.bf16.msra.mxu1 %v4867_v38  ;;  %v1314_v31 = vshll.u32 %v3581_v55, 16  ;;  %v1312_v2 = vshrl.u32 %v3581_v55, 16  ;;  %v1550_v27 = vrot.slane %v5717_v56, 1  ;;  %v4888_v38 = vld [vmem:[%s6746_s1 + $0x228] sm:$0xff]   ;;  %v1351_v55 = vshll.u32 %v5760_v15, 16 }
  0xad   :  { %4360 = vmatprep.subr.bf16.mxu0 %v4971_v0  ;;  %4404 = vmatprep.subr.bf16.mxu1 %v4971_v0 }
  0xae   :  { %v1316_v7 = vrot.slane %v1314_v31, 1  ;;  %v1551_v31 = vsel %vm461_vm3, %v1548_v57, %v1550_v27 }
  0xb0   :  { %4361 = vmatpush3.bf16.msra.mxu0 %v4869_v41  ;;  %4405 = vmatpush3.bf16.msra.mxu1 %v4870_v23  ;;  %v4889_v41 = vld [vmem:[%s6746_s1 + $0x268] sm:$0xff]   ;;  %v1346_v23 = vsel %vm97_vm1, %v1341_v26, %v1345_v28 }
  0xb1   :  { %4434 = vmatprep.subr.bf16.mxu0 %v4971_v0  ;;  %4478 = vmatprep.subr.bf16.mxu1 %v4971_v0 }
  0xb2   :  { %4291 = vmatmul.mubr.bf16.gmra.mrb[72].mxu0 %v5335_v44  ;;  %4335 = vmatmul.mubr.bf16.gmra.mrb[72].mxu1 %v3554_v4  ;;  %v5613_v4 = vcombine.low %v5598_v48, %v5603_v1  ;;  %v1522_v44 = vld [vmem:[%s6747_s0 + $0x4] sm:$0xe] }
  0xb3   :  { %4294 = vmatprep.mubr.msk.bf16.mxu0 %vm4972_vm0, %v4971_v0  ;;  %4338 = vmatprep.mubr.msk.bf16.mxu1 %vm4972_vm0, %v4971_v0  ;;  %v3612_v3 = vcombine.low %v1522_v44, %v5592_v47  ;;  %v5780_v44 = vld [vmem:[%s6747_s0 + $0x34] sm:$0xf] }
  0xb4   :  { %v1544_v19 = vrot.slane %v5613_v4, 1  ;;  %v1323_v60 = vshrl.u32 %v5613_v4, 16 }
  0xb5   :  { %v1543_v11 = vrot.slane %v3612_v3, 1  ;;  %v1349_v3 = vor.u32 %v1347_v39, %v1345_v28 }
  0xb6   :  { %v1547_v17 = vsel %vm461_vm3, %v1544_v19, %v1546_v42  ;;  %v1936_v26 = vrot.slane %v1323_v60, 3 }
  0xb7   :  { %v1545_v20 = vsel %vm461_vm3, %v1543_v11, %v1544_v19  ;;  %v1552_v11 = vrot.slane %v5760_v15, 1  ;;  %v4893_v19 = vld [vmem:[%s6746_s1 + $0x238] sm:$0xff]  }
  0xba   :  { %4295 = vmatmul.mubr.bf16.gmra.mrb[76].mxu0 %v5352_v8  ;;  %4339 = vmatmul.mubr.bf16.gmra.mrb[76].mxu1 %v3555_v33  ;;  %v3556_v8 = vcombine.low %v5331_v40, %v5331_v40  ;;  %v1319_v33 = vshll.u32 %v5613_v4, 16  ;;  %v1317_v40 = vor.u32 %v1316_v7, %v1312_v2  ;;  %v4891_v2 = vld [vmem:[%s6746_s1 + $0x230] sm:$0xff]  }
  0xbb   :  { %4298 = vmatprep.mubr.msk.bf16.mxu0 %vm4972_vm0, %v4971_v0  ;;  %4342 = vmatprep.mubr.msk.bf16.mxu1 %vm4972_vm0, %v4971_v0  ;;  %v4892_v7 = vld [vmem:[%s6746_s1 + $0x270] sm:$0xff]  }
  0xbc   :  { %v1321_v9 = vrot.slane %v1319_v33, 1 }
  0xbe   :  { %v1325_v36 = vor.u32 %v1323_v60, %v1321_v9 }
  0xc0   :  { %v1330_v45 = vsel %vm97_vm1, %v1325_v36, %v1329_v25  ;;  %v1553_v36 = vsel %vm461_vm3, %v1550_v27, %v1552_v11 }
  0xc2   :  { %4299 = vmatmul.mubr.bf16.gmra.mrb[80].mxu0 %v5346_v63  ;;  %4343 = vmatmul.mubr.bf16.gmra.mrb[80].mxu1 %v3556_v8  ;;  %v1322_v63 = vsel %vm97_vm1, %v1317_v40, %v1321_v9  ;;  %v1258_v8 = vld [vmem:[%s6747_s0 + $0x38] sm:$0x1]  ;;  %v1353_v40 = vrot.slane %v1351_v55, 1 }
  0xc3   :  { %4362 = vmatprep.mubr.msk.bf16.mxu0 %vm4972_vm0, %v4971_v0  ;;  %4406 = vmatprep.mubr.msk.bf16.mxu1 %vm4972_vm0, %v4971_v0  ;;  %v3587_v9 = vcombine.low %v5780_v44, %v1258_v8 }
  0xc5   :  { %v1554_v42 = vrot.slane %v3587_v9, 1 }
  0xca   :  { %4363 = vmatmul.mubr.bf16.vlgmr.msra.gmra.mrb[84].mxu0 %v1322_v63  ;;  %4407 = vmatmul.mubr.bf16.vlgmr.msra.gmra.mrb[84].mxu1 %v1545_v20  ;;  %v4894_v63 = vld [vmem:[%s6746_s1 + $0x278] sm:$0xff]   ;;  %v1355_v20 = vshrl.u32 %v5760_v15, 16 }
  0xcb   :  { %4435 = vmatpush3.bf16.msra.mxu0 %v4874_v21  ;;  %4479 = vmatpush3.bf16.msra.mxu1 %v4875_v30  ;;  %v1354_v21 = vsel %vm97_vm1, %v1349_v3, %v1353_v40  ;;  %v1359_v30 = vshll.u32 %v3587_v9, 16 }
  0xcc   :  { %4366 = vmatprep.mubr.msk.bf16.mxu0 %vm4972_vm0, %v4971_v0  ;;  %4410 = vmatprep.mubr.msk.bf16.mxu1 %vm4972_vm0, %v4971_v0  ;;  %v1357_v25 = vor.u32 %v1355_v20, %v1353_v40 }
  0xcd   :  { %4436 = vmatprep.subr.bf16.mxu0 %v4971_v0  ;;  %4480 = vmatprep.subr.bf16.mxu1 %v4971_v0 }
  0xcf   :  { %4437 = vmatpush3.bf16.msra.mxu0 %v4877_v6  ;;  %4481 = vmatpush3.bf16.msra.mxu1 %v4878_v18  ;;  %v1361_v6 = vrot.slane %v1359_v30, 1  ;;  %v1712_v18 = vld [vmem:[%s6747_s0 + $0x4] sm:$0x8] }
  0xd0   :  { %4438 = vmatprep.subr.bf16.mxu0 %v4971_v0  ;;  %4482 = vmatprep.subr.bf16.mxu1 %v4971_v0  ;;  %v4896_v30 = vld [vmem:[%s6746_s1 + $0x280] sm:$0xff]  }
  0xd2   :  { %4367 = vmatmul.mubr.bf16.gmra.mrb[88].mxu0 %v1330_v45  ;;  %4411 = vmatmul.mubr.bf16.gmra.mrb[88].mxu1 %v1547_v17  ;;  %v1362_v45 = vsel %vm97_vm1, %v1357_v25, %v1361_v6  ;;  %v1555_v17 = vsel %vm461_vm3, %v1552_v11, %v1554_v42 }
  0xd3   :  { %4370 = vmatprep.mubr.msk.bf16.mxu0 %vm4972_vm0, %v4971_v0  ;;  %4414 = vmatprep.mubr.msk.bf16.mxu1 %vm4972_vm0, %v4971_v0 }
  0xd4   :  { %4439 = vmatpush3.bf16.msra.mxu0 %v4879_v50  ;;  %4483 = vmatpush3.bf16.msra.mxu1 %v4881_v32  ;;  %v3637_v50 = vcombine.low %v1712_v18, %v5592_v47  ;;  %v1363_v32 = vshrl.u32 %v3587_v9, 16  ;;  %v1941_v18 = vrot.slane %v1327_v29, 4  ;;  %v4899_v29 = vld [vmem:[%s6746_s1 + $0x2c8] sm:$0xff]  }
  0xd5   :  { %4440 = vmatprep.subr.bf16.mxu0 %v4971_v0  ;;  %4484 = vmatprep.subr.bf16.mxu1 %v4971_v0 }
  0xd6   :  { %v1929_v37 = vshrl.u32 %v3637_v50, 16  ;;  %v1932_v53 = vshll.u32 %v3637_v50, 16 }
  0xd8   :  { %4441 = vmatpush3.bf16.msra.mxu0 %v4882_v58  ;;  %4485 = vmatpush3.bf16.msra.mxu1 %v4884_v22 }
  0xd9   :  { %4442 = vmatprep.subr.bf16.mxu0 %v4971_v0  ;;  %4486 = vmatprep.subr.bf16.mxu1 %v4971_v0 }
  0xda   :  { %4371 = vmatmul.mubr.bf16.gmra.mrb[92].mxu0 %v1338_v61  ;;  %4415 = vmatmul.mubr.bf16.gmra.mrb[92].mxu1 %v1549_v12  ;;  %v1365_v61 = vor.u32 %v1363_v32, %v1361_v6  ;;  %v4897_v6 = vld [vmem:[%s6746_s1 + $0x2c0] sm:$0xff]   ;;  %v4898_v32 = vld [vmem:[%s6746_s1 + $0x288] sm:$0xff]  }
  0xdb   :  { %4374 = vmatprep.mubr.msk.bf16.mxu0 %vm4972_vm0, %v4971_v0  ;;  %4418 = vmatprep.mubr.msk.bf16.mxu1 %vm4972_vm0, %v4971_v0 }
  0xdc   :  { %4443 = vmatpush3.bf16.msra.mxu0 %v4885_v13  ;;  %4487 = vmatpush3.bf16.msra.mxu1 %v4886_v14 }
  0xdd   :  { %4444 = vmatprep.subr.bf16.mxu0 %v4971_v0  ;;  %4488 = vmatprep.subr.bf16.mxu1 %v4971_v0 }
  0xe0   :  { %4445 = vmatpush3.bf16.msra.mxu0 %v4888_v38  ;;  %4489 = vmatpush3.bf16.msra.mxu1 %v4889_v41  ;;  %v1931_v38 = vrot.slane %v1929_v37, 3  ;;  %v1934_v41 = vrot.slane %v1932_v53, 4 }
  0xe1   :  { %4446 = vmatprep.subr.bf16.mxu0 %v4971_v0  ;;  %4490 = vmatprep.subr.bf16.mxu1 %v4971_v0 }
  0xe2   :  { %4375 = vmatmul.mubr.bf16.gmra.mrb[96].mxu0 %v1346_v23  ;;  %4419 = vmatmul.mubr.bf16.gmra.mrb[96].mxu1 %v1551_v31  ;;  %v1937_v23 = vrot.slane %v1319_v33, 4  ;;  %v1935_v60 = vor.u32 %v1934_v41, %v1931_v38  ;;  %v1945_v38 = vrot.slane %v1335_v35, 4 }
  0xe3   :  { %4378 = vmatprep.mubr.msk.bf16.mxu0 %vm4972_vm0, %v4971_v0  ;;  %4422 = vmatprep.mubr.msk.bf16.mxu1 %vm4972_vm0, %v4971_v0 }
  0xe4   :  { %4447 = vmatpush3.bf16.msra.mxu0 %v4891_v2  ;;  %4491 = vmatpush3.bf16.msra.mxu1 %v4892_v7  ;;  %v1738_v2 = vrot.slane %v3637_v50, 3  ;;  %v1739_v7 = vrot.slane %v5613_v4, 3  ;;  %v1938_v3 = vor.u32 %v1937_v23, %v1936_v26  ;;  %v1741_v50 = vrot.slane %v5641_v10, 3 }
  0xe5   :  { %4448 = vmatprep.subr.bf16.mxu0 %v4971_v0  ;;  %4492 = vmatprep.subr.bf16.mxu1 %v4971_v0 }
  0xe6   :  { %v1939_v25 = vsel %vm871_vm2, %v1935_v60, %v1938_v3  ;;  %v4903_v60 = vld [vmem:[%s6746_s1 + $0x2d8] sm:$0xff]  }
  0xe8   :  { %4449 = vmatpush3.bf16.msra.mxu0 %v4893_v19  ;;  %4493 = vmatpush3.bf16.msra.mxu1 %v4894_v63 }
  0xe9   :  { %4522 = vmatprep.subr.bf16.mxu0 %v4971_v0  ;;  %4566 = vmatprep.subr.bf16.mxu1 %v4971_v0 }
  0xea   :  { %4379 = vmatmul.mubr.bf16.gmra.mrb[100].mxu0 %v1354_v21  ;;  %4423 = vmatmul.mubr.bf16.gmra.mrb[100].mxu1 %v1553_v36  ;;  %v1740_v21 = vsel %vm1737_vm5, %v1738_v2, %v1739_v7  ;;  %v1743_v2 = vrot.slane %v5675_v34, 3 }
  0xeb   :  { %4382 = vmatprep.mubr.msk.bf16.mxu0 %vm4972_vm0, %v4971_v0  ;;  %4426 = vmatprep.mubr.msk.bf16.mxu1 %vm4972_vm0, %v4971_v0 }
  0xf2   :  { %4383 = vmatmul.mubr.bf16.gmra.mrb[104].mxu0 %v1362_v45  ;;  %4427 = vmatmul.mubr.bf16.gmra.mrb[104].mxu1 %v1555_v17 }
  0xf3   :  { %4386 = vmatprep.mubr.msk.bf16.mxu0 %vm4972_vm0, %v4971_v0  ;;  %4430 = vmatprep.mubr.msk.bf16.mxu1 %vm4972_vm0, %v4971_v0 }
  0xf5   :  { %v242_v57 = vpop.f32.mrb[0].mxu0  ;;  %v386_v58 = vpop.f32.mrb[0].mxu1 }
  0xf6   :  { %v4100_v22 = vpop.f32.mrb[1].mxu0  ;;  %v5832_v12 = vadd.f32 %v386_v58, %v242_v57  ;;  %v4144_v13 = vpop.f32.mrb[1].mxu1 }
  0xf7   :  { %v245_v14 = vpop.f32.mrb[2].mxu0  ;;  %v389_v28 = vpop.f32.mrb[2].mxu1 }
  0xf8   :  { %v4101_v27 = vpop.f32.mrb[3].mxu0  ;;  %v5838_v31 = vadd.f32 %v389_v28, %v245_v14  ;;  %v4145_v8 = vpop.f32.mrb[3].mxu1  ;;  %v4900_v28 = vld [vmem:[%s6746_s1 + $0x290] sm:$0xff]  }
  0xf9   :  { %v1944_v27 = vrot.slane %v1339_v59, 3  ;;  %v4901_v8 = vld [vmem:[%s6746_s1 + $0x2d0] sm:$0xff]   ;;  %v4902_v59 = vld [vmem:[%s6746_s1 + $0x298] sm:$0xff]  }
  0xfa   :  { %4387 = vmatmul.mubr.bf16.gmra.mrb[108].mxu0 %v1365_v61  ;;  %4431 = vmatmul.mubr.bf16.gmra.mrb[108].mxu1 %v1554_v42  ;;  %v1940_v42 = vrot.slane %v1331_v46, 3  ;;  %v1742_v61 = vsel %vm1737_vm5, %v1739_v7, %v1741_v50 }
  0xfb   :  { %4450 = vmatprep.mubr.msk.bf16.mxu0 %vm4972_vm0, %v4971_v0  ;;  %4494 = vmatprep.mubr.msk.bf16.mxu1 %vm4972_vm0, %v4971_v0  ;;  %v1946_v35 = vor.u32 %v1945_v38, %v1944_v27  ;;  %v4910_v27 = vld [vmem:[%s6746_s1 + $0x2b0] sm:$0xff]  }
  0xfc   :  { %v1942_v46 = vor.u32 %v1941_v18, %v1940_v42  ;;  %v4905_v18 = vld [vmem:[%s6746_s1 + $0x2e0] sm:$0xff]  }
  0xfd   :  { %v250_v40 = vpop.f32.mrb[4].mxu0  ;;  %v394_v9 = vpop.f32.mrb[4].mxu1 }
  0xfe   :  { %v4104_v33 = vpop.f32.mrb[5].mxu0  ;;  %v5845_v11 = vadd.f32 %v394_v9, %v250_v40  ;;  %v4148_v19 = vpop.f32.mrb[5].mxu1  ;;  %v1943_v26 = vsel %vm871_vm2, %v1938_v3, %v1942_v46 }
  0xff   :  { %v253_v63 = vpop.f32.mrb[6].mxu0  ;;  %v397_v4 = vpop.f32.mrb[6].mxu1  ;;  %v1744_v19 = vsel %vm1737_vm5, %v1741_v50, %v1743_v2 }
 0x100   :  { %v4105_v36 = vpop.f32.mrb[7].mxu0  ;;  %v5859_v45 = vadd.f32 %v397_v4, %v253_v63  ;;  %v4149_v17 = vpop.f32.mrb[7].mxu1  ;;  %v1948_v4 = vrot.slane %v1347_v39, 3 }
 0x101   :  { %v1949_v36 = vrot.slane %v1343_v49, 4  ;;  %v1745_v49 = vrot.slane %v5717_v56, 3  ;;  %v4906_v17 = vld [vmem:[%s6746_s1 + $0x2a8] sm:$0xff]   ;;  %v5938_v56 = vld [vmem:[%s6747_s0 + $0x38] sm:$0xf] }
 0x102   :  { %4451 = vmatmul.mubr.bf16.vlgmr.msra.gmra.mrb[112].mxu0 %v1740_v21  ;;  %4495 = vmatmul.mubr.bf16.vlgmr.msra.gmra.mrb[112].mxu1 %v1939_v25  ;;  %v4904_v25 = vld [vmem:[%s6746_s1 + $0x2a0] sm:$0xff]  }
 0x103   :  { %4523 = vmatpush3.bf16.msra.mxu0 %v4896_v30  ;;  %4567 = vmatpush3.bf16.msra.mxu1 %v4897_v6  ;;  %v1947_v30 = vsel %vm871_vm2, %v1942_v46, %v1946_v35  ;;  %v1950_v39 = vor.u32 %v1949_v36, %v1948_v4 }
 0x104   :  { %4454 = vmatprep.mubr.msk.bf16.mxu0 %vm4972_vm0, %v4971_v0  ;;  %4498 = vmatprep.mubr.msk.bf16.mxu1 %vm4972_vm0, %v4971_v0 }
 0x105   :  { %v258_v37 = vpop.f32.mrb[8].mxu0  ;;  %4524 = vmatprep.subr.bf16.mxu0 %v4971_v0  ;;  %v402_v10 = vpop.f32.mrb[8].mxu1  ;;  %4568 = vmatprep.subr.bf16.mxu1 %v4971_v0 }
 0x106   :  { %v4108_v53 = vpop.f32.mrb[9].mxu0  ;;  %v5874_v57 = vadd.f32 %v402_v10, %v258_v37  ;;  %v4152_v58 = vpop.f32.mrb[9].mxu1 }
 0x107   :  { %v261_v22 = vpop.f32.mrb[10].mxu0  ;;  %4525 = vmatpush3.bf16.msra.mxu0 %v4898_v32  ;;  %v405_v13 = vpop.f32.mrb[10].mxu1  ;;  %4569 = vmatpush3.bf16.msra.mxu1 %v4899_v29  ;;  %v4907_v32 = vld [vmem:[%s6746_s1 + $0x2e8] sm:$0xff]   ;;  %v1746_v58 = vsel %vm1737_vm5, %v1743_v2, %v1745_v49  ;;  %v1713_v2 = vld [vmem:[%s6747_s0 + $0x38] sm:$0x7] }
 0x108   :  { %v4109_v14 = vpop.f32.mrb[11].mxu0  ;;  %4526 = vmatprep.subr.bf16.mxu0 %v4971_v0  ;;  %v5886_v41 = vadd.f32 %v405_v13, %v261_v22  ;;  %v4153_v23 = vpop.f32.mrb[11].mxu1  ;;  %4570 = vmatprep.subr.bf16.mxu1 %v4971_v0  ;;  %v1951_v13 = vsel %vm871_vm2, %v1946_v35, %v1950_v39 }
 0x109   :  { %v1952_v14 = vrot.slane %v1355_v20, 3  ;;  %v4911_v20 = vld [vmem:[%s6746_s1 + $0x2f0] sm:$0xff]  }
 0x10a   :  { %4455 = vmatmul.mubr.bf16.gmra.mrb[116].mxu0 %v1742_v61  ;;  %4499 = vmatmul.mubr.bf16.gmra.mrb[116].mxu1 %v1943_v26  ;;  %v1953_v26 = vrot.slane %v1351_v55, 4  ;;  %v1747_v55 = vrot.slane %v5760_v15, 3  ;;  %v4913_v15 = vld [vmem:[%s6746_s1 + $0x2f8] sm:$0xff]  }
 0x10b   :  { %4458 = vmatprep.mubr.msk.bf16.mxu0 %vm4972_vm0, %v4971_v0  ;;  %4502 = vmatprep.mubr.msk.bf16.mxu1 %vm4972_vm0, %v4971_v0 }
 0x10c   :  { %4527 = vmatpush3.bf16.msra.mxu0 %v4900_v28  ;;  %4571 = vmatpush3.bf16.msra.mxu1 %v4901_v8  ;;  %v3663_v28 = vcombine.low %v5780_v44, %v5938_v56  ;;  %v1954_v8 = vor.u32 %v1953_v26, %v1952_v14 }
 0x10d   :  { %v266_v7 = vpop.f32.mrb[12].mxu0  ;;  %4528 = vmatprep.subr.bf16.mxu0 %v4971_v0  ;;  %v410_v3 = vpop.f32.mrb[12].mxu1  ;;  %4572 = vmatprep.subr.bf16.mxu1 %v4971_v0 }
 0x10e   :  { %v4112_v40 = vpop.f32.mrb[13].mxu0  ;;  %v5905_v34 = vadd.f32 %v410_v3, %v266_v7  ;;  %v4156_v9 = vpop.f32.mrb[13].mxu1  ;;  %v1957_v35 = vshrl.u32 %v3663_v28, 16  ;;  %v4912_v7 = vld [vmem:[%s6746_s1 + $0x2b8] sm:$0xff]   ;;  %v1955_v36 = vsel %vm871_vm2, %v1950_v39, %v1954_v8 }
 0x10f   :  { %v269_v33 = vpop.f32.mrb[14].mxu0  ;;  %v413_v63 = vpop.f32.mrb[14].mxu1 }
 0x110   :  { %v4113_v21 = vpop.f32.mrb[15].mxu0  ;;  %4529 = vmatpush3.bf16.msra.mxu0 %v4902_v59  ;;  %v5916_v6 = vadd.f32 %v413_v63, %v269_v33  ;;  %v4157_v42 = vpop.f32.mrb[15].mxu1  ;;  %4573 = vmatpush3.bf16.msra.mxu1 %v4903_v60  ;;  %v1960_v59 = vshll.u32 %v3663_v28, 16  ;;  %v1748_v63 = vsel %vm1737_vm5, %v1745_v49, %v1747_v55 }
 0x111   :  { %4530 = vmatprep.subr.bf16.mxu0 %v4971_v0  ;;  %4574 = vmatprep.subr.bf16.mxu1 %v4971_v0  ;;  %v3638_v21 = vcombine.low %v5780_v44, %v1713_v2 }
 0x112   :  { %4459 = vmatmul.mubr.bf16.gmra.mrb[120].mxu0 %v1744_v19  ;;  %4503 = vmatmul.mubr.bf16.gmra.mrb[120].mxu1 %v1947_v30  ;;  %v1962_v42 = vrot.slane %v1960_v59, 4 }
 0x113   :  { %4462 = vmatprep.mubr.msk.bf16.mxu0 %vm4972_vm0, %v4971_v0  ;;  %4506 = vmatprep.mubr.msk.bf16.mxu1 %vm4972_vm0, %v4971_v0  ;;  %v1749_v49 = vrot.slane %v3638_v21, 3 }
 0x114   :  { %4531 = vmatpush3.bf16.msra.mxu0 %v4904_v25  ;;  %4575 = vmatpush3.bf16.msra.mxu1 %v4905_v18  ;;  %v1959_v25 = vrot.slane %v1957_v35, 3 }
 0x115   :  { %v274_v50 = vpop.f32.mrb[16].mxu0  ;;  %4532 = vmatprep.subr.bf16.mxu0 %v4971_v0  ;;  %v418_v46 = vpop.f32.mrb[16].mxu1  ;;  %4576 = vmatprep.subr.bf16.mxu1 %v4971_v0 }
 0x116   :  { %v4116_v29 = vpop.f32.mrb[17].mxu0  ;;  %v5941_v37 = vadd.f32 %v418_v46, %v274_v50  ;;  %v4160_v10 = vpop.f32.mrb[17].mxu1  ;;  %v1963_v39 = vor.u32 %v1962_v42, %v1959_v25  ;;  %v2301_v50 = vld [vmem:[%s6747_s0 + $0x8] sm:$0xf] }
 0x117   :  { %v277_v53 = vpop.f32.mrb[18].mxu0  ;;  %v421_v22 = vpop.f32.mrb[18].mxu1 }
 0x118   :  { %v4117_v61 = vpop.f32.mrb[19].mxu0  ;;  %4533 = vmatpush3.bf16.msra.mxu0 %v4906_v17  ;;  %v5954_v38 = vadd.f32 %v421_v22, %v277_v53  ;;  %v4161_v23 = vpop.f32.mrb[19].mxu1  ;;  %4577 = vmatpush3.bf16.msra.mxu1 %v4907_v32  ;;  %v5996_v32 = vld [vmem:[%s6747_s0 + $0xc] sm:$0xf]  ;;  %v1964_v28 = vsel %vm871_vm2, %v1954_v8, %v1963_v39 }
 0x119   :  { %4534 = vmatprep.subr.bf16.mxu0 %v4971_v0  ;;  %4578 = vmatprep.subr.bf16.mxu1 %v4971_v0  ;;  %v1750_v61 = vsel %vm1737_vm5, %v1747_v55, %v1749_v49  ;;  %v6011_v23 = vld [vmem:[%s6747_s0 + $0x14] sm:$0xf] }
 0x11a   :  { %4463 = vmatmul.mubr.bf16.gmra.mrb[124].mxu0 %v1746_v58  ;;  %4507 = vmatmul.mubr.bf16.gmra.mrb[124].mxu1 %v1951_v13  ;;  %v3719_v13 = vcombine.low %v2301_v50, %v5996_v32 }
 0x11b   :  { %4466 = vmatprep.mubr.msk.bf16.mxu0 %vm4972_vm0, %v4971_v0  ;;  %4510 = vmatprep.mubr.msk.bf16.mxu1 %vm4972_vm0, %v4971_v0 }
 0x11c   :  { %4535 = vmatpush3.bf16.msra.mxu0 %v4910_v27  ;;  %4579 = vmatpush3.bf16.msra.mxu1 %v4911_v20  ;;  %v6006_v27 = vld [vmem:[%s6747_s0 + $0x10] sm:$0xf]  ;;  %v2370_v8 = vshll.u32 %v3719_v13, 16 }
 0x11d   :  { %v282_v60 = vpop.f32.mrb[20].mxu0  ;;  %4536 = vmatprep.subr.bf16.mxu0 %v4971_v0  ;;  %v426_v3 = vpop.f32.mrb[20].mxu1  ;;  %4580 = vmatprep.subr.bf16.mxu1 %v4971_v0  ;;  %v6017_v55 = vcombine.low %v6006_v27, %v6011_v23 }
 0x11e   :  { %v4120_v40 = vpop.f32.mrb[21].mxu0  ;;  %v5977_v9 = vadd.f32 %v426_v3, %v282_v60  ;;  %v4164_v33 = vpop.f32.mrb[21].mxu1  ;;  %v2368_v3 = vshrl.u32 %v3719_v13, 16 }
 0x11f   :  { %v285_v19 = vpop.f32.mrb[22].mxu0  ;;  %v429_v30 = vpop.f32.mrb[22].mxu1  ;;  %v2372_v40 = vrot.slane %v2370_v8, 1  ;;  %v6023_v33 = vshll.u32 %v6017_v55, 16  ;;  %v6071_v8 = vld [vmem:[%s6747_s0 + $0x20] sm:$0xf] }
 0x120   :  { %v4121_v4 = vpop.f32.mrb[23].mxu0  ;;  %4537 = vmatpush3.bf16.msra.mxu0 %v4912_v7  ;;  %v5982_v18 = vadd.f32 %v429_v30, %v285_v19  ;;  %v4165_v17 = vpop.f32.mrb[23].mxu1  ;;  %4581 = vmatpush3.bf16.msra.mxu1 %v4913_v15 }
 0x121   :  { %4610 = vmatprep.subr.bf16.mxu0 %v4971_v0  ;;  %4654 = vmatprep.subr.bf16.mxu1 %v4971_v0  ;;  %v6031_v4 = vld [vmem:[%s6747_s0 + $0x18] sm:$0xf]  ;;  %v2373_v42 = vor.u32 %v2372_v40, %v2368_v3  ;;  %v2377_v17 = vrot.slane %v6023_v33, 1 }
 0x122   :  { %4467 = vmatmul.mubr.bf16.gmra.mrb[128].mxu0 %v1748_v63  ;;  %4511 = vmatmul.mubr.bf16.gmra.mrb[128].mxu1 %v1955_v36 }
 0x123   :  { %4470 = vmatprep.mubr.msk.bf16.mxu0 %vm4972_vm0, %v4971_v0  ;;  %4514 = vmatprep.mubr.msk.bf16.mxu1 %vm4972_vm0, %v4971_v0 }
 0x125   :  { %v290_v46 = vpop.f32.mrb[24].mxu0  ;;  %v434_v29 = vpop.f32.mrb[24].mxu1 }
 0x126   :  { %v4124_v10 = vpop.f32.mrb[25].mxu0  ;;  %v5998_v53 = vadd.f32 %v434_v29, %v290_v46  ;;  %v4168_v58 = vpop.f32.mrb[25].mxu1 }
 0x127   :  { %v293_v22 = vpop.f32.mrb[26].mxu0  ;;  %v437_v14 = vpop.f32.mrb[26].mxu1 }
 0x128   :  { %v4125_v26 = vpop.f32.mrb[27].mxu0  ;;  %v4169_v20 = vpop.f32.mrb[27].mxu1  ;;  %v4917_v22 = vld [vmem:[%s6746_s1 + $0x300] sm:$0xff]  }
 0x12a   :  { %4471 = vmatmul.mubr.bf16.gmra.mrb[132].mxu0 %v1750_v61  ;;  %4515 = vmatmul.mubr.bf16.gmra.mrb[132].mxu1 %v1964_v28  ;;  %v6056_v61 = vshrl.u32 %v6017_v55, 16 }
 0x12b   :  { %4474 = vmatprep.mubr.msk.bf16.mxu0 %vm4972_vm0, %v4971_v0  ;;  %4518 = vmatprep.mubr.msk.bf16.mxu1 %vm4972_vm0, %v4971_v0 }
 0x12d   :  { %v564_v2 = vpop.f32.mrb[28].mxu0  ;;  %v779_v59 = vpop.f32.mrb[28].mxu1 }
 0x12e   :  { %v618_v35 = vadd.f32 %v564_v2, %v5832_v12  ;;  %v4188_v7 = vpop.f32.mrb[29].mxu0  ;;  %v4232_v60 = vpop.f32.mrb[29].mxu1  ;;  %v6036_v12 = vld [vmem:[%s6747_s0 + $0x1c] sm:$0xf]  ;;  %v6076_v2 = vld [vmem:[%s6747_s0 + $0x24] sm:$0xf] }
 0x12f   :  { %v567_v15 = vpop.f32.mrb[30].mxu0  ;;  %v782_v21 = vpop.f32.mrb[30].mxu1  ;;  %v4921_v7 = vld [vmem:[%s6746_s1 + $0x308] sm:$0xff]  }
 0x130   :  { %v6025_v19 = vadd.f32 %v779_v59, %v618_v35  ;;  %v619_v63 = vadd.f32 %v567_v15, %v5838_v31  ;;  %v4189_v30 = vpop.f32.mrb[31].mxu0  ;;  %v4233_v36 = vpop.f32.mrb[31].mxu1  ;;  %v6044_v31 = vcombine.low %v6031_v4, %v6036_v12  ;;  %v2381_v35 = vor.u32 %v6056_v61, %v2377_v17  ;;  %v4922_v60 = vld [vmem:[%s6746_s1 + $0x348] sm:$0xff]  }
 0x131   :  { %v6092_v15 = vcombine.low %v6071_v8, %v6076_v2  ;;  %v3689_v30 = vcombine.low %v5603_v1, %v5627_v43  ;;  %v4923_v1 = vld [vmem:[%s6746_s1 + $0x310] sm:$0xff]  }
 0x132   :  { %v6038_v25 = vadd.f32 %v782_v21, %v619_v63  ;;  %4475 = vmatmul.mubr.bf16.gmra.mrb[136].mxu0 %v1749_v49  ;;  %4519 = vmatmul.mubr.bf16.gmra.mrb[136].mxu1 %v1963_v39  ;;  %v3688_v49 = vcombine.low %v5592_v47, %v5598_v48  ;;  %v6059_v13 = vshll.u32 %v6044_v31, 16  ;;  %v2378_v47 = vsel %vm97_vm1, %v2373_v42, %v2377_v17  ;;  %v4918_v48 = vld [vmem:[%s6746_s1 + $0x340] sm:$0xff]  }
 0x133   :  { %4538 = vmatprep.mubr.msk.bf16.mxu0 %vm4972_vm0, %v4971_v0  ;;  %4582 = vmatprep.mubr.msk.bf16.mxu1 %vm4972_vm0, %v4971_v0  ;;  %v6110_v43 = vshrl.u32 %v6044_v31, 16 }
 0x134   :  { %v2385_v59 = vrot.slane %v6059_v13, 1 }
 0x135   :  { %v572_v50 = vpop.f32.mrb[32].mxu0  ;;  %v787_v29 = vpop.f32.mrb[32].mxu1 }
 0x136   :  { %v620_v46 = vadd.f32 %v572_v50, %v5845_v11  ;;  %v4192_v10 = vpop.f32.mrb[33].mxu0  ;;  %v4236_v39 = vpop.f32.mrb[33].mxu1  ;;  %v2386_v17 = vsel %vm97_vm1, %v2381_v35, %v2385_v59 }
 0x137   :  { %v575_v58 = vpop.f32.mrb[34].mxu0  ;;  %v790_v26 = vpop.f32.mrb[34].mxu1  ;;  %v6122_v39 = vld [vmem:[%s6747_s0 + $0x28] sm:$0xf] }
 0x138   :  { %v6061_v14 = vadd.f32 %v787_v29, %v620_v46  ;;  %v621_v11 = vadd.f32 %v575_v58, %v5859_v45  ;;  %v4193_v28 = vpop.f32.mrb[35].mxu0  ;;  %v4237_v20 = vpop.f32.mrb[35].mxu1  ;;  %v6127_v58 = vld [vmem:[%s6747_s0 + $0x2c] sm:$0xf] }
 0x139   :  { %v4927_v28 = vld [vmem:[%s6746_s1 + $0x318] sm:$0xff]  }
 0x13a   :  { %v6078_v45 = vadd.f32 %v790_v26, %v621_v11  ;;  %4539 = vmatmul.mubr.bf16.vlgmr.msra.gmra.mrb[140].mxu0 %v3688_v49  ;;  %4583 = vmatmul.mubr.bf16.vlgmr.msra.gmra.mrb[140].mxu1 %v2378_v47  ;;  %v2389_v11 = vor.u32 %v6110_v43, %v2385_v59  ;;  %v6142_v47 = vcombine.low %v6122_v39, %v6127_v58  ;;  %v4930_v20 = vld [vmem:[%s6746_s1 + $0x358] sm:$0xff]  }
 0x13b   :  { %4611 = vmatpush3.bf16.msra.mxu0 %v4917_v22  ;;  %4655 = vmatpush3.bf16.msra.mxu1 %v4918_v48 }
 0x13c   :  { %4542 = vmatprep.mubr.msk.bf16.mxu0 %vm4972_vm0, %v4971_v0  ;;  %4586 = vmatprep.mubr.msk.bf16.mxu1 %vm4972_vm0, %v4971_v0 }
 0x13d   :  { %v580_v3 = vpop.f32.mrb[36].mxu0  ;;  %4612 = vmatprep.subr.bf16.mxu0 %v4971_v0  ;;  %v795_v63 = vpop.f32.mrb[36].mxu1  ;;  %4656 = vmatprep.subr.bf16.mxu1 %v4971_v0 }
 0x13e   :  { %v622_v40 = vadd.f32 %v580_v3, %v5874_v57  ;;  %v4196_v21 = vpop.f32.mrb[37].mxu0  ;;  %v4240_v36 = vpop.f32.mrb[37].mxu1  ;;  %v6113_v57 = vshll.u32 %v6092_v15, 16 }
 0x13f   :  { %v583_v42 = vpop.f32.mrb[38].mxu0  ;;  %4613 = vmatpush3.bf16.msra.mxu0 %v4921_v7  ;;  %v798_v29 = vpop.f32.mrb[38].mxu1  ;;  %4657 = vmatpush3.bf16.msra.mxu1 %v4922_v60  ;;  %v3690_v60 = vcombine.low %v5632_v5, %v5659_v24  ;;  %v6158_v21 = vld [vmem:[%s6747_s0 + $0x30] sm:$0xf]  ;;  %v6165_v24 = vshll.u32 %v6142_v47, 16 }
 0x140   :  { %v6102_v50 = vadd.f32 %v795_v63, %v622_v40  ;;  %v623_v46 = vadd.f32 %v583_v42, %v5886_v41  ;;  %v4197_v10 = vpop.f32.mrb[39].mxu0  ;;  %4614 = vmatprep.subr.bf16.mxu0 %v4971_v0  ;;  %v4241_v49 = vpop.f32.mrb[39].mxu1  ;;  %4658 = vmatprep.subr.bf16.mxu1 %v4971_v0  ;;  %v4926_v41 = vld [vmem:[%s6746_s1 + $0x350] sm:$0xff]   ;;  %v2393_v26 = vrot.slane %v6113_v57, 1  ;;  %v6153_v63 = vshrl.u32 %v6092_v15, 16 }
 0x142   :  { %v6129_v22 = vadd.f32 %v798_v29, %v623_v46  ;;  %4543 = vmatmul.mubr.bf16.gmra.mrb[144].mxu0 %v3689_v30  ;;  %4587 = vmatmul.mubr.bf16.gmra.mrb[144].mxu1 %v2386_v17  ;;  %v2394_v5 = vsel %vm97_vm1, %v2389_v11, %v2393_v26  ;;  %v4931_v17 = vld [vmem:[%s6746_s1 + $0x320] sm:$0xff]   ;;  %v6173_v46 = vld [vmem:[%s6747_s0 + $0x34] sm:$0xf]  ;;  %v2397_v49 = vor.u32 %v6153_v63, %v2393_v26  ;;  %v4935_v11 = vld [vmem:[%s6746_s1 + $0x328] sm:$0xff]  }
 0x143   :  { %4546 = vmatprep.mubr.msk.bf16.mxu0 %vm4972_vm0, %v4971_v0  ;;  %4590 = vmatprep.mubr.msk.bf16.mxu1 %vm4972_vm0, %v4971_v0  ;;  %v3691_v26 = vcombine.low %v5664_v54, %v5698_v51  ;;  %v4939_v54 = vld [vmem:[%s6746_s1 + $0x330] sm:$0xff]  }
 0x144   :  { %4615 = vmatpush3.bf16.msra.mxu0 %v4923_v1  ;;  %4659 = vmatpush3.bf16.msra.mxu1 %v4926_v41  ;;  %v6186_v1 = vcombine.low %v6158_v21, %v6173_v46  ;;  %v2401_v41 = vrot.slane %v6165_v24, 1 }
 0x145   :  { %v588_v48 = vpop.f32.mrb[40].mxu0  ;;  %4616 = vmatprep.subr.bf16.mxu0 %v4971_v0  ;;  %v803_v59 = vpop.f32.mrb[40].mxu1  ;;  %4660 = vmatprep.subr.bf16.mxu1 %v4971_v0 }
 0x146   :  { %v624_v35 = vadd.f32 %v588_v48, %v5905_v34  ;;  %v4200_v7 = vpop.f32.mrb[41].mxu0  ;;  %v4244_v3 = vpop.f32.mrb[41].mxu1  ;;  %v4936_v48 = vld [vmem:[%s6746_s1 + $0x368] sm:$0xff]  }
 0x147   :  { %v591_v40 = vpop.f32.mrb[42].mxu0  ;;  %v806_v36 = vpop.f32.mrb[42].mxu1  ;;  %v6204_v3 = vshrl.u32 %v6142_v47, 16 }
 0x148   :  { %v6160_v30 = vadd.f32 %v803_v59, %v624_v35  ;;  %v625_v34 = vadd.f32 %v591_v40, %v5916_v6  ;;  %v4201_v42 = vpop.f32.mrb[43].mxu0  ;;  %4617 = vmatpush3.bf16.msra.mxu0 %v4927_v28  ;;  %v4245_v29 = vpop.f32.mrb[43].mxu1  ;;  %4661 = vmatpush3.bf16.msra.mxu1 %v4930_v20  ;;  %v4932_v6 = vld [vmem:[%s6746_s1 + $0x360] sm:$0xff]   ;;  %v6207_v40 = vshll.u32 %v6186_v1, 16 }
 0x149   :  { %4618 = vmatprep.subr.bf16.mxu0 %v4971_v0  ;;  %4662 = vmatprep.subr.bf16.mxu1 %v4971_v0  ;;  %v4940_v29 = vld [vmem:[%s6746_s1 + $0x370] sm:$0xff]  }
 0x14a   :  { %v6179_v10 = vadd.f32 %v806_v36, %v625_v34  ;;  %4547 = vmatmul.mubr.bf16.gmra.mrb[148].mxu0 %v3690_v60  ;;  %4591 = vmatmul.mubr.bf16.gmra.mrb[148].mxu1 %v2394_v5  ;;  %v2402_v5 = vsel %vm97_vm1, %v2397_v49, %v2401_v41  ;;  %v2405_v49 = vor.u32 %v6204_v3, %v2401_v41  ;;  %v4943_v41 = vld [vmem:[%s6746_s1 + $0x378] sm:$0xff]  }
 0x14b   :  { %4550 = vmatprep.mubr.msk.bf16.mxu0 %vm4972_vm0, %v4971_v0  ;;  %4594 = vmatprep.mubr.msk.bf16.mxu1 %vm4972_vm0, %v4971_v0 }
 0x14c   :  { %4619 = vmatpush3.bf16.msra.mxu0 %v4931_v17  ;;  %4663 = vmatpush3.bf16.msra.mxu1 %v4932_v6  ;;  %v6219_v17 = vld [vmem:[%s6747_s0 + $0x38] sm:$0xf] }
 0x14d   :  { %v596_v28 = vpop.f32.mrb[44].mxu0  ;;  %4620 = vmatprep.subr.bf16.mxu0 %v4971_v0  ;;  %v811_v35 = vpop.f32.mrb[44].mxu1  ;;  %4664 = vmatprep.subr.bf16.mxu1 %v4971_v0 }
 0x14e   :  { %v626_v20 = vadd.f32 %v596_v28, %v5941_v37  ;;  %v4204_v59 = vpop.f32.mrb[45].mxu0  ;;  %v4248_v7 = vpop.f32.mrb[45].mxu1 }
 0x14f   :  { %v599_v60 = vpop.f32.mrb[46].mxu0  ;;  %v814_v37 = vpop.f32.mrb[46].mxu1  ;;  %v3692_v7 = vcombine.low %v5703_v52, %v5740_v16 }
 0x150   :  { %v6209_v34 = vadd.f32 %v811_v35, %v626_v20  ;;  %v627_v36 = vadd.f32 %v599_v60, %v5954_v38  ;;  %v4205_v42 = vpop.f32.mrb[47].mxu0  ;;  %4621 = vmatpush3.bf16.msra.mxu0 %v4935_v11  ;;  %v4249_v51 = vpop.f32.mrb[47].mxu1  ;;  %4665 = vmatpush3.bf16.msra.mxu1 %v4936_v48  ;;  %v2314_v38 = vld [vmem:[%s6747_s0 + $0x3c] sm:$0x1]  ;;  %v2409_v11 = vrot.slane %v6207_v40, 1 }
 0x151   :  { %4622 = vmatprep.subr.bf16.mxu0 %v4971_v0  ;;  %4666 = vmatprep.subr.bf16.mxu1 %v4971_v0  ;;  %v3725_v28 = vcombine.low %v6219_v17, %v2314_v38  ;;  %v4942_v48 = vld [vmem:[%s6746_s1 + $0x338] sm:$0xff]   ;;  %v6254_v38 = vshrl.u32 %v6186_v1, 16 }
 0x152   :  { %v6228_v6 = vadd.f32 %v814_v37, %v627_v36  ;;  %4551 = vmatmul.mubr.bf16.gmra.mrb[152].mxu0 %v3691_v26  ;;  %4595 = vmatmul.mubr.bf16.gmra.mrb[152].mxu1 %v2402_v5  ;;  %v2410_v37 = vsel %vm97_vm1, %v2405_v49, %v2409_v11  ;;  %v2578_v49 = vld [vmem:[%s6747_s0 + $0x8] sm:$0xc] }
 0x153   :  { %4554 = vmatprep.mubr.msk.bf16.mxu0 %vm4972_vm0, %v4971_v0  ;;  %4598 = vmatprep.mubr.msk.bf16.mxu1 %vm4972_vm0, %v4971_v0  ;;  %v2413_v16 = vor.u32 %v6254_v38, %v2409_v11 }
 0x154   :  { %4623 = vmatpush3.bf16.msra.mxu0 %v4939_v54  ;;  %4667 = vmatpush3.bf16.msra.mxu1 %v4940_v29 }
 0x155   :  { %v604_v20 = vpop.f32.mrb[48].mxu0  ;;  %4624 = vmatprep.subr.bf16.mxu0 %v4971_v0  ;;  %v819_v59 = vpop.f32.mrb[48].mxu1  ;;  %4668 = vmatprep.subr.bf16.mxu1 %v4971_v0 }
 0x156   :  { %v628_v35 = vadd.f32 %v604_v20, %v5977_v9  ;;  %v4208_v26 = vpop.f32.mrb[49].mxu0  ;;  %v4252_v60 = vpop.f32.mrb[49].mxu1  ;;  %v2415_v9 = vshll.u32 %v3725_v28, 16 }
 0x157   :  { %v607_v36 = vpop.f32.mrb[50].mxu0  ;;  %v822_v54 = vpop.f32.mrb[50].mxu1  ;;  %v3750_v60 = vcombine.low %v2578_v49, %v5996_v32 }
 0x158   :  { %v6250_v42 = vadd.f32 %v819_v59, %v628_v35  ;;  %v629_v5 = vadd.f32 %v607_v36, %v5982_v18  ;;  %v4209_v51 = vpop.f32.mrb[51].mxu0  ;;  %4625 = vmatpush3.bf16.msra.mxu0 %v4942_v48  ;;  %v4253_v29 = vpop.f32.mrb[51].mxu1  ;;  %4669 = vmatpush3.bf16.msra.mxu1 %v4943_v41  ;;  %v2417_v18 = vrot.slane %v2415_v9, 1  ;;  %v3693_v59 = vcombine.low %v5745_v62, %v5780_v44  ;;  %v2797_v44 = vld [vmem:[%s6747_s0 + $0x8] sm:$0x8] }
 0x159   :  { %4698 = vmatprep.subr.bf16.mxu0 %v4971_v0  ;;  %4742 = vmatprep.subr.bf16.mxu1 %v4971_v0  ;;  %v2419_v51 = vshrl.u32 %v3725_v28, 16  ;;  %v2608_v9 = vshll.u32 %v3750_v60, 16  ;;  %v3694_v28 = vcombine.low %v5938_v56, %v5938_v56 }
 0x15a   :  { %v6257_v52 = vadd.f32 %v822_v54, %v629_v5  ;;  %4555 = vmatmul.mubr.bf16.gmra.mrb[156].mxu0 %v3692_v7  ;;  %4599 = vmatmul.mubr.bf16.gmra.mrb[156].mxu1 %v2410_v37  ;;  %v2418_v5 = vsel %vm97_vm1, %v2413_v16, %v2417_v18 }
 0x15b   :  { %4558 = vmatprep.mubr.msk.bf16.mxu0 %vm4972_vm0, %v4971_v0  ;;  %4602 = vmatprep.mubr.msk.bf16.mxu1 %vm4972_vm0, %v4971_v0 }
 0x15d   :  { %v612_v48 = vpop.f32.mrb[52].mxu0  ;;  %v827_v41 = vpop.f32.mrb[52].mxu1 }
 0x15e   :  { %v630_v20 = vadd.f32 %v612_v48, %v5998_v53  ;;  %v4212_v35 = vpop.f32.mrb[53].mxu0  ;;  %v4256_v26 = vpop.f32.mrb[53].mxu1  ;;  %v2605_v53 = vshrl.u32 %v3750_v60, 16  ;;  %v2421_v48 = vor.u32 %v2419_v51, %v2417_v18 }
 0x15f   :  { %v615_v7 = vpop.f32.mrb[54].mxu0  ;;  %v830_v11 = vpop.f32.mrb[54].mxu1  ;;  %v2612_v26 = vrot.slane %v6056_v61, 2 }
 0x160   :  { %v6272_v36 = vadd.f32 %v827_v41, %v630_v20  ;;  %v4213_v37 = vpop.f32.mrb[55].mxu0  ;;  %v4257_v54 = vpop.f32.mrb[55].mxu1  ;;  %v2607_v35 = vrot.slane %v2605_v53, 2  ;;  %v2613_v7 = vrot.slane %v6023_v33, 3  ;;  %v2819_v53 = vrot.slane %v6017_v55, 3 }
 0x162   :  { %4559 = vmatmul.mubr.bf16.gmra.mrb[160].mxu0 %v3693_v59  ;;  %4603 = vmatmul.mubr.bf16.gmra.mrb[160].mxu1 %v2418_v5  ;;  %v2610_v59 = vrot.slane %v2608_v9, 3  ;;  %v6291_v5 = vcombine.low %v2797_v44, %v5996_v32  ;;  %v2614_v51 = vor.u32 %v2613_v7, %v2612_v26  ;;  %v4947_v7 = vld [vmem:[%s6746_s1 + $0x3c0] sm:$0xff]  }
 0x163   :  { %4562 = vmatprep.mubr.msk.bf16.mxu0 %vm4972_vm0, %v4971_v0  ;;  %4606 = vmatprep.mubr.msk.bf16.mxu1 %vm4972_vm0, %v4971_v0 }
 0x164   :  { %v2611_v18 = vor.u32 %v2610_v59, %v2607_v35 }
 0x165   :  { %v998_v62 = vpop.f32.mrb[56].mxu0  ;;  %v1178_v16 = vpop.f32.mrb[56].mxu1 }
 0x166   :  { %v1052_v29 = vadd.f32 %v998_v62, %v6025_v19  ;;  %v4276_v49 = vpop.f32.mrb[57].mxu0  ;;  %v4320_v20 = vpop.f32.mrb[57].mxu1 }
 0x167   :  { %v1001_v41 = vpop.f32.mrb[58].mxu0  ;;  %v1181_v37 = vpop.f32.mrb[58].mxu1  ;;  %v2616_v20 = vrot.slane %v6110_v43, 2 }
 0x168   :  { %v6287_v60 = vadd.f32 %v1178_v16, %v1052_v29  ;;  %v1053_v11 = vadd.f32 %v1001_v41, %v6038_v25  ;;  %v4277_v19 = vpop.f32.mrb[59].mxu0  ;;  %v4321_v54 = vpop.f32.mrb[59].mxu1  ;;  %v2818_v25 = vrot.slane %v6291_v5, 3  ;;  %v2617_v41 = vrot.slane %v6059_v13, 3 }
 0x169   :  { %v4948_v54 = vld [vmem:[%s6746_s1 + $0x388] sm:$0xff]  }
 0x16a   :  { %v6293_v56 = vadd.f32 %v1181_v37, %v1053_v11  ;;  %4563 = vmatmul.mubr.bf16.gmra.mrb[164].mxu0 %v3694_v28  ;;  %4607 = vmatmul.mubr.bf16.gmra.mrb[164].mxu1 %v2421_v48  ;;  %v2615_v28 = vsel %vm2603_vm6, %v2611_v18, %v2614_v51  ;;  %v4946_v48 = vld [vmem:[%s6746_s1 + $0x380] sm:$0xff]   ;;  %v2820_v26 = vsel %vm1737_vm5, %v2818_v25, %v2819_v53  ;;  %v4949_v18 = vld [vmem:[%s6746_s1 + $0x3c8] sm:$0xff]  }
 0x16b   :  { %4626 = vmatprep.mubr.msk.bf16.mxu0 %vm4972_vm0, %v4971_v0  ;;  %4670 = vmatprep.mubr.msk.bf16.mxu1 %vm4972_vm0, %v4971_v0  ;;  %v2618_v19 = vor.u32 %v2617_v41, %v2616_v20 }
 0x16d   :  { %v1006_v9 = vpop.f32.mrb[60].mxu0  ;;  %v1186_v44 = vpop.f32.mrb[60].mxu1 }
 0x16e   :  { %v1054_v62 = vadd.f32 %v1006_v9, %v6061_v14  ;;  %v4280_v29 = vpop.f32.mrb[61].mxu0  ;;  %v4324_v16 = vpop.f32.mrb[61].mxu1 }
 0x16f   :  { %v1009_v49 = vpop.f32.mrb[62].mxu0  ;;  %v1189_v59 = vpop.f32.mrb[62].mxu1 }
 0x170   :  { %v6308_v35 = vadd.f32 %v1186_v44, %v1054_v62  ;;  %v1055_v55 = vadd.f32 %v1009_v49, %v6078_v45  ;;  %v4281_v14 = vpop.f32.mrb[63].mxu0  ;;  %v4325_v11 = vpop.f32.mrb[63].mxu1  ;;  %v2821_v45 = vrot.slane %v6044_v31, 3  ;;  %v2619_v31 = vsel %vm2603_vm6, %v2614_v51, %v2618_v19  ;;  %v4950_v51 = vld [vmem:[%s6746_s1 + $0x390] sm:$0xff]  }
 0x171   :  { %v2620_v49 = vrot.slane %v6153_v63, 2  ;;  %v4951_v14 = vld [vmem:[%s6746_s1 + $0x3d0] sm:$0xff]  }
 0x172   :  { %v6315_v37 = vadd.f32 %v1189_v59, %v1055_v55  ;;  %4627 = vmatmul.mubr.bf16.vlgmr.msra.gmra.mrb[168].mxu0 %v2615_v28  ;;  %4671 = vmatmul.mubr.bf16.vlgmr.msra.gmra.mrb[168].mxu1 %v2820_v26  ;;  %v2621_v28 = vrot.slane %v6113_v57, 3 }
 0x173   :  { %4699 = vmatpush3.bf16.msra.mxu0 %v4946_v48  ;;  %4743 = vmatpush3.bf16.msra.mxu1 %v4947_v7  ;;  %v4952_v7 = vld [vmem:[%s6746_s1 + $0x398] sm:$0xff]  }
 0x174   :  { %4630 = vmatprep.mubr.msk.bf16.mxu0 %vm4972_vm0, %v4971_v0  ;;  %4674 = vmatprep.mubr.msk.bf16.mxu1 %vm4972_vm0, %v4971_v0 }
 0x175   :  { %v1014_v25 = vpop.f32.mrb[64].mxu0  ;;  %4700 = vmatprep.subr.bf16.mxu0 %v4971_v0  ;;  %v1194_v62 = vpop.f32.mrb[64].mxu1  ;;  %4744 = vmatprep.subr.bf16.mxu1 %v4971_v0 }
 0x176   :  { %v1056_v9 = vadd.f32 %v1014_v25, %v6102_v50  ;;  %v4284_v44 = vpop.f32.mrb[65].mxu0  ;;  %v4328_v29 = vpop.f32.mrb[65].mxu1  ;;  %v2822_v50 = vsel %vm1737_vm5, %v2819_v53, %v2821_v45  ;;  %v2823_v53 = vrot.slane %v6092_v15, 3 }
 0x177   :  { %v1017_v16 = vpop.f32.mrb[66].mxu0  ;;  %4701 = vmatpush3.bf16.msra.mxu0 %v4948_v54  ;;  %v1197_v41 = vpop.f32.mrb[66].mxu1  ;;  %4745 = vmatpush3.bf16.msra.mxu1 %v4949_v18  ;;  %v4953_v54 = vld [vmem:[%s6746_s1 + $0x3d8] sm:$0xff]   ;;  %v2624_v29 = vrot.slane %v6204_v3, 2 }
 0x178   :  { %v6334_v48 = vadd.f32 %v1194_v62, %v1056_v9  ;;  %v1057_v20 = vadd.f32 %v1017_v16, %v6129_v22  ;;  %v4285_v55 = vpop.f32.mrb[67].mxu0  ;;  %4702 = vmatprep.subr.bf16.mxu0 %v4971_v0  ;;  %v4329_v59 = vpop.f32.mrb[67].mxu1  ;;  %4746 = vmatprep.subr.bf16.mxu1 %v4971_v0  ;;  %v2622_v22 = vor.u32 %v2621_v28, %v2620_v49  ;;  %v2625_v16 = vrot.slane %v6165_v24, 3 }
 0x179   :  { %v2579_v59 = vld [vmem:[%s6747_s0 + $0x3c] sm:$0x7] }
 0x17a   :  { %v6346_v26 = vadd.f32 %v1197_v41, %v1057_v20  ;;  %4631 = vmatmul.mubr.bf16.gmra.mrb[172].mxu0 %v2619_v31  ;;  %4675 = vmatmul.mubr.bf16.gmra.mrb[172].mxu1 %v2822_v50  ;;  %v2623_v44 = vsel %vm2603_vm6, %v2618_v19, %v2622_v22  ;;  %v4954_v41 = vld [vmem:[%s6746_s1 + $0x3a0] sm:$0xff]  }
 0x17b   :  { %4634 = vmatprep.mubr.msk.bf16.mxu0 %vm4972_vm0, %v4971_v0  ;;  %4678 = vmatprep.mubr.msk.bf16.mxu1 %vm4972_vm0, %v4971_v0  ;;  %v4955_v19 = vld [vmem:[%s6746_s1 + $0x3e0] sm:$0xff]  }
 0x17c   :  { %4703 = vmatpush3.bf16.msra.mxu0 %v4950_v51  ;;  %4747 = vmatpush3.bf16.msra.mxu1 %v4951_v14  ;;  %v4956_v51 = vld [vmem:[%s6746_s1 + $0x3a8] sm:$0xff]  }
 0x17d   :  { %v1022_v11 = vpop.f32.mrb[68].mxu0  ;;  %4704 = vmatprep.subr.bf16.mxu0 %v4971_v0  ;;  %v1202_v25 = vpop.f32.mrb[68].mxu1  ;;  %4748 = vmatprep.subr.bf16.mxu1 %v4971_v0 }
 0x17e   :  { %v1058_v18 = vadd.f32 %v1022_v11, %v6160_v30  ;;  %v4288_v9 = vpop.f32.mrb[69].mxu0  ;;  %v4332_v62 = vpop.f32.mrb[69].mxu1  ;;  %v2824_v30 = vsel %vm1737_vm5, %v2821_v45, %v2823_v53  ;;  %v2825_v45 = vrot.slane %v6142_v47, 3 }
 0x17f   :  { %v1025_v15 = vpop.f32.mrb[70].mxu0  ;;  %v1205_v28 = vpop.f32.mrb[70].mxu1  ;;  %v2628_v62 = vrot.slane %v6254_v38, 2 }
 0x180   :  { %v6365_v31 = vadd.f32 %v1202_v25, %v1058_v18  ;;  %v1059_v49 = vadd.f32 %v1025_v15, %v6179_v10  ;;  %v4289_v20 = vpop.f32.mrb[71].mxu0  ;;  %4705 = vmatpush3.bf16.msra.mxu0 %v4952_v7  ;;  %v4333_v55 = vpop.f32.mrb[71].mxu1  ;;  %4749 = vmatpush3.bf16.msra.mxu1 %v4953_v54  ;;  %v2626_v10 = vor.u32 %v2625_v16, %v2624_v29  ;;  %v4957_v7 = vld [vmem:[%s6746_s1 + $0x3e8] sm:$0xff]   ;;  %v2629_v15 = vrot.slane %v6207_v40, 3 }
 0x181   :  { %4706 = vmatprep.subr.bf16.mxu0 %v4971_v0  ;;  %4750 = vmatprep.subr.bf16.mxu1 %v4971_v0 }
 0x182   :  { %v6376_v50 = vadd.f32 %v1205_v28, %v1059_v49  ;;  %4635 = vmatmul.mubr.bf16.gmra.mrb[176].mxu0 %v2623_v44  ;;  %4679 = vmatmul.mubr.bf16.gmra.mrb[176].mxu1 %v2824_v30  ;;  %v2627_v9 = vsel %vm2603_vm6, %v2622_v22, %v2626_v10  ;;  %v6400_v44 = vcombine.low %v6219_v17, %v2579_v59  ;;  %v4959_v22 = vld [vmem:[%s6746_s1 + $0x3b0] sm:$0xff]  }
 0x183   :  { %4638 = vmatprep.mubr.msk.bf16.mxu0 %vm4972_vm0, %v4971_v0  ;;  %4682 = vmatprep.mubr.msk.bf16.mxu1 %vm4972_vm0, %v4971_v0  ;;  %v2826_v28 = vsel %vm1737_vm5, %v2823_v53, %v2825_v45  ;;  %v4960_v30 = vld [vmem:[%s6746_s1 + $0x3f0] sm:$0xff]  }
 0x184   :  { %4707 = vmatpush3.bf16.msra.mxu0 %v4954_v41  ;;  %4751 = vmatpush3.bf16.msra.mxu1 %v4955_v19  ;;  %v2633_v53 = vshrl.u32 %v6400_v44, 16  ;;  %v2636_v55 = vshll.u32 %v6400_v44, 16  ;;  %v2827_v19 = vrot.slane %v6186_v1, 3 }
 0x185   :  { %v1030_v14 = vpop.f32.mrb[72].mxu0  ;;  %4708 = vmatprep.subr.bf16.mxu0 %v4971_v0  ;;  %v1210_v47 = vpop.f32.mrb[72].mxu1  ;;  %4752 = vmatprep.subr.bf16.mxu1 %v4971_v0 }
 0x186   :  { %v1060_v11 = vadd.f32 %v1030_v14, %v6209_v34  ;;  %v4292_v54 = vpop.f32.mrb[73].mxu0  ;;  %v4336_v18 = vpop.f32.mrb[73].mxu1  ;;  %v4962_v14 = vld [vmem:[%s6746_s1 + $0x3f8] sm:$0xff]  }
 0x187   :  { %v1033_v25 = vpop.f32.mrb[74].mxu0  ;;  %v1213_v34 = vpop.f32.mrb[74].mxu1 }
 0x188   :  { %v6402_v29 = vadd.f32 %v1210_v47, %v1060_v11  ;;  %v1061_v16 = vadd.f32 %v1033_v25, %v6228_v6  ;;  %v4293_v49 = vpop.f32.mrb[75].mxu0  ;;  %4709 = vmatpush3.bf16.msra.mxu0 %v4956_v51  ;;  %v4337_v20 = vpop.f32.mrb[75].mxu1  ;;  %4753 = vmatpush3.bf16.msra.mxu1 %v4957_v7  ;;  %v2630_v6 = vor.u32 %v2629_v15, %v2628_v62  ;;  %v4961_v51 = vld [vmem:[%s6746_s1 + $0x3b8] sm:$0xff]   ;;  %v2635_v25 = vrot.slane %v2633_v53, 2 }
 0x189   :  { %4710 = vmatprep.subr.bf16.mxu0 %v4971_v0  ;;  %4754 = vmatprep.subr.bf16.mxu1 %v4971_v0  ;;  %v2828_v49 = vsel %vm1737_vm5, %v2825_v45, %v2827_v19 }
 0x18a   :  { %v6413_v41 = vadd.f32 %v1213_v34, %v1061_v16  ;;  %4639 = vmatmul.mubr.bf16.gmra.mrb[180].mxu0 %v2627_v9  ;;  %4683 = vmatmul.mubr.bf16.gmra.mrb[180].mxu1 %v2826_v28  ;;  %v2631_v18 = vsel %vm2603_vm6, %v2626_v10, %v2630_v6  ;;  %v2638_v9 = vrot.slane %v2636_v55, 3 }
 0x18b   :  { %4642 = vmatprep.mubr.msk.bf16.mxu0 %vm4972_vm0, %v4971_v0  ;;  %4686 = vmatprep.mubr.msk.bf16.mxu1 %vm4972_vm0, %v4971_v0 }
 0x18c   :  { %4711 = vmatpush3.bf16.msra.mxu0 %v4959_v22  ;;  %4755 = vmatpush3.bf16.msra.mxu1 %v4960_v30  ;;  %v2639_v10 = vor.u32 %v2638_v9, %v2635_v25 }
 0x18d   :  { %v1038_v59 = vpop.f32.mrb[76].mxu0  ;;  %4712 = vmatprep.subr.bf16.mxu0 %v4971_v0  ;;  %v1218_v11 = vpop.f32.mrb[76].mxu1  ;;  %4756 = vmatprep.subr.bf16.mxu1 %v4971_v0 }
 0x18e   :  { %v1062_v7 = vadd.f32 %v1038_v59, %v6250_v42  ;;  %v4296_v47 = vpop.f32.mrb[77].mxu0  ;;  %v4340_v1 = vpop.f32.mrb[77].mxu1 }
 0x18f   :  { %v1041_v54 = vpop.f32.mrb[78].mxu0  ;;  %v1221_v16 = vpop.f32.mrb[78].mxu1 }
 0x190   :  { %v6433_v62 = vadd.f32 %v1218_v11, %v1062_v7  ;;  %v1063_v15 = vadd.f32 %v1041_v54, %v6257_v52  ;;  %v4297_v34 = vpop.f32.mrb[79].mxu0  ;;  %4713 = vmatpush3.bf16.msra.mxu0 %v4961_v51  ;;  %v4341_v42 = vpop.f32.mrb[79].mxu1  ;;  %4757 = vmatpush3.bf16.msra.mxu1 %v4962_v14  ;;  %v2829_v52 = vrot.slane %v6400_v44, 3  ;;  %v2640_v51 = vsel %vm2603_vm6, %v2630_v6, %v2639_v10 }
 0x191   :  { %v3012_v44 = vshll.u32 %v6291_v5, 16  ;;  %v3017_v34 = vrot.slane %v6023_v33, 4 }
 0x192   :  { %v6437_v28 = vadd.f32 %v1221_v16, %v1063_v15  ;;  %4643 = vmatmul.mubr.bf16.gmra.mrb[184].mxu0 %v2631_v18  ;;  %4687 = vmatmul.mubr.bf16.gmra.mrb[184].mxu1 %v2828_v49  ;;  %v2830_v11 = vsel %vm1737_vm5, %v2827_v19, %v2829_v52  ;;  %v3016_v16 = vrot.slane %v6056_v61, 3 }
 0x193   :  { %4646 = vmatprep.mubr.msk.bf16.mxu0 %vm4972_vm0, %v4971_v0  ;;  %4690 = vmatprep.mubr.msk.bf16.mxu1 %vm4972_vm0, %v4971_v0  ;;  %v3014_v15 = vrot.slane %v3012_v44, 4 }
 0x195   :  { %v1046_v22 = vpop.f32.mrb[80].mxu0  ;;  %v1226_v45 = vpop.f32.mrb[80].mxu1 }
 0x196   :  { %v1064_v20 = vadd.f32 %v1046_v22, %v6272_v36  ;;  %v4300_v30 = vpop.f32.mrb[81].mxu0  ;;  %v4344_v53 = vpop.f32.mrb[81].mxu1  ;;  %v3009_v36 = vshrl.u32 %v6291_v5, 16 }
 0x197   :  { %v1049_v55 = vpop.f32.mrb[82].mxu0  ;;  %v1229_v14 = vpop.f32.mrb[82].mxu1  ;;  %v3018_v30 = vor.u32 %v3017_v34, %v3016_v16 }
 0x198   :  { %v6446_v59 = vadd.f32 %v1226_v45, %v1064_v20  ;;  %v4301_v7 = vpop.f32.mrb[83].mxu0  ;;  %v4345_v47 = vpop.f32.mrb[83].mxu1  ;;  %v3011_v9 = vrot.slane %v3009_v36, 3 }
 0x199   :  { %v3021_v7 = vrot.slane %v6059_v13, 4 }
 0x19a   :  { %4647 = vmatmul.mubr.bf16.gmra.mrb[188].mxu0 %v2640_v51  ;;  %4691 = vmatmul.mubr.bf16.gmra.mrb[188].mxu1 %v2830_v11 }
 0x19b   :  { %4650 = vmatprep.mubr.msk.bf16.mxu0 %vm4972_vm0, %v4971_v0  ;;  %4694 = vmatprep.mubr.msk.bf16.mxu1 %vm4972_vm0, %v4971_v0 }
 0x19d   :  { %v1455_v6 = vpop.f32.mrb[84].mxu0  ;;  %v1645_v54 = vpop.f32.mrb[84].mxu1 }
 0x19e   :  { %v1509_v1 = vadd.f32 %v1455_v6, %v6287_v60  ;;  %v4364_v18 = vpop.f32.mrb[85].mxu0  ;;  %v4408_v25 = vpop.f32.mrb[85].mxu1  ;;  %v3015_v60 = vor.u32 %v3014_v15, %v3011_v9  ;;  %v3025_v9 = vrot.slane %v6113_v57, 4 }
 0x19f   :  { %v1458_v19 = vpop.f32.mrb[86].mxu0  ;;  %v1648_v42 = vpop.f32.mrb[86].mxu1  ;;  %v3827_v25 = vcombine.low %v6011_v23, %v6031_v4 }
 0x1a0   :  { %v6458_v49 = vadd.f32 %v1645_v54, %v1509_v1  ;;  %v1510_v5 = vadd.f32 %v1458_v19, %v6293_v56  ;;  %v4365_v22 = vpop.f32.mrb[87].mxu0  ;;  %v4409_v20 = vpop.f32.mrb[87].mxu1  ;;  %v3019_v14 = vsel %vm871_vm2, %v3015_v60, %v3018_v30  ;;  %v3024_v19 = vrot.slane %v6153_v63, 3 }
 0x1a2   :  { %v6461_v45 = vadd.f32 %v1648_v42, %v1510_v5  ;;  %4651 = vmatmul.mubr.bf16.gmra.mrb[192].mxu0 %v2639_v10  ;;  %4695 = vmatmul.mubr.bf16.gmra.mrb[192].mxu1 %v2829_v52  ;;  %v3826_v10 = vcombine.low %v5996_v32, %v6006_v27  ;;  %v3020_v52 = vrot.slane %v6110_v43, 3  ;;  %v3026_v22 = vor.u32 %v3025_v9, %v3024_v19 }
 0x1a3   :  { %4714 = vmatprep.mubr.msk.bf16.mxu0 %vm4972_vm0, %v4971_v0  ;;  %4758 = vmatprep.mubr.msk.bf16.mxu1 %vm4972_vm0, %v4971_v0 }
 0x1a4   :  { %v3022_v1 = vor.u32 %v3021_v7, %v3020_v52  ;;  %v3829_v52 = vcombine.low %v6076_v2, %v6122_v39 }
 0x1a5   :  { %v1463_v33 = vpop.f32.mrb[88].mxu0  ;;  %v1653_v53 = vpop.f32.mrb[88].mxu1 }
 0x1a6   :  { %v1511_v61 = vadd.f32 %v1463_v33, %v6308_v35  ;;  %v4368_v56 = vpop.f32.mrb[89].mxu0  ;;  %v4412_v55 = vpop.f32.mrb[89].mxu1  ;;  %v3023_v18 = vsel %vm871_vm2, %v3018_v30, %v3022_v1  ;;  %v3027_v60 = vsel %vm871_vm2, %v3022_v1, %v3026_v22  ;;  %v3828_v30 = vcombine.low %v6036_v12, %v6071_v8  ;;  %v6515_v12 = vld [vmem:[%s6747_s0 + $0x3c] sm:$0xf] }
 0x1a7   :  { %v1466_v51 = vpop.f32.mrb[90].mxu0  ;;  %v1656_v36 = vpop.f32.mrb[90].mxu1  ;;  %v3028_v33 = vrot.slane %v6204_v3, 3  ;;  %v3801_v1 = vcombine.low %v6219_v17, %v6515_v12 }
 0x1a8   :  { %v6473_v11 = vadd.f32 %v1653_v53, %v1511_v61  ;;  %v1512_v47 = vadd.f32 %v1466_v51, %v6315_v37  ;;  %v4369_v44 = vpop.f32.mrb[91].mxu0  ;;  %v4413_v35 = vpop.f32.mrb[91].mxu1  ;;  %v3029_v61 = vrot.slane %v6165_v24, 4 }
 0x1a9   :  { %v3032_v44 = vrot.slane %v6254_v38, 3  ;;  %v3033_v35 = vrot.slane %v6207_v40, 4  ;;  %v3037_v39 = vshrl.u32 %v3801_v1, 16  ;;  %v3040_v40 = vshll.u32 %v3801_v1, 16 }
 0x1aa   :  { %v6476_v6 = vadd.f32 %v1656_v36, %v1512_v47  ;;  %4715 = vmatmul.mubr.bf16.vlgmr.msra.gmra.mrb[196].mxu0 %v3019_v14  ;;  %4759 = vmatmul.mubr.bf16.vlgmr.msra.gmra.mrb[196].mxu1 %v3826_v10  ;;  %v3030_v10 = vor.u32 %v3029_v61, %v3028_v33  ;;  %v3831_v33 = vcombine.low %v6173_v46, %v6219_v17 }
 0x1ab   :  { %4718 = vmatprep.mubr.msk.bf16.mxu0 %vm4972_vm0, %v4971_v0  ;;  %4762 = vmatprep.mubr.msk.bf16.mxu1 %vm4972_vm0, %v4971_v0  ;;  %v3034_v2 = vor.u32 %v3033_v35, %v3032_v44  ;;  %v3832_v17 = vcombine.low %v6515_v12, %v6515_v12 }
 0x1ac   :  { %v3031_v36 = vsel %vm871_vm2, %v3026_v22, %v3030_v10 }
 0x1ad   :  { %v1471_v32 = vpop.f32.mrb[92].mxu0  ;;  %v1661_v13 = vpop.f32.mrb[92].mxu1  ;;  %v3035_v9 = vsel %vm871_vm2, %v3030_v10, %v3034_v2 }
 0x1ae   :  { %v1513_v27 = vadd.f32 %v1471_v32, %v6334_v48  ;;  %v4372_v43 = vpop.f32.mrb[93].mxu0  ;;  %v4416_v37 = vpop.f32.mrb[93].mxu1 }
 0x1af   :  { %v1474_v54 = vpop.f32.mrb[94].mxu0  ;;  %v1664_v34 = vpop.f32.mrb[94].mxu1 }
 0x1b0   :  { %v6488_v15 = vadd.f32 %v1661_v13, %v1513_v27  ;;  %v1514_v16 = vadd.f32 %v1474_v54, %v6346_v26  ;;  %v4373_v5 = vpop.f32.mrb[95].mxu0  ;;  %v4417_v48 = vpop.f32.mrb[95].mxu1 }
 0x1b1   :  { %v3042_v5 = vrot.slane %v3040_v40, 4 }
 0x1b2   :  { %v6491_v42 = vadd.f32 %v1664_v34, %v1514_v16  ;;  %4719 = vmatmul.mubr.bf16.gmra.mrb[200].mxu0 %v3023_v18  ;;  %4763 = vmatmul.mubr.bf16.gmra.mrb[200].mxu1 %v3827_v25  ;;  %v3830_v16 = vcombine.low %v6127_v58, %v6158_v21  ;;  %v3039_v34 = vrot.slane %v3037_v39, 3 }
 0x1b3   :  { %4722 = vmatprep.mubr.msk.bf16.mxu0 %vm4972_vm0, %v4971_v0  ;;  %4766 = vmatprep.mubr.msk.bf16.mxu1 %vm4972_vm0, %v4971_v0 }
 0x1b5   :  { %v1479_v23 = vpop.f32.mrb[96].mxu0  ;;  %v1669_v57 = vpop.f32.mrb[96].mxu1 }
 0x1b6   :  { %v1515_v4 = vadd.f32 %v1479_v23, %v6365_v31  ;;  %v4376_v63 = vpop.f32.mrb[97].mxu0  ;;  %v4420_v26 = vpop.f32.mrb[97].mxu1 }
 0x1b7   :  { %v1482_v20 = vpop.f32.mrb[98].mxu0  ;;  %v1672_v55 = vpop.f32.mrb[98].mxu1 }
 0x1b8   :  { %v6503_v53 = vadd.f32 %v1669_v57, %v1515_v4  ;;  %v1516_v56 = vadd.f32 %v1482_v20, %v6376_v50  ;;  %v4377_v51 = vpop.f32.mrb[99].mxu0  ;;  %v4421_v31 = vpop.f32.mrb[99].mxu1 }
 0x1ba   :  { %v6506_v14 = vadd.f32 %v1672_v55, %v1516_v56  ;;  %4723 = vmatmul.mubr.bf16.gmra.mrb[204].mxu0 %v3027_v60  ;;  %4767 = vmatmul.mubr.bf16.gmra.mrb[204].mxu1 %v3828_v30 }
 0x1bb   :  { %4726 = vmatprep.mubr.msk.bf16.mxu0 %vm4972_vm0, %v4971_v0  ;;  %4770 = vmatprep.mubr.msk.bf16.mxu1 %vm4972_vm0, %v4971_v0 }
 0x1bd   :  { %v1487_v8 = vpop.f32.mrb[100].mxu0  ;;  %v1677_v3 = vpop.f32.mrb[100].mxu1 }
 0x1be   :  { %v1517_v24 = vadd.f32 %v1487_v8, %v6402_v29  ;;  %v4380_v50 = vpop.f32.mrb[101].mxu0  ;;  %v4424_v7 = vpop.f32.mrb[101].mxu1 }
 0x1bf   :  { %v1490_v47 = vpop.f32.mrb[102].mxu0  ;;  %v1680_v27 = vpop.f32.mrb[102].mxu1 }
 0x1c0   :  { %v6525_v32 = vadd.f32 %v1677_v3, %v1517_v24  ;;  %v1518_v29 = vadd.f32 %v1490_v47, %v6413_v41  ;;  %v4381_v13 = vpop.f32.mrb[103].mxu0  ;;  %v4425_v43 = vpop.f32.mrb[103].mxu1 }
 0x1c2   :  { %v6528_v37 = vadd.f32 %v1680_v27, %v1518_v29  ;;  %4727 = vmatmul.mubr.bf16.gmra.mrb[208].mxu0 %v3031_v36  ;;  %4771 = vmatmul.mubr.bf16.gmra.mrb[208].mxu1 %v3829_v52 }
 0x1c3   :  { %4730 = vmatprep.mubr.msk.bf16.mxu0 %vm4972_vm0, %v4971_v0  ;;  %4774 = vmatprep.mubr.msk.bf16.mxu1 %vm4972_vm0, %v4971_v0 }
 0x1c5   :  { %v1495_v38 = vpop.f32.mrb[104].mxu0  ;;  %v1685_v41 = vpop.f32.mrb[104].mxu1 }
 0x1c6   :  { %v1519_v54 = vadd.f32 %v1495_v38, %v6433_v62  ;;  %v4384_v18 = vpop.f32.mrb[105].mxu0  ;;  %v4428_v25 = vpop.f32.mrb[105].mxu1  ;;  %v3043_v62 = vor.u32 %v3042_v5, %v3039_v34 }
 0x1c7   :  { %v1498_v19 = vpop.f32.mrb[106].mxu0  ;;  %v1688_v23 = vpop.f32.mrb[106].mxu1 }
 0x1c8   :  { %v6538_v48 = vadd.f32 %v1685_v41, %v1519_v54  ;;  %v1520_v22 = vadd.f32 %v1498_v19, %v6437_v28  ;;  %v4385_v4 = vpop.f32.mrb[107].mxu0  ;;  %v4429_v57 = vpop.f32.mrb[107].mxu1  ;;  %v3044_v30 = vsel %vm871_vm2, %v3034_v2, %v3043_v62 }
 0x1ca   :  { %v6541_v63 = vadd.f32 %v1688_v23, %v1520_v22  ;;  %4731 = vmatmul.mubr.bf16.gmra.mrb[212].mxu0 %v3035_v9  ;;  %4775 = vmatmul.mubr.bf16.gmra.mrb[212].mxu1 %v3830_v16 }
 0x1cb   :  { %4734 = vmatprep.mubr.msk.bf16.mxu0 %vm4972_vm0, %v4971_v0  ;;  %4778 = vmatprep.mubr.msk.bf16.mxu1 %vm4972_vm0, %v4971_v0 }
 0x1cd   :  { %v1503_v58 = vpop.f32.mrb[108].mxu0  ;;  %v1693_v26 = vpop.f32.mrb[108].mxu1 }
 0x1ce   :  { %v1521_v21 = vadd.f32 %v1503_v58, %v6446_v59  ;;  %v4388_v20 = vpop.f32.mrb[109].mxu0  ;;  %v4432_v28 = vpop.f32.mrb[109].mxu1 }
 0x1cf   :  { %v1506_v60 = vpop.f32.mrb[110].mxu0  ;;  %v1696_v56 = vpop.f32.mrb[110].mxu1 }
 0x1d0   :  { %v6551_v61 = vadd.f32 %v1693_v26, %v1521_v21  ;;  %v4389_v55 = vpop.f32.mrb[111].mxu0  ;;  %v4433_v51 = vpop.f32.mrb[111].mxu1 }
 0x1d2   :  { %4735 = vmatmul.mubr.bf16.gmra.mrb[216].mxu0 %v3044_v30  ;;  %4779 = vmatmul.mubr.bf16.gmra.mrb[216].mxu1 %v3831_v33 }
 0x1d3   :  { %4738 = vmatprep.mubr.msk.bf16.mxu0 %vm4972_vm0, %v4971_v0  ;;  %4782 = vmatprep.mubr.msk.bf16.mxu1 %vm4972_vm0, %v4971_v0 }
 0x1d5   :  { %v1840_v59 = vpop.f32.mrb[112].mxu0  ;;  %v2054_v10 = vpop.f32.mrb[112].mxu1 }
 0x1d6   :  { %v1894_v31 = vadd.f32 %v1840_v59, %v6458_v49  ;;  %v4452_v8 = vpop.f32.mrb[113].mxu0  ;;  %v4496_v24 = vpop.f32.mrb[113].mxu1 }
 0x1d7   :  { %v1843_v46 = vpop.f32.mrb[114].mxu0  ;;  %v2057_v52 = vpop.f32.mrb[114].mxu1 }
 0x1d8   :  { %v6560_v3 = vadd.f32 %v2054_v10, %v1894_v31  ;;  %v1895_v50 = vadd.f32 %v1843_v46, %v6461_v45  ;;  %v4453_v7 = vpop.f32.mrb[115].mxu0  ;;  %v4497_v47 = vpop.f32.mrb[115].mxu1 }
 0x1da   :  { %v6563_v36 = vadd.f32 %v2057_v52, %v1895_v50  ;;  %4739 = vmatmul.mubr.bf16.gmra.mrb[220].mxu0 %v3043_v62  ;;  %4783 = vmatmul.mubr.bf16.gmra.mrb[220].mxu1 %v3832_v17 }
 0x1dd   :  { %v1848_v0 = vpop.f32.mrb[116].mxu0  ;;  %v2062_v44 = vpop.f32.mrb[116].mxu1 }
 0x1de   :  { %v1896_v49 = vadd.f32 %v1848_v0, %v6473_v11  ;;  %v4456_v35 = vpop.f32.mrb[117].mxu0  ;;  %v4500_v1 = vpop.f32.mrb[117].mxu1 }
 0x1df   :  { %v1851_v29 = vpop.f32.mrb[118].mxu0  ;;  %v2065_v13 = vpop.f32.mrb[118].mxu1 }
 0x1e0   :  { %v6566_v27 = vadd.f32 %v2062_v44, %v1896_v49  ;;  %v1897_v12 = vadd.f32 %v1851_v29, %v6476_v6  ;;  %v4457_v45 = vpop.f32.mrb[119].mxu0  ;;  %v4501_v43 = vpop.f32.mrb[119].mxu1 }
 0x1e2   :  { %v6569_v2 = vadd.f32 %v2065_v13, %v1897_v12 }
 0x1e5   :  { %v1856_v39 = vpop.f32.mrb[120].mxu0  ;;  %v2070_v38 = vpop.f32.mrb[120].mxu1 }
 0x1e6   :  { %v1898_v40 = vadd.f32 %v1856_v39, %v6488_v15  ;;  %v4460_v54 = vpop.f32.mrb[121].mxu0  ;;  %v4504_v41 = vpop.f32.mrb[121].mxu1 }
 0x1e7   :  { %v1859_v11 = vpop.f32.mrb[122].mxu0  ;;  %v2073_v19 = vpop.f32.mrb[122].mxu1 }
 0x1e8   :  { %v6572_v18 = vadd.f32 %v2070_v38, %v1898_v40  ;;  %v1899_v25 = vadd.f32 %v1859_v11, %v6491_v42  ;;  %v4461_v9 = vpop.f32.mrb[123].mxu0  ;;  %v4505_v16 = vpop.f32.mrb[123].mxu1 }
 0x1ea   :  { %v6575_v6 = vadd.f32 %v2073_v19, %v1899_v25 }
 0x1ed   :  { %v1864_v34 = vpop.f32.mrb[124].mxu0  ;;  %v2078_v22 = vpop.f32.mrb[124].mxu1 }
 0x1ee   :  { %v1900_v5 = vadd.f32 %v1864_v34, %v6503_v53  ;;  %v4464_v23 = vpop.f32.mrb[125].mxu0  ;;  %v4508_v4 = vpop.f32.mrb[125].mxu1 }
 0x1ef   :  { %v1867_v15 = vpop.f32.mrb[126].mxu0  ;;  %v2081_v58 = vpop.f32.mrb[126].mxu1 }
 0x1f0   :  { %v6578_v57 = vadd.f32 %v2078_v22, %v1900_v5  ;;  %v1901_v62 = vadd.f32 %v1867_v15, %v6506_v14  ;;  %v4465_v21 = vpop.f32.mrb[127].mxu0  ;;  %v4509_v26 = vpop.f32.mrb[127].mxu1 }
 0x1f2   :  { %v6581_v42 = vadd.f32 %v2081_v58, %v1901_v62 }
 0x1f5   :  { %v1872_v20 = vpop.f32.mrb[128].mxu0  ;;  %v2086_v60 = vpop.f32.mrb[128].mxu1 }
 0x1f6   :  { %v1902_v28 = vadd.f32 %v1872_v20, %v6525_v32  ;;  %v4468_v30 = vpop.f32.mrb[129].mxu0  ;;  %v4512_v33 = vpop.f32.mrb[129].mxu1 }
 0x1f7   :  { %v1875_v53 = vpop.f32.mrb[130].mxu0  ;;  %v2089_v51 = vpop.f32.mrb[130].mxu1 }
 0x1f8   :  { %v6584_v56 = vadd.f32 %v2086_v60, %v1902_v28  ;;  %v1903_v55 = vadd.f32 %v1875_v53, %v6528_v37  ;;  %v4469_v59 = vpop.f32.mrb[131].mxu0  ;;  %v4513_v31 = vpop.f32.mrb[131].mxu1 }
 0x1fa   :  { %v6587_v14 = vadd.f32 %v2089_v51, %v1903_v55 }
 0x1fd   :  { %v1880_v10 = vpop.f32.mrb[132].mxu0  ;;  %v2094_v24 = vpop.f32.mrb[132].mxu1 }
 0x1fe   :  { %v1904_v8 = vadd.f32 %v1880_v10, %v6538_v48  ;;  %v4472_v46 = vpop.f32.mrb[133].mxu0  ;;  %v4516_v17 = vpop.f32.mrb[133].mxu1 }
 0x1ff   :  { %v1883_v32 = vpop.f32.mrb[134].mxu0  ;;  %v2097_v7 = vpop.f32.mrb[134].mxu1 }
 0x200   :  { %v6590_v50 = vadd.f32 %v2094_v24, %v1904_v8  ;;  %v1905_v52 = vadd.f32 %v1883_v32, %v6541_v63  ;;  %v4473_v47 = vpop.f32.mrb[135].mxu0  ;;  %v4517_v0 = vpop.f32.mrb[135].mxu1 }
 0x202   :  { %v6593_v37 = vadd.f32 %v2097_v7, %v1905_v52 }
 0x205   :  { %v1888_v49 = vpop.f32.mrb[136].mxu0  ;;  %v2102_v35 = vpop.f32.mrb[136].mxu1 }
 0x206   :  { %v1906_v44 = vadd.f32 %v1888_v49, %v6551_v61  ;;  %v4476_v1 = vpop.f32.mrb[137].mxu0  ;;  %v4520_v29 = vpop.f32.mrb[137].mxu1 }
 0x207   :  { %v1891_v48 = vpop.f32.mrb[138].mxu0  ;;  %v2105_v13 = vpop.f32.mrb[138].mxu1 }
 0x208   :  { %v6596_v12 = vadd.f32 %v2102_v35, %v1906_v44  ;;  %v4477_v45 = vpop.f32.mrb[139].mxu0  ;;  %v4521_v43 = vpop.f32.mrb[139].mxu1 }
 0x20d   :  { %v2234_v39 = vpop.f32.mrb[140].mxu0  ;;  %v2511_v40 = vpop.f32.mrb[140].mxu1 }
 0x20e   :  { %v2288_v63 = vadd.f32 %v2234_v39, %v6560_v3  ;;  %v4540_v38 = vpop.f32.mrb[141].mxu0  ;;  %v4584_v54 = vpop.f32.mrb[141].mxu1 }
 0x20f   :  { %v2237_v41 = vpop.f32.mrb[142].mxu0  ;;  %v2514_v25 = vpop.f32.mrb[142].mxu1 }
 0x210   :  { %v6599_v11 = vadd.f32 %v2511_v40, %v2288_v63  ;;  %v2289_v61 = vadd.f32 %v2237_v41, %v6563_v36  ;;  %v4541_v19 = vpop.f32.mrb[143].mxu0  ;;  %v4585_v9 = vpop.f32.mrb[143].mxu1 }
 0x212   :  { %v6602_v16 = vadd.f32 %v2514_v25, %v2289_v61 }
 0x215   :  { %v2242_v34 = vpop.f32.mrb[144].mxu0  ;;  %v2519_v22 = vpop.f32.mrb[144].mxu1 }
 0x216   :  { %v2290_v5 = vadd.f32 %v2242_v34, %v6566_v27  ;;  %v4544_v23 = vpop.f32.mrb[145].mxu0  ;;  %v4588_v4 = vpop.f32.mrb[145].mxu1 }
 0x217   :  { %v2245_v3 = vpop.f32.mrb[146].mxu0  ;;  %v2522_v58 = vpop.f32.mrb[146].mxu1 }
 0x218   :  { %v6605_v15 = vadd.f32 %v2519_v22, %v2290_v5  ;;  %v2291_v62 = vadd.f32 %v2245_v3, %v6569_v2  ;;  %v4545_v21 = vpop.f32.mrb[147].mxu0  ;;  %v4589_v26 = vpop.f32.mrb[147].mxu1 }
 0x21a   :  { %v6608_v36 = vadd.f32 %v2522_v58, %v2291_v62 }
 0x21d   :  { %v2250_v20 = vpop.f32.mrb[148].mxu0  ;;  %v2527_v60 = vpop.f32.mrb[148].mxu1 }
 0x21e   :  { %v2292_v28 = vadd.f32 %v2250_v20, %v6572_v18  ;;  %v4548_v30 = vpop.f32.mrb[149].mxu0  ;;  %v4592_v33 = vpop.f32.mrb[149].mxu1 }
 0x21f   :  { %v2253_v27 = vpop.f32.mrb[150].mxu0  ;;  %v2530_v51 = vpop.f32.mrb[150].mxu1 }
 0x220   :  { %v6611_v53 = vadd.f32 %v2527_v60, %v2292_v28  ;;  %v2293_v55 = vadd.f32 %v2253_v27, %v6575_v6  ;;  %v4549_v59 = vpop.f32.mrb[151].mxu0  ;;  %v4593_v31 = vpop.f32.mrb[151].mxu1 }
 0x222   :  { %v6614_v2 = vadd.f32 %v2530_v51, %v2293_v55 }
 0x225   :  { %v2258_v10 = vpop.f32.mrb[152].mxu0  ;;  %v2535_v24 = vpop.f32.mrb[152].mxu1 }
 0x226   :  { %v2294_v8 = vadd.f32 %v2258_v10, %v6578_v57  ;;  %v4552_v46 = vpop.f32.mrb[153].mxu0  ;;  %v4596_v17 = vpop.f32.mrb[153].mxu1 }
 0x227   :  { %v2261_v18 = vpop.f32.mrb[154].mxu0  ;;  %v2538_v7 = vpop.f32.mrb[154].mxu1 }
 0x228   :  { %v6617_v32 = vadd.f32 %v2535_v24, %v2294_v8  ;;  %v2295_v52 = vadd.f32 %v2261_v18, %v6581_v42  ;;  %v4553_v47 = vpop.f32.mrb[155].mxu0  ;;  %v4597_v0 = vpop.f32.mrb[155].mxu1 }
 0x22a   :  { %v6620_v6 = vadd.f32 %v2538_v7, %v2295_v52 }
 0x22d   :  { %v2266_v49 = vpop.f32.mrb[156].mxu0  ;;  %v2543_v35 = vpop.f32.mrb[156].mxu1 }
 0x22e   :  { %v2296_v44 = vadd.f32 %v2266_v49, %v6584_v56  ;;  %v4556_v1 = vpop.f32.mrb[157].mxu0  ;;  %v4600_v29 = vpop.f32.mrb[157].mxu1 }
 0x22f   :  { %v2269_v57 = vpop.f32.mrb[158].mxu0  ;;  %v2546_v45 = vpop.f32.mrb[158].mxu1 }
 0x230   :  { %v6623_v48 = vadd.f32 %v2543_v35, %v2296_v44  ;;  %v2297_v13 = vadd.f32 %v2269_v57, %v6587_v14  ;;  %v4557_v43 = vpop.f32.mrb[159].mxu0  ;;  %v4601_v39 = vpop.f32.mrb[159].mxu1 }
 0x232   :  { %v6626_v42 = vadd.f32 %v2546_v45, %v2297_v13 }
 0x235   :  { %v2274_v63 = vpop.f32.mrb[160].mxu0  ;;  %v2551_v38 = vpop.f32.mrb[160].mxu1 }
 0x236   :  { %v2298_v40 = vadd.f32 %v2274_v63, %v6590_v50  ;;  %v4560_v54 = vpop.f32.mrb[161].mxu0  ;;  %v4604_v41 = vpop.f32.mrb[161].mxu1 }
 0x237   :  { %v2277_v56 = vpop.f32.mrb[162].mxu0  ;;  %v2554_v19 = vpop.f32.mrb[162].mxu1 }
 0x238   :  { %v6629_v61 = vadd.f32 %v2551_v38, %v2298_v40  ;;  %v2299_v25 = vadd.f32 %v2277_v56, %v6593_v37  ;;  %v4561_v9 = vpop.f32.mrb[163].mxu0  ;;  %v4605_v34 = vpop.f32.mrb[163].mxu1 }
 0x23a   :  { %v6632_v14 = vadd.f32 %v2554_v19, %v2299_v25 }
 0x23d   :  { %v2282_v5 = vpop.f32.mrb[164].mxu0  ;;  %v2559_v23 = vpop.f32.mrb[164].mxu1 }
 0x23e   :  { %v2300_v22 = vadd.f32 %v2282_v5, %v6596_v12  ;;  %v4564_v4 = vpop.f32.mrb[165].mxu0  ;;  %v4608_v3 = vpop.f32.mrb[165].mxu1 }
 0x23f   :  { %v2285_v50 = vpop.f32.mrb[166].mxu0  ;;  %v2562_v58 = vpop.f32.mrb[166].mxu1 }
 0x240   :  { %v6635_v62 = vadd.f32 %v2559_v23, %v2300_v22  ;;  %v4565_v21 = vpop.f32.mrb[167].mxu0  ;;  %v4609_v26 = vpop.f32.mrb[167].mxu1 }
 0x245   :  { %v2730_v20 = vpop.f32.mrb[168].mxu0  ;;  %v2920_v28 = vpop.f32.mrb[168].mxu1 }
 0x246   :  { %v2784_v37 = vadd.f32 %v2730_v20, %v6599_v11  ;;  %v4628_v60 = vpop.f32.mrb[169].mxu0  ;;  %v4672_v30 = vpop.f32.mrb[169].mxu1 }
 0x247   :  { %v2733_v33 = vpop.f32.mrb[170].mxu0  ;;  %v2923_v55 = vpop.f32.mrb[170].mxu1 }
 0x248   :  { %v6638_v27 = vadd.f32 %v2920_v28, %v2784_v37  ;;  %v2785_v12 = vadd.f32 %v2733_v33, %v6602_v16  ;;  %v4629_v51 = vpop.f32.mrb[171].mxu0  ;;  %v4673_v59 = vpop.f32.mrb[171].mxu1 }
 0x24a   :  { %v6641_v31 = vadd.f32 %v2923_v55, %v2785_v12 }
 0x24d   :  { %v2738_v10 = vpop.f32.mrb[172].mxu0  ;;  %v2928_v24 = vpop.f32.mrb[172].mxu1 }
 0x24e   :  { %v2786_v8 = vadd.f32 %v2738_v10, %v6605_v15  ;;  %v4632_v46 = vpop.f32.mrb[173].mxu0  ;;  %v4676_v17 = vpop.f32.mrb[173].mxu1 }
 0x24f   :  { %v2741_v11 = vpop.f32.mrb[174].mxu0  ;;  %v2931_v7 = vpop.f32.mrb[174].mxu1 }
 0x250   :  { %v6644_v18 = vadd.f32 %v2928_v24, %v2786_v8  ;;  %v2787_v52 = vadd.f32 %v2741_v11, %v6608_v36  ;;  %v4633_v47 = vpop.f32.mrb[175].mxu0  ;;  %v4677_v0 = vpop.f32.mrb[175].mxu1 }
 0x252   :  { %v6647_v16 = vadd.f32 %v2931_v7, %v2787_v52 }
 0x255   :  { %v2746_v49 = vpop.f32.mrb[176].mxu0  ;;  %v2936_v35 = vpop.f32.mrb[176].mxu1 }
 0x256   :  { %v2788_v44 = vadd.f32 %v2746_v49, %v6611_v53  ;;  %v4636_v1 = vpop.f32.mrb[177].mxu0  ;;  %v4680_v29 = vpop.f32.mrb[177].mxu1 }
 0x257   :  { %v2749_v15 = vpop.f32.mrb[178].mxu0  ;;  %v2939_v45 = vpop.f32.mrb[178].mxu1  ;;  %v6680_v1 = vld [vmem:[%s6748_s2] ss:$0 sm:$0xff] }
 0x258   :  { %v6650_v57 = vadd.f32 %v2936_v35, %v2788_v44  ;;  %v2789_v13 = vadd.f32 %v2749_v15, %v6614_v2  ;;  %v4637_v43 = vpop.f32.mrb[179].mxu0  ;;  %v4681_v39 = vpop.f32.mrb[179].mxu1 }
 0x25a   :  { %v6653_v36 = vadd.f32 %v2939_v45, %v2789_v13 }
 0x25d   :  { %v2754_v63 = vpop.f32.mrb[180].mxu0  ;;  %v2944_v38 = vpop.f32.mrb[180].mxu1 }
 0x25e   :  { %v2790_v40 = vadd.f32 %v2754_v63, %v6617_v32  ;;  %v4640_v54 = vpop.f32.mrb[181].mxu0  ;;  %v4684_v41 = vpop.f32.mrb[181].mxu1 }
 0x25f   :  { %v2757_v53 = vpop.f32.mrb[182].mxu0  ;;  %v2947_v19 = vpop.f32.mrb[182].mxu1 }
 0x260   :  { %v6656_v56 = vadd.f32 %v2944_v38, %v2790_v40  ;;  %v2791_v25 = vadd.f32 %v2757_v53, %v6620_v6  ;;  %v4641_v9 = vpop.f32.mrb[183].mxu0  ;;  %v4685_v34 = vpop.f32.mrb[183].mxu1 }
 0x262   :  { %v6659_v2 = vadd.f32 %v2947_v19, %v2791_v25 }
 0x265   :  { %v2762_v5 = vpop.f32.mrb[184].mxu0  ;;  %v2952_v23 = vpop.f32.mrb[184].mxu1 }
 0x266   :  { %v2792_v22 = vadd.f32 %v2762_v5, %v6623_v48  ;;  %v4644_v4 = vpop.f32.mrb[185].mxu0  ;;  %v4688_v3 = vpop.f32.mrb[185].mxu1 }
 0x267   :  { %v2765_v32 = vpop.f32.mrb[186].mxu0  ;;  %v2955_v21 = vpop.f32.mrb[186].mxu1 }
 0x268   :  { %v6662_v50 = vadd.f32 %v2952_v23, %v2792_v22  ;;  %v2793_v58 = vadd.f32 %v2765_v32, %v6626_v42  ;;  %v4645_v26 = vpop.f32.mrb[187].mxu0  ;;  %v4689_v20 = vpop.f32.mrb[187].mxu1 }
 0x26a   :  { %v6665_v6 = vadd.f32 %v2955_v21, %v2793_v58 }
 0x26d   :  { %v2770_v37 = vpop.f32.mrb[188].mxu0  ;;  %v2960_v60 = vpop.f32.mrb[188].mxu1 }
 0x26e   :  { %v2794_v28 = vadd.f32 %v2770_v37, %v6629_v61  ;;  %v4648_v30 = vpop.f32.mrb[189].mxu0  ;;  %v4692_v33 = vpop.f32.mrb[189].mxu1 }
 0x26f   :  { %v2773_v48 = vpop.f32.mrb[190].mxu0  ;;  %v2963_v51 = vpop.f32.mrb[190].mxu1 }
 0x270   :  { %v6668_v12 = vadd.f32 %v2960_v60, %v2794_v28  ;;  %v2795_v55 = vadd.f32 %v2773_v48, %v6632_v14  ;;  %v4649_v59 = vpop.f32.mrb[191].mxu0  ;;  %v4693_v10 = vpop.f32.mrb[191].mxu1 }
 0x272   :  { %v6671_v42 = vadd.f32 %v2963_v51, %v2795_v55 }
 0x275   :  { %v2778_v8 = vpop.f32.mrb[192].mxu0  ;;  %v2968_v46 = vpop.f32.mrb[192].mxu1 }
 0x276   :  { %v2796_v24 = vadd.f32 %v2778_v8, %v6635_v62  ;;  %v4652_v17 = vpop.f32.mrb[193].mxu0  ;;  %v4696_v11 = vpop.f32.mrb[193].mxu1 }
 0x277   :  { %v2781_v61 = vpop.f32.mrb[194].mxu0  ;;  %v2971_v7 = vpop.f32.mrb[194].mxu1 }
 0x278   :  { %v6674_v52 = vadd.f32 %v2968_v46, %v2796_v24  ;;  %v4653_v47 = vpop.f32.mrb[195].mxu0  ;;  %v4697_v0 = vpop.f32.mrb[195].mxu1 }
 0x27d   :  { %v3134_v49 = vpop.f32.mrb[196].mxu0  ;;  %v3314_v44 = vpop.f32.mrb[196].mxu1 }
 0x27e   :  { %v3188_v14 = vadd.f32 %v3134_v49, %v6638_v27  ;;  %v4716_v35 = vpop.f32.mrb[197].mxu0  ;;  %v4760_v62 = vpop.f32.mrb[197].mxu1 }
 0x27f   :  { %v3137_v29 = vpop.f32.mrb[198].mxu0  ;;  %v3317_v45 = vpop.f32.mrb[198].mxu1 }
 0x280   :  { %v3368_v15 = vadd.f32 %v3314_v44, %v3188_v14  ;;  %v3189_v13 = vadd.f32 %v3137_v29, %v6641_v31  ;;  %v4717_v43 = vpop.f32.mrb[199].mxu0  ;;  %v4761_v39 = vpop.f32.mrb[199].mxu1 }
 0x282   :  { %v3388_v63 = vadd.f32 %v6680_v1, %v3368_v15  ;;  %v3369_v40 = vadd.f32 %v3317_v45, %v3189_v13 }
 0x284   :  { %3401 = vst [vmem:[%s6749_s3] sm:$0xff] %v3388_v63  ;;  %v3389_v27 = vadd.f32 %v6680_v1, %v3369_v40 }
 0x285   :  { %v3142_v38 = vpop.f32.mrb[200].mxu0  ;;  %v3322_v31 = vpop.f32.mrb[200].mxu1 }
 0x286   :  { %3402 = vst [vmem:[%s6749_s3 + $0x8] sm:$0xff] %v3389_v27  ;;  %v3190_v54 = vadd.f32 %v3142_v38, %v6644_v18  ;;  %v4720_v41 = vpop.f32.mrb[201].mxu0  ;;  %v4764_v53 = vpop.f32.mrb[201].mxu1 }
 0x287   :  { %v3145_v25 = vpop.f32.mrb[202].mxu0  ;;  %v3325_v34 = vpop.f32.mrb[202].mxu1 }
 0x288   :  { %v3370_v19 = vadd.f32 %v3322_v31, %v3190_v54  ;;  %v3191_v9 = vadd.f32 %v3145_v25, %v6647_v16  ;;  %v4721_v5 = vpop.f32.mrb[203].mxu0  ;;  %v4765_v22 = vpop.f32.mrb[203].mxu1 }
 0x28a   :  { %v3390_v23 = vadd.f32 %v6680_v1, %v3370_v19  ;;  %v3371_v4 = vadd.f32 %v3325_v34, %v3191_v9 }
 0x28c   :  { %3403 = vst [vmem:[%s6749_s3 + $0x10] sm:$0xff] %v3390_v23  ;;  %v3391_v3 = vadd.f32 %v6680_v1, %v3371_v4 }
 0x28d   :  { %v3150_v18 = vpop.f32.mrb[204].mxu0  ;;  %v3330_v16 = vpop.f32.mrb[204].mxu1 }
 0x28e   :  { %3404 = vst [vmem:[%s6749_s3 + $0x18] sm:$0xff] %v3391_v3  ;;  %v3192_v32 = vadd.f32 %v3150_v18, %v6650_v57  ;;  %v4724_v58 = vpop.f32.mrb[205].mxu0  ;;  %v4768_v21 = vpop.f32.mrb[205].mxu1 }
 0x28f   :  { %v3153_v26 = vpop.f32.mrb[206].mxu0  ;;  %v3333_v28 = vpop.f32.mrb[206].mxu1 }
 0x290   :  { %v3372_v20 = vadd.f32 %v3330_v16, %v3192_v32  ;;  %v3193_v37 = vadd.f32 %v3153_v26, %v6653_v36  ;;  %v4725_v60 = vpop.f32.mrb[207].mxu0  ;;  %v4769_v30 = vpop.f32.mrb[207].mxu1 }
 0x292   :  { %v3392_v33 = vadd.f32 %v6680_v1, %v3372_v20  ;;  %v3373_v48 = vadd.f32 %v3333_v28, %v3193_v37 }
 0x294   :  { %3405 = vst [vmem:[%s6749_s3 + $0x20] sm:$0xff] %v3392_v33  ;;  %v3393_v55 = vadd.f32 %v6680_v1, %v3373_v48 }
 0x295   :  { %v3158_v57 = vpop.f32.mrb[208].mxu0  ;;  %v3338_v36 = vpop.f32.mrb[208].mxu1 }
 0x296   :  { %3406 = vst [vmem:[%s6749_s3 + $0x28] sm:$0xff] %v3393_v55  ;;  %v3194_v51 = vadd.f32 %v3158_v57, %v6656_v56  ;;  %v4728_v59 = vpop.f32.mrb[209].mxu0  ;;  %v4772_v10 = vpop.f32.mrb[209].mxu1 }
 0x297   :  { %v3161_v8 = vpop.f32.mrb[210].mxu0  ;;  %v3341_v17 = vpop.f32.mrb[210].mxu1 }
 0x298   :  { %v3374_v24 = vadd.f32 %v3338_v36, %v3194_v51  ;;  %v3195_v46 = vadd.f32 %v3161_v8, %v6659_v2  ;;  %v4729_v11 = vpop.f32.mrb[211].mxu0  ;;  %v4773_v61 = vpop.f32.mrb[211].mxu1 }
 0x29a   :  { %v3394_v7 = vadd.f32 %v6680_v1, %v3374_v24  ;;  %v3375_v47 = vadd.f32 %v3341_v17, %v3195_v46 }
 0x29c   :  { %3407 = vst [vmem:[%s6749_s3 + $0x30] sm:$0xff] %v3394_v7  ;;  %v3395_v0 = vadd.f32 %v6680_v1, %v3375_v47 }
 0x29d   :  { %v3166_v56 = vpop.f32.mrb[212].mxu0  ;;  %v3346_v2 = vpop.f32.mrb[212].mxu1 }
 0x29e   :  { %3408 = vst [vmem:[%s6749_s3 + $0x38] sm:$0xff] %v3395_v0  ;;  %v3196_v49 = vadd.f32 %v3166_v56, %v6662_v50  ;;  %v4732_v14 = vpop.f32.mrb[213].mxu0  ;;  %v4776_v44 = vpop.f32.mrb[213].mxu1 }
 0x29f   :  { %v3169_v35 = vpop.f32.mrb[214].mxu0  ;;  %v3349_v15 = vpop.f32.mrb[214].mxu1 }
 0x2a0   :  { %v3376_v62 = vadd.f32 %v3346_v2, %v3196_v49  ;;  %v3197_v29 = vadd.f32 %v3169_v35, %v6665_v6  ;;  %v4733_v13 = vpop.f32.mrb[215].mxu0  ;;  %v4777_v45 = vpop.f32.mrb[215].mxu1 }
 0x2a2   :  { %v3396_v43 = vadd.f32 %v6680_v1, %v3376_v62  ;;  %v3377_v39 = vadd.f32 %v3349_v15, %v3197_v29 }
 0x2a4   :  { %3409 = vst [vmem:[%s6749_s3 + $0x40] sm:$0xff] %v3396_v43  ;;  %v3397_v63 = vadd.f32 %v6680_v1, %v3377_v39 }
 0x2a5   :  { %v3174_v50 = vpop.f32.mrb[216].mxu0  ;;  %v3354_v6 = vpop.f32.mrb[216].mxu1 }
 0x2a6   :  { %3410 = vst [vmem:[%s6749_s3 + $0x48] sm:$0xff] %v3397_v63  ;;  %v3198_v40 = vadd.f32 %v3174_v50, %v6668_v12  ;;  %v4736_v27 = vpop.f32.mrb[217].mxu0  ;;  %v4780_v38 = vpop.f32.mrb[217].mxu1 }
 0x2a7   :  { %v3177_v54 = vpop.f32.mrb[218].mxu0  ;;  %v3357_v53 = vpop.f32.mrb[218].mxu1 }
 0x2a8   :  { %v3378_v31 = vadd.f32 %v3354_v6, %v3198_v40  ;;  %v3199_v41 = vadd.f32 %v3177_v54, %v6671_v42  ;;  %v4737_v25 = vpop.f32.mrb[219].mxu0  ;;  %v4781_v19 = vpop.f32.mrb[219].mxu1 }
 0x2aa   :  { %v3398_v9 = vadd.f32 %v6680_v1, %v3378_v31  ;;  %v3379_v34 = vadd.f32 %v3357_v53, %v3199_v41 }
 0x2ac   :  { %3411 = vst [vmem:[%s6749_s3 + $0x50] sm:$0xff] %v3398_v9  ;;  %v3399_v5 = vadd.f32 %v6680_v1, %v3379_v34 }
 0x2ad   :  { %v3182_v12 = vpop.f32.mrb[220].mxu0  ;;  %v3362_v42 = vpop.f32.mrb[220].mxu1 }
 0x2ae   :  { %3412 = vst [vmem:[%s6749_s3 + $0x58] sm:$0xff] %v3399_v5  ;;  %v3200_v22 = vadd.f32 %v3182_v12, %v6674_v52  ;;  %v4740_v23 = vpop.f32.mrb[221].mxu0  ;;  %v4784_v4 = vpop.f32.mrb[221].mxu1 }
 0x2af   :  { %v3185_v3 = vpop.f32.mrb[222].mxu0  ;;  %v3365_v32 = vpop.f32.mrb[222].mxu1 }
 0x2b0   :  { %v3380_v18 = vadd.f32 %v3362_v42, %v3200_v22  ;;  %v4741_v16 = vpop.f32.mrb[223].mxu0  ;;  %v4785_v58 = vpop.f32.mrb[223].mxu1 }
 0x2b2   :  { %v3400_v21 = vadd.f32 %v6680_v1, %v3380_v18 }
 0x2b4   :  { %3413 = vst [vmem:[%s6749_s3 + $0x60] sm:$0xff] %v3400_v21 }

</bundles_post_ra>
